<compile_context>
chip_gen: v5e
topology: v5e:2x2
jax: 0.10.0
libtpu: 0.0.40
codegen_flags: <defaults>
</compile_context>

<pallas_src>
import jax
import jax.numpy as jnp
from jax.experimental import pallas as pl
from jax.experimental.pallas import tpu as pltpu

EPS = 1e-5  # nn.BatchNorm2d default eps

_VMEM = pl.BlockSpec(memory_space=pltpu.MemorySpace.VMEM)


def _round_up(x, m):
    return (x + m - 1) // m * m


# ----------------------------- Pallas kernels ------------------------------

def _mm_bn_tanh_kernel(x_ref, w_ref, b_ref, g_ref, beta_ref, o_ref):
    # out = tanh(BatchNorm(x @ w + b)) with batch statistics over the M axis
    # (rows are (n, ho, wo), so the per-column mean/var is exactly
    # BatchNorm2d's per-channel statistic over (N, H, W) in training mode).
    x = x_ref[...].astype(jnp.bfloat16)                 # cast only at the MXU input
    y = jnp.dot(x, w_ref[...], preferred_element_type=jnp.float32)
    y = y + b_ref[...]
    inv_m = 1.0 / y.shape[0]
    mean = jnp.sum(y, axis=0, keepdims=True) * inv_m
    d = y - mean                                        # shifted form, no cancellation
    var = jnp.sum(d * d, axis=0, keepdims=True) * inv_m
    yhat = d * jax.lax.rsqrt(var + EPS)
    o_ref[...] = jnp.tanh(yhat * g_ref[...] + beta_ref[...]).astype(o_ref.dtype)


def _mm_tanh_kernel(x_ref, w_ref, b_ref, o_ref):
    # out = tanh(x @ w + b) on one (tm, K) row tile.
    x = x_ref[...].astype(jnp.bfloat16)
    y = jnp.dot(x, w_ref[...], preferred_element_type=jnp.float32)
    o_ref[...] = jnp.tanh(y + b_ref[...]).astype(o_ref.dtype)


def _fc_stack_kernel(x_ref, w11_ref, b11_ref, w1_ref, b1_ref,
                     w2_ref, b2_ref, w22_ref, b22_ref, o_ref):
    # Fused fc11 -> fc1 -> fc2 -> fc22, each followed by tanh; every
    # intermediate stays in VMEM / vregs.
    def layer(h, w_ref, b_ref):
        y = jnp.dot(h.astype(jnp.bfloat16), w_ref[...],
                    preferred_element_type=jnp.float32)
        return jnp.tanh(y + b_ref[...])

    h = layer(x_ref[...], w11_ref, b11_ref)   # (N, 196)
    h = layer(h, w1_ref, b1_ref)              # (N, 16)
    h = layer(h, w2_ref, b2_ref)              # (N, 196)
    h = layer(h, w22_ref, b22_ref)            # (N, 3136)
    o_ref[...] = h.astype(o_ref.dtype)


# ----------------------------- kernel wrappers ------------------------------

def matmul_bn_tanh(patches, w_bf16, b, gamma, beta):
    # BN needs whole-batch statistics and these conv layers are small, so this
    # runs as a single whole-array invocation (everything fits VMEM easily).
    M = patches.shape[0]
    cout = w_bf16.shape[1]
    return pl.pallas_call(
        _mm_bn_tanh_kernel,
        out_shape=jax.ShapeDtypeStruct((M, cout), jnp.float32),
        in_specs=[_VMEM] * 5,
        out_specs=_VMEM,
    )(patches, w_bf16, b, gamma, beta)


def matmul_tanh(x, w_bf16, b, tm_max=512):
    # M-tiled pipelined matmul+bias+tanh; the M axis is "parallel" so it can
    # shard across both TensorCores on v7x and stays VMEM-bounded at any batch.
    M, K = x.shape
    cout = w_bf16.shape[1]
    tm = min(tm_max, _round_up(M, 8))
    Mp = _round_up(M, tm)
    if Mp != M:
        x = jnp.pad(x, ((0, Mp - M), (0, 0)))
    out = pl.pallas_call(
        _mm_tanh_kernel,
        out_shape=jax.ShapeDtypeStruct((Mp, cout), jnp.float32),
        grid=(Mp // tm,),
        in_specs=[pl.BlockSpec((tm, K), lambda i: (i, 0)),
                  pl.BlockSpec((K, cout), lambda i: (0, 0)),
                  pl.BlockSpec((1, cout), lambda i: (0, 0))],
        out_specs=pl.BlockSpec((tm, cout), lambda i: (i, 0)),
        compiler_params=pltpu.CompilerParams(dimension_semantics=("parallel",)),
    )(x, w_bf16, b)
    return out[:M] if Mp != M else out


def fc_stack(x, kp):
    n = x.shape[0]
    out_dim = kp["fc22_w"].shape[1]
    return pl.pallas_call(
        _fc_stack_kernel,
        out_shape=jax.ShapeDtypeStruct((n, out_dim), jnp.float32),
        in_specs=[_VMEM] * 9,
        out_specs=_VMEM,
    )(x, kp["fc11_w"], kp["fc11_b"], kp["fc1_w"], kp["fc1_b"],
      kp["fc2_w"], kp["fc2_b"], kp["fc22_w"], kp["fc22_b"])


# ----------------------------- conv glue (NHWC) ------------------------------

def im2col_nhwc(x, k, stride, pad):
    # x: (N, H, W, C) -> (N*Ho*Wo, k*k*C); rows ordered (n, ho, wo),
    # columns ordered (kh, kw, c) -- matches the prepared weight matrices.
    N, H, W, C = x.shape
    xp = jnp.pad(x, ((0, 0), (pad, pad), (pad, pad), (0, 0)))
    Ho = (H + 2 * pad - k) // stride + 1
    Wo = (W + 2 * pad - k) // stride + 1
    taps = [xp[:, kh:kh + stride * Ho:stride, kw:kw + stride * Wo:stride, :]
            for kh in range(k) for kw in range(k)]
    p = jnp.stack(taps, axis=3)                       # (N, Ho, Wo, k*k, C)
    return p.reshape(N * Ho * Wo, k * k * C), Ho, Wo


def conv2d_bn_tanh(x_nhwc, w_bf16, b, gamma, beta, stride, pad):
    n = x_nhwc.shape[0]
    patches, Ho, Wo = im2col_nhwc(x_nhwc, 3, stride, pad)
    cout = w_bf16.shape[1]
    y = matmul_bn_tanh(patches, w_bf16, b, gamma, beta)
    return y.reshape(n, Ho, Wo, cout)                 # already NHWC, no transpose


def conv_transpose2d_tanh(x_nhwc, wt_bf16, b4, cout):
    # Sub-pixel decomposition: out[2a+r, 2b+s] only depends on x[a..a+1, b..b+1]
    # and a fixed subset of kernel taps, so all four parity sub-grids are one
    # matmul against a (4*Cin, 4*Cout) block-tap matrix.
    n, H, W, cin = x_nhwc.shape
    xh = jnp.pad(x_nhwc, ((0, 0), (0, 1), (0, 1), (0, 0)))   # high-side zero pad
    shifted = [xh[:, dh:dh + H, dw:dw + W, :]
               for dh in (0, 1) for dw in (0, 1)]            # x00, x01, x10, x11
    p = jnp.concatenate(shifted, axis=-1).reshape(n * H * W, 4 * cin)
    y = matmul_tanh(p, wt_bf16, b4)                          # (n*H*W, 4*cout)
    y = y.reshape(n, H, W, 2, 2, cout)                       # (..., r, s, c)
    return y.transpose(0, 1, 3, 2, 4, 5).reshape(n, 2 * H, 2 * W, cout)


# ----------------------------- parameters ------------------------------

def init_torch_params(key):
    """Random parameters in the original PyTorch layouts (f32)."""
    ks = jax.random.split(key, 16)

    def u(k, shape, fan_in):
        bound = 1.0 / float(fan_in) ** 0.5
        return jax.random.uniform(k, shape, jnp.float32, -bound, bound)

    p = {}
    p["conv1_w"] = u(ks[0], (32, 1, 3, 3), 1 * 9)
    p["conv1_b"] = u(ks[1], (32,), 1 * 9)
    p["bn1_g"] = jnp.ones((32,), jnp.float32)
    p["bn1_b"] = jnp.zeros((32,), jnp.float32)
    p["conv2_w"] = u(ks[2], (64, 32, 3, 3), 32 * 9)
    p["conv2_b"] = u(ks[3], (64,), 32 * 9)
    p["bn2_g"] = jnp.ones((64,), jnp.float32)
    p["bn2_b"] = jnp.zeros((64,), jnp.float32)
    p["fc11_w"] = u(ks[4], (196, 64 * 7 * 7), 64 * 7 * 7)    # (out, in) torch layout
    p["fc11_b"] = u(ks[5], (196,), 64 * 7 * 7)
    p["fc1_w"] = u(ks[6], (16, 196), 196)
    p["fc1_b"] = u(ks[7], (16,), 196)
    p["fc2_w"] = u(ks[8], (196, 16), 16)
    p["fc2_b"] = u(ks[9], (196,), 16)
    p["fc22_w"] = u(ks[10], (64 * 7 * 7, 196), 196)
    p["fc22_b"] = u(ks[11], (64 * 7 * 7,), 196)
    p["convt1_w"] = u(ks[12], (64, 32, 3, 3), 64 * 9)        # (Cin, Cout, k, k)
    p["convt1_b"] = u(ks[13], (32,), 64 * 9)
    p["convt2_w"] = u(ks[14], (32, 1, 3, 3), 32 * 9)
    p["convt2_b"] = u(ks[15], (1,), 32 * 9)
    return p


def prepare_params(p):
    """Fold every layout permutation / dtype cast into the weights, once."""
    bf = jnp.bfloat16
    kp = {}

    def conv_mat(w):          # (Cout, Cin, 3, 3) -> (9*Cin, Cout), rows (kh, kw, ci)
        cout, cin = w.shape[0], w.shape[1]
        return w.transpose(2, 3, 1, 0).reshape(9 * cin, cout).astype(bf)

    def row(v):               # (C,) -> (1, C) f32
        return v.reshape(1, -1).astype(jnp.float32)

    kp["conv1_w"] = conv_mat(p["conv1_w"]); kp["conv1_b"] = row(p["conv1_b"])
    kp["bn1_g"] = row(p["bn1_g"]);          kp["bn1_b"] = row(p["bn1_b"])
    kp["conv2_w"] = conv_mat(p["conv2_w"]); kp["conv2_b"] = row(p["conv2_b"])
    kp["bn2_g"] = row(p["bn2_g"]);          kp["bn2_b"] = row(p["bn2_b"])

    # fc11 consumes an NHWC flatten (h, w, c) instead of torch's NCHW (c, h, w):
    # permute its input features to keep the original module's semantics.
    kp["fc11_w"] = (p["fc11_w"].reshape(196, 64, 7, 7)
                    .transpose(2, 3, 1, 0).reshape(64 * 7 * 7, 196).astype(bf))
    kp["fc11_b"] = row(p["fc11_b"])
    kp["fc1_w"] = p["fc1_w"].T.astype(bf); kp["fc1_b"] = row(p["fc1_b"])
    kp["fc2_w"] = p["fc2_w"].T.astype(bf); kp["fc2_b"] = row(p["fc2_b"])
    # fc22 emits the decoder input directly in NHWC (h, w, c) order.
    kp["fc22_w"] = (p["fc22_w"].reshape(64, 7, 7, 196)
                    .transpose(1, 2, 0, 3).reshape(64 * 7 * 7, 196).T.astype(bf))
    kp["fc22_b"] = row(p["fc22_b"].reshape(64, 7, 7).transpose(1, 2, 0).reshape(-1))

    def convt_subpixel(w):    # (Cin, Cout, 3, 3) -> (4*Cin, 4*Cout)
        cin, cout = w.shape[0], w.shape[1]
        z = jnp.zeros((cin, cout), w.dtype)
        t = lambda kh, kw: w[:, :, kh, kw]
        # rows = input-shift blocks [x[a,b] | x[a,b+1] | x[a+1,b] | x[a+1,b+1]]
        # cols = output parity blocks [(ev,ev) | (ev,od) | (od,ev) | (od,od)]
        rows = [
            [t(1, 1), t(1, 2), t(2, 1), t(2, 2)],
            [z,       t(1, 0), z,       t(2, 0)],
            [z,       z,       t(0, 1), t(0, 2)],
            [z,       z,       z,       t(0, 0)],
        ]
        return jnp.concatenate(
            [jnp.concatenate(r, axis=1) for r in rows], axis=0).astype(bf)

    kp["convt1_w"] = convt_subpixel(p["convt1_w"])
    kp["convt1_b"] = row(jnp.tile(p["convt1_b"], 4))
    kp["convt2_w"] = convt_subpixel(p["convt2_w"])
    kp["convt2_b"] = row(jnp.tile(p["convt2_b"], 4))
    return kp


# ----------------------------- model ------------------------------

@jax.jit
def autoencoder_forward(x_nchw, kp):
    x = x_nchw.transpose(0, 2, 3, 1)                         # NCHW -> NHWC once
    x = conv2d_bn_tanh(x, kp["conv1_w"], kp["conv1_b"],
                       kp["bn1_g"], kp["bn1_b"], stride=2, pad=1)   # (N,14,14,32)
    x = conv2d_bn_tanh(x, kp["conv2_w"], kp["conv2_b"],
                       kp["bn2_g"], kp["bn2_b"], stride=2, pad=1)   # (N,7,7,64)
    n = x.shape[0]
    x = x.reshape(n, 7 * 7 * 64)     # NHWC flatten; fc11/fc22 weights are permuted to match
    x = fc_stack(x, kp)              # fused fc11->fc1->fc2->fc22 -> (N, 3136)
    x = x.reshape(n, 7, 7, 64)
    x = conv_transpose2d_tanh(x, kp["convt1_w"], kp["convt1_b"], 32)  # (N,14,14,32)
    x = conv_transpose2d_tanh(x, kp["convt2_w"], kp["convt2_b"], 1)   # (N,28,28,1)
    return x.transpose(0, 3, 1, 2)                            # NHWC -> NCHW once


if __name__ == "__main__":
    key = jax.random.PRNGKey(0)
    k_param, k_x = jax.random.split(key)
    torch_params = init_torch_params(k_param)
    kparams = prepare_params(torch_params)
    # fc11 expects 64*7*7 features -> input spatial size is fixed at 28x28.
    x = jax.random.normal(k_x, (2, 1, 28, 28), jnp.float32)
    out = jax.block_until_ready(autoencoder_forward(x, kparams))
    assert out.shape == (2, 1, 28, 28), out.shape
    assert bool(jnp.all(jnp.isfinite(out)))
    print("KERNEL_OK")
</pallas_src>

<mosaic_0001>
module attributes {stable_mosaic.version = 11 : i64} {
  func.func @_mm_bn_tanh_kernel(%arg0: memref<392x9xf32, #tpu.memory_space<vmem>>, %arg1: memref<9x32xbf16, #tpu.memory_space<vmem>>, %arg2: memref<1x32xf32, #tpu.memory_space<vmem>>, %arg3: memref<1x32xf32, #tpu.memory_space<vmem>>, %arg4: memref<1x32xf32, #tpu.memory_space<vmem>>, %arg5: memref<392x32xf32, #tpu.memory_space<vmem>>) attributes {dimension_semantics = [], scalar_prefetch = 0 : i64, scratch_operands = 0 : i64, tpu.core_type = #tpu.core_type<tc>} {
    %c0 = arith.constant 0 : index
    %c0_0 = arith.constant 0 : index
    %0 = vector.load %arg0[%c0, %c0_0] : memref<392x9xf32, #tpu.memory_space<vmem>>, vector<392x9xf32>
    %1 = arith.truncf %0 : vector<392x9xf32> to vector<392x9xbf16>
    %c0_1 = arith.constant 0 : index
    %c0_2 = arith.constant 0 : index
    %2 = vector.load %arg1[%c0_1, %c0_2] : memref<9x32xbf16, #tpu.memory_space<vmem>>, vector<9x32xbf16>
    %cst = arith.constant dense<0.000000e+00> : vector<392x32xf32>
    %3 = tpu.matmul %1, %2, %cst {dimension_numbers = #tpu.dot_dimension_numbers<[1], [0], [0], [1], [0, 0, 1, 1], [], []>} : vector<392x9xbf16>, vector<9x32xbf16>, vector<392x32xf32> -> vector<392x32xf32>
    %c0_3 = arith.constant 0 : index
    %c0_4 = arith.constant 0 : index
    %4 = vector.load %arg2[%c0_3, %c0_4] : memref<1x32xf32, #tpu.memory_space<vmem>>, vector<1x32xf32>
    %5 = vector.broadcast %4 : vector<1x32xf32> to vector<392x32xf32>
    %6 = arith.addf %3, %5 : vector<392x32xf32>
    %cst_5 = arith.constant dense<0.000000e+00> : vector<32xf32>
    %7 = vector.multi_reduction <add>, %6, %cst_5 [0] : vector<392x32xf32> to vector<32xf32>
    %8 = vector.shape_cast %7 : vector<32xf32> to vector<1x32xf32>
    %cst_6 = arith.constant 0.00255102036 : f32
    %9 = vector.broadcast %cst_6 : f32 to vector<1x32xf32>
    %10 = arith.mulf %8, %9 : vector<1x32xf32>
    %11 = vector.broadcast %10 : vector<1x32xf32> to vector<392x32xf32>
    %12 = arith.subf %6, %11 : vector<392x32xf32>
    %13 = arith.mulf %12, %12 : vector<392x32xf32>
    %cst_7 = arith.constant dense<0.000000e+00> : vector<32xf32>
    %14 = vector.multi_reduction <add>, %13, %cst_7 [0] : vector<392x32xf32> to vector<32xf32>
    %15 = vector.shape_cast %14 : vector<32xf32> to vector<1x32xf32>
    %cst_8 = arith.constant 0.00255102036 : f32
    %16 = vector.broadcast %cst_8 : f32 to vector<1x32xf32>
    %17 = arith.mulf %15, %16 : vector<1x32xf32>
    %cst_9 = arith.constant 9.99999974E-6 : f32
    %18 = vector.broadcast %cst_9 : f32 to vector<1x32xf32>
    %19 = arith.addf %17, %18 : vector<1x32xf32>
    %20 = math.rsqrt %19 : vector<1x32xf32>
    %21 = vector.broadcast %20 : vector<1x32xf32> to vector<392x32xf32>
    %22 = arith.mulf %12, %21 : vector<392x32xf32>
    %c0_10 = arith.constant 0 : index
    %c0_11 = arith.constant 0 : index
    %23 = vector.load %arg3[%c0_10, %c0_11] : memref<1x32xf32, #tpu.memory_space<vmem>>, vector<1x32xf32>
    %24 = vector.broadcast %23 : vector<1x32xf32> to vector<392x32xf32>
    %25 = arith.mulf %22, %24 : vector<392x32xf32>
    %c0_12 = arith.constant 0 : index
    %c0_13 = arith.constant 0 : index
    %26 = vector.load %arg4[%c0_12, %c0_13] : memref<1x32xf32, #tpu.memory_space<vmem>>, vector<1x32xf32>
    %27 = vector.broadcast %26 : vector<1x32xf32> to vector<392x32xf32>
    %28 = arith.addf %25, %27 : vector<392x32xf32>
    %29 = math.tanh %28 : vector<392x32xf32>
    %c0_14 = arith.constant 0 : index
    %c0_15 = arith.constant 0 : index
    %30 = vector.load %arg5[%c0_14, %c0_15] : memref<392x32xf32, #tpu.memory_space<vmem>>, vector<392x32xf32>
    tpu.vector_store %arg5[%c0_14, %c0_15], %29 {strides = array<i32>} : memref<392x32xf32, #tpu.memory_space<vmem>>, vector<392x32xf32>,
    return
  }
}

module attributes {stable_mosaic.version = 11 : i64} {
  func.func @_mm_bn_tanh_kernel(%arg0: memref<98x288xf32, #tpu.memory_space<vmem>>, %arg1: memref<288x64xbf16, #tpu.memory_space<vmem>>, %arg2: memref<1x64xf32, #tpu.memory_space<vmem>>, %arg3: memref<1x64xf32, #tpu.memory_space<vmem>>, %arg4: memref<1x64xf32, #tpu.memory_space<vmem>>, %arg5: memref<98x64xf32, #tpu.memory_space<vmem>>) attributes {dimension_semantics = [], scalar_prefetch = 0 : i64, scratch_operands = 0 : i64, tpu.core_type = #tpu.core_type<tc>} {
    %c0 = arith.constant 0 : index
    %c0_0 = arith.constant 0 : index
    %0 = vector.load %arg0[%c0, %c0_0] : memref<98x288xf32, #tpu.memory_space<vmem>>, vector<98x288xf32>
    %1 = arith.truncf %0 : vector<98x288xf32> to vector<98x288xbf16>
    %c0_1 = arith.constant 0 : index
    %c0_2 = arith.constant 0 : index
    %2 = vector.load %arg1[%c0_1, %c0_2] : memref<288x64xbf16, #tpu.memory_space<vmem>>, vector<288x64xbf16>
    %cst = arith.constant dense<0.000000e+00> : vector<98x64xf32>
    %3 = tpu.matmul %1, %2, %cst {dimension_numbers = #tpu.dot_dimension_numbers<[1], [0], [0], [1], [0, 0, 1, 1], [], []>} : vector<98x288xbf16>, vector<288x64xbf16>, vector<98x64xf32> -> vector<98x64xf32>
    %c0_3 = arith.constant 0 : index
    %c0_4 = arith.constant 0 : index
    %4 = vector.load %arg2[%c0_3, %c0_4] : memref<1x64xf32, #tpu.memory_space<vmem>>, vector<1x64xf32>
    %5 = vector.broadcast %4 : vector<1x64xf32> to vector<98x64xf32>
    %6 = arith.addf %3, %5 : vector<98x64xf32>
    %cst_5 = arith.constant dense<0.000000e+00> : vector<64xf32>
    %7 = vector.multi_reduction <add>, %6, %cst_5 [0] : vector<98x64xf32> to vector<64xf32>
    %8 = vector.shape_cast %7 : vector<64xf32> to vector<1x64xf32>
    %cst_6 = arith.constant 0.0102040814 : f32
    %9 = vector.broadcast %cst_6 : f32 to vector<1x64xf32>
    %10 = arith.mulf %8, %9 : vector<1x64xf32>
    %11 = vector.broadcast %10 : vector<1x64xf32> to vector<98x64xf32>
    %12 = arith.subf %6, %11 : vector<98x64xf32>
    %13 = arith.mulf %12, %12 : vector<98x64xf32>
    %cst_7 = arith.constant dense<0.000000e+00> : vector<64xf32>
    %14 = vector.multi_reduction <add>, %13, %cst_7 [0] : vector<98x64xf32> to vector<64xf32>
    %15 = vector.shape_cast %14 : vector<64xf32> to vector<1x64xf32>
    %cst_8 = arith.constant 0.0102040814 : f32
    %16 = vector.broadcast %cst_8 : f32 to vector<1x64xf32>
    %17 = arith.mulf %15, %16 : vector<1x64xf32>
    %cst_9 = arith.constant 9.99999974E-6 : f32
    %18 = vector.broadcast %cst_9 : f32 to vector<1x64xf32>
    %19 = arith.addf %17, %18 : vector<1x64xf32>
    %20 = math.rsqrt %19 : vector<1x64xf32>
    %21 = vector.broadcast %20 : vector<1x64xf32> to vector<98x64xf32>
    %22 = arith.mulf %12, %21 : vector<98x64xf32>
    %c0_10 = arith.constant 0 : index
    %c0_11 = arith.constant 0 : index
    %23 = vector.load %arg3[%c0_10, %c0_11] : memref<1x64xf32, #tpu.memory_space<vmem>>, vector<1x64xf32>
    %24 = vector.broadcast %23 : vector<1x64xf32> to vector<98x64xf32>
    %25 = arith.mulf %22, %24 : vector<98x64xf32>
    %c0_12 = arith.constant 0 : index
    %c0_13 = arith.constant 0 : index
    %26 = vector.load %arg4[%c0_12, %c0_13] : memref<1x64xf32, #tpu.memory_space<vmem>>, vector<1x64xf32>
    %27 = vector.broadcast %26 : vector<1x64xf32> to vector<98x64xf32>
    %28 = arith.addf %25, %27 : vector<98x64xf32>
    %29 = math.tanh %28 : vector<98x64xf32>
    %c0_14 = arith.constant 0 : index
    %c0_15 = arith.constant 0 : index
    %30 = vector.load %arg5[%c0_14, %c0_15] : memref<98x64xf32, #tpu.memory_space<vmem>>, vector<98x64xf32>
    tpu.vector_store %arg5[%c0_14, %c0_15], %29 {strides = array<i32>} : memref<98x64xf32, #tpu.memory_space<vmem>>, vector<98x64xf32>,
    return
  }
}

module attributes {stable_mosaic.version = 11 : i64} {
  func.func @_fc_stack_kernel(%arg0: memref<2x3136xf32, #tpu.memory_space<vmem>>, %arg1: memref<3136x196xbf16, #tpu.memory_space<vmem>>, %arg2: memref<1x196xf32, #tpu.memory_space<vmem>>, %arg3: memref<196x16xbf16, #tpu.memory_space<vmem>>, %arg4: memref<1x16xf32, #tpu.memory_space<vmem>>, %arg5: memref<16x196xbf16, #tpu.memory_space<vmem>>, %arg6: memref<1x196xf32, #tpu.memory_space<vmem>>, %arg7: memref<196x3136xbf16, #tpu.memory_space<vmem>>, %arg8: memref<1x3136xf32, #tpu.memory_space<vmem>>, %arg9: memref<2x3136xf32, #tpu.memory_space<vmem>>) attributes {dimension_semantics = [], scalar_prefetch = 0 : i64, scratch_operands = 0 : i64, tpu.core_type = #tpu.core_type<tc>} {
    %c0 = arith.constant 0 : index
    %c0_0 = arith.constant 0 : index
    %0 = vector.load %arg0[%c0, %c0_0] : memref<2x3136xf32, #tpu.memory_space<vmem>>, vector<2x3136xf32>
    %1 = arith.truncf %0 : vector<2x3136xf32> to vector<2x3136xbf16>
    %c0_1 = arith.constant 0 : index
    %c0_2 = arith.constant 0 : index
    %2 = vector.load %arg1[%c0_1, %c0_2] : memref<3136x196xbf16, #tpu.memory_space<vmem>>, vector<3136x196xbf16>
    %cst = arith.constant dense<0.000000e+00> : vector<2x196xf32>
    %3 = tpu.matmul %1, %2, %cst {dimension_numbers = #tpu.dot_dimension_numbers<[1], [0], [0], [1], [0, 0, 1, 1], [], []>} : vector<2x3136xbf16>, vector<3136x196xbf16>, vector<2x196xf32> -> vector<2x196xf32>
    %c0_3 = arith.constant 0 : index
    %c0_4 = arith.constant 0 : index
    %4 = vector.load %arg2[%c0_3, %c0_4] : memref<1x196xf32, #tpu.memory_space<vmem>>, vector<1x196xf32>
    %5 = vector.broadcast %4 : vector<1x196xf32> to vector<2x196xf32>
    %6 = arith.addf %3, %5 : vector<2x196xf32>
    %7 = math.tanh %6 : vector<2x196xf32>
    %8 = arith.truncf %7 : vector<2x196xf32> to vector<2x196xbf16>
    %c0_5 = arith.constant 0 : index
    %c0_6 = arith.constant 0 : index
    %9 = vector.load %arg3[%c0_5, %c0_6] : memref<196x16xbf16, #tpu.memory_space<vmem>>, vector<196x16xbf16>
    %cst_7 = arith.constant dense<0.000000e+00> : vector<2x16xf32>
    %10 = tpu.matmul %8, %9, %cst_7 {dimension_numbers = #tpu.dot_dimension_numbers<[1], [0], [0], [1], [0, 0, 1, 1], [], []>} : vector<2x196xbf16>, vector<196x16xbf16>, vector<2x16xf32> -> vector<2x16xf32>
    %c0_8 = arith.constant 0 : index
    %c0_9 = arith.constant 0 : index
    %11 = vector.load %arg4[%c0_8, %c0_9] : memref<1x16xf32, #tpu.memory_space<vmem>>, vector<1x16xf32>
    %12 = vector.broadcast %11 : vector<1x16xf32> to vector<2x16xf32>
    %13 = arith.addf %10, %12 : vector<2x16xf32>
    %14 = math.tanh %13 : vector<2x16xf32>
    %15 = arith.truncf %14 : vector<2x16xf32> to vector<2x16xbf16>
    %c0_10 = arith.constant 0 : index
    %c0_11 = arith.constant 0 : index
    %16 = vector.load %arg5[%c0_10, %c0_11] : memref<16x196xbf16, #tpu.memory_space<vmem>>, vector<16x196xbf16>
    %cst_12 = arith.constant dense<0.000000e+00> : vector<2x196xf32>
    %17 = tpu.matmul %15, %16, %cst_12 {dimension_numbers = #tpu.dot_dimension_numbers<[1], [0], [0], [1], [0, 0, 1, 1], [], []>} : vector<2x16xbf16>, vector<16x196xbf16>, vector<2x196xf32> -> vector<2x196xf32>
    %c0_13 = arith.constant 0 : index
    %c0_14 = arith.constant 0 : index
    %18 = vector.load %arg6[%c0_13, %c0_14] : memref<1x196xf32, #tpu.memory_space<vmem>>, vector<1x196xf32>
    %19 = vector.broadcast %18 : vector<1x196xf32> to vector<2x196xf32>
    %20 = arith.addf %17, %19 : vector<2x196xf32>
    %21 = math.tanh %20 : vector<2x196xf32>
    %22 = arith.truncf %21 : vector<2x196xf32> to vector<2x196xbf16>
    %c0_15 = arith.constant 0 : index
    %c0_16 = arith.constant 0 : index
    %23 = vector.load %arg7[%c0_15, %c0_16] : memref<196x3136xbf16, #tpu.memory_space<vmem>>, vector<196x3136xbf16>
    %cst_17 = arith.constant dense<0.000000e+00> : vector<2x3136xf32>
    %24 = tpu.matmul %22, %23, %cst_17 {dimension_numbers = #tpu.dot_dimension_numbers<[1], [0], [0], [1], [0, 0, 1, 1], [], []>} : vector<2x196xbf16>, vector<196x3136xbf16>, vector<2x3136xf32> -> vector<2x3136xf32>
    %c0_18 = arith.constant 0 : index
    %c0_19 = arith.constant 0 : index
    %25 = vector.load %arg8[%c0_18, %c0_19] : memref<1x3136xf32, #tpu.memory_space<vmem>>, vector<1x3136xf32>
    %26 = vector.broadcast %25 : vector<1x3136xf32> to vector<2x3136xf32>
    %27 = arith.addf %24, %26 : vector<2x3136xf32>
    %28 = math.tanh %27 : vector<2x3136xf32>
    %c0_20 = arith.constant 0 : index
    %c0_21 = arith.constant 0 : index
    %29 = vector.load %arg9[%c0_20, %c0_21] : memref<2x3136xf32, #tpu.memory_space<vmem>>, vector<2x3136xf32>
    tpu.vector_store %arg9[%c0_20, %c0_21], %28 {strides = array<i32>} : memref<2x3136xf32, #tpu.memory_space<vmem>>, vector<2x3136xf32>,
    return
  }
}

module attributes {stable_mosaic.version = 11 : i64} {
  func.func @_mm_tanh_kernel(%arg0: i32, %arg1: memref<104x256xf32, #tpu.memory_space<vmem>>, %arg2: memref<256x128xbf16, #tpu.memory_space<vmem>>, %arg3: memref<1x128xf32, #tpu.memory_space<vmem>>, %arg4: memref<104x128xf32, #tpu.memory_space<vmem>>) attributes {dimension_semantics = [#tpu.dimension_semantics<parallel>], iteration_bounds = array<i64: 1>, scalar_prefetch = 0 : i64, scratch_operands = 0 : i64, tpu.core_type = #tpu.core_type<tc>, window_params = [{transform_indices = @transform_0, window_bounds = array<i64: 104, 256>}, {pipeline_mode = #tpu.pipeline_mode<synchronous>, transform_indices = @transform_1, window_bounds = array<i64: 256, 128>}, {pipeline_mode = #tpu.pipeline_mode<synchronous>, transform_indices = @transform_2, window_bounds = array<i64: 1, 128>}, {transform_indices = @transform_3, window_bounds = array<i64: 104, 128>}]} {
    %c0 = arith.constant 0 : index
    %c0_0 = arith.constant 0 : index
    %0 = vector.load %arg1[%c0, %c0_0] : memref<104x256xf32, #tpu.memory_space<vmem>>, vector<104x256xf32>
    %1 = arith.truncf %0 : vector<104x256xf32> to vector<104x256xbf16>
    %c0_1 = arith.constant 0 : index
    %c0_2 = arith.constant 0 : index
    %2 = vector.load %arg2[%c0_1, %c0_2] : memref<256x128xbf16, #tpu.memory_space<vmem>>, vector<256x128xbf16>
    %cst = arith.constant dense<0.000000e+00> : vector<104x128xf32>
    %3 = tpu.matmul %1, %2, %cst {dimension_numbers = #tpu.dot_dimension_numbers<[1], [0], [0], [1], [0, 0, 1, 1], [], []>} : vector<104x256xbf16>, vector<256x128xbf16>, vector<104x128xf32> -> vector<104x128xf32>
    %c0_3 = arith.constant 0 : index
    %c0_4 = arith.constant 0 : index
    %4 = vector.load %arg3[%c0_3, %c0_4] : memref<1x128xf32, #tpu.memory_space<vmem>>, vector<1x128xf32>
    %5 = vector.broadcast %4 : vector<1x128xf32> to vector<104x128xf32>
    %6 = arith.addf %3, %5 : vector<104x128xf32>
    %7 = math.tanh %6 : vector<104x128xf32>
    %c0_5 = arith.constant 0 : index
    %c0_6 = arith.constant 0 : index
    %8 = vector.load %arg4[%c0_5, %c0_6] : memref<104x128xf32, #tpu.memory_space<vmem>>, vector<104x128xf32>
    tpu.vector_store %arg4[%c0_5, %c0_6], %7 {strides = array<i32>} : memref<104x128xf32, #tpu.memory_space<vmem>>, vector<104x128xf32>,
    return
  }
  func.func @transform_0(%arg0: i32) -> (i32, i32) {
    %c0_i32 = arith.constant 0 : i32
    %c0_i32_0 = arith.constant 0 : i32
    return %arg0, %c0_i32 : i32, i32
  }
  func.func @transform_1(%arg0: i32) -> (i32, i32) {
    %c0_i32 = arith.constant 0 : i32
    %c0_i32_0 = arith.constant 0 : i32
    %c0_i32_1 = arith.constant 0 : i32
    return %c0_i32, %c0_i32_0 : i32, i32
  }
  func.func @transform_2(%arg0: i32) -> (i32, i32) {
    %c0_i32 = arith.constant 0 : i32
    %c0_i32_0 = arith.constant 0 : i32
    %c0_i32_1 = arith.constant 0 : i32
    return %c0_i32, %c0_i32_0 : i32, i32
  }
  func.func @transform_3(%arg0: i32) -> (i32, i32) {
    %c0_i32 = arith.constant 0 : i32
    %c0_i32_0 = arith.constant 0 : i32
    return %arg0, %c0_i32 : i32, i32
  }
}

module attributes {stable_mosaic.version = 11 : i64} {
  func.func @_mm_tanh_kernel(%arg0: i32, %arg1: memref<392x128xf32, #tpu.memory_space<vmem>>, %arg2: memref<128x4xbf16, #tpu.memory_space<vmem>>, %arg3: memref<1x4xf32, #tpu.memory_space<vmem>>, %arg4: memref<392x4xf32, #tpu.memory_space<vmem>>) attributes {dimension_semantics = [#tpu.dimension_semantics<parallel>], iteration_bounds = array<i64: 1>, scalar_prefetch = 0 : i64, scratch_operands = 0 : i64, tpu.core_type = #tpu.core_type<tc>, window_params = [{transform_indices = @transform_0, window_bounds = array<i64: 392, 128>}, {pipeline_mode = #tpu.pipeline_mode<synchronous>, transform_indices = @transform_1, window_bounds = array<i64: 128, 4>}, {pipeline_mode = #tpu.pipeline_mode<synchronous>, transform_indices = @transform_2, window_bounds = array<i64: 1, 4>}, {transform_indices = @transform_3, window_bounds = array<i64: 392, 4>}]} {
    %c0 = arith.constant 0 : index
    %c0_0 = arith.constant 0 : index
    %0 = vector.load %arg1[%c0, %c0_0] : memref<392x128xf32, #tpu.memory_space<vmem>>, vector<392x128xf32>
    %1 = arith.truncf %0 : vector<392x128xf32> to vector<392x128xbf16>
    %c0_1 = arith.constant 0 : index
    %c0_2 = arith.constant 0 : index
    %2 = vector.load %arg2[%c0_1, %c0_2] : memref<128x4xbf16, #tpu.memory_space<vmem>>, vector<128x4xbf16>
    %cst = arith.constant dense<0.000000e+00> : vector<392x4xf32>
    %3 = tpu.matmul %1, %2, %cst {dimension_numbers = #tpu.dot_dimension_numbers<[1], [0], [0], [1], [0, 0, 1, 1], [], []>} : vector<392x128xbf16>, vector<128x4xbf16>, vector<392x4xf32> -> vector<392x4xf32>
    %c0_3 = arith.constant 0 : index
    %c0_4 = arith.constant 0 : index
    %4 = vector.load %arg3[%c0_3, %c0_4] : memref<1x4xf32, #tpu.memory_space<vmem>>, vector<1x4xf32>
    %5 = vector.broadcast %4 : vector<1x4xf32> to vector<392x4xf32>
    %6 = arith.addf %3, %5 : vector<392x4xf32>
    %7 = math.tanh %6 : vector<392x4xf32>
    %c0_5 = arith.constant 0 : index
    %c0_6 = arith.constant 0 : index
    %8 = vector.load %arg4[%c0_5, %c0_6] : memref<392x4xf32, #tpu.memory_space<vmem>>, vector<392x4xf32>
    tpu.vector_store %arg4[%c0_5, %c0_6], %7 {strides = array<i32>} : memref<392x4xf32, #tpu.memory_space<vmem>>, vector<392x4xf32>,
    return
  }
  func.func @transform_0(%arg0: i32) -> (i32, i32) {
    %c0_i32 = arith.constant 0 : i32
    %c0_i32_0 = arith.constant 0 : i32
    return %arg0, %c0_i32 : i32, i32
  }
  func.func @transform_1(%arg0: i32) -> (i32, i32) {
    %c0_i32 = arith.constant 0 : i32
    %c0_i32_0 = arith.constant 0 : i32
    %c0_i32_1 = arith.constant 0 : i32
    return %c0_i32, %c0_i32_0 : i32, i32
  }
  func.func @transform_2(%arg0: i32) -> (i32, i32) {
    %c0_i32 = arith.constant 0 : i32
    %c0_i32_0 = arith.constant 0 : i32
    %c0_i32_1 = arith.constant 0 : i32
    return %c0_i32, %c0_i32_0 : i32, i32
  }
  func.func @transform_3(%arg0: i32) -> (i32, i32) {
    %c0_i32 = arith.constant 0 : i32
    %c0_i32_0 = arith.constant 0 : i32
    return %arg0, %c0_i32 : i32, i32
  }
}

</mosaic_0001>

<bundles_post_ra>
// kernel: autoencoder_forward.5
= control target key start
LH: loop header
LB: loop body
LE: loop exit
PB: predicated region body
PF: predicated region fallthrough
CT: control target
= control target key end

     0   :  { %10 = vsyncpa [#allocation3], 0  ;;  %s2484_s0 = inlined_call_operand.vmem [shape: f32[392,9], index: 0, kind: input, shape index: {}]   ;;  %s2485_s1 = inlined_call_operand.hbm [shape: bf16[9,32], index: 1, kind: input, shape index: {}]   ;;  %s2486_s2 = inlined_call_operand.hbm [shape: f32[1,32], index: 2, kind: input, shape index: {}]   ;;  %s2487_s3 = inlined_call_operand.hbm [shape: f32[1,32], index: 3, kind: input, shape index: {}]   ;;  %s2488_s4 = inlined_call_operand.hbm [shape: f32[1,32], index: 4, kind: input, shape index: {}]   ;;  %s2489_s5 = inlined_call_operand.vmem [shape: f32[392,32], index: 5, kind: output, shape index: {}]  }
   0x1   :  { %11 = vsyncpa [#allocation5], 0  ;;  %s33_s20 = sshll.u32 %s2486_s2, 4  ;;  %s34_s20 = int_to_ptr.hbm [resolvable:$true] %s33_s20 }
   0x2   :  { %12 = vsyncpa [#allocation8], 0  ;;  %s1202_s21 = smov [#allocation4]   ;;  %s19_s25 = sshll.u32 %s2485_s1, 4  ;;  %s20_s25 = int_to_ptr.hbm [resolvable:$true] %s19_s25 }
   0x3   :  { %s35_s22 = sshll.u32 %s1202_s21, 4  ;;  %s1203_s26 = smov [#allocation2]   ;;  %s36_s22 = int_to_ptr.vmem [resolvable:$true] %s35_s22 }
   0x4   :  { %38 = dma.hbm_to_vmem [thread:$0]  %s34_s20, 16, %s36_s22, [#allocation5]  }
   0x5   :  { %s21_s27 = sshll.u32 %s1203_s26, 4  ;;  %s1204_s28 = smov 64   ;;  %s22_s27 = int_to_ptr.vmem [resolvable:$true] %s21_s27 }
   0x6   :  { %s1205_s29 = smov 4   ;;  %s44_s2 = sshll.u32 %s2487_s3, 4  ;;  %s45_s2 = int_to_ptr.hbm [resolvable:$true] %s44_s2 }
   0x7   :  { %27 = dma.hbm_to_vmem [thread:$0]  %s20_s25, 128, %s22_s27, [#allocation3], %s1204_s28, %s1204_s28, %s1205_s29  }
   0x8   :  { %s1206_s7 = smov [#allocation6]   ;;  %s55_s1 = sshll.u32 %s2488_s4, 4  ;;  %s56_s1 = int_to_ptr.hbm [resolvable:$true] %s55_s1 }
   0x9   :  { %s46_s8 = sshll.u32 %s1206_s7, 4  ;;  %s1207_s11 = smov [#allocation7]   ;;  %s47_s8 = int_to_ptr.vmem [resolvable:$true] %s46_s8 }
   0xa   :  { %49 = dma.hbm_to_vmem [thread:$0]  %s45_s2, 16, %s47_s8, [#allocation5]  }
   0xb   :  { %s57_s12 = sshll.u32 %s1207_s11, 4  ;;  %s58_s12 = int_to_ptr.vmem [resolvable:$true] %s57_s12 }
   0xc   :  { %60 = dma.hbm_to_vmem [thread:$0]  %s56_s1, 16, %s58_s12, [#allocation8]  }
   0xd   :  { %1196 = dma.done.wait [#allocation3], 128  }
   0xe   :  { %1197 = vsyncadd [#allocation3], 4294967168 }
   0xf   :  { %1198 = dma.done.wait [#allocation5], 32  }
  0x10   :  { %1199 = vsyncadd [#allocation5], 4294967264 }
  0x11   :  { %1200 = dma.done.wait [#allocation8], 16  }
  0x12   :  { %1201 = vsyncadd [#allocation8], 4294967280  ;;  %vm239_vm0 = vcmask 1043456   ;;  %vm240_vm1 = vcmask 1044480   ;;  %v1208_v0 = vmov 65535   ;;  %v78_v6 = vld [vmem:[%s2484_s0] sm:$0xff] }
  0x13   :  { %v241_v1 = vsel %vm239_vm0, 4294967295, %v1208_v0  ;;  %v959_v2 = vld [vmem:[#allocation2] sm:$0xf]  ;;  %v986_v3 = vld [vmem:[#allocation2] sm:$0x10]  ;;  %v79_v7 = vld [vmem:[%s2484_s0 + $0x8] sm:$0xff] }
  0x14   :  { %v242_v4 = vsel %vm240_vm1, %v241_v1, 0  ;;  %v960_v5 = vor.u32 %v986_v3, %v959_v2  ;;  %v92_v8 = vld [vmem:[%s2484_s0 + $0x70] sm:$0xff]  ;;  %v93_v9 = vld [vmem:[%s2484_s0 + $0x78] sm:$0xff]  ;;  %v127_v11 = vpack.c.bf16 %v79_v7, %v78_v6  ;;  %vm163_vm2 = vcmask 72704   ;;  %v106_v13 = vld [vmem:[%s2484_s0 + $0xe0] sm:$0xff] }
  0x15   :  { %v134_v12 = vpack.c.bf16 %v93_v9, %v92_v8  ;;  %v107_v14 = vld [vmem:[%s2484_s0 + $0xe8] sm:$0xff]  ;;  %v80_v16 = vld [vmem:[%s2484_s0 + $0x10] sm:$0xff]  ;;  %v81_v17 = vld [vmem:[%s2484_s0 + $0x18] sm:$0xff]  ;;  %vm379_vm3 = vcmask 261120  }
  0x16   :  { %v244_v10 = vand.u32 %v960_v5, %v242_v4  ;;  %v141_v15 = vpack.c.bf16 %v107_v14, %v106_v13  ;;  %v94_v18 = vld [vmem:[%s2484_s0 + $0x80] sm:$0xff]  ;;  %v95_v19 = vld [vmem:[%s2484_s0 + $0x88] sm:$0xff]  ;;  %v128_v20 = vpack.c.bf16 %v81_v17, %v80_v16  ;;  %v108_v22 = vld [vmem:[%s2484_s0 + $0xf0] sm:$0xff] }
  0x17   :  { %v135_v21 = vpack.c.bf16 %v95_v19, %v94_v18  ;;  %v109_v23 = vld [vmem:[%s2484_s0 + $0xf8] sm:$0xff]  ;;  %v82_v25 = vld [vmem:[%s2484_s0 + $0x20] sm:$0xff]  ;;  %v83_v26 = vld [vmem:[%s2484_s0 + $0x28] sm:$0xff] }
  0x18   :  { %253 = vmatpush.bf16.msra.mxu0 %v244_v10  ;;  %987 = vmatpush.bf16.msra.mxu1 %v244_v10  ;;  %v142_v24 = vpack.c.bf16 %v109_v23, %v108_v22  ;;  %v96_v27 = vld [vmem:[%s2484_s0 + $0x90] sm:$0xff]  ;;  %v97_v28 = vld [vmem:[%s2484_s0 + $0x98] sm:$0xff]  ;;  %v129_v29 = vpack.c.bf16 %v83_v26, %v82_v25  ;;  %v110_v31 = vld [vmem:[%s2484_s0 + $0x100] sm:$0xff] }
  0x19   :  { %988 = vmatpush.bf16.msra.mxu2 %v244_v10  ;;  %989 = vmatpush.bf16.msra.mxu3 %v244_v10  ;;  %v136_v30 = vpack.c.bf16 %v97_v28, %v96_v27  ;;  %v111_v32 = vld [vmem:[%s2484_s0 + $0x108] sm:$0xff]  ;;  %v84_v34 = vld [vmem:[%s2484_s0 + $0x30] sm:$0xff]  ;;  %v85_v35 = vld [vmem:[%s2484_s0 + $0x38] sm:$0xff] }
  0x1a   :  { %v143_v33 = vpack.c.bf16 %v111_v32, %v110_v31  ;;  %v98_v36 = vld [vmem:[%s2484_s0 + $0xa0] sm:$0xff]  ;;  %v99_v37 = vld [vmem:[%s2484_s0 + $0xa8] sm:$0xff]  ;;  %v130_v38 = vpack.c.bf16 %v85_v35, %v84_v34  ;;  %v112_v40 = vld [vmem:[%s2484_s0 + $0x110] sm:$0xff] }
  0x1b   :  { %961 = vmatmul.msk.bf16.vlgmr.msra.gmra.mxu0 %vm163_vm2, %v127_v11  ;;  %968 = vmatmul.msk.bf16.vlgmr.msra.gmra.mxu1 %vm163_vm2, %v134_v12  ;;  %v137_v39 = vpack.c.bf16 %v99_v37, %v98_v36  ;;  %v113_v41 = vld [vmem:[%s2484_s0 + $0x118] sm:$0xff]  ;;  %v86_v43 = vld [vmem:[%s2484_s0 + $0x40] sm:$0xff]  ;;  %v87_v44 = vld [vmem:[%s2484_s0 + $0x48] sm:$0xff] }
  0x1c   :  { %975 = vmatmul.msk.bf16.vlgmr.msra.gmra.mxu2 %vm163_vm2, %v141_v15  ;;  %v144_v42 = vpack.c.bf16 %v113_v41, %v112_v40  ;;  %v100_v45 = vld [vmem:[%s2484_s0 + $0xb0] sm:$0xff]  ;;  %v101_v46 = vld [vmem:[%s2484_s0 + $0xb8] sm:$0xff]  ;;  %v131_v47 = vpack.c.bf16 %v87_v44, %v86_v43  ;;  %v114_v49 = vld [vmem:[%s2484_s0 + $0x120] sm:$0xff] }
  0x1d   :  { %v138_v48 = vpack.c.bf16 %v101_v46, %v100_v45  ;;  %v115_v50 = vld [vmem:[%s2484_s0 + $0x128] sm:$0xff]  ;;  %v120_v51 = vld [vmem:[%s2484_s0 + $0x150] sm:$0xff]  ;;  %v121_v52 = vld [vmem:[%s2484_s0 + $0x158] sm:$0xff] }
  0x1e   :  { %v145_v53 = vpack.c.bf16 %v115_v50, %v114_v49  ;;  %v148_v54 = vpack.c.bf16 %v121_v52, %v120_v51  ;;  %v88_v55 = vld [vmem:[%s2484_s0 + $0x50] sm:$0xff]  ;;  %v89_v56 = vld [vmem:[%s2484_s0 + $0x58] sm:$0xff]  ;;  %v102_v57 = vld [vmem:[%s2484_s0 + $0xc0] sm:$0xff] }
  0x1f   :  { %v103_v58 = vld [vmem:[%s2484_s0 + $0xc8] sm:$0xff]  ;;  %v132_v59 = vpack.c.bf16 %v89_v56, %v88_v55  ;;  %v116_v61 = vld [vmem:[%s2484_s0 + $0x130] sm:$0xff]  ;;  %v117_v62 = vld [vmem:[%s2484_s0 + $0x138] sm:$0xff] }
  0x20   :  { %982 = vmatmul.msk.bf16.vlgmr.msra.gmra.mxu3 %vm163_vm2, %v148_v54  ;;  %v139_v60 = vpack.c.bf16 %v103_v58, %v102_v57  ;;  %v146_v63 = vpack.c.bf16 %v117_v62, %v116_v61  ;;  %v90_v0 = vld [vmem:[%s2484_s0 + $0x60] sm:$0xff]  ;;  %v91_v1 = vld [vmem:[%s2484_s0 + $0x68] sm:$0xff]  ;;  %v104_v2 = vld [vmem:[%s2484_s0 + $0xd0] sm:$0xff] }
  0x21   :  { %v105_v3 = vld [vmem:[%s2484_s0 + $0xd8] sm:$0xff]  ;;  %v133_v4 = vpack.c.bf16 %v91_v1, %v90_v0  ;;  %v122_v6 = vld [vmem:[%s2484_s0 + $0x160] sm:$0xff]  ;;  %v123_v7 = vld [vmem:[%s2484_s0 + $0x168] sm:$0xff] }
  0x22   :  { %v140_v5 = vpack.c.bf16 %v105_v3, %v104_v2  ;;  %v149_v8 = vpack.c.bf16 %v123_v7, %v122_v6  ;;  %v118_v9 = vld [vmem:[%s2484_s0 + $0x140] sm:$0xff]  ;;  %v119_v10 = vld [vmem:[%s2484_s0 + $0x148] sm:$0xff]  ;;  %v124_v12 = vld [vmem:[%s2484_s0 + $0x170] sm:$0xff] }
  0x23   :  { %v147_v11 = vpack.c.bf16 %v119_v10, %v118_v9  ;;  %v125_v13 = vld [vmem:[%s2484_s0 + $0x178] sm:$0xff]  ;;  %v126_v17 = vld [vmem:[%s2484_s0 + $0x180] sm:$0xff]  ;;  %v1449_v40 = vld [vmem:[#allocation4] ss:$0 sm:$0xff] }
  0x24   :  { %v150_v14 = vpack.c.bf16 %v125_v13, %v124_v12  ;;  %v151_v18 = vpack.c.bf16 %v126_v17, %v126_v17 }
  0x2b   :  { %962 = vmatmul.msk.bf16.gmra.mxu0 %vm163_vm2, %v128_v20  ;;  %969 = vmatmul.msk.bf16.gmra.mxu1 %vm163_vm2, %v135_v21 }
  0x2c   :  { %976 = vmatmul.msk.bf16.gmra.mxu2 %vm163_vm2, %v142_v24 }
  0x30   :  { %983 = vmatmul.msk.bf16.gmra.mxu3 %vm163_vm2, %v149_v8 }
  0x3b   :  { %963 = vmatmul.msk.bf16.gmra.mxu0 %vm163_vm2, %v129_v29  ;;  %970 = vmatmul.msk.bf16.gmra.mxu1 %vm163_vm2, %v136_v30 }
  0x3c   :  { %977 = vmatmul.msk.bf16.gmra.mxu2 %vm163_vm2, %v143_v33 }
  0x40   :  { %984 = vmatmul.msk.bf16.gmra.mxu3 %vm163_vm2, %v150_v14 }
  0x4b   :  { %964 = vmatmul.msk.bf16.gmra.mxu0 %vm163_vm2, %v130_v38  ;;  %971 = vmatmul.msk.bf16.gmra.mxu1 %vm163_vm2, %v137_v39 }
  0x4c   :  { %978 = vmatmul.msk.bf16.gmra.mxu2 %vm163_vm2, %v144_v42 }
  0x50   :  { %985 = vmatmul.msk.bf16.gmra.mxu3 %vm163_vm2, %v151_v18 }
  0x5b   :  { %965 = vmatmul.msk.bf16.gmra.mxu0 %vm163_vm2, %v131_v47  ;;  %972 = vmatmul.msk.bf16.gmra.mxu1 %vm163_vm2, %v138_v48 }
  0x5c   :  { %979 = vmatmul.msk.bf16.gmra.mxu2 %vm163_vm2, %v145_v53 }
  0x6b   :  { %966 = vmatmul.msk.bf16.gmra.mxu0 %vm163_vm2, %v132_v59  ;;  %973 = vmatmul.msk.bf16.gmra.mxu1 %vm163_vm2, %v139_v60 }
  0x6c   :  { %980 = vmatmul.msk.bf16.gmra.mxu2 %vm163_vm2, %v146_v63 }
  0x7b   :  { %967 = vmatmul.msk.bf16.gmra.mxu0 %vm163_vm2, %v133_v4  ;;  %974 = vmatmul.msk.bf16.gmra.mxu1 %vm163_vm2, %v140_v5 }
  0x7c   :  { %981 = vmatmul.msk.bf16.gmra.mxu2 %vm163_vm2, %v147_v11 }
  0x98   :  { %v255_v15 = vpop.f32.mrf.mxu0  ;;  %v1419_v16 = vpop.f32.mrf.mxu1 }
  0x99   :  { %v1459_v44 = vadd.f32 %v1449_v40, %v255_v15 }
  0x9b   :  { %v380_v49 = vsel %vm379_vm3, %v1459_v44, 0.0 }
  0x9f   :  { %v1429_v24 = vpop.f32.mrf.mxu2 }
  0xa0   :  { %v257_v19 = vpop.f32.mrf.mxu0  ;;  %v1425_v20 = vpop.f32.mrf.mxu1 }
  0xa1   :  { %v1454_v42 = vadd.f32 %v1449_v40, %v257_v19 }
  0xa3   :  { %v381_v47 = vsel %vm379_vm3, %v1454_v42, 0.0  ;;  %v1483_v57 = vpop.f32.mrf.mxu3 }
  0xa4   :  { %v382_v52 = vadd.f32 %v381_v47, %v380_v49 }
  0xa7   :  { %v1433_v27 = vpop.f32.mrf.mxu2 }
  0xa8   :  { %v260_v21 = vpop.f32.mrf.mxu0  ;;  %v1427_v22 = vpop.f32.mrf.mxu1 }
  0xa9   :  { %v1462_v45 = vadd.f32 %v1449_v40, %v260_v21 }
  0xab   :  { %v383_v50 = vsel %vm379_vm3, %v1462_v45, 0.0  ;;  %v1507_v8 = vpop.f32.mrf.mxu3 }
  0xac   :  { %v384_v55 = vadd.f32 %v383_v50, %v382_v52  ;;  %v1543_v52 = vadd.f32 %v1449_v40, %v1425_v20 }
  0xaf   :  { %v1437_v30 = vpop.f32.mrf.mxu2 }
  0xb0   :  { %v262_v23 = vpop.f32.mrf.mxu0  ;;  %v1431_v25 = vpop.f32.mrf.mxu1 }
  0xb1   :  { %v1467_v48 = vadd.f32 %v1449_v40, %v262_v23  ;;  %v1557_v20 = vadd.f32 %v1449_v40, %v1431_v25 }
  0xb3   :  { %v385_v53 = vsel %vm379_vm3, %v1467_v48, 0.0 }
  0xb4   :  { %v386_v60 = vadd.f32 %v385_v53, %v384_v55 }
  0xb7   :  { %v1441_v34 = vpop.f32.mrf.mxu2 }
  0xb8   :  { %v265_v26 = vpop.f32.mrf.mxu0  ;;  %v1435_v28 = vpop.f32.mrf.mxu1 }
  0xb9   :  { %v1474_v51 = vadd.f32 %v1449_v40, %v265_v26 }
  0xbb   :  { %v387_v58 = vsel %vm379_vm3, %v1474_v51, 0.0 }
  0xbc   :  { %v388_v1 = vadd.f32 %v387_v58, %v386_v60 }
  0xbf   :  { %v1445_v37 = vpop.f32.mrf.mxu2 }
  0xc0   :  { %v267_v29 = vpop.f32.mrf.mxu0  ;;  %v1439_v32 = vpop.f32.mrf.mxu1 }
  0xc1   :  { %v1479_v54 = vadd.f32 %v1449_v40, %v267_v29 }
  0xc3   :  { %v389_v63 = vsel %vm379_vm3, %v1479_v54, 0.0 }
  0xc4   :  { %v390_v4 = vadd.f32 %v389_v63, %v388_v1  ;;  %v409_v63 = vsel %vm379_vm3, %v1543_v52, 0.0 }
  0xc7   :  { %v1451_v41 = vpop.f32.mrf.mxu2 }
  0xc8   :  { %v270_v31 = vpop.f32.mrf.mxu0  ;;  %v1443_v35 = vpop.f32.mrf.mxu1 }
  0xc9   :  { %v1488_v59 = vadd.f32 %v1449_v40, %v270_v31 }
  0xcb   :  { %v391_v2 = vsel %vm379_vm3, %v1488_v59, 0.0 }
  0xcc   :  { %v392_v7 = vadd.f32 %v391_v2, %v390_v4 }
  0xcf   :  { %v1481_v56 = vpop.f32.mrf.mxu2 }
  0xd0   :  { %v272_v33 = vpop.f32.mrf.mxu0  ;;  %v1447_v38 = vpop.f32.mrf.mxu1 }
  0xd1   :  { %v1495_v0 = vadd.f32 %v1449_v40, %v272_v33  ;;  %v1530_v33 = vpop.f32.mrf.mxu3 }
  0xd3   :  { %v393_v5 = vsel %vm379_vm3, %v1495_v0, 0.0 }
  0xd4   :  { %v394_v11 = vadd.f32 %v393_v5, %v392_v7  ;;  %v1565_v5 = vadd.f32 %v1449_v40, %v1435_v28  ;;  %v413_v7 = vsel %vm379_vm3, %v1557_v20, 0.0 }
  0xd7   :  { %v1514_v13 = vpop.f32.mrf.mxu2 }
  0xd8   :  { %v275_v36 = vpop.f32.mrf.mxu0  ;;  %v1456_v43 = vpop.f32.mrf.mxu1 }
  0xd9   :  { %v1500_v3 = vadd.f32 %v1449_v40, %v275_v36  ;;  %v1559_v1 = vpop.f32.mrf.mxu3 }
  0xdb   :  { %v395_v9 = vsel %vm379_vm3, %v1500_v3, 0.0 }
  0xdc   :  { %v396_v17 = vadd.f32 %v395_v9, %v394_v11  ;;  %v1571_v9 = vadd.f32 %v1449_v40, %v1439_v32 }
  0xdf   :  { %v1539_v50 = vpop.f32.mrf.mxu2 }
  0xe0   :  { %v277_v39 = vpop.f32.mrf.mxu0  ;;  %v1490_v62 = vpop.f32.mrf.mxu1 }
  0xe1   :  { %v1505_v6 = vadd.f32 %v1449_v40, %v277_v39  ;;  %v1585_v32 = vpop.f32.mrf.mxu3 }
  0xe3   :  { %v397_v14 = vsel %vm379_vm3, %v1505_v6, 0.0 }
  0xe4   :  { %v398_v23 = vadd.f32 %v397_v14, %v396_v17  ;;  %v1577_v14 = vadd.f32 %v1449_v40, %v1443_v35 }
  0xe7   :  { %v347_v11 = vpop.f32.mrf.mxu2 }
  0xe8   :  { %v280_v46 = vpop.f32.mrf.mxu0  ;;  %v315_v18 = vpop.f32.mrf.mxu1 }
  0xe9   :  { %v1512_v10 = vadd.f32 %v1449_v40, %v280_v46  ;;  %v1534_v46 = vadd.f32 %v1449_v40, %v1419_v16  ;;  %v1551_v16 = vadd.f32 %v1449_v40, %v1427_v22 }
  0xeb   :  { %v399_v19 = vsel %vm379_vm3, %v1512_v10, 0.0  ;;  %v407_v60 = vsel %vm379_vm3, %v1534_v46, 0.0  ;;  %v411_v4 = vsel %vm379_vm3, %v1551_v16, 0.0 }
  0xec   :  { %v400_v29 = vadd.f32 %v399_v19, %v398_v23  ;;  %v417_v19 = vsel %vm379_vm3, %v1571_v9, 0.0  ;;  %v1583_v23 = vadd.f32 %v1449_v40, %v1447_v38 }
  0xf0   :  { %v282_v61 = vpop.f32.mrf.mxu0  ;;  %v317_v58 = vpop.f32.mrf.mxu1 }
  0xf1   :  { %v1519_v15 = vadd.f32 %v1449_v40, %v282_v61 }
  0xf3   :  { %v401_v26 = vsel %vm379_vm3, %v1519_v15, 0.0 }
  0xf4   :  { %v402_v36 = vadd.f32 %v401_v26, %v400_v29  ;;  %v419_v29 = vsel %vm379_vm3, %v1577_v14, 0.0 }
  0xf8   :  { %v285_v12 = vpop.f32.mrf.mxu0  ;;  %v320_v28 = vpop.f32.mrf.mxu1 }
  0xf9   :  { %v1524_v21 = vadd.f32 %v1449_v40, %v285_v12  ;;  %v415_v12 = vsel %vm379_vm3, %v1565_v5, 0.0 }
  0xfb   :  { %v403_v31 = vsel %vm379_vm3, %v1524_v21, 0.0 }
  0xfc   :  { %v404_v49 = vadd.f32 %v403_v31, %v402_v36  ;;  %v1591_v31 = vadd.f32 %v1449_v40, %v1456_v43  ;;  %v421_v36 = vsel %vm379_vm3, %v1583_v23, 0.0 }
 0x100   :  { %v287_v39 = vpop.f32.mrf.mxu0 }
 0x101   :  { %v1537_v47 = vadd.f32 %v1449_v40, %v287_v39  ;;  %v1597_v39 = vadd.f32 %v1449_v40, %v1490_v62  ;;  %v322_v62 = vpop.f32.mrf.mxu1 }
 0x103   :  { %v405_v53 = vsel %vm379_vm3, %v1537_v47, 0.0  ;;  %v425_v43 = vsel %vm379_vm3, %v1597_v39, 0.0 }
 0x104   :  { %v406_v55 = vadd.f32 %v405_v53, %v404_v49  ;;  %v423_v49 = vsel %vm379_vm3, %v1591_v31, 0.0  ;;  %v1602_v53 = vadd.f32 %v1449_v40, %v315_v18 }
 0x106   :  { %v408_v61 = vadd.f32 %v407_v60, %v406_v55  ;;  %v350_v60 = vpop.f32.mrf.mxu2 }
 0x108   :  { %v410_v2 = vadd.f32 %v409_v63, %v408_v61  ;;  %v1607_v61 = vadd.f32 %v1449_v40, %v317_v58  ;;  %v1609_v63 = vpop.f32.mrf.mxu3  ;;  %v1623_v58 = vadd.f32 %v1449_v40, %v1429_v24  ;;  %v1637_v24 = vadd.f32 %v1449_v40, %v1437_v30 }
 0x10a   :  { %v412_v22 = vadd.f32 %v411_v4, %v410_v2  ;;  %v427_v4 = vsel %vm379_vm3, %v1602_v53, 0.0 }
 0x10c   :  { %v414_v25 = vadd.f32 %v413_v7, %v412_v22  ;;  %v1614_v22 = vadd.f32 %v1449_v40, %v320_v28  ;;  %v429_v7 = vsel %vm379_vm3, %v1607_v61, 0.0  ;;  %v1629_v28 = vadd.f32 %v1449_v40, %v1433_v27 }
 0x10d   :  { %v1643_v27 = vadd.f32 %v1449_v40, %v1441_v34 }
 0x10e   :  { %v416_v17 = vadd.f32 %v415_v12, %v414_v25  ;;  %v1619_v25 = vadd.f32 %v1449_v40, %v322_v62  ;;  %v1649_v62 = vadd.f32 %v1449_v40, %v1445_v37 }
 0x10f   :  { %v441_v30 = vsel %vm379_vm3, %v1643_v27, 0.0 }
 0x110   :  { %v418_v26 = vadd.f32 %v417_v19, %v416_v17  ;;  %v431_v17 = vsel %vm379_vm3, %v1614_v22, 0.0  ;;  %v443_v34 = vsel %vm379_vm3, %v1649_v62, 0.0 }
 0x112   :  { %v420_v35 = vadd.f32 %v419_v29, %v418_v26  ;;  %v433_v26 = vsel %vm379_vm3, %v1619_v25, 0.0  ;;  %v375_v29 = vpop.f32.mrf.mxu3 }
 0x114   :  { %v422_v38 = vadd.f32 %v421_v36, %v420_v35  ;;  %v352_v36 = vpop.f32.mrf.mxu2 }
 0x116   :  { %v424_v55 = vadd.f32 %v423_v49, %v422_v38  ;;  %v435_v38 = vsel %vm379_vm3, %v1623_v58, 0.0 }
 0x118   :  { %v426_v2 = vadd.f32 %v425_v43, %v424_v55  ;;  %v437_v55 = vsel %vm379_vm3, %v1629_v28, 0.0 }
 0x11a   :  { %v428_v18 = vadd.f32 %v427_v4, %v426_v2  ;;  %v439_v2 = vsel %vm379_vm3, %v1637_v24, 0.0 }
 0x11c   :  { %v430_v12 = vadd.f32 %v429_v7, %v428_v18  ;;  %v1655_v18 = vadd.f32 %v1449_v40, %v1451_v41  ;;  %v377_v7 = vpop.f32.mrf.mxu3  ;;  %v355_v37 = vpop.f32.mrf.mxu2 }
 0x11e   :  { %v432_v19 = vadd.f32 %v431_v17, %v430_v12  ;;  %v1661_v17 = vadd.f32 %v1449_v40, %v1481_v56 }
 0x120   :  { %v434_v35 = vadd.f32 %v433_v26, %v432_v19  ;;  %v445_v26 = vsel %vm379_vm3, %v1655_v18, 0.0 }
 0x122   :  { %v436_v49 = vadd.f32 %v435_v38, %v434_v35  ;;  %v1667_v35 = vadd.f32 %v1449_v40, %v1514_v13  ;;  %v447_v38 = vsel %vm379_vm3, %v1661_v17, 0.0 }
 0x124   :  { %v438_v43 = vadd.f32 %v437_v55, %v436_v49  ;;  %v1673_v49 = vadd.f32 %v1449_v40, %v1539_v50  ;;  %v449_v56 = vsel %vm379_vm3, %v1667_v35, 0.0  ;;  %v1688_v50 = vadd.f32 %v1449_v40, %v352_v36 }
 0x125   :  { %v1702_v36 = vadd.f32 %v1449_v40, %v1483_v57 }
 0x126   :  { %v440_v4 = vadd.f32 %v439_v2, %v438_v43  ;;  %v1678_v43 = vadd.f32 %v1449_v40, %v347_v11  ;;  %v451_v13 = vsel %vm379_vm3, %v1673_v49, 0.0 }
 0x128   :  { %v442_v12 = vadd.f32 %v441_v30, %v440_v4  ;;  %v1683_v4 = vadd.f32 %v1449_v40, %v350_v60  ;;  %v453_v7 = vsel %vm379_vm3, %v1678_v43, 0.0  ;;  %v457_v60 = vsel %vm379_vm3, %v1688_v50, 0.0 }
 0x12a   :  { %v444_v19 = vadd.f32 %v443_v34, %v442_v12  ;;  %v357_v34 = vpop.f32.mrf.mxu2  ;;  %v455_v11 = vsel %vm379_vm3, %v1683_v4, 0.0 }
 0x12c   :  { %v446_v41 = vadd.f32 %v445_v26, %v444_v19  ;;  %v1693_v19 = vadd.f32 %v1449_v40, %v355_v37  ;;  %v1708_v37 = vadd.f32 %v1449_v40, %v1507_v8 }
 0x12e   :  { %v448_v55 = vadd.f32 %v447_v38, %v446_v41  ;;  %v1698_v41 = vadd.f32 %v1449_v40, %v357_v34  ;;  %2499 = vst [vmem:[#allocation12_spill] sm:$0xff] %v1708_v37  ;;  %v1722_v34 = vadd.f32 %v1449_v40, %v1559_v1 }
 0x130   :  { %v450_v2 = vadd.f32 %v449_v56, %v448_v55  ;;  %v459_v55 = vsel %vm379_vm3, %v1693_v19, 0.0  ;;  %2501 = vst [vmem:[#allocation14_spill] sm:$0xff] %v1722_v34 }
 0x132   :  { %v452_v30 = vadd.f32 %v451_v13, %v450_v2  ;;  %v461_v2 = vsel %vm379_vm3, %v1698_v41, 0.0 }
 0x134   :  { %v454_v12 = vadd.f32 %v453_v7, %v452_v30  ;;  %v463_v30 = vsel %vm379_vm3, %v1702_v36, 0.0  ;;  %v1716_v7 = vadd.f32 %v1449_v40, %v1530_v33  ;;  %v469_v33 = vsel %vm379_vm3, %v1722_v34, 0.0 }
 0x136   :  { %v456_v26 = vadd.f32 %v455_v11, %v454_v12  ;;  %2500 = vst [vmem:[#allocation13_spill] sm:$0xff] %v1716_v7  ;;  %v465_v12 = vsel %vm379_vm3, %v1708_v37, 0.0  ;;  %v467_v11 = vsel %vm379_vm3, %v1716_v7, 0.0 }
 0x138   :  { %v458_v38 = vadd.f32 %v457_v60, %v456_v26  ;;  %v1728_v26 = vadd.f32 %v1449_v40, %v1585_v32 }
 0x13a   :  { %v460_v56 = vadd.f32 %v459_v55, %v458_v38  ;;  %v1734_v38 = vadd.f32 %v1449_v40, %v1609_v63  ;;  %v376_v55 = vadd.f32 %v1449_v40, %v375_v29 }
 0x13c   :  { %v462_v13 = vadd.f32 %v461_v2, %v460_v56  ;;  %v471_v56 = vsel %vm379_vm3, %v1728_v26, 0.0  ;;  %v475_v32 = vsel %vm379_vm3, %v376_v55, 0.0 }
 0x13e   :  { %v464_v57 = vadd.f32 %v463_v30, %v462_v13  ;;  %v473_v13 = vsel %vm379_vm3, %v1734_v38, 0.0 }
 0x140   :  { %v466_v8 = vadd.f32 %v465_v12, %v464_v57 }
 0x142   :  { %v468_v60 = vadd.f32 %v467_v11, %v466_v8 }
 0x144   :  { %v470_v1 = vadd.f32 %v469_v33, %v468_v60 }
 0x146   :  { %v472_v2 = vadd.f32 %v471_v56, %v470_v1 }
 0x148   :  { %v474_v30 = vadd.f32 %v473_v13, %v472_v2 }
 0x14a   :  { %v476_v57 = vadd.f32 %v475_v32, %v474_v30 }
 0x14c   :  { %v477_v12 = vrot.slane %v476_v57, 4 }
 0x14e   :  { %v478_v8 = vadd.f32 %v477_v12, %v476_v57 }
 0x150   :  { %v479_v11 = vrot.slane %v478_v8, 2 }
 0x152   :  { %v480_v34 = vadd.f32 %v479_v11, %v478_v8 }
 0x154   :  { %v481_v63 = vrot.slane %v480_v34, 1 }
 0x156   :  { %v482_v7 = vadd.f32 %v481_v63, %v480_v34 }
 0x158   :  { %v1742_v37 = vmul.f32 0.0025510204, %v482_v7 }
 0x15a   :  { %v1745_v40 = vsub.f32 %v376_v55, %v1742_v37  ;;  %v1749_v29 = vsub.f32 %v1459_v44, %v1742_v37  ;;  %v1753_v60 = vsub.f32 %v1454_v42, %v1742_v37  ;;  %v1757_v33 = vsub.f32 %v1462_v45, %v1742_v37 }
 0x15b   :  { %v1761_v34 = vsub.f32 %v1467_v48, %v1742_v37  ;;  %v1769_v44 = vsub.f32 %v1474_v51, %v1742_v37  ;;  %v1775_v45 = vsub.f32 %v1479_v54, %v1742_v37  ;;  %v1783_v13 = vsub.f32 %v1488_v59, %v1742_v37 }
 0x15c   :  { %2502 = vst [vmem:[#allocation15_spill] sm:$0xff] %v1745_v40  ;;  %v533_v7 = vmul.f32 %v1749_v29, %v1749_v29  ;;  %v534_v55 = vmul.f32 %v1753_v60, %v1753_v60  ;;  %v535_v42 = vmul.f32 %v1757_v33, %v1757_v33  ;;  %v1790_v54 = vsub.f32 %v1495_v0, %v1742_v37 }
 0x15d   :  { %v536_v48 = vmul.f32 %v1761_v34, %v1761_v34  ;;  %v537_v51 = vmul.f32 %v1769_v44, %v1769_v44  ;;  %v538_v57 = vmul.f32 %v1775_v45, %v1775_v45  ;;  %v1797_v59 = vsub.f32 %v1500_v3, %v1742_v37 }
 0x15e   :  { %v582_v1 = vsel %vm379_vm3, %v533_v7, 0.0  ;;  %v583_v56 = vsel %vm379_vm3, %v534_v55, 0.0  ;;  %v585_v32 = vsel %vm379_vm3, %v535_v42, 0.0  ;;  %v539_v11 = vmul.f32 %v1783_v13, %v1783_v13 }
 0x15f   :  { %v584_v2 = vadd.f32 %v583_v56, %v582_v1  ;;  %v587_v12 = vsel %vm379_vm3, %v536_v48, 0.0  ;;  %v589_v63 = vsel %vm379_vm3, %v537_v51, 0.0  ;;  %v1804_v0 = vsub.f32 %v1505_v6, %v1742_v37 }
 0x160   :  { %v540_v55 = vmul.f32 %v1790_v54, %v1790_v54  ;;  %v591_v42 = vsel %vm379_vm3, %v538_v57, 0.0  ;;  %v1811_v3 = vsub.f32 %v1512_v10, %v1742_v37  ;;  %v541_v1 = vmul.f32 %v1797_v59, %v1797_v59 }
 0x161   :  { %v586_v30 = vadd.f32 %v585_v32, %v584_v2  ;;  %v593_v56 = vsel %vm379_vm3, %v539_v11, 0.0  ;;  %v1818_v6 = vsub.f32 %v1519_v15, %v1742_v37  ;;  %v542_v51 = vmul.f32 %v1804_v0, %v1804_v0 }
 0x162   :  { %v595_v32 = vsel %vm379_vm3, %v540_v55, 0.0  ;;  %v1825_v10 = vsub.f32 %v1524_v21, %v1742_v37  ;;  %v543_v57 = vmul.f32 %v1811_v3, %v1811_v3  ;;  %v1832_v15 = vsub.f32 %v1537_v47, %v1742_v37 }
 0x163   :  { %v588_v8 = vadd.f32 %v587_v12, %v586_v30  ;;  %v597_v12 = vsel %vm379_vm3, %v541_v1, 0.0  ;;  %v544_v11 = vmul.f32 %v1818_v6, %v1818_v6  ;;  %v1839_v21 = vsub.f32 %v1534_v46, %v1742_v37 }
 0x164   :  { %v545_v55 = vmul.f32 %v1825_v10, %v1825_v10  ;;  %v1846_v47 = vsub.f32 %v1543_v52, %v1742_v37  ;;  %v546_v1 = vmul.f32 %v1832_v15, %v1832_v15  ;;  %v1853_v46 = vsub.f32 %v1551_v16, %v1742_v37 }
 0x165   :  { %v590_v7 = vadd.f32 %v589_v63, %v588_v8  ;;  %v599_v63 = vsel %vm379_vm3, %v542_v51, 0.0  ;;  %v547_v51 = vmul.f32 %v1839_v21, %v1839_v21  ;;  %v1860_v52 = vsub.f32 %v1557_v20, %v1742_v37 }
 0x166   :  { %v1867_v16 = vsub.f32 %v1565_v5, %v1742_v37  ;;  %v1874_v20 = vsub.f32 %v1571_v9, %v1742_v37  ;;  %v1881_v5 = vsub.f32 %v1577_v14, %v1742_v37  ;;  %v1888_v9 = vsub.f32 %v1583_v23, %v1742_v37 }
 0x167   :  { %v592_v48 = vadd.f32 %v591_v42, %v590_v7  ;;  %v601_v42 = vsel %vm379_vm3, %v543_v57, 0.0  ;;  %v548_v57 = vmul.f32 %v1846_v47, %v1846_v47  ;;  %v1895_v14 = vsub.f32 %v1591_v31, %v1742_v37 }
 0x168   :  { %v1902_v23 = vsub.f32 %v1597_v39, %v1742_v37  ;;  %v1909_v31 = vsub.f32 %v1602_v53, %v1742_v37  ;;  %v1916_v39 = vsub.f32 %v1607_v61, %v1742_v37  ;;  %v1923_v53 = vsub.f32 %v1614_v22, %v1742_v37 }
 0x169   :  { %v594_v2 = vadd.f32 %v593_v56, %v592_v48  ;;  %v603_v56 = vsel %vm379_vm3, %v544_v11, 0.0  ;;  %v549_v11 = vmul.f32 %v1853_v46, %v1853_v46  ;;  %v1930_v61 = vsub.f32 %v1619_v25, %v1742_v37 }
 0x16a   :  { %v1937_v22 = vsub.f32 %v1623_v58, %v1742_v37  ;;  %v1944_v25 = vsub.f32 %v1629_v28, %v1742_v37  ;;  %v1951_v58 = vsub.f32 %v1637_v24, %v1742_v37  ;;  %v1958_v28 = vsub.f32 %v1643_v27, %v1742_v37 }
 0x16b   :  { %v596_v30 = vadd.f32 %v595_v32, %v594_v2  ;;  %v605_v32 = vsel %vm379_vm3, %v545_v55, 0.0  ;;  %v550_v55 = vmul.f32 %v1860_v52, %v1860_v52  ;;  %v1965_v24 = vsub.f32 %v1649_v62, %v1742_v37 }
 0x16c   :  { %v1972_v27 = vsub.f32 %v1655_v18, %v1742_v37  ;;  %v1979_v62 = vsub.f32 %v1661_v17, %v1742_v37  ;;  %v1986_v18 = vsub.f32 %v1667_v35, %v1742_v37  ;;  %v1993_v17 = vsub.f32 %v1673_v49, %v1742_v37 }
 0x16d   :  { %v598_v8 = vadd.f32 %v597_v12, %v596_v30  ;;  %v607_v12 = vsel %vm379_vm3, %v546_v1, 0.0  ;;  %v551_v1 = vmul.f32 %v1867_v16, %v1867_v16  ;;  %v2000_v35 = vsub.f32 %v1678_v43, %v1742_v37 }
 0x16e   :  { %v2007_v49 = vsub.f32 %v1683_v4, %v1742_v37  ;;  %v2014_v43 = vsub.f32 %v1688_v50, %v1742_v37  ;;  %v2021_v4 = vsub.f32 %v1693_v19, %v1742_v37  ;;  %v2028_v50 = vsub.f32 %v1698_v41, %v1742_v37 }
 0x16f   :  { %v600_v7 = vadd.f32 %v599_v63, %v598_v8  ;;  %v609_v63 = vsel %vm379_vm3, %v547_v51, 0.0  ;;  %v552_v51 = vmul.f32 %v1874_v20, %v1874_v20  ;;  %v2035_v19 = vsub.f32 %v1702_v36, %v1742_v37 }
 0x171   :  { %v602_v48 = vadd.f32 %v601_v42, %v600_v7  ;;  %v611_v42 = vsel %vm379_vm3, %v548_v57, 0.0  ;;  %v553_v57 = vmul.f32 %v1881_v5, %v1881_v5 }
 0x173   :  { %v604_v2 = vadd.f32 %v603_v56, %v602_v48  ;;  %v613_v56 = vsel %vm379_vm3, %v549_v11, 0.0  ;;  %v554_v11 = vmul.f32 %v1888_v9, %v1888_v9 }
 0x175   :  { %v606_v30 = vadd.f32 %v605_v32, %v604_v2  ;;  %v615_v32 = vsel %vm379_vm3, %v550_v55, 0.0  ;;  %v555_v55 = vmul.f32 %v1895_v14, %v1895_v14 }
 0x177   :  { %v608_v8 = vadd.f32 %v607_v12, %v606_v30  ;;  %v617_v12 = vsel %vm379_vm3, %v551_v1, 0.0  ;;  %v556_v1 = vmul.f32 %v1902_v23, %v1902_v23 }
 0x179   :  { %v610_v7 = vadd.f32 %v609_v63, %v608_v8  ;;  %v619_v63 = vsel %vm379_vm3, %v552_v51, 0.0  ;;  %v557_v51 = vmul.f32 %v1909_v31, %v1909_v31 }
 0x17b   :  { %v612_v48 = vadd.f32 %v611_v42, %v610_v7  ;;  %v621_v42 = vsel %vm379_vm3, %v553_v57, 0.0  ;;  %v558_v57 = vmul.f32 %v1916_v39, %v1916_v39 }
 0x17d   :  { %v614_v2 = vadd.f32 %v613_v56, %v612_v48  ;;  %v623_v56 = vsel %vm379_vm3, %v554_v11, 0.0  ;;  %v559_v11 = vmul.f32 %v1923_v53, %v1923_v53 }
 0x17f   :  { %v616_v30 = vadd.f32 %v615_v32, %v614_v2  ;;  %v625_v32 = vsel %vm379_vm3, %v555_v55, 0.0  ;;  %v560_v55 = vmul.f32 %v1930_v61, %v1930_v61 }
 0x181   :  { %v618_v8 = vadd.f32 %v617_v12, %v616_v30  ;;  %v627_v12 = vsel %vm379_vm3, %v556_v1, 0.0  ;;  %v561_v1 = vmul.f32 %v1937_v22, %v1937_v22 }
 0x183   :  { %v620_v7 = vadd.f32 %v619_v63, %v618_v8  ;;  %v629_v63 = vsel %vm379_vm3, %v557_v51, 0.0  ;;  %v562_v51 = vmul.f32 %v1944_v25, %v1944_v25 }
 0x185   :  { %v622_v48 = vadd.f32 %v621_v42, %v620_v7  ;;  %v631_v42 = vsel %vm379_vm3, %v558_v57, 0.0  ;;  %v563_v57 = vmul.f32 %v1951_v58, %v1951_v58 }
 0x187   :  { %v624_v2 = vadd.f32 %v623_v56, %v622_v48  ;;  %v633_v56 = vsel %vm379_vm3, %v559_v11, 0.0  ;;  %v564_v11 = vmul.f32 %v1958_v28, %v1958_v28 }
 0x189   :  { %v626_v30 = vadd.f32 %v625_v32, %v624_v2  ;;  %v635_v32 = vsel %vm379_vm3, %v560_v55, 0.0  ;;  %v565_v55 = vmul.f32 %v1965_v24, %v1965_v24 }
 0x18b   :  { %v628_v8 = vadd.f32 %v627_v12, %v626_v30  ;;  %v637_v12 = vsel %vm379_vm3, %v561_v1, 0.0  ;;  %v566_v1 = vmul.f32 %v1972_v27, %v1972_v27 }
 0x18d   :  { %v630_v7 = vadd.f32 %v629_v63, %v628_v8  ;;  %v639_v63 = vsel %vm379_vm3, %v562_v51, 0.0  ;;  %v567_v51 = vmul.f32 %v1979_v62, %v1979_v62 }
 0x18f   :  { %v632_v48 = vadd.f32 %v631_v42, %v630_v7  ;;  %v641_v42 = vsel %vm379_vm3, %v563_v57, 0.0  ;;  %v568_v57 = vmul.f32 %v1986_v18, %v1986_v18 }
 0x191   :  { %v634_v2 = vadd.f32 %v633_v56, %v632_v48  ;;  %v643_v56 = vsel %vm379_vm3, %v564_v11, 0.0  ;;  %v569_v11 = vmul.f32 %v1993_v17, %v1993_v17 }
 0x193   :  { %v636_v30 = vadd.f32 %v635_v32, %v634_v2  ;;  %v645_v32 = vsel %vm379_vm3, %v565_v55, 0.0  ;;  %v570_v55 = vmul.f32 %v2000_v35, %v2000_v35 }
 0x195   :  { %v638_v8 = vadd.f32 %v637_v12, %v636_v30  ;;  %v647_v12 = vsel %vm379_vm3, %v566_v1, 0.0  ;;  %v571_v1 = vmul.f32 %v2007_v49, %v2007_v49 }
 0x197   :  { %v640_v7 = vadd.f32 %v639_v63, %v638_v8  ;;  %v649_v63 = vsel %vm379_vm3, %v567_v51, 0.0  ;;  %v572_v51 = vmul.f32 %v2014_v43, %v2014_v43 }
 0x199   :  { %v642_v48 = vadd.f32 %v641_v42, %v640_v7  ;;  %v651_v42 = vsel %vm379_vm3, %v568_v57, 0.0  ;;  %v573_v57 = vmul.f32 %v2021_v4, %v2021_v4 }
 0x19b   :  { %v644_v2 = vadd.f32 %v643_v56, %v642_v48  ;;  %v653_v56 = vsel %vm379_vm3, %v569_v11, 0.0  ;;  %v2503_v11 = vld [vmem:[#allocation12_spill] sm:$0xff] }
 0x19c   :  { %v2042_v41 = vsub.f32 %v2503_v11, %v1742_v37 }
 0x19d   :  { %v646_v30 = vadd.f32 %v645_v32, %v644_v2  ;;  %v655_v32 = vsel %vm379_vm3, %v570_v55, 0.0 }
 0x19e   :  { %2504 = vst [vmem:[#allocation12_spill] sm:$0xff] %v2042_v41 }
 0x19f   :  { %v648_v8 = vadd.f32 %v647_v12, %v646_v30  ;;  %v657_v12 = vsel %vm379_vm3, %v571_v1, 0.0  ;;  %v661_v1 = vsel %vm379_vm3, %v573_v57, 0.0 }
 0x1a1   :  { %v650_v7 = vadd.f32 %v649_v63, %v648_v8  ;;  %v574_v63 = vmul.f32 %v2028_v50, %v2028_v50 }
 0x1a3   :  { %v652_v48 = vadd.f32 %v651_v42, %v650_v7  ;;  %v659_v7 = vsel %vm379_vm3, %v572_v51, 0.0  ;;  %v2505_v42 = vld [vmem:[#allocation13_spill] sm:$0xff]  ;;  %v663_v51 = vsel %vm379_vm3, %v574_v63, 0.0 }
 0x1a4   :  { %v2049_v36 = vsub.f32 %v2505_v42, %v1742_v37 }
 0x1a5   :  { %v654_v2 = vadd.f32 %v653_v56, %v652_v48  ;;  %v575_v48 = vmul.f32 %v2035_v19, %v2035_v19 }
 0x1a6   :  { %2506 = vst [vmem:[#allocation13_spill] sm:$0xff] %v2049_v36  ;;  %v577_v11 = vmul.f32 %v2049_v36, %v2049_v36 }
 0x1a7   :  { %v656_v30 = vadd.f32 %v655_v32, %v654_v2  ;;  %v2507_v2 = vld [vmem:[#allocation14_spill] sm:$0xff]  ;;  %v665_v57 = vsel %vm379_vm3, %v575_v48, 0.0 }
 0x1a8   :  { %v2056_v32 = vsub.f32 %v2507_v2, %v1742_v37 }
 0x1a9   :  { %v658_v8 = vadd.f32 %v657_v12, %v656_v30  ;;  %v576_v30 = vmul.f32 %v2042_v41, %v2042_v41 }
 0x1aa   :  { %2508 = vst [vmem:[#allocation14_spill] sm:$0xff] %v2056_v32  ;;  %v578_v42 = vmul.f32 %v2056_v32, %v2056_v32 }
 0x1ab   :  { %v660_v55 = vadd.f32 %v659_v7, %v658_v8  ;;  %v2063_v8 = vsub.f32 %v1728_v26, %v1742_v37  ;;  %v667_v63 = vsel %vm379_vm3, %v576_v30, 0.0 }
 0x1ad   :  { %v662_v56 = vadd.f32 %v661_v1, %v660_v55  ;;  %2509 = vst [vmem:[#allocation16_spill] sm:$0xff] %v2063_v8  ;;  %v2070_v55 = vsub.f32 %v1734_v38, %v1742_v37  ;;  %v579_v26 = vmul.f32 %v2063_v8, %v2063_v8  ;;  %v581_v37 = vmul.f32 %v1745_v40, %v1745_v40 }
 0x1af   :  { %v664_v12 = vadd.f32 %v663_v51, %v662_v56  ;;  %2510 = vst [vmem:[#allocation17_spill] sm:$0xff] %v2070_v55  ;;  %v669_v56 = vsel %vm379_vm3, %v577_v11, 0.0  ;;  %v580_v48 = vmul.f32 %v2070_v55, %v2070_v55  ;;  %v671_v51 = vsel %vm379_vm3, %v578_v42, 0.0 }
 0x1b0   :  { %v673_v38 = vsel %vm379_vm3, %v579_v26, 0.0 }
 0x1b1   :  { %v666_v7 = vadd.f32 %v665_v57, %v664_v12  ;;  %v675_v30 = vsel %vm379_vm3, %v580_v48, 0.0 }
 0x1b3   :  { %v668_v1 = vadd.f32 %v667_v63, %v666_v7  ;;  %v677_v63 = vsel %vm379_vm3, %v581_v37, 0.0  ;;  %v2090_v37 = vld [vmem:[#allocation6] ss:$0 sm:$0xff] }
 0x1b5   :  { %v670_v2 = vadd.f32 %v669_v56, %v668_v1 }
 0x1b7   :  { %v672_v12 = vadd.f32 %v671_v51, %v670_v2 }
 0x1b9   :  { %v674_v57 = vadd.f32 %v673_v38, %v672_v12 }
 0x1bb   :  { %v676_v7 = vadd.f32 %v675_v30, %v674_v57  ;;  %v2101_v57 = vld [vmem:[#allocation7] ss:$0 sm:$0xff] }
 0x1bd   :  { %v678_v8 = vadd.f32 %v677_v63, %v676_v7 }
 0x1bf   :  { %v679_v11 = vrot.slane %v678_v8, 4 }
 0x1c1   :  { %v680_v1 = vadd.f32 %v679_v11, %v678_v8 }
 0x1c3   :  { %v681_v56 = vrot.slane %v680_v1, 2 }
 0x1c5   :  { %v682_v32 = vadd.f32 %v681_v56, %v680_v1 }
 0x1c7   :  { %v683_v55 = vrot.slane %v682_v32, 1 }
 0x1c9   :  { %v684_v36 = vadd.f32 %v683_v55, %v682_v32 }
 0x1cb   :  { %v685_v42 = vmul.f32 0.0025510204, %v684_v36 }
 0x1cd   :  { %v686_v2 = vadd.f32 1e-05, %v685_v42 }
 0x1cf   :  { %1000 = vrsqrt.f32 %v686_v2  ;;  %vm693_vm5 = vweird.f32 %v686_v2 }
 0x1d5   :  { %v1001_v51 = vpop.eup %1000 }
 0x1d6   :  { %v688_v40 = vmul.f32 %v1001_v51, %v686_v2  ;;  %vm694_vm4 = vweird.f32 %v1001_v51 }
 0x1d7   :  { %vm695_vm6 = vmor %vm693_vm5, %vm694_vm4 }
 0x1d8   :  { %v689_v41 = vmul.f32 %v1001_v51, %v688_v40 }
 0x1da   :  { %v690_v26 = vmul.f32 0.5, %v689_v41 }
 0x1dc   :  { %v691_v12 = vsub.f32 1.5, %v690_v26 }
 0x1de   :  { %v692_v38 = vmul.f32 %v1001_v51, %v691_v12 }
 0x1e0   :  { %v2086_v48 = vsel %vm695_vm6, %v1001_v51, %v692_v38 }
 0x1e1   :  { %v697_v8 = vmul.f32 %v2086_v48, %v1749_v29  ;;  %v698_v36 = vmul.f32 %v2086_v48, %v1753_v60  ;;  %v699_v32 = vmul.f32 %v2086_v48, %v1757_v33  ;;  %v700_v40 = vmul.f32 %v2086_v48, %v1761_v34 }
 0x1e2   :  { %v701_v41 = vmul.f32 %v2086_v48, %v1769_v44  ;;  %v702_v29 = vmul.f32 %v2086_v48, %v1775_v45  ;;  %v703_v60 = vmul.f32 %v2086_v48, %v1783_v13  ;;  %v704_v34 = vmul.f32 %v2086_v48, %v1790_v54 }
 0x1e3   :  { %v750_v55 = vmul.f32 %v2090_v37, %v697_v8  ;;  %v751_v30 = vmul.f32 %v2090_v37, %v698_v36  ;;  %v752_v33 = vmul.f32 %v2090_v37, %v699_v32  ;;  %v753_v7 = vmul.f32 %v2090_v37, %v700_v40 }
 0x1e4   :  { %v705_v44 = vmul.f32 %v2086_v48, %v1797_v59  ;;  %v754_v63 = vmul.f32 %v2090_v37, %v701_v41  ;;  %v706_v45 = vmul.f32 %v2086_v48, %v1804_v0  ;;  %v755_v1 = vmul.f32 %v2090_v37, %v702_v29 }
 0x1e5   :  { %v803_v11 = vadd.f32 %v2101_v57, %v750_v55  ;;  %v804_v13 = vadd.f32 %v2101_v57, %v751_v30  ;;  %v707_v56 = vmul.f32 %v2086_v48, %v1811_v3  ;;  %v756_v54 = vmul.f32 %v2090_v37, %v703_v60 }
 0x1e6   :  { %v805_v42 = vadd.f32 %v2101_v57, %v752_v33  ;;  %v708_v59 = vmul.f32 %v2086_v48, %v1818_v6  ;;  %v757_v2 = vmul.f32 %v2090_v37, %v704_v34  ;;  %v806_v51 = vadd.f32 %v2101_v57, %v753_v7 }
 0x1e7   :  { %v709_v0 = vmul.f32 %v2086_v48, %v1825_v10  ;;  %v758_v26 = vmul.f32 %v2090_v37, %v705_v44  ;;  %v807_v12 = vadd.f32 %v2101_v57, %v754_v63  ;;  %1002 = vtanh.f32 %v803_v11 }
 0x1e8   :  { %v710_v3 = vmul.f32 %v2086_v48, %v1832_v15  ;;  %v759_v38 = vmul.f32 %v2090_v37, %v706_v45  ;;  %v808_v8 = vadd.f32 %v2101_v57, %v755_v1  ;;  %1004 = vtanh.f32 %v804_v13 }
 0x1e9   :  { %v711_v6 = vmul.f32 %v2086_v48, %v1839_v21  ;;  %v760_v36 = vmul.f32 %v2090_v37, %v707_v56  ;;  %v809_v10 = vadd.f32 %v2101_v57, %v756_v54  ;;  %1006 = vtanh.f32 %v805_v42 }
 0x1ea   :  { %v712_v32 = vmul.f32 %v2086_v48, %v1846_v47  ;;  %v761_v40 = vmul.f32 %v2090_v37, %v708_v59  ;;  %v810_v15 = vadd.f32 %v2101_v57, %v757_v2  ;;  %1008 = vtanh.f32 %v806_v51 }
 0x1eb   :  { %v713_v41 = vmul.f32 %v2086_v48, %v1853_v46  ;;  %v762_v55 = vmul.f32 %v2090_v37, %v709_v0  ;;  %v811_v21 = vadd.f32 %v2101_v57, %v758_v26  ;;  %1010 = vtanh.f32 %v807_v12 }
 0x1ec   :  { %v714_v29 = vmul.f32 %v2086_v48, %v1860_v52  ;;  %v763_v30 = vmul.f32 %v2090_v37, %v710_v3  ;;  %v812_v47 = vadd.f32 %v2101_v57, %v759_v38  ;;  %1012 = vtanh.f32 %v808_v8 }
 0x1ed   :  { %v1003_v60 = vpop.eup %1002  ;;  %v715_v33 = vmul.f32 %v2086_v48, %v1867_v16  ;;  %v764_v34 = vmul.f32 %v2090_v37, %v711_v6  ;;  %v813_v46 = vadd.f32 %v2101_v57, %v760_v36  ;;  %1014 = vtanh.f32 %v809_v10 }
 0x1ee   :  { %v1005_v7 = vpop.eup %1004  ;;  %v716_v44 = vmul.f32 %v2086_v48, %v1874_v20  ;;  %v765_v52 = vmul.f32 %v2090_v37, %v712_v32  ;;  %v814_v63 = vadd.f32 %v2101_v57, %v761_v40  ;;  %1016 = vtanh.f32 %v810_v15  ;;  %901 = vst.msk [vmem:[%s2489_s5] sm:$0xff] %vm379_vm3, %v1003_v60 }
 0x1ef   :  { %v1007_v16 = vpop.eup %1006  ;;  %v717_v11 = vmul.f32 %v2086_v48, %v1881_v5  ;;  %v766_v45 = vmul.f32 %v2090_v37, %v713_v41  ;;  %v815_v1 = vadd.f32 %v2101_v57, %v762_v55  ;;  %1018 = vtanh.f32 %v811_v21  ;;  %902 = vst.msk [vmem:[%s2489_s5 + $0x8] sm:$0xff] %vm379_vm3, %v1005_v7 }
 0x1f0   :  { %v1009_v20 = vpop.eup %1008  ;;  %v718_v13 = vmul.f32 %v2086_v48, %v1888_v9  ;;  %v767_v56 = vmul.f32 %v2090_v37, %v714_v29  ;;  %v816_v54 = vadd.f32 %v2101_v57, %v763_v30  ;;  %1020 = vtanh.f32 %v812_v47  ;;  %903 = vst.msk [vmem:[%s2489_s5 + $0x10] sm:$0xff] %vm379_vm3, %v1007_v16 }
 0x1f1   :  { %v1011_v5 = vpop.eup %1010  ;;  %v719_v42 = vmul.f32 %v2086_v48, %v1895_v14  ;;  %v768_v59 = vmul.f32 %v2090_v37, %v715_v33  ;;  %v817_v2 = vadd.f32 %v2101_v57, %v764_v34  ;;  %1022 = vtanh.f32 %v813_v46  ;;  %904 = vst.msk [vmem:[%s2489_s5 + $0x18] sm:$0xff] %vm379_vm3, %v1009_v20 }
 0x1f2   :  { %v1013_v9 = vpop.eup %1012  ;;  %v720_v51 = vmul.f32 %v2086_v48, %v1902_v23  ;;  %v769_v0 = vmul.f32 %v2090_v37, %v716_v44  ;;  %v818_v26 = vadd.f32 %v2101_v57, %v765_v52  ;;  %1024 = vtanh.f32 %v814_v63  ;;  %905 = vst.msk [vmem:[%s2489_s5 + $0x20] sm:$0xff] %vm379_vm3, %v1011_v5 }
 0x1f3   :  { %v1015_v14 = vpop.eup %1014  ;;  %v721_v12 = vmul.f32 %v2086_v48, %v1909_v31  ;;  %v770_v3 = vmul.f32 %v2090_v37, %v717_v11  ;;  %v819_v38 = vadd.f32 %v2101_v57, %v766_v45  ;;  %1026 = vtanh.f32 %v815_v1  ;;  %906 = vst.msk [vmem:[%s2489_s5 + $0x28] sm:$0xff] %vm379_vm3, %v1013_v9 }
 0x1f4   :  { %v1017_v23 = vpop.eup %1016  ;;  %v722_v8 = vmul.f32 %v2086_v48, %v1916_v39  ;;  %v771_v6 = vmul.f32 %v2090_v37, %v718_v13  ;;  %v820_v36 = vadd.f32 %v2101_v57, %v767_v56  ;;  %1028 = vtanh.f32 %v816_v54  ;;  %907 = vst.msk [vmem:[%s2489_s5 + $0x30] sm:$0xff] %vm379_vm3, %v1015_v14 }
 0x1f5   :  { %v1019_v31 = vpop.eup %1018  ;;  %v723_v10 = vmul.f32 %v2086_v48, %v1923_v53  ;;  %v772_v32 = vmul.f32 %v2090_v37, %v719_v42  ;;  %v821_v40 = vadd.f32 %v2101_v57, %v768_v59  ;;  %1030 = vtanh.f32 %v817_v2  ;;  %908 = vst.msk [vmem:[%s2489_s5 + $0x38] sm:$0xff] %vm379_vm3, %v1017_v23 }
 0x1f6   :  { %v1021_v39 = vpop.eup %1020  ;;  %v724_v15 = vmul.f32 %v2086_v48, %v1930_v61  ;;  %v773_v41 = vmul.f32 %v2090_v37, %v720_v51  ;;  %v822_v55 = vadd.f32 %v2101_v57, %v769_v0  ;;  %1032 = vtanh.f32 %v818_v26  ;;  %909 = vst.msk [vmem:[%s2489_s5 + $0x40] sm:$0xff] %vm379_vm3, %v1019_v31 }
 0x1f7   :  { %v1023_v53 = vpop.eup %1022  ;;  %v725_v21 = vmul.f32 %v2086_v48, %v1937_v22  ;;  %v774_v29 = vmul.f32 %v2090_v37, %v721_v12  ;;  %v823_v30 = vadd.f32 %v2101_v57, %v770_v3  ;;  %1034 = vtanh.f32 %v819_v38  ;;  %910 = vst.msk [vmem:[%s2489_s5 + $0x48] sm:$0xff] %vm379_vm3, %v1021_v39 }
 0x1f8   :  { %v1025_v61 = vpop.eup %1024  ;;  %v726_v47 = vmul.f32 %v2086_v48, %v1944_v25  ;;  %v775_v60 = vmul.f32 %v2090_v37, %v722_v8  ;;  %v824_v33 = vadd.f32 %v2101_v57, %v771_v6  ;;  %1036 = vtanh.f32 %v820_v36  ;;  %911 = vst.msk [vmem:[%s2489_s5 + $0x50] sm:$0xff] %vm379_vm3, %v1023_v53 }
 0x1f9   :  { %v1027_v22 = vpop.eup %1026  ;;  %v727_v34 = vmul.f32 %v2086_v48, %v1951_v58  ;;  %v776_v46 = vmul.f32 %v2090_v37, %v723_v10  ;;  %v825_v7 = vadd.f32 %v2101_v57, %v772_v32  ;;  %1038 = vtanh.f32 %v821_v40  ;;  %912 = vst.msk [vmem:[%s2489_s5 + $0x58] sm:$0xff] %vm379_vm3, %v1025_v61 }
 0x1fa   :  { %v1029_v25 = vpop.eup %1028  ;;  %v728_v44 = vmul.f32 %v2086_v48, %v1958_v28  ;;  %v777_v52 = vmul.f32 %v2090_v37, %v724_v15  ;;  %v826_v63 = vadd.f32 %v2101_v57, %v773_v41  ;;  %1040 = vtanh.f32 %v822_v55  ;;  %913 = vst.msk [vmem:[%s2489_s5 + $0x60] sm:$0xff] %vm379_vm3, %v1027_v22 }
 0x1fb   :  { %v1031_v58 = vpop.eup %1030  ;;  %v729_v16 = vmul.f32 %v2086_v48, %v1965_v24  ;;  %v778_v11 = vmul.f32 %v2090_v37, %v725_v21  ;;  %v827_v45 = vadd.f32 %v2101_v57, %v774_v29  ;;  %1042 = vtanh.f32 %v823_v30  ;;  %914 = vst.msk [vmem:[%s2489_s5 + $0x68] sm:$0xff] %vm379_vm3, %v1029_v25  ;;  %v2511_v21 = vld [vmem:[#allocation12_spill] sm:$0xff] }
 0x1fc   :  { %v1033_v28 = vpop.eup %1032  ;;  %v730_v1 = vmul.f32 %v2086_v48, %v1972_v27  ;;  %v779_v20 = vmul.f32 %v2090_v37, %v726_v47  ;;  %v828_v13 = vadd.f32 %v2101_v57, %v775_v60  ;;  %1044 = vtanh.f32 %v824_v33  ;;  %915 = vst.msk [vmem:[%s2489_s5 + $0x70] sm:$0xff] %vm379_vm3, %v1031_v58  ;;  %v2512_v47 = vld [vmem:[#allocation13_spill] sm:$0xff] }
 0x1fd   :  { %v1035_v24 = vpop.eup %1034  ;;  %v731_v56 = vmul.f32 %v2086_v48, %v1979_v62  ;;  %v780_v54 = vmul.f32 %v2090_v37, %v727_v34  ;;  %v829_v5 = vadd.f32 %v2101_v57, %v776_v46  ;;  %1046 = vtanh.f32 %v825_v7  ;;  %916 = vst.msk [vmem:[%s2489_s5 + $0x78] sm:$0xff] %vm379_vm3, %v1033_v28  ;;  %v2513_v46 = vld [vmem:[#allocation14_spill] sm:$0xff]  ;;  %v2515_v28 = vld [vmem:[#allocation17_spill] sm:$0xff] }
 0x1fe   :  { %v1037_v27 = vpop.eup %1036  ;;  %v732_v42 = vmul.f32 %v2086_v48, %v1986_v18  ;;  %v781_v59 = vmul.f32 %v2090_v37, %v728_v44  ;;  %v830_v2 = vadd.f32 %v2101_v57, %v777_v52  ;;  %1048 = vtanh.f32 %v826_v63  ;;  %917 = vst.msk [vmem:[%s2489_s5 + $0x80] sm:$0xff] %vm379_vm3, %v1035_v24  ;;  %v2514_v63 = vld [vmem:[#allocation16_spill] sm:$0xff] }
 0x1ff   :  { %v1039_v62 = vpop.eup %1038  ;;  %v733_v9 = vmul.f32 %v2086_v48, %v1993_v17  ;;  %v782_v51 = vmul.f32 %v2090_v37, %v729_v16  ;;  %v831_v0 = vadd.f32 %v2101_v57, %v778_v11  ;;  %1050 = vtanh.f32 %v827_v45  ;;  %918 = vst.msk [vmem:[%s2489_s5 + $0x88] sm:$0xff] %vm379_vm3, %v1037_v27 }
 0x200   :  { %v1041_v18 = vpop.eup %1040  ;;  %v734_v26 = vmul.f32 %v2086_v48, %v2000_v35  ;;  %v783_v14 = vmul.f32 %v2090_v37, %v730_v1  ;;  %v832_v12 = vadd.f32 %v2101_v57, %v779_v20  ;;  %1052 = vtanh.f32 %v828_v13  ;;  %919 = vst.msk [vmem:[%s2489_s5 + $0x90] sm:$0xff] %vm379_vm3, %v1039_v62 }
 0x201   :  { %v1043_v17 = vpop.eup %1042  ;;  %v735_v3 = vmul.f32 %v2086_v48, %v2007_v49  ;;  %v784_v38 = vmul.f32 %v2090_v37, %v731_v56  ;;  %v833_v23 = vadd.f32 %v2101_v57, %v780_v54  ;;  %1054 = vtanh.f32 %v829_v5  ;;  %920 = vst.msk [vmem:[%s2489_s5 + $0x98] sm:$0xff] %vm379_vm3, %v1041_v18  ;;  %v2516_v56 = vld [vmem:[#allocation15_spill] sm:$0xff] }
 0x202   :  { %v1045_v35 = vpop.eup %1044  ;;  %v736_v8 = vmul.f32 %v2086_v48, %v2014_v43  ;;  %v785_v6 = vmul.f32 %v2090_v37, %v732_v42  ;;  %v834_v36 = vadd.f32 %v2101_v57, %v781_v59  ;;  %1056 = vtanh.f32 %v830_v2  ;;  %921 = vst.msk [vmem:[%s2489_s5 + $0xa0] sm:$0xff] %vm379_vm3, %v1043_v17 }
 0x203   :  { %v1047_v49 = vpop.eup %1046  ;;  %v737_v31 = vmul.f32 %v2086_v48, %v2021_v4  ;;  %v786_v10 = vmul.f32 %v2090_v37, %v733_v9  ;;  %v835_v32 = vadd.f32 %v2101_v57, %v782_v51  ;;  %1058 = vtanh.f32 %v831_v0  ;;  %922 = vst.msk [vmem:[%s2489_s5 + $0xa8] sm:$0xff] %vm379_vm3, %v1045_v35 }
 0x204   :  { %v1049_v43 = vpop.eup %1048  ;;  %v738_v40 = vmul.f32 %v2086_v48, %v2028_v50  ;;  %v787_v39 = vmul.f32 %v2090_v37, %v734_v26  ;;  %v836_v15 = vadd.f32 %v2101_v57, %v783_v14  ;;  %1060 = vtanh.f32 %v832_v12  ;;  %923 = vst.msk [vmem:[%s2489_s5 + $0xb0] sm:$0xff] %vm379_vm3, %v1047_v49 }
 0x205   :  { %v1051_v4 = vpop.eup %1050  ;;  %v739_v41 = vmul.f32 %v2086_v48, %v2035_v19  ;;  %v788_v55 = vmul.f32 %v2090_v37, %v735_v3  ;;  %v837_v53 = vadd.f32 %v2101_v57, %v784_v38  ;;  %1062 = vtanh.f32 %v833_v23  ;;  %924 = vst.msk [vmem:[%s2489_s5 + $0xb8] sm:$0xff] %vm379_vm3, %v1049_v43 }
 0x206   :  { %v1053_v50 = vpop.eup %1052  ;;  %v740_v29 = vmul.f32 %v2086_v48, %v2511_v21  ;;  %v789_v30 = vmul.f32 %v2090_v37, %v736_v8  ;;  %v838_v61 = vadd.f32 %v2101_v57, %v785_v6  ;;  %1064 = vtanh.f32 %v834_v36  ;;  %925 = vst.msk [vmem:[%s2489_s5 + $0xc0] sm:$0xff] %vm379_vm3, %v1051_v4 }
 0x207   :  { %v1055_v19 = vpop.eup %1054  ;;  %v741_v60 = vmul.f32 %v2086_v48, %v2512_v47  ;;  %v790_v33 = vmul.f32 %v2090_v37, %v737_v31  ;;  %v839_v22 = vadd.f32 %v2101_v57, %v786_v10  ;;  %1066 = vtanh.f32 %v835_v32  ;;  %926 = vst.msk [vmem:[%s2489_s5 + $0xc8] sm:$0xff] %vm379_vm3, %v1053_v50 }
 0x208   :  { %v1057_v34 = vpop.eup %1056  ;;  %v742_v7 = vmul.f32 %v2086_v48, %v2513_v46  ;;  %v791_v25 = vmul.f32 %v2090_v37, %v738_v40  ;;  %v840_v44 = vadd.f32 %v2101_v57, %v787_v39  ;;  %1068 = vtanh.f32 %v836_v15  ;;  %927 = vst.msk [vmem:[%s2489_s5 + $0xd0] sm:$0xff] %vm379_vm3, %v1055_v19 }
 0x209   :  { %v1059_v52 = vpop.eup %1058  ;;  %v743_v58 = vmul.f32 %v2086_v48, %v2514_v63  ;;  %v792_v16 = vmul.f32 %v2090_v37, %v739_v41  ;;  %v841_v11 = vadd.f32 %v2101_v57, %v788_v55  ;;  %1070 = vtanh.f32 %v837_v53  ;;  %928 = vst.msk [vmem:[%s2489_s5 + $0xd8] sm:$0xff] %vm379_vm3, %v1057_v34 }
 0x20a   :  { %v1061_v45 = vpop.eup %1060  ;;  %v744_v1 = vmul.f32 %v2086_v48, %v2515_v28  ;;  %v793_v20 = vmul.f32 %v2090_v37, %v740_v29  ;;  %v842_v13 = vadd.f32 %v2101_v57, %v789_v30  ;;  %1072 = vtanh.f32 %v838_v61  ;;  %929 = vst.msk [vmem:[%s2489_s5 + $0xe0] sm:$0xff] %vm379_vm3, %v1059_v52 }
 0x20b   :  { %v1063_v24 = vpop.eup %1062  ;;  %v745_v54 = vmul.f32 %v2086_v48, %v2516_v56  ;;  %v794_v5 = vmul.f32 %v2090_v37, %v741_v60  ;;  %v843_v27 = vadd.f32 %v2101_v57, %v790_v33  ;;  %1074 = vtanh.f32 %v839_v22  ;;  %930 = vst.msk [vmem:[%s2489_s5 + $0xe8] sm:$0xff] %vm379_vm3, %v1061_v45 }
 0x20c   :  { %v1065_v42 = vpop.eup %1064  ;;  %v795_v59 = vmul.f32 %v2090_v37, %v742_v7  ;;  %v844_v2 = vadd.f32 %v2101_v57, %v791_v25  ;;  %1076 = vtanh.f32 %v840_v44  ;;  %931 = vst.msk [vmem:[%s2489_s5 + $0xf0] sm:$0xff] %vm379_vm3, %v1063_v24  ;;  %v796_v62 = vmul.f32 %v2090_v37, %v743_v58 }
 0x20d   :  { %v1067_v48 = vpop.eup %1066  ;;  %v845_v9 = vadd.f32 %v2101_v57, %v792_v16  ;;  %1078 = vtanh.f32 %v841_v11  ;;  %932 = vst.msk [vmem:[%s2489_s5 + $0xf8] sm:$0xff] %vm379_vm3, %v1065_v42  ;;  %v797_v0 = vmul.f32 %v2090_v37, %v744_v1  ;;  %v846_v18 = vadd.f32 %v2101_v57, %v793_v20 }
 0x20e   :  { %v1069_v51 = vpop.eup %1068  ;;  %1080 = vtanh.f32 %v842_v13  ;;  %933 = vst.msk [vmem:[%s2489_s5 + $0x100] sm:$0xff] %vm379_vm3, %v1067_v48  ;;  %v798_v14 = vmul.f32 %v2090_v37, %v745_v54  ;;  %v847_v12 = vadd.f32 %v2101_v57, %v794_v5  ;;  %v848_v3 = vadd.f32 %v2101_v57, %v795_v59 }
 0x20f   :  { %v1071_v26 = vpop.eup %1070  ;;  %1082 = vtanh.f32 %v843_v27  ;;  %934 = vst.msk [vmem:[%s2489_s5 + $0x108] sm:$0xff] %vm379_vm3, %v1069_v51  ;;  %v849_v37 = vadd.f32 %v2101_v57, %v796_v62  ;;  %v850_v35 = vadd.f32 %v2101_v57, %v797_v0 }
 0x210   :  { %v1073_v17 = vpop.eup %1072  ;;  %1084 = vtanh.f32 %v844_v2  ;;  %935 = vst.msk [vmem:[%s2489_s5 + $0x110] sm:$0xff] %vm379_vm3, %v1071_v26  ;;  %v851_v6 = vadd.f32 %v2101_v57, %v798_v14 }
 0x211   :  { %v1075_v38 = vpop.eup %1074  ;;  %1086 = vtanh.f32 %v845_v9  ;;  %936 = vst.msk [vmem:[%s2489_s5 + $0x118] sm:$0xff] %vm379_vm3, %v1073_v17 }
 0x212   :  { %v1077_v23 = vpop.eup %1076  ;;  %1088 = vtanh.f32 %v846_v18  ;;  %937 = vst.msk [vmem:[%s2489_s5 + $0x120] sm:$0xff] %vm379_vm3, %v1075_v38 }
 0x213   :  { %v1079_v8 = vpop.eup %1078  ;;  %1090 = vtanh.f32 %v847_v12  ;;  %938 = vst.msk [vmem:[%s2489_s5 + $0x128] sm:$0xff] %vm379_vm3, %v1077_v23 }
 0x214   :  { %v1081_v36 = vpop.eup %1080  ;;  %1092 = vtanh.f32 %v848_v3  ;;  %939 = vst.msk [vmem:[%s2489_s5 + $0x130] sm:$0xff] %vm379_vm3, %v1079_v8 }
 0x215   :  { %v1083_v49 = vpop.eup %1082  ;;  %1094 = vtanh.f32 %v849_v37  ;;  %940 = vst.msk [vmem:[%s2489_s5 + $0x138] sm:$0xff] %vm379_vm3, %v1081_v36 }
 0x216   :  { %v1085_v57 = vpop.eup %1084  ;;  %1096 = vtanh.f32 %v850_v35  ;;  %941 = vst.msk [vmem:[%s2489_s5 + $0x140] sm:$0xff] %vm379_vm3, %v1083_v49 }
 0x217   :  { %v1087_v31 = vpop.eup %1086  ;;  %1098 = vtanh.f32 %v851_v6  ;;  %942 = vst.msk [vmem:[%s2489_s5 + $0x148] sm:$0xff] %vm379_vm3, %v1085_v57 }
 0x218   :  { %v1089_v10 = vpop.eup %1088  ;;  %943 = vst.msk [vmem:[%s2489_s5 + $0x150] sm:$0xff] %vm379_vm3, %v1087_v31 }
 0x219   :  { %v1091_v32 = vpop.eup %1090  ;;  %944 = vst.msk [vmem:[%s2489_s5 + $0x158] sm:$0xff] %vm379_vm3, %v1089_v10 }
 0x21a   :  { %v1093_v43 = vpop.eup %1092  ;;  %945 = vst.msk [vmem:[%s2489_s5 + $0x160] sm:$0xff] %vm379_vm3, %v1091_v32 }
 0x21b   :  { %v1095_v40 = vpop.eup %1094  ;;  %946 = vst.msk [vmem:[%s2489_s5 + $0x168] sm:$0xff] %vm379_vm3, %v1093_v43 }
 0x21c   :  { %v1097_v39 = vpop.eup %1096  ;;  %947 = vst.msk [vmem:[%s2489_s5 + $0x170] sm:$0xff] %vm379_vm3, %v1095_v40 }
 0x21d   :  { %v1099_v15 = vpop.eup %1098  ;;  %948 = vst.msk [vmem:[%s2489_s5 + $0x178] sm:$0xff] %vm379_vm3, %v1097_v39 }
 0x21e   :  { %949 = vst.msk [vmem:[%s2489_s5 + $0x180] sm:$0xff] %vm379_vm3, %v1099_v15 }
 0x21f   :  { %954 = vsyncpa [#allocation3], 1 }
 0x220   :  { %955 = vsyncpa [#allocation5], 1 }
 0x221   :  { %956 = vsyncpa [#allocation8], 1 }

// kernel: autoencoder_forward.6
= control target key start
LH: loop header
LB: loop body
LE: loop exit
PB: predicated region body
PF: predicated region fallthrough
CT: control target
= control target key end

     0   :  { %vm229_vm0 = vcmask 261120   ;;  %vm380_vm1 = vcmask 523264   ;;  %vm404_vm2 = vcmask 517120   ;;  %s1084_s1 = inlined_call_operand.vmem [shape: bf16[288,64], index: 1, kind: input, shape index: {}]   ;;  %s1085_s0 = inlined_call_operand.vmem [shape: f32[98,288], index: 0, kind: input, shape index: {}]   ;;  %s1086_s2 = inlined_call_operand.vmem [shape: f32[1,64], index: 2, kind: input, shape index: {}]   ;;  %s1087_s3 = inlined_call_operand.vmem [shape: f32[1,64], index: 3, kind: input, shape index: {}]   ;;  %s1088_s4 = inlined_call_operand.vmem [shape: f32[1,64], index: 4, kind: input, shape index: {}]   ;;  %s1089_s5 = inlined_call_operand.vmem [shape: f32[98,64], index: 5, kind: output, shape index: {}]  }
   0x1   :  { %v646_v0 = vld [vmem:[%s1084_s1 + $0x38] sm:$0xff]  ;;  %v656_v2 = vld [vmem:[%s1084_s1 + $0x88] sm:$0xff]  ;;  %v645_v3 = vld [vmem:[%s1084_s1 + $0x30] sm:$0xff] }
   0x2   :  { %v654_v1 = vld [vmem:[%s1084_s1 + $0x78] sm:$0xff]  ;;  %251 = vmatpush.bf16.msra.mxu0 %v646_v0  ;;  %657 = vmatpush.bf16.msra.mxu3 %v646_v0  ;;  %v653_v4 = vld [vmem:[%s1084_s1 + $0x70] sm:$0xff]  ;;  %v655_v5 = vld [vmem:[%s1084_s1 + $0x80] sm:$0xff] }
   0x3   :  { %294 = vmatpush.bf16.msra.mxu1 %v654_v1  ;;  %343 = vmatpush.bf16.msra.mxu2 %v656_v2  ;;  %v23_v6 = vld [vmem:[%s1085_s0 + $0x10] sm:$0xff]  ;;  %v26_v7 = vld [vmem:[%s1085_s0 + $0x28] sm:$0xff]  ;;  %v643_v11 = vld [vmem:[%s1084_s1 + $0x20] sm:$0xff] }
   0x4   :  { %v62_v8 = vpack.c.bf16 %v26_v7, %v23_v6  ;;  %v644_v9 = vld [vmem:[%s1084_s1 + $0x28] sm:$0xff]  ;;  %v651_v12 = vld [vmem:[%s1084_s1 + $0x60] sm:$0xff]  ;;  %v642_v13 = vld [vmem:[%s1084_s1 + $0x18] sm:$0xff] }
   0x5   :  { %v652_v10 = vld [vmem:[%s1084_s1 + $0x68] sm:$0xff]  ;;  %v650_v14 = vld [vmem:[%s1084_s1 + $0x58] sm:$0xff]  ;;  %v641_v15 = vld [vmem:[%s1084_s1 + $0x10] sm:$0xff] }
   0x6   :  { %252 = vmatpush.bf16.msra.mxu0 %v645_v3  ;;  %658 = vmatpush.bf16.msra.mxu3 %v645_v3  ;;  %v649_v16 = vld [vmem:[%s1084_s1 + $0x50] sm:$0xff]  ;;  %v29_v17 = vld [vmem:[%s1085_s0 + $0x40] sm:$0xff]  ;;  %v32_v18 = vld [vmem:[%s1085_s0 + $0x58] sm:$0xff] }
   0x7   :  { %295 = vmatpush.bf16.msra.mxu1 %v653_v4  ;;  %344 = vmatpush.bf16.msra.mxu2 %v655_v5  ;;  %v65_v19 = vpack.c.bf16 %v32_v18, %v29_v17  ;;  %v640_v20 = vld [vmem:[%s1084_s1 + $0x8] sm:$0xff]  ;;  %v639_v22 = vld [vmem:[%s1084_s1] sm:$0xff]  ;;  %v24_v25 = vld [vmem:[%s1085_s0 + $0x18] sm:$0xff] }
   0x8   :  { %v648_v21 = vld [vmem:[%s1084_s1 + $0x48] sm:$0xff]  ;;  %v647_v23 = vld [vmem:[%s1084_s1 + $0x40] sm:$0xff]  ;;  %v51_v26 = vld [vmem:[%s1085_s0 + $0xf0] sm:$0xff] }
   0x9   :  { %v21_v24 = vld [vmem:[%s1085_s0] sm:$0xff]  ;;  %v54_v27 = vld [vmem:[%s1085_s0 + $0x108] sm:$0xff]  ;;  %v35_v33 = vld [vmem:[%s1085_s0 + $0x70] sm:$0xff] }
   0xa   :  { %632 = vmatmul.msk.bf16.vlgmr.msra.gmra.mxu2 %vm229_vm0, %v62_v8  ;;  %253 = vmatpush.bf16.msra.mxu0 %v644_v9  ;;  %v22_v28 = vld [vmem:[%s1085_s0 + $0x8] sm:$0xff]  ;;  %v25_v29 = vld [vmem:[%s1085_s0 + $0x20] sm:$0xff]  ;;  %v60_v30 = vpack.c.bf16 %v24_v25, %v21_v24  ;;  %v75_v31 = vpack.c.bf16 %v54_v27, %v51_v26  ;;  %v27_v36 = vld [vmem:[%s1085_s0 + $0x30] sm:$0xff] }
   0xb   :  { %659 = vmatpush.bf16.msra.mxu3 %v644_v9  ;;  %296 = vmatpush.bf16.msra.mxu1 %v652_v10  ;;  %v61_v32 = vpack.c.bf16 %v25_v29, %v22_v28  ;;  %v38_v34 = vld [vmem:[%s1085_s0 + $0x88] sm:$0xff]  ;;  %v57_v38 = vld [vmem:[%s1085_s0 + $0x120] sm:$0x3]  ;;  %v28_v39 = vld [vmem:[%s1085_s0 + $0x38] sm:$0xff] }
   0xc   :  { %v68_v35 = vpack.c.bf16 %v38_v34, %v35_v33  ;;  %v30_v37 = vld [vmem:[%s1085_s0 + $0x48] sm:$0xff]  ;;  %v31_v40 = vld [vmem:[%s1085_s0 + $0x50] sm:$0xff]  ;;  %v78_v42 = vpack.c.bf16 %v57_v38, %v57_v38  ;;  %v41_v44 = vld [vmem:[%s1085_s0 + $0xa0] sm:$0xff] }
   0xd   :  { %v63_v41 = vpack.c.bf16 %v30_v37, %v27_v36  ;;  %v64_v43 = vpack.c.bf16 %v31_v40, %v28_v39  ;;  %v44_v45 = vld [vmem:[%s1085_s0 + $0xb8] sm:$0xff]  ;;  %v33_v47 = vld [vmem:[%s1085_s0 + $0x60] sm:$0xff]  ;;  %v34_v49 = vld [vmem:[%s1085_s0 + $0x68] sm:$0xff] }
   0xe   :  { %254 = vmatpush.bf16.msra.mxu0 %v643_v11  ;;  %v71_v46 = vpack.c.bf16 %v44_v45, %v41_v44  ;;  %v36_v48 = vld [vmem:[%s1085_s0 + $0x78] sm:$0xff]  ;;  %v37_v50 = vld [vmem:[%s1085_s0 + $0x80] sm:$0xff]  ;;  %v55_v52 = vld [vmem:[%s1085_s0 + $0x110] sm:$0xff] }
   0xf   :  { %660 = vmatpush.bf16.msra.mxu3 %v643_v11  ;;  %297 = vmatpush.bf16.msra.mxu1 %v651_v12  ;;  %v52_v51 = vld [vmem:[%s1085_s0 + $0xf8] sm:$0xff]  ;;  %v66_v53 = vpack.c.bf16 %v36_v48, %v33_v47  ;;  %v67_v54 = vpack.c.bf16 %v37_v50, %v34_v49  ;;  %v47_v56 = vld [vmem:[%s1085_s0 + $0xd0] sm:$0xff]  ;;  %v50_v57 = vld [vmem:[%s1085_s0 + $0xe8] sm:$0xff] }
  0x10   :  { %v76_v55 = vpack.c.bf16 %v55_v52, %v52_v51  ;;  %v74_v58 = vpack.c.bf16 %v50_v57, %v47_v56  ;;  %v39_v59 = vld [vmem:[%s1085_s0 + $0x90] sm:$0xff]  ;;  %v42_v60 = vld [vmem:[%s1085_s0 + $0xa8] sm:$0xff]  ;;  %v40_v61 = vld [vmem:[%s1085_s0 + $0x98] sm:$0xff] }
  0x11   :  { %v43_v62 = vld [vmem:[%s1085_s0 + $0xb0] sm:$0xff]  ;;  %v58_v63 = vld [vmem:[%s1085_s0 + $0x128] sm:$0x3]  ;;  %v69_v0 = vpack.c.bf16 %v42_v60, %v39_v59  ;;  %v53_v3 = vld [vmem:[%s1085_s0 + $0x100] sm:$0xff] }
  0x12   :  { %255 = vmatpush.bf16.msra.mxu0 %v642_v13  ;;  %v79_v2 = vpack.c.bf16 %v58_v63, %v58_v63  ;;  %v45_v6 = vld [vmem:[%s1085_s0 + $0xc0] sm:$0xff]  ;;  %v48_v7 = vld [vmem:[%s1085_s0 + $0xd8] sm:$0xff]  ;;  %v46_v8 = vld [vmem:[%s1085_s0 + $0xc8] sm:$0xff] }
  0x13   :  { %661 = vmatpush.bf16.msra.mxu3 %v642_v13  ;;  %298 = vmatpush.bf16.msra.mxu1 %v650_v14  ;;  %v49_v9 = vld [vmem:[%s1085_s0 + $0xe0] sm:$0xff] }
  0x14   :  { %v73_v11 = vpack.c.bf16 %v49_v9, %v46_v8  ;;  %v915_v17 = vld [vmem:[%s1086_s2] ss:$0 sm:$0xff] }
  0x16   :  { %256 = vmatpush.bf16.msra.mxu0 %v641_v15 }
  0x17   :  { %662 = vmatpush.bf16.msra.mxu3 %v641_v15  ;;  %299 = vmatpush.bf16.msra.mxu1 %v649_v16 }
  0x1a   :  { %633 = vmatmul.msk.bf16.gmra.mxu2 %vm229_vm0, %v65_v19  ;;  %257 = vmatpush.bf16.msra.mxu0 %v640_v20 }
  0x1b   :  { %663 = vmatpush.bf16.msra.mxu3 %v640_v20  ;;  %300 = vmatpush.bf16.msra.mxu1 %v648_v21 }
  0x1e   :  { %258 = vmatpush.bf16.msra.mxu0 %v639_v22 }
  0x1f   :  { %664 = vmatpush.bf16.msra.mxu3 %v639_v22  ;;  %301 = vmatpush.bf16.msra.mxu1 %v647_v23 }
  0x21   :  { %259 = vmatmul.bf16.vlgmr.msra.gmra.mxu0 %v60_v30 }
  0x22   :  { %284 = vmatmul.bf16.vlgmr.msra.gmra.mxu3 %v75_v31  ;;  %302 = vmatmul.bf16.vlgmr.msra.gmra.mxu1 %v61_v32 }
  0x23   :  { %665 = vmatpush.bf16.msrb.mxu3 %v654_v1  ;;  %v70_v1 = vpack.c.bf16 %v43_v62, %v40_v61 }
  0x27   :  { %666 = vmatpush.bf16.msrb.mxu3 %v653_v4  ;;  %v56_v4 = vld [vmem:[%s1085_s0 + $0x118] sm:$0xff] }
  0x28   :  { %v77_v5 = vpack.c.bf16 %v56_v4, %v53_v3 }
  0x2a   :  { %634 = vmatmul.msk.bf16.gmra.mxu2 %vm229_vm0, %v68_v35 }
  0x2b   :  { %667 = vmatpush.bf16.msrb.mxu3 %v652_v10  ;;  %v72_v10 = vpack.c.bf16 %v48_v7, %v45_v6 }
  0x2f   :  { %668 = vmatpush.bf16.msrb.mxu3 %v651_v12  ;;  %v59_v12 = vld [vmem:[%s1085_s0 + $0x130] sm:$0x3] }
  0x30   :  { %v80_v13 = vpack.c.bf16 %v59_v12, %v59_v12 }
  0x31   :  { %264 = vmatmul.bf16.gmra.mxu0 %v63_v41 }
  0x32   :  { %289 = vmatmul.bf16.gmra.mxu3 %v78_v42  ;;  %307 = vmatmul.bf16.gmra.mxu1 %v64_v43 }
  0x33   :  { %669 = vmatpush.bf16.msrb.mxu3 %v650_v14 }
  0x37   :  { %670 = vmatpush.bf16.msrb.mxu3 %v649_v16 }
  0x3a   :  { %635 = vmatmul.msk.bf16.gmra.mxu2 %vm229_vm0, %v71_v46 }
  0x3b   :  { %671 = vmatpush.bf16.msrb.mxu3 %v648_v21 }
  0x3f   :  { %672 = vmatpush.bf16.msrb.mxu3 %v647_v23 }
  0x41   :  { %269 = vmatmul.bf16.gmra.mxu0 %v66_v53 }
  0x42   :  { %312 = vmatmul.bf16.gmra.mxu1 %v67_v54  ;;  %327 = vmatmul.bf16.vlgmr.msrb.gmra.mxu3 %v76_v55 }
  0x4a   :  { %636 = vmatmul.msk.bf16.gmra.mxu2 %vm229_vm0, %v74_v58 }
  0x51   :  { %274 = vmatmul.bf16.gmra.mxu0 %v69_v0 }
  0x52   :  { %317 = vmatmul.bf16.gmra.mxu1 %v70_v1  ;;  %332 = vmatmul.bf16.gmra.mxu3 %v79_v2 }
  0x5a   :  { %637 = vmatmul.msk.bf16.gmra.mxu2 %vm229_vm0, %v77_v5 }
  0x61   :  { %279 = vmatmul.bf16.gmra.mxu0 %v72_v10 }
  0x62   :  { %322 = vmatmul.bf16.gmra.mxu1 %v73_v11 }
  0x6a   :  { %638 = vmatmul.msk.bf16.gmra.mxu2 %vm229_vm0, %v80_v13 }
  0x8d   :  { %v346_v14 = vpop.f32.mrf.mxu2 }
  0x95   :  { %v348_v15 = vpop.f32.mrf.mxu2 }
  0x9d   :  { %v351_v16 = vpop.f32.mrf.mxu2 }
  0x9e   :  { %v260_v18 = vpop.f32.mrf.mxu0 }
  0x9f   :  { %v303_v19 = vpop.f32.mrf.mxu1  ;;  %v261_v20 = vadd.f32 %v915_v17, %v260_v18 }
  0xa1   :  { %v304_v21 = vadd.f32 %v303_v19, %v261_v20 }
  0xa3   :  { %v921_v27 = vadd.f32 %v346_v14, %v304_v21 }
  0xa5   :  { %v918_v22 = vpop.f32.mrf.mxu3  ;;  %v353_v23 = vpop.f32.mrf.mxu2  ;;  %v381_v30 = vsel %vm380_vm1, %v921_v27, 0.0 }
  0xa6   :  { %v262_v24 = vpop.f32.mrf.mxu0 }
  0xa7   :  { %v263_v25 = vadd.f32 %v915_v17, %v262_v24  ;;  %v305_v26 = vpop.f32.mrf.mxu1 }
  0xa9   :  { %v306_v28 = vadd.f32 %v305_v26, %v263_v25 }
  0xab   :  { %v923_v29 = vadd.f32 %v348_v15, %v306_v28 }
  0xad   :  { %v382_v31 = vsel %vm380_vm1, %v923_v29, 0.0  ;;  %v929_v32 = vpop.f32.mrf.mxu3  ;;  %v356_v33 = vpop.f32.mrf.mxu2 }
  0xae   :  { %v383_v34 = vadd.f32 %v382_v31, %v381_v30  ;;  %v265_v35 = vpop.f32.mrf.mxu0 }
  0xaf   :  { %v266_v36 = vadd.f32 %v915_v17, %v265_v35  ;;  %v308_v37 = vpop.f32.mrf.mxu1 }
  0xb1   :  { %v309_v38 = vadd.f32 %v308_v37, %v266_v36 }
  0xb3   :  { %v932_v39 = vadd.f32 %v351_v16, %v309_v38 }
  0xb5   :  { %v384_v40 = vsel %vm380_vm1, %v932_v39, 0.0  ;;  %v290_v41 = vpop.f32.mrf.mxu3  ;;  %v358_v42 = vpop.f32.mrf.mxu2 }
  0xb6   :  { %v385_v43 = vadd.f32 %v384_v40, %v383_v34  ;;  %v267_v44 = vpop.f32.mrf.mxu0  ;;  %v286_v34 = vadd.f32 %v915_v17, %v918_v22  ;;  %v288_v40 = vadd.f32 %v915_v17, %v929_v32 }
  0xb7   :  { %v310_v45 = vpop.f32.mrf.mxu1  ;;  %v268_v58 = vadd.f32 %v915_v17, %v267_v44 }
  0xb9   :  { %v311_v63 = vadd.f32 %v310_v45, %v268_v58 }
  0xbb   :  { %v940_v4 = vadd.f32 %v353_v23, %v311_v63 }
  0xbd   :  { %v292_v46 = vpop.f32.mrf.mxu3  ;;  %v361_v47 = vpop.f32.mrf.mxu2  ;;  %v386_v12 = vsel %vm380_vm1, %v940_v4, 0.0 }
  0xbe   :  { %v270_v48 = vpop.f32.mrf.mxu0  ;;  %v387_v21 = vadd.f32 %v386_v12, %v385_v43  ;;  %v291_v46 = vadd.f32 %v915_v17, %v290_v41 }
  0xbf   :  { %v313_v49 = vpop.f32.mrf.mxu1  ;;  %v271_v59 = vadd.f32 %v915_v17, %v270_v48 }
  0xc1   :  { %v314_v2 = vadd.f32 %v313_v49, %v271_v59 }
  0xc3   :  { %v943_v7 = vadd.f32 %v356_v33, %v314_v2 }
  0xc5   :  { %v328_v50 = vpop.f32.mrf.mxu3  ;;  %v363_v51 = vpop.f32.mrf.mxu2  ;;  %v388_v18 = vsel %vm380_vm1, %v943_v7, 0.0 }
  0xc6   :  { %v272_v52 = vpop.f32.mrf.mxu0  ;;  %v389_v25 = vadd.f32 %v388_v18, %v387_v21 }
  0xc7   :  { %v315_v53 = vpop.f32.mrf.mxu1  ;;  %v273_v0 = vadd.f32 %v915_v17, %v272_v52 }
  0xc9   :  { %v316_v5 = vadd.f32 %v315_v53, %v273_v0 }
  0xcb   :  { %v359_v13 = vadd.f32 %v358_v42, %v316_v5  ;;  %v329_v42 = vadd.f32 %v328_v50, %v286_v34 }
  0xcd   :  { %v330_v54 = vpop.f32.mrf.mxu3  ;;  %v366_v55 = vpop.f32.mrf.mxu2  ;;  %v390_v23 = vsel %vm380_vm1, %v359_v13, 0.0 }
  0xce   :  { %v275_v56 = vpop.f32.mrf.mxu0  ;;  %v391_v31 = vadd.f32 %v390_v23, %v389_v25 }
  0xcf   :  { %v318_v57 = vpop.f32.mrf.mxu1  ;;  %v276_v3 = vadd.f32 %v915_v17, %v275_v56 }
  0xd1   :  { %v319_v8 = vadd.f32 %v318_v57, %v276_v3 }
  0xd3   :  { %v362_v19 = vadd.f32 %v361_v47, %v319_v8  ;;  %v331_v47 = vadd.f32 %v330_v54, %v288_v40 }
  0xd5   :  { %v333_v60 = vpop.f32.mrf.mxu3  ;;  %v368_v61 = vpop.f32.mrf.mxu2  ;;  %v392_v26 = vsel %vm380_vm1, %v362_v19, 0.0 }
  0xd6   :  { %v277_v62 = vpop.f32.mrf.mxu0  ;;  %v393_v37 = vadd.f32 %v392_v26, %v391_v31 }
  0xd7   :  { %v320_v1 = vpop.f32.mrf.mxu1  ;;  %v278_v6 = vadd.f32 %v915_v17, %v277_v62 }
  0xd9   :  { %v321_v14 = vadd.f32 %v320_v1, %v278_v6 }
  0xdb   :  { %v364_v24 = vadd.f32 %v363_v51, %v321_v14  ;;  %v334_v51 = vadd.f32 %v333_v60, %v291_v46 }
  0xdd   :  { %v371_v9 = vpop.f32.mrf.mxu2  ;;  %v335_v10 = vpop.f32.mrf.mxu3  ;;  %v394_v35 = vsel %vm380_vm1, %v364_v24, 0.0 }
  0xde   :  { %v280_v11 = vpop.f32.mrf.mxu0  ;;  %v395_v45 = vadd.f32 %v394_v35, %v393_v37  ;;  %v372_v48 = vadd.f32 %v371_v9, %v329_v42 }
  0xdf   :  { %v281_v15 = vadd.f32 %v915_v17, %v280_v11  ;;  %v323_v16 = vpop.f32.mrf.mxu1 }
  0xe0   :  { %v400_v32 = vsel %vm380_vm1, %v372_v48, 0.0 }
  0xe1   :  { %v324_v20 = vadd.f32 %v323_v16, %v281_v15 }
  0xe3   :  { %v952_v28 = vadd.f32 %v366_v55, %v324_v20 }
  0xe5   :  { %v373_v30 = vpop.f32.mrf.mxu2  ;;  %v396_v43 = vsel %vm380_vm1, %v952_v28, 0.0 }
  0xe6   :  { %v282_v33 = vpop.f32.mrf.mxu0  ;;  %v397_v49 = vadd.f32 %v396_v43, %v395_v45  ;;  %v374_v52 = vadd.f32 %v373_v30, %v331_v47 }
  0xe7   :  { %v283_v36 = vadd.f32 %v915_v17, %v282_v33  ;;  %v325_v38 = vpop.f32.mrf.mxu1 }
  0xe8   :  { %v402_v58 = vsel %vm380_vm1, %v374_v52, 0.0 }
  0xe9   :  { %v326_v44 = vadd.f32 %v325_v38, %v283_v36 }
  0xeb   :  { %v369_v22 = vadd.f32 %v368_v61, %v326_v44 }
  0xed   :  { %v398_v53 = vsel %vm380_vm1, %v369_v22, 0.0  ;;  %v376_v55 = vpop.f32.mrf.mxu2 }
  0xee   :  { %v399_v56 = vadd.f32 %v398_v53, %v397_v49  ;;  %v377_v50 = vadd.f32 %v376_v55, %v334_v51 }
  0xf0   :  { %v401_v57 = vadd.f32 %v400_v32, %v399_v56  ;;  %v405_v17 = vsel %vm404_vm2, %v377_v50, 0.0 }
  0xf2   :  { %v403_v59 = vadd.f32 %v402_v58, %v401_v57 }
  0xf4   :  { %v406_v41 = vadd.f32 %v405_v17, %v403_v59 }
  0xf5   :  { %v378_v54 = vpop.f32.mrf.mxu2 }
  0xf6   :  { %v407_v61 = vrot.slane %v406_v41, 4 }
  0xf8   :  { %v408_v62 = vadd.f32 %v407_v61, %v406_v41 }
  0xfa   :  { %v409_v60 = vrot.slane %v408_v62, 2 }
  0xfc   :  { %v410_v63 = vadd.f32 %v409_v60, %v408_v62 }
  0xfe   :  { %v411_v0 = vrot.slane %v410_v63, 1 }
 0x100   :  { %v412_v1 = vadd.f32 %v411_v0, %v410_v63 }
 0x102   :  { %v413_v2 = vmul.f32 0.010204081, %v412_v1 }
 0x104   :  { %v968_v3 = vsub.f32 %v921_v27, %v413_v2  ;;  %v971_v5 = vsub.f32 %v923_v29, %v413_v2  ;;  %v974_v6 = vsub.f32 %v932_v39, %v413_v2  ;;  %v977_v8 = vsub.f32 %v940_v4, %v413_v2 }
 0x105   :  { %v979_v9 = vsub.f32 %v372_v48, %v413_v2  ;;  %v981_v10 = vsub.f32 %v374_v52, %v413_v2  ;;  %v988_v12 = vsub.f32 %v943_v7, %v413_v2  ;;  %v992_v39 = vsub.f32 %v359_v13, %v413_v2 }
 0x106   :  { %v427_v11 = vmul.f32 %v968_v3, %v968_v3  ;;  %v428_v27 = vmul.f32 %v971_v5, %v971_v5  ;;  %v429_v29 = vmul.f32 %v974_v6, %v974_v6  ;;  %v430_v4 = vmul.f32 %v977_v8, %v977_v8 }
 0x107   :  { %v420_v18 = vsub.f32 %v362_v19, %v413_v2  ;;  %v431_v20 = vmul.f32 %v988_v12, %v988_v12  ;;  %v421_v23 = vsub.f32 %v364_v24, %v413_v2  ;;  %v432_v13 = vmul.f32 %v992_v39, %v992_v39 }
 0x108   :  { %v440_v14 = vsel %vm380_vm1, %v427_v11, 0.0  ;;  %v441_v15 = vsel %vm380_vm1, %v428_v27, 0.0  ;;  %v443_v7 = vsel %vm380_vm1, %v429_v29, 0.0  ;;  %v445_v25 = vsel %vm380_vm1, %v430_v4, 0.0  ;;  %v674_v29 = vld [vmem:[%s1087_s3] ss:$0 sm:$0xff] }
 0x109   :  { %v442_v16 = vadd.f32 %v441_v15, %v440_v14  ;;  %v422_v30 = vsub.f32 %v952_v28, %v413_v2  ;;  %v433_v31 = vmul.f32 %v420_v18, %v420_v18  ;;  %v447_v33 = vsel %vm380_vm1, %v431_v20, 0.0 }
 0x10a   :  { %v423_v19 = vsub.f32 %v369_v22, %v413_v2  ;;  %v434_v35 = vmul.f32 %v421_v23, %v421_v23  ;;  %v449_v36 = vsel %vm380_vm1, %v432_v13, 0.0  ;;  %v426_v45 = vsub.f32 %v377_v50, %v413_v2 }
 0x10b   :  { %v444_v21 = vadd.f32 %v443_v7, %v442_v16  ;;  %v435_v38 = vmul.f32 %v422_v30, %v422_v30  ;;  %v451_v24 = vsel %vm380_vm1, %v433_v31, 0.0  ;;  %v437_v28 = vmul.f32 %v979_v9, %v979_v9 }
 0x10c   :  { %v436_v42 = vmul.f32 %v423_v19, %v423_v19  ;;  %v453_v43 = vsel %vm380_vm1, %v434_v35, 0.0  ;;  %v438_v48 = vmul.f32 %v981_v10, %v981_v10  ;;  %v439_v51 = vmul.f32 %v426_v45, %v426_v45 }
 0x10d   :  { %v446_v26 = vadd.f32 %v445_v25, %v444_v21  ;;  %v455_v46 = vsel %vm380_vm1, %v435_v38, 0.0  ;;  %v459_v52 = vsel %vm380_vm1, %v437_v28, 0.0 }
 0x10e   :  { %v457_v22 = vsel %vm380_vm1, %v436_v42, 0.0  ;;  %v461_v55 = vsel %vm380_vm1, %v438_v48, 0.0  ;;  %v463_v32 = vsel %vm404_vm2, %v439_v51, 0.0 }
 0x10f   :  { %v448_v34 = vadd.f32 %v447_v33, %v446_v26 }
 0x111   :  { %v450_v37 = vadd.f32 %v449_v36, %v448_v34 }
 0x113   :  { %v452_v40 = vadd.f32 %v451_v24, %v450_v37 }
 0x115   :  { %v454_v44 = vadd.f32 %v453_v43, %v452_v40 }
 0x117   :  { %v456_v47 = vadd.f32 %v455_v46, %v454_v44 }
 0x119   :  { %v458_v49 = vadd.f32 %v457_v22, %v456_v47 }
 0x11b   :  { %v460_v53 = vadd.f32 %v459_v52, %v458_v49 }
 0x11d   :  { %v462_v56 = vadd.f32 %v461_v55, %v460_v53 }
 0x11f   :  { %v464_v50 = vadd.f32 %v463_v32, %v462_v56 }
 0x121   :  { %v465_v57 = vrot.slane %v464_v50, 4 }
 0x123   :  { %v466_v58 = vadd.f32 %v465_v57, %v464_v50 }
 0x125   :  { %v467_v59 = vrot.slane %v466_v58, 2 }
 0x127   :  { %v468_v17 = vadd.f32 %v467_v59, %v466_v58 }
 0x129   :  { %v469_v41 = vrot.slane %v468_v17, 1 }
 0x12b   :  { %v470_v54 = vadd.f32 %v469_v41, %v468_v17 }
 0x12d   :  { %v471_v61 = vmul.f32 0.010204081, %v470_v54 }
 0x12f   :  { %v472_v62 = vadd.f32 1e-05, %v471_v61 }
 0x131   :  { %676 = vrsqrt.f32 %v472_v62  ;;  %vm479_vm4 = vweird.f32 %v472_v62 }
 0x137   :  { %v677_v60 = vpop.eup %676 }
 0x138   :  { %v474_v63 = vmul.f32 %v677_v60, %v472_v62  ;;  %vm480_vm3 = vweird.f32 %v677_v60 }
 0x139   :  { %vm481_vm5 = vmor %vm479_vm4, %vm480_vm3 }
 0x13a   :  { %v475_v0 = vmul.f32 %v677_v60, %v474_v63 }
 0x13c   :  { %v476_v1 = vmul.f32 0.5, %v475_v0 }
 0x13e   :  { %v477_v2 = vsub.f32 1.5, %v476_v1 }
 0x140   :  { %v478_v11 = vmul.f32 %v677_v60, %v477_v2 }
 0x142   :  { %v482_v27 = vsel %vm481_vm5, %v677_v60, %v478_v11 }
 0x143   :  { %v483_v4 = vmul.f32 %v482_v27, %v968_v3  ;;  %v484_v14 = vmul.f32 %v482_v27, %v971_v5  ;;  %v485_v15 = vmul.f32 %v482_v27, %v974_v6  ;;  %v486_v16 = vmul.f32 %v482_v27, %v977_v8  ;;  %v675_v3 = vld [vmem:[%s1088_s4] ss:$0 sm:$0xff] }
 0x144   :  { %v487_v20 = vmul.f32 %v482_v27, %v988_v12  ;;  %v488_v7 = vmul.f32 %v482_v27, %v992_v39  ;;  %v489_v21 = vmul.f32 %v482_v27, %v420_v18  ;;  %v490_v13 = vmul.f32 %v482_v27, %v421_v23 }
 0x145   :  { %v491_v25 = vmul.f32 %v482_v27, %v422_v30  ;;  %v492_v26 = vmul.f32 %v482_v27, %v423_v19  ;;  %v493_v31 = vmul.f32 %v482_v27, %v979_v9  ;;  %v494_v33 = vmul.f32 %v482_v27, %v981_v10 }
 0x146   :  { %v495_v5 = vmul.f32 %v482_v27, %v426_v45  ;;  %v500_v6 = vmul.f32 %v674_v29, %v483_v4  ;;  %v501_v34 = vmul.f32 %v674_v29, %v484_v14  ;;  %v502_v8 = vmul.f32 %v674_v29, %v485_v15 }
 0x147   :  { %v503_v35 = vmul.f32 %v674_v29, %v486_v16  ;;  %v504_v12 = vmul.f32 %v674_v29, %v487_v20  ;;  %v505_v36 = vmul.f32 %v674_v29, %v488_v7  ;;  %v506_v23 = vmul.f32 %v674_v29, %v489_v21 }
 0x148   :  { %v517_v39 = vadd.f32 %v675_v3, %v500_v6  ;;  %v518_v18 = vadd.f32 %v675_v3, %v501_v34  ;;  %v519_v30 = vadd.f32 %v675_v3, %v502_v8  ;;  %v507_v19 = vmul.f32 %v674_v29, %v490_v13 }
 0x149   :  { %v520_v37 = vadd.f32 %v675_v3, %v503_v35  ;;  %v508_v9 = vmul.f32 %v674_v29, %v491_v25  ;;  %v521_v38 = vadd.f32 %v675_v3, %v504_v12  ;;  %v509_v10 = vmul.f32 %v674_v29, %v492_v26 }
 0x14a   :  { %678 = vtanh.f32 %v517_v39  ;;  %v522_v24 = vadd.f32 %v675_v3, %v505_v36  ;;  %v510_v40 = vmul.f32 %v674_v29, %v493_v31  ;;  %v523_v42 = vadd.f32 %v675_v3, %v506_v23 }
 0x14b   :  { %680 = vtanh.f32 %v518_v18  ;;  %v511_v43 = vmul.f32 %v674_v29, %v494_v33  ;;  %v524_v44 = vadd.f32 %v675_v3, %v507_v19  ;;  %v512_v45 = vmul.f32 %v674_v29, %v495_v5 }
 0x14c   :  { %682 = vtanh.f32 %v519_v30  ;;  %v525_v28 = vadd.f32 %v675_v3, %v508_v9  ;;  %v526_v46 = vadd.f32 %v675_v3, %v509_v10  ;;  %v527_v48 = vadd.f32 %v675_v3, %v510_v40 }
 0x14d   :  { %684 = vtanh.f32 %v520_v37  ;;  %v528_v49 = vadd.f32 %v675_v3, %v511_v43  ;;  %v529_v52 = vadd.f32 %v675_v3, %v512_v45 }
 0x14e   :  { %686 = vtanh.f32 %v521_v38 }
 0x14f   :  { %688 = vtanh.f32 %v522_v24 }
 0x150   :  { %v679_v47 = vpop.eup %678  ;;  %690 = vtanh.f32 %v523_v42 }
 0x151   :  { %v681_v22 = vpop.eup %680  ;;  %692 = vtanh.f32 %v524_v44  ;;  %543 = vst.msk [vmem:[%s1089_s5] sm:$0xff] %vm380_vm1, %v679_v47 }
 0x152   :  { %v683_v51 = vpop.eup %682  ;;  %694 = vtanh.f32 %v525_v28  ;;  %544 = vst.msk [vmem:[%s1089_s5 + $0x8] sm:$0xff] %vm380_vm1, %v681_v22 }
 0x153   :  { %v685_v53 = vpop.eup %684  ;;  %696 = vtanh.f32 %v526_v46  ;;  %545 = vst.msk [vmem:[%s1089_s5 + $0x10] sm:$0xff] %vm380_vm1, %v683_v51 }
 0x154   :  { %v687_v55 = vpop.eup %686  ;;  %698 = vtanh.f32 %v527_v48  ;;  %546 = vst.msk [vmem:[%s1089_s5 + $0x18] sm:$0xff] %vm380_vm1, %v685_v53 }
 0x155   :  { %v689_v56 = vpop.eup %688  ;;  %700 = vtanh.f32 %v528_v49  ;;  %547 = vst.msk [vmem:[%s1089_s5 + $0x20] sm:$0xff] %vm380_vm1, %v687_v55 }
 0x156   :  { %v691_v32 = vpop.eup %690  ;;  %702 = vtanh.f32 %v529_v52  ;;  %548 = vst.msk [vmem:[%s1089_s5 + $0x28] sm:$0xff] %vm380_vm1, %v689_v56 }
 0x157   :  { %v693_v50 = vpop.eup %692  ;;  %549 = vst.msk [vmem:[%s1089_s5 + $0x30] sm:$0xff] %vm380_vm1, %v691_v32 }
 0x158   :  { %v695_v57 = vpop.eup %694  ;;  %550 = vst.msk [vmem:[%s1089_s5 + $0x38] sm:$0xff] %vm380_vm1, %v693_v50 }
 0x159   :  { %v697_v58 = vpop.eup %696  ;;  %551 = vst.msk [vmem:[%s1089_s5 + $0x40] sm:$0xff] %vm380_vm1, %v695_v57 }
 0x15a   :  { %v699_v59 = vpop.eup %698  ;;  %552 = vst.msk [vmem:[%s1089_s5 + $0x48] sm:$0xff] %vm380_vm1, %v697_v58 }
 0x15b   :  { %v701_v17 = vpop.eup %700  ;;  %553 = vst.msk [vmem:[%s1089_s5 + $0x50] sm:$0xff] %vm380_vm1, %v699_v59 }
 0x15c   :  { %v703_v41 = vpop.eup %702  ;;  %554 = vst.msk [vmem:[%s1089_s5 + $0x58] sm:$0xff] %vm380_vm1, %v701_v17 }
 0x15d   :  { %555 = vst.msk [vmem:[%s1089_s5 + $0x60] sm:$0x3] %vm404_vm2, %v703_v41 }

// kernel: autoencoder_forward.8
= control target key start
LH: loop header
LB: loop body
LE: loop exit
PB: predicated region body
PF: predicated region fallthrough
CT: control target
= control target key end

     0   :  { %s631_s1 = inlined_call_operand.vmem [shape: bf16[256,128], index: 1, kind: input, shape index: {}]   ;;  %s632_s2 = inlined_call_operand.vmem [shape: f32[1,128], index: 2, kind: input, shape index: {}]   ;;  %s633_s0 = inlined_call_operand.vmem [shape: f32[104,256], index: 0, kind: input, shape index: {}]   ;;  %s634_s3 = inlined_call_operand.vmem [shape: f32[104,128], index: 3, kind: output, shape index: {}]  }
   0x1   :  { %v373_v0 = vld [vmem:[%s631_s1 + $0x38] sm:$0xff]  ;;  %v372_v2 = vld [vmem:[%s631_s1 + $0x30] sm:$0xff]  ;;  %v371_v4 = vld [vmem:[%s631_s1 + $0x28] sm:$0xff] }
   0x2   :  { %v381_v1 = vld [vmem:[%s631_s1 + $0x78] sm:$0xff]  ;;  %186 = vmatpush.bf16.msra.mxu0 %v373_v0  ;;  %382 = vmatpush.bf16.msra.mxu2 %v373_v0  ;;  %v380_v3 = vld [vmem:[%s631_s1 + $0x70] sm:$0xff]  ;;  %v379_v5 = vld [vmem:[%s631_s1 + $0x68] sm:$0xff] }
   0x3   :  { %229 = vmatpush.bf16.msra.mxu1 %v381_v1  ;;  %390 = vmatpush.bf16.msra.mxu3 %v381_v1  ;;  %v370_v6 = vld [vmem:[%s631_s1 + $0x20] sm:$0xff]  ;;  %v369_v8 = vld [vmem:[%s631_s1 + $0x18] sm:$0xff]  ;;  %v368_v10 = vld [vmem:[%s631_s1 + $0x10] sm:$0xff] }
   0x4   :  { %v378_v7 = vld [vmem:[%s631_s1 + $0x60] sm:$0xff]  ;;  %v377_v9 = vld [vmem:[%s631_s1 + $0x58] sm:$0xff]  ;;  %v376_v11 = vld [vmem:[%s631_s1 + $0x50] sm:$0xff] }
   0x5   :  { %v367_v12 = vld [vmem:[%s631_s1 + $0x8] sm:$0xff]  ;;  %v366_v14 = vld [vmem:[%s631_s1] sm:$0xff]  ;;  %v16_v17 = vld [vmem:[%s633_s0 + $0x10] sm:$0xff] }
   0x6   :  { %187 = vmatpush.bf16.msra.mxu0 %v372_v2  ;;  %383 = vmatpush.bf16.msra.mxu2 %v372_v2  ;;  %v375_v13 = vld [vmem:[%s631_s1 + $0x48] sm:$0xff]  ;;  %v374_v15 = vld [vmem:[%s631_s1 + $0x40] sm:$0xff]  ;;  %v28_v19 = vld [vmem:[%s633_s0 + $0x70] sm:$0xff] }
   0x7   :  { %230 = vmatpush.bf16.msra.mxu1 %v380_v3  ;;  %391 = vmatpush.bf16.msra.mxu3 %v380_v3  ;;  %v14_v16 = vld [vmem:[%s633_s0] sm:$0xff]  ;;  %v15_v20 = vld [vmem:[%s633_s0 + $0x8] sm:$0xff]  ;;  %v17_v21 = vld [vmem:[%s633_s0 + $0x18] sm:$0xff] }
   0x8   :  { %v26_v18 = vld [vmem:[%s633_s0 + $0x60] sm:$0xff]  ;;  %v31_v22 = vld [vmem:[%s633_s0 + $0x88] sm:$0xff]  ;;  %v33_v23 = vld [vmem:[%s633_s0 + $0x98] sm:$0xff]  ;;  %v40_v24 = vpack.c.bf16 %v16_v17, %v14_v16  ;;  %v41_v26 = vpack.c.bf16 %v17_v21, %v15_v20 }
   0x9   :  { %v46_v25 = vpack.c.bf16 %v28_v19, %v26_v18  ;;  %v49_v27 = vpack.c.bf16 %v33_v23, %v31_v22  ;;  %v18_v28 = vld [vmem:[%s633_s0 + $0x20] sm:$0xff]  ;;  %v20_v29 = vld [vmem:[%s633_s0 + $0x30] sm:$0xff]  ;;  %v19_v32 = vld [vmem:[%s633_s0 + $0x28] sm:$0xff] }
   0xa   :  { %188 = vmatpush.bf16.msra.mxu0 %v371_v4  ;;  %384 = vmatpush.bf16.msra.mxu2 %v371_v4  ;;  %v30_v30 = vld [vmem:[%s633_s0 + $0x80] sm:$0xff]  ;;  %v32_v31 = vld [vmem:[%s633_s0 + $0x90] sm:$0xff]  ;;  %v21_v33 = vld [vmem:[%s633_s0 + $0x38] sm:$0xff]  ;;  %v42_v36 = vpack.c.bf16 %v20_v29, %v18_v28 }
   0xb   :  { %231 = vmatpush.bf16.msra.mxu1 %v379_v5  ;;  %392 = vmatpush.bf16.msra.mxu3 %v379_v5  ;;  %v35_v34 = vld [vmem:[%s633_s0 + $0xa8] sm:$0xff]  ;;  %v37_v35 = vld [vmem:[%s633_s0 + $0xb8] sm:$0xff]  ;;  %v48_v37 = vpack.c.bf16 %v32_v31, %v30_v30  ;;  %v43_v38 = vpack.c.bf16 %v21_v33, %v19_v32  ;;  %v22_v40 = vld [vmem:[%s633_s0 + $0x40] sm:$0xff] }
   0xc   :  { %v51_v39 = vpack.c.bf16 %v37_v35, %v35_v34  ;;  %v24_v41 = vld [vmem:[%s633_s0 + $0x50] sm:$0xff]  ;;  %v34_v42 = vld [vmem:[%s633_s0 + $0xa0] sm:$0xff]  ;;  %v23_v44 = vld [vmem:[%s633_s0 + $0x48] sm:$0xff] }
   0xd   :  { %v36_v43 = vld [vmem:[%s633_s0 + $0xb0] sm:$0xff]  ;;  %v25_v45 = vld [vmem:[%s633_s0 + $0x58] sm:$0xff]  ;;  %v39_v46 = vld [vmem:[%s633_s0 + $0xc8] sm:$0xff]  ;;  %v44_v47 = vpack.c.bf16 %v24_v41, %v22_v40 }
   0xe   :  { %189 = vmatpush.bf16.msra.mxu0 %v370_v6  ;;  %385 = vmatpush.bf16.msra.mxu2 %v370_v6  ;;  %v50_v48 = vpack.c.bf16 %v36_v43, %v34_v42  ;;  %v45_v49 = vpack.c.bf16 %v25_v45, %v23_v44  ;;  %v53_v50 = vpack.c.bf16 %v39_v46, %v39_v46  ;;  %v38_v51 = vld [vmem:[%s633_s0 + $0xc0] sm:$0xff]  ;;  %v27_v52 = vld [vmem:[%s633_s0 + $0x68] sm:$0xff]  ;;  %v29_v53 = vld [vmem:[%s633_s0 + $0x78] sm:$0xff] }
   0xf   :  { %232 = vmatpush.bf16.msra.mxu1 %v378_v7  ;;  %393 = vmatpush.bf16.msra.mxu3 %v378_v7  ;;  %v52_v54 = vpack.c.bf16 %v38_v51, %v38_v51  ;;  %v47_v55 = vpack.c.bf16 %v29_v53, %v27_v52  ;;  %v574_v56 = vld [vmem:[%s632_s2] ss:$0 sm:$0xff] }
  0x12   :  { %190 = vmatpush.bf16.msra.mxu0 %v369_v8  ;;  %386 = vmatpush.bf16.msra.mxu2 %v369_v8 }
  0x13   :  { %233 = vmatpush.bf16.msra.mxu1 %v377_v9  ;;  %394 = vmatpush.bf16.msra.mxu3 %v377_v9 }
  0x16   :  { %191 = vmatpush.bf16.msra.mxu0 %v368_v10  ;;  %387 = vmatpush.bf16.msra.mxu2 %v368_v10 }
  0x17   :  { %234 = vmatpush.bf16.msra.mxu1 %v376_v11  ;;  %395 = vmatpush.bf16.msra.mxu3 %v376_v11 }
  0x1a   :  { %192 = vmatpush.bf16.msra.mxu0 %v367_v12  ;;  %388 = vmatpush.bf16.msra.mxu2 %v367_v12 }
  0x1b   :  { %235 = vmatpush.bf16.msra.mxu1 %v375_v13  ;;  %396 = vmatpush.bf16.msra.mxu3 %v375_v13 }
  0x1e   :  { %193 = vmatpush.bf16.msra.mxu0 %v366_v14  ;;  %389 = vmatpush.bf16.msra.mxu2 %v366_v14 }
  0x1f   :  { %236 = vmatpush.bf16.msra.mxu1 %v374_v15  ;;  %397 = vmatpush.bf16.msra.mxu3 %v374_v15 }
  0x21   :  { %194 = vmatmul.bf16.vlgmr.msra.gmra.mxu0 %v40_v24  ;;  %209 = vmatmul.bf16.vlgmr.msra.gmra.mxu2 %v46_v25 }
  0x22   :  { %237 = vmatmul.bf16.vlgmr.msra.gmra.mxu1 %v41_v26  ;;  %257 = vmatmul.bf16.vlgmr.msra.gmra.mxu3 %v49_v27 }
  0x31   :  { %199 = vmatmul.bf16.gmra.mxu0 %v42_v36  ;;  %214 = vmatmul.bf16.gmra.mxu2 %v48_v37 }
  0x32   :  { %242 = vmatmul.bf16.gmra.mxu1 %v43_v38  ;;  %262 = vmatmul.bf16.gmra.mxu3 %v51_v39 }
  0x41   :  { %204 = vmatmul.bf16.gmra.mxu0 %v44_v47  ;;  %219 = vmatmul.bf16.gmra.mxu2 %v50_v48 }
  0x42   :  { %247 = vmatmul.bf16.gmra.mxu1 %v45_v49  ;;  %267 = vmatmul.bf16.gmra.mxu3 %v53_v50 }
  0x51   :  { %224 = vmatmul.bf16.gmra.mxu2 %v52_v54 }
  0x52   :  { %252 = vmatmul.bf16.gmra.mxu1 %v47_v55 }
  0x9e   :  { %v195_v57 = vpop.f32.mrf.mxu0 }
  0x9f   :  { %v196_v58 = vadd.f32 %v574_v56, %v195_v57  ;;  %v238_v59 = vpop.f32.mrf.mxu1 }
  0xa1   :  { %v239_v60 = vadd.f32 %v238_v59, %v196_v58 }
  0xa3   :  { %399 = vtanh.f32 %v239_v60 }
  0xa4   :  { %v210_v61 = vpop.f32.mrf.mxu2 }
  0xa5   :  { %v258_v62 = vpop.f32.mrf.mxu3  ;;  %v211_v43 = vadd.f32 %v574_v56, %v210_v61 }
  0xa6   :  { %v197_v63 = vpop.f32.mrf.mxu0 }
  0xa7   :  { %v198_v0 = vadd.f32 %v574_v56, %v197_v63  ;;  %v240_v1 = vpop.f32.mrf.mxu1 }
  0xa9   :  { %v400_v2 = vpop.eup %399  ;;  %v241_v3 = vadd.f32 %v240_v1, %v198_v0 }
  0xaa   :  { %285 = vst [vmem:[%s634_s3] sm:$0xff] %v400_v2 }
  0xab   :  { %401 = vtanh.f32 %v241_v3 }
  0xac   :  { %v581_v4 = vpop.f32.mrf.mxu2 }
  0xad   :  { %v260_v5 = vpop.f32.mrf.mxu3  ;;  %v213_v51 = vadd.f32 %v574_v56, %v581_v4 }
  0xae   :  { %v200_v6 = vpop.f32.mrf.mxu0 }
  0xaf   :  { %v201_v7 = vadd.f32 %v574_v56, %v200_v6  ;;  %v243_v8 = vpop.f32.mrf.mxu1 }
  0xb1   :  { %v402_v9 = vpop.eup %401  ;;  %v244_v10 = vadd.f32 %v243_v8, %v201_v7 }
  0xb2   :  { %286 = vst [vmem:[%s634_s3 + $0x8] sm:$0xff] %v402_v9 }
  0xb3   :  { %403 = vtanh.f32 %v244_v10 }
  0xb4   :  { %v215_v11 = vpop.f32.mrf.mxu2 }
  0xb5   :  { %v216_v12 = vadd.f32 %v574_v56, %v215_v11  ;;  %v263_v13 = vpop.f32.mrf.mxu3 }
  0xb6   :  { %v202_v14 = vpop.f32.mrf.mxu0 }
  0xb7   :  { %v259_v15 = vadd.f32 %v258_v62, %v216_v12  ;;  %v203_v16 = vadd.f32 %v574_v56, %v202_v14  ;;  %v245_v17 = vpop.f32.mrf.mxu1 }
  0xb9   :  { %v404_v18 = vpop.eup %403  ;;  %405 = vtanh.f32 %v259_v15  ;;  %v246_v19 = vadd.f32 %v245_v17, %v203_v16 }
  0xba   :  { %287 = vst [vmem:[%s634_s3 + $0x10] sm:$0xff] %v404_v18 }
  0xbb   :  { %407 = vtanh.f32 %v246_v19 }
  0xbc   :  { %v217_v20 = vpop.f32.mrf.mxu2 }
  0xbd   :  { %v218_v21 = vadd.f32 %v574_v56, %v217_v20  ;;  %v265_v22 = vpop.f32.mrf.mxu3 }
  0xbe   :  { %v205_v23 = vpop.f32.mrf.mxu0 }
  0xbf   :  { %v406_v24 = vpop.eup %405  ;;  %v261_v25 = vadd.f32 %v260_v5, %v218_v21  ;;  %v206_v26 = vadd.f32 %v574_v56, %v205_v23  ;;  %v248_v27 = vpop.f32.mrf.mxu1 }
  0xc0   :  { %293 = vst [vmem:[%s634_s3 + $0x40] sm:$0xff] %v406_v24 }
  0xc1   :  { %v408_v28 = vpop.eup %407  ;;  %409 = vtanh.f32 %v261_v25  ;;  %v249_v29 = vadd.f32 %v248_v27, %v206_v26 }
  0xc2   :  { %288 = vst [vmem:[%s634_s3 + $0x18] sm:$0xff] %v408_v28 }
  0xc3   :  { %411 = vtanh.f32 %v249_v29 }
  0xc4   :  { %v220_v30 = vpop.f32.mrf.mxu2 }
  0xc5   :  { %v221_v31 = vadd.f32 %v574_v56, %v220_v30  ;;  %v268_v32 = vpop.f32.mrf.mxu3 }
  0xc6   :  { %v207_v33 = vpop.f32.mrf.mxu0 }
  0xc7   :  { %v410_v34 = vpop.eup %409  ;;  %v264_v35 = vadd.f32 %v263_v13, %v221_v31  ;;  %v208_v36 = vadd.f32 %v574_v56, %v207_v33  ;;  %v250_v37 = vpop.f32.mrf.mxu1 }
  0xc8   :  { %294 = vst [vmem:[%s634_s3 + $0x48] sm:$0xff] %v410_v34 }
  0xc9   :  { %v412_v38 = vpop.eup %411  ;;  %413 = vtanh.f32 %v264_v35  ;;  %v251_v39 = vadd.f32 %v250_v37, %v208_v36 }
  0xca   :  { %289 = vst [vmem:[%s634_s3 + $0x20] sm:$0xff] %v412_v38 }
  0xcb   :  { %415 = vtanh.f32 %v251_v39 }
  0xcc   :  { %v222_v40 = vpop.f32.mrf.mxu2 }
  0xcd   :  { %v223_v41 = vadd.f32 %v574_v56, %v222_v40  ;;  %v270_v42 = vpop.f32.mrf.mxu3 }
  0xcf   :  { %v414_v44 = vpop.eup %413  ;;  %v266_v45 = vadd.f32 %v265_v22, %v223_v41  ;;  %v253_v46 = vpop.f32.mrf.mxu1 }
  0xd0   :  { %295 = vst [vmem:[%s634_s3 + $0x50] sm:$0xff] %v414_v44  ;;  %v254_v47 = vadd.f32 %v253_v46, %v211_v43 }
  0xd1   :  { %v416_v48 = vpop.eup %415  ;;  %417 = vtanh.f32 %v266_v45 }
  0xd2   :  { %290 = vst [vmem:[%s634_s3 + $0x28] sm:$0xff] %v416_v48  ;;  %419 = vtanh.f32 %v254_v47 }
  0xd4   :  { %v225_v49 = vpop.f32.mrf.mxu2 }
  0xd5   :  { %v226_v50 = vadd.f32 %v574_v56, %v225_v49 }
  0xd7   :  { %v418_v52 = vpop.eup %417  ;;  %v269_v53 = vadd.f32 %v268_v32, %v226_v50  ;;  %v255_v54 = vpop.f32.mrf.mxu1 }
  0xd8   :  { %v420_v55 = vpop.eup %419  ;;  %296 = vst [vmem:[%s634_s3 + $0x58] sm:$0xff] %v418_v52  ;;  %v256_v57 = vadd.f32 %v255_v54, %v213_v51 }
  0xd9   :  { %291 = vst [vmem:[%s634_s3 + $0x30] sm:$0xff] %v420_v55  ;;  %421 = vtanh.f32 %v269_v53 }
  0xda   :  { %423 = vtanh.f32 %v256_v57 }
  0xdc   :  { %v227_v58 = vpop.f32.mrf.mxu2 }
  0xdf   :  { %v422_v59 = vpop.eup %421 }
  0xe0   :  { %v424_v60 = vpop.eup %423  ;;  %297 = vst [vmem:[%s634_s3 + $0x60] sm:$0xff] %v422_v59 }
  0xe1   :  { %292 = vst [vmem:[%s634_s3 + $0x38] sm:$0xff] %v424_v60 }

// kernel: autoencoder_forward.9
= control target key start
LH: loop header
LB: loop body
LE: loop exit
PB: predicated region body
PF: predicated region fallthrough
CT: control target
= control target key end

     0   :  { %vm338_vm0 = vcmask 31744   ;;  %s996_s1 = inlined_call_operand.vmem [shape: bf16[128,4], index: 1, kind: input, shape index: {}]   ;;  %s997_s2 = inlined_call_operand.vmem [shape: f32[1,4], index: 2, kind: input, shape index: {}]   ;;  %s998_s0 = inlined_call_operand.vmem [shape: f32[392,128], index: 0, kind: input, shape index: {}]   ;;  %s999_s3 = inlined_call_operand.vmem [shape: f32[392,4], index: 3, kind: output, shape index: {}]  }
   0x1   :  { %v431_v0 = vld [vmem:[%s996_s1 + $0x38] sm:$0xff]  ;;  %v430_v1 = vld [vmem:[%s996_s1 + $0x30] sm:$0xff]  ;;  %v429_v2 = vld [vmem:[%s996_s1 + $0x28] sm:$0xff] }
   0x2   :  { %433 = vmatpush.bf16.msra.mxu2 %v431_v0  ;;  %156 = vmatpush.bf16.msra.mxu0 %v431_v0  ;;  %v428_v3 = vld [vmem:[%s996_s1 + $0x20] sm:$0xff]  ;;  %v427_v4 = vld [vmem:[%s996_s1 + $0x18] sm:$0xff]  ;;  %v426_v5 = vld [vmem:[%s996_s1 + $0x10] sm:$0xff] }
   0x3   :  { %432 = vmatpush.bf16.msra.mxu1 %v431_v0  ;;  %434 = vmatpush.bf16.msra.mxu3 %v431_v0  ;;  %v425_v6 = vld [vmem:[%s996_s1 + $0x8] sm:$0xff]  ;;  %v424_v7 = vld [vmem:[%s996_s1] sm:$0xff]  ;;  %v52_v14 = vld [vmem:[%s998_s0 + $0x130] sm:$0xff] }
   0x4   :  { %v38_v8 = vld [vmem:[%s998_s0 + $0xc0] sm:$0xff]  ;;  %v39_v9 = vld [vmem:[%s998_s0 + $0xc8] sm:$0xff]  ;;  %v53_v15 = vld [vmem:[%s998_s0 + $0x138] sm:$0xff] }
   0x5   :  { %v14_v10 = vld [vmem:[%s998_s0] sm:$0xff]  ;;  %v15_v11 = vld [vmem:[%s998_s0 + $0x8] sm:$0xff]  ;;  %v75_v16 = vpack.c.bf16 %v39_v9, %v38_v8  ;;  %v82_v19 = vpack.c.bf16 %v53_v15, %v52_v14  ;;  %v40_v20 = vld [vmem:[%s998_s0 + $0xd0] sm:$0xff] }
   0x6   :  { %436 = vmatpush.bf16.msra.mxu2 %v430_v1  ;;  %157 = vmatpush.bf16.msra.mxu0 %v430_v1  ;;  %v26_v12 = vld [vmem:[%s998_s0 + $0x60] sm:$0xff]  ;;  %v27_v13 = vld [vmem:[%s998_s0 + $0x68] sm:$0xff]  ;;  %v63_v17 = vpack.c.bf16 %v15_v11, %v14_v10  ;;  %v41_v21 = vld [vmem:[%s998_s0 + $0xd8] sm:$0xff] }
   0x7   :  { %435 = vmatpush.bf16.msra.mxu1 %v430_v1  ;;  %437 = vmatpush.bf16.msra.mxu3 %v430_v1  ;;  %v69_v18 = vpack.c.bf16 %v27_v13, %v26_v12  ;;  %v16_v22 = vld [vmem:[%s998_s0 + $0x10] sm:$0xff]  ;;  %v17_v23 = vld [vmem:[%s998_s0 + $0x18] sm:$0xff]  ;;  %v54_v26 = vld [vmem:[%s998_s0 + $0x140] sm:$0xff]  ;;  %v76_v28 = vpack.c.bf16 %v41_v21, %v40_v20 }
   0x8   :  { %v28_v24 = vld [vmem:[%s998_s0 + $0x70] sm:$0xff]  ;;  %v29_v25 = vld [vmem:[%s998_s0 + $0x78] sm:$0xff]  ;;  %v55_v27 = vld [vmem:[%s998_s0 + $0x148] sm:$0xff]  ;;  %v64_v29 = vpack.c.bf16 %v17_v23, %v16_v22 }
   0x9   :  { %v70_v30 = vpack.c.bf16 %v29_v25, %v28_v24  ;;  %v83_v31 = vpack.c.bf16 %v55_v27, %v54_v26  ;;  %v42_v32 = vld [vmem:[%s998_s0 + $0xe0] sm:$0xff]  ;;  %v43_v33 = vld [vmem:[%s998_s0 + $0xe8] sm:$0xff]  ;;  %v56_v38 = vld [vmem:[%s998_s0 + $0x150] sm:$0xff] }
   0xa   :  { %439 = vmatpush.bf16.msra.mxu2 %v429_v2  ;;  %158 = vmatpush.bf16.msra.mxu0 %v429_v2  ;;  %v18_v34 = vld [vmem:[%s998_s0 + $0x20] sm:$0xff]  ;;  %v19_v35 = vld [vmem:[%s998_s0 + $0x28] sm:$0xff]  ;;  %v57_v39 = vld [vmem:[%s998_s0 + $0x158] sm:$0xff]  ;;  %v77_v40 = vpack.c.bf16 %v43_v33, %v42_v32 }
   0xb   :  { %438 = vmatpush.bf16.msra.mxu1 %v429_v2  ;;  %440 = vmatpush.bf16.msra.mxu3 %v429_v2  ;;  %v30_v36 = vld [vmem:[%s998_s0 + $0x80] sm:$0xff]  ;;  %v31_v37 = vld [vmem:[%s998_s0 + $0x88] sm:$0xff]  ;;  %v65_v41 = vpack.c.bf16 %v19_v35, %v18_v34  ;;  %v84_v43 = vpack.c.bf16 %v57_v39, %v56_v38  ;;  %v44_v44 = vld [vmem:[%s998_s0 + $0xf0] sm:$0xff] }
   0xc   :  { %v71_v42 = vpack.c.bf16 %v31_v37, %v30_v36  ;;  %v45_v45 = vld [vmem:[%s998_s0 + $0xf8] sm:$0xff]  ;;  %v20_v46 = vld [vmem:[%s998_s0 + $0x30] sm:$0xff]  ;;  %v58_v50 = vld [vmem:[%s998_s0 + $0x160] sm:$0xff] }
   0xd   :  { %v21_v47 = vld [vmem:[%s998_s0 + $0x38] sm:$0xff]  ;;  %v32_v48 = vld [vmem:[%s998_s0 + $0x90] sm:$0xff]  ;;  %v59_v51 = vld [vmem:[%s998_s0 + $0x168] sm:$0xff]  ;;  %v78_v52 = vpack.c.bf16 %v45_v45, %v44_v44 }
   0xe   :  { %442 = vmatpush.bf16.msra.mxu2 %v428_v3  ;;  %159 = vmatpush.bf16.msra.mxu0 %v428_v3  ;;  %v33_v49 = vld [vmem:[%s998_s0 + $0x98] sm:$0xff]  ;;  %v66_v53 = vpack.c.bf16 %v21_v47, %v20_v46  ;;  %v85_v55 = vpack.c.bf16 %v59_v51, %v58_v50  ;;  %v46_v56 = vld [vmem:[%s998_s0 + $0x100] sm:$0xff]  ;;  %v47_v57 = vld [vmem:[%s998_s0 + $0x108] sm:$0xff] }
   0xf   :  { %441 = vmatpush.bf16.msra.mxu1 %v428_v3  ;;  %443 = vmatpush.bf16.msra.mxu3 %v428_v3  ;;  %v72_v54 = vpack.c.bf16 %v33_v49, %v32_v48  ;;  %v22_v58 = vld [vmem:[%s998_s0 + $0x40] sm:$0xff]  ;;  %v23_v59 = vld [vmem:[%s998_s0 + $0x48] sm:$0xff]  ;;  %v60_v62 = vld [vmem:[%s998_s0 + $0x170] sm:$0xff]  ;;  %v79_v0 = vpack.c.bf16 %v47_v57, %v46_v56 }
  0x10   :  { %v34_v60 = vld [vmem:[%s998_s0 + $0xa0] sm:$0xff]  ;;  %v35_v61 = vld [vmem:[%s998_s0 + $0xa8] sm:$0xff]  ;;  %v61_v63 = vld [vmem:[%s998_s0 + $0x178] sm:$0xff]  ;;  %v67_v1 = vpack.c.bf16 %v23_v59, %v22_v58 }
  0x11   :  { %v73_v2 = vpack.c.bf16 %v35_v61, %v34_v60  ;;  %v86_v3 = vpack.c.bf16 %v61_v63, %v60_v62  ;;  %v36_v8 = vld [vmem:[%s998_s0 + $0xb0] sm:$0xff]  ;;  %v37_v9 = vld [vmem:[%s998_s0 + $0xb8] sm:$0xff]  ;;  %v62_v10 = vld [vmem:[%s998_s0 + $0x180] sm:$0xff] }
  0x12   :  { %445 = vmatpush.bf16.msra.mxu2 %v427_v4  ;;  %160 = vmatpush.bf16.msra.mxu0 %v427_v4  ;;  %v74_v13 = vpack.c.bf16 %v37_v9, %v36_v8  ;;  %v87_v14 = vpack.c.bf16 %v62_v10, %v62_v10  ;;  %v50_v15 = vld [vmem:[%s998_s0 + $0x120] sm:$0xff] }
  0x13   :  { %444 = vmatpush.bf16.msra.mxu1 %v427_v4  ;;  %446 = vmatpush.bf16.msra.mxu3 %v427_v4  ;;  %v48_v4 = vld [vmem:[%s998_s0 + $0x110] sm:$0xff] }
  0x16   :  { %448 = vmatpush.bf16.msra.mxu2 %v426_v5  ;;  %161 = vmatpush.bf16.msra.mxu0 %v426_v5 }
  0x17   :  { %447 = vmatpush.bf16.msra.mxu1 %v426_v5  ;;  %449 = vmatpush.bf16.msra.mxu3 %v426_v5  ;;  %v49_v5 = vld [vmem:[%s998_s0 + $0x118] sm:$0xff] }
  0x18   :  { %v80_v11 = vpack.c.bf16 %v49_v5, %v48_v4 }
  0x1a   :  { %451 = vmatpush.bf16.msra.mxu2 %v425_v6  ;;  %162 = vmatpush.bf16.msra.mxu0 %v425_v6 }
  0x1b   :  { %450 = vmatpush.bf16.msra.mxu1 %v425_v6  ;;  %452 = vmatpush.bf16.msra.mxu3 %v425_v6  ;;  %v24_v6 = vld [vmem:[%s998_s0 + $0x50] sm:$0xff] }
  0x1e   :  { %454 = vmatpush.bf16.msra.mxu2 %v424_v7  ;;  %163 = vmatpush.bf16.msra.mxu0 %v424_v7 }
  0x1f   :  { %453 = vmatpush.bf16.msra.mxu1 %v424_v7  ;;  %455 = vmatpush.bf16.msra.mxu3 %v424_v7  ;;  %v25_v7 = vld [vmem:[%s998_s0 + $0x58] sm:$0xff] }
  0x20   :  { %v68_v12 = vpack.c.bf16 %v25_v7, %v24_v6 }
  0x21   :  { %224 = vmatmul.bf16.vlgmr.msra.gmra.mxu2 %v75_v16  ;;  %164 = vmatmul.bf16.vlgmr.msra.gmra.mxu0 %v63_v17  ;;  %v51_v16 = vld [vmem:[%s998_s0 + $0x128] sm:$0xff] }
  0x22   :  { %194 = vmatmul.bf16.vlgmr.msra.gmra.mxu1 %v69_v18  ;;  %259 = vmatmul.bf16.vlgmr.msra.gmra.mxu3 %v82_v19  ;;  %v81_v17 = vpack.c.bf16 %v51_v16, %v50_v15  ;;  %v749_v18 = vld [vmem:[%s997_s2] ss:$0 sm:$0xff] }
  0x31   :  { %229 = vmatmul.bf16.gmra.mxu2 %v76_v28  ;;  %169 = vmatmul.bf16.gmra.mxu0 %v64_v29 }
  0x32   :  { %199 = vmatmul.bf16.gmra.mxu1 %v70_v30  ;;  %264 = vmatmul.bf16.gmra.mxu3 %v83_v31 }
  0x41   :  { %234 = vmatmul.bf16.gmra.mxu2 %v77_v40  ;;  %174 = vmatmul.bf16.gmra.mxu0 %v65_v41 }
  0x42   :  { %204 = vmatmul.bf16.gmra.mxu1 %v71_v42  ;;  %269 = vmatmul.bf16.gmra.mxu3 %v84_v43 }
  0x51   :  { %239 = vmatmul.bf16.gmra.mxu2 %v78_v52  ;;  %179 = vmatmul.bf16.gmra.mxu0 %v66_v53 }
  0x52   :  { %209 = vmatmul.bf16.gmra.mxu1 %v72_v54  ;;  %274 = vmatmul.bf16.gmra.mxu3 %v85_v55 }
  0x61   :  { %244 = vmatmul.bf16.gmra.mxu2 %v79_v0  ;;  %184 = vmatmul.bf16.gmra.mxu0 %v67_v1 }
  0x62   :  { %214 = vmatmul.bf16.gmra.mxu1 %v73_v2  ;;  %279 = vmatmul.bf16.gmra.mxu3 %v86_v3 }
  0x71   :  { %249 = vmatmul.bf16.gmra.mxu2 %v80_v11  ;;  %189 = vmatmul.bf16.gmra.mxu0 %v68_v12 }
  0x72   :  { %219 = vmatmul.bf16.gmra.mxu1 %v74_v13  ;;  %284 = vmatmul.bf16.gmra.mxu3 %v87_v14 }
  0x81   :  { %254 = vmatmul.bf16.gmra.mxu2 %v81_v17 }
  0x9e   :  { %v165_v19 = vpop.f32.mrf.mxu0 }
  0x9f   :  { %v166_v20 = vadd.f32 %v749_v18, %v165_v19  ;;  %v195_v21 = vpop.f32.mrf.mxu1 }
  0xa0   :  { %v196_v22 = vadd.f32 %v749_v18, %v195_v21 }
  0xa1   :  { %457 = vtanh.f32 %v166_v20 }
  0xa2   :  { %459 = vtanh.f32 %v196_v22 }
  0xa4   :  { %v225_v23 = vpop.f32.mrf.mxu2 }
  0xa5   :  { %v226_v24 = vadd.f32 %v749_v18, %v225_v23  ;;  %v260_v25 = vpop.f32.mrf.mxu3 }
  0xa6   :  { %v167_v26 = vpop.f32.mrf.mxu0  ;;  %v261_v27 = vadd.f32 %v749_v18, %v260_v25 }
  0xa7   :  { %v458_v28 = vpop.eup %457  ;;  %461 = vtanh.f32 %v226_v24  ;;  %v168_v29 = vadd.f32 %v749_v18, %v167_v26  ;;  %v197_v30 = vpop.f32.mrf.mxu1 }
  0xa8   :  { %v460_v31 = vpop.eup %459  ;;  %339 = vst.msk [vmem:[%s999_s3] sm:$0xff] %vm338_vm0, %v458_v28  ;;  %v198_v32 = vadd.f32 %v749_v18, %v197_v30  ;;  %463 = vtanh.f32 %v261_v27 }
  0xa9   :  { %351 = vst.msk [vmem:[%s999_s3 + $0x60] sm:$0xff] %vm338_vm0, %v460_v31  ;;  %465 = vtanh.f32 %v168_v29 }
  0xaa   :  { %467 = vtanh.f32 %v198_v32 }
  0xac   :  { %v227_v33 = vpop.f32.mrf.mxu2 }
  0xad   :  { %v462_v34 = vpop.eup %461  ;;  %v228_v35 = vadd.f32 %v749_v18, %v227_v33  ;;  %v262_v36 = vpop.f32.mrf.mxu3 }
  0xae   :  { %v464_v37 = vpop.eup %463  ;;  %363 = vst.msk [vmem:[%s999_s3 + $0xc0] sm:$0xff] %vm338_vm0, %v462_v34  ;;  %v170_v38 = vpop.f32.mrf.mxu0  ;;  %v263_v39 = vadd.f32 %v749_v18, %v262_v36 }
  0xaf   :  { %v466_v40 = vpop.eup %465  ;;  %469 = vtanh.f32 %v228_v35  ;;  %377 = vst.msk [vmem:[%s999_s3 + $0x130] sm:$0xff] %vm338_vm0, %v464_v37  ;;  %v171_v41 = vadd.f32 %v749_v18, %v170_v38  ;;  %v200_v42 = vpop.f32.mrf.mxu1 }
  0xb0   :  { %v468_v43 = vpop.eup %467  ;;  %340 = vst.msk [vmem:[%s999_s3 + $0x8] sm:$0xff] %vm338_vm0, %v466_v40  ;;  %v201_v44 = vadd.f32 %v749_v18, %v200_v42  ;;  %471 = vtanh.f32 %v263_v39 }
  0xb1   :  { %352 = vst.msk [vmem:[%s999_s3 + $0x68] sm:$0xff] %vm338_vm0, %v468_v43  ;;  %473 = vtanh.f32 %v171_v41 }
  0xb2   :  { %475 = vtanh.f32 %v201_v44 }
  0xb4   :  { %v230_v45 = vpop.f32.mrf.mxu2 }
  0xb5   :  { %v470_v46 = vpop.eup %469  ;;  %v231_v47 = vadd.f32 %v749_v18, %v230_v45  ;;  %v265_v48 = vpop.f32.mrf.mxu3 }
  0xb6   :  { %v472_v49 = vpop.eup %471  ;;  %364 = vst.msk [vmem:[%s999_s3 + $0xc8] sm:$0xff] %vm338_vm0, %v470_v46  ;;  %v172_v50 = vpop.f32.mrf.mxu0  ;;  %v266_v51 = vadd.f32 %v749_v18, %v265_v48 }
  0xb7   :  { %v474_v52 = vpop.eup %473  ;;  %477 = vtanh.f32 %v231_v47  ;;  %378 = vst.msk [vmem:[%s999_s3 + $0x138] sm:$0xff] %vm338_vm0, %v472_v49  ;;  %v173_v53 = vadd.f32 %v749_v18, %v172_v50  ;;  %v202_v54 = vpop.f32.mrf.mxu1 }
  0xb8   :  { %v476_v55 = vpop.eup %475  ;;  %341 = vst.msk [vmem:[%s999_s3 + $0x10] sm:$0xff] %vm338_vm0, %v474_v52  ;;  %v203_v56 = vadd.f32 %v749_v18, %v202_v54  ;;  %479 = vtanh.f32 %v266_v51 }
  0xb9   :  { %353 = vst.msk [vmem:[%s999_s3 + $0x70] sm:$0xff] %vm338_vm0, %v476_v55  ;;  %481 = vtanh.f32 %v173_v53 }
  0xba   :  { %483 = vtanh.f32 %v203_v56 }
  0xbc   :  { %v232_v57 = vpop.f32.mrf.mxu2 }
  0xbd   :  { %v478_v58 = vpop.eup %477  ;;  %v233_v59 = vadd.f32 %v749_v18, %v232_v57  ;;  %v267_v60 = vpop.f32.mrf.mxu3 }
  0xbe   :  { %v480_v61 = vpop.eup %479  ;;  %365 = vst.msk [vmem:[%s999_s3 + $0xd0] sm:$0xff] %vm338_vm0, %v478_v58  ;;  %v175_v62 = vpop.f32.mrf.mxu0  ;;  %v268_v63 = vadd.f32 %v749_v18, %v267_v60 }
  0xbf   :  { %v482_v0 = vpop.eup %481  ;;  %485 = vtanh.f32 %v233_v59  ;;  %379 = vst.msk [vmem:[%s999_s3 + $0x140] sm:$0xff] %vm338_vm0, %v480_v61  ;;  %v176_v1 = vadd.f32 %v749_v18, %v175_v62  ;;  %v205_v2 = vpop.f32.mrf.mxu1 }
  0xc0   :  { %v484_v3 = vpop.eup %483  ;;  %342 = vst.msk [vmem:[%s999_s3 + $0x18] sm:$0xff] %vm338_vm0, %v482_v0  ;;  %v206_v4 = vadd.f32 %v749_v18, %v205_v2  ;;  %487 = vtanh.f32 %v268_v63 }
  0xc1   :  { %354 = vst.msk [vmem:[%s999_s3 + $0x78] sm:$0xff] %vm338_vm0, %v484_v3  ;;  %489 = vtanh.f32 %v176_v1 }
  0xc2   :  { %491 = vtanh.f32 %v206_v4 }
  0xc4   :  { %v235_v5 = vpop.f32.mrf.mxu2 }
  0xc5   :  { %v486_v6 = vpop.eup %485  ;;  %v236_v7 = vadd.f32 %v749_v18, %v235_v5  ;;  %v270_v8 = vpop.f32.mrf.mxu3 }
  0xc6   :  { %v488_v9 = vpop.eup %487  ;;  %366 = vst.msk [vmem:[%s999_s3 + $0xd8] sm:$0xff] %vm338_vm0, %v486_v6  ;;  %v177_v10 = vpop.f32.mrf.mxu0  ;;  %v271_v11 = vadd.f32 %v749_v18, %v270_v8 }
  0xc7   :  { %v490_v12 = vpop.eup %489  ;;  %493 = vtanh.f32 %v236_v7  ;;  %380 = vst.msk [vmem:[%s999_s3 + $0x148] sm:$0xff] %vm338_vm0, %v488_v9  ;;  %v178_v13 = vadd.f32 %v749_v18, %v177_v10  ;;  %v207_v14 = vpop.f32.mrf.mxu1 }
  0xc8   :  { %v492_v15 = vpop.eup %491  ;;  %343 = vst.msk [vmem:[%s999_s3 + $0x20] sm:$0xff] %vm338_vm0, %v490_v12  ;;  %v208_v16 = vadd.f32 %v749_v18, %v207_v14  ;;  %495 = vtanh.f32 %v271_v11 }
  0xc9   :  { %355 = vst.msk [vmem:[%s999_s3 + $0x80] sm:$0xff] %vm338_vm0, %v492_v15  ;;  %497 = vtanh.f32 %v178_v13 }
  0xca   :  { %499 = vtanh.f32 %v208_v16 }
  0xcc   :  { %v237_v17 = vpop.f32.mrf.mxu2 }
  0xcd   :  { %v494_v19 = vpop.eup %493  ;;  %v238_v20 = vadd.f32 %v749_v18, %v237_v17  ;;  %v272_v21 = vpop.f32.mrf.mxu3 }
  0xce   :  { %v496_v22 = vpop.eup %495  ;;  %367 = vst.msk [vmem:[%s999_s3 + $0xe0] sm:$0xff] %vm338_vm0, %v494_v19  ;;  %v180_v23 = vpop.f32.mrf.mxu0  ;;  %v273_v24 = vadd.f32 %v749_v18, %v272_v21 }
  0xcf   :  { %v498_v25 = vpop.eup %497  ;;  %501 = vtanh.f32 %v238_v20  ;;  %381 = vst.msk [vmem:[%s999_s3 + $0x150] sm:$0xff] %vm338_vm0, %v496_v22  ;;  %v181_v26 = vadd.f32 %v749_v18, %v180_v23  ;;  %v210_v27 = vpop.f32.mrf.mxu1 }
  0xd0   :  { %v500_v28 = vpop.eup %499  ;;  %344 = vst.msk [vmem:[%s999_s3 + $0x28] sm:$0xff] %vm338_vm0, %v498_v25  ;;  %v211_v29 = vadd.f32 %v749_v18, %v210_v27  ;;  %503 = vtanh.f32 %v273_v24 }
  0xd1   :  { %356 = vst.msk [vmem:[%s999_s3 + $0x88] sm:$0xff] %vm338_vm0, %v500_v28  ;;  %505 = vtanh.f32 %v181_v26 }
  0xd2   :  { %507 = vtanh.f32 %v211_v29 }
  0xd4   :  { %v240_v30 = vpop.f32.mrf.mxu2 }
  0xd5   :  { %v502_v31 = vpop.eup %501  ;;  %v241_v32 = vadd.f32 %v749_v18, %v240_v30  ;;  %v275_v33 = vpop.f32.mrf.mxu3 }
  0xd6   :  { %v504_v34 = vpop.eup %503  ;;  %368 = vst.msk [vmem:[%s999_s3 + $0xe8] sm:$0xff] %vm338_vm0, %v502_v31  ;;  %v182_v35 = vpop.f32.mrf.mxu0  ;;  %v276_v36 = vadd.f32 %v749_v18, %v275_v33 }
  0xd7   :  { %v506_v37 = vpop.eup %505  ;;  %509 = vtanh.f32 %v241_v32  ;;  %382 = vst.msk [vmem:[%s999_s3 + $0x158] sm:$0xff] %vm338_vm0, %v504_v34  ;;  %v183_v38 = vadd.f32 %v749_v18, %v182_v35  ;;  %v212_v39 = vpop.f32.mrf.mxu1 }
  0xd8   :  { %v508_v40 = vpop.eup %507  ;;  %345 = vst.msk [vmem:[%s999_s3 + $0x30] sm:$0xff] %vm338_vm0, %v506_v37  ;;  %v213_v41 = vadd.f32 %v749_v18, %v212_v39  ;;  %511 = vtanh.f32 %v276_v36 }
  0xd9   :  { %357 = vst.msk [vmem:[%s999_s3 + $0x90] sm:$0xff] %vm338_vm0, %v508_v40  ;;  %513 = vtanh.f32 %v183_v38 }
  0xda   :  { %515 = vtanh.f32 %v213_v41 }
  0xdc   :  { %v242_v42 = vpop.f32.mrf.mxu2 }
  0xdd   :  { %v510_v43 = vpop.eup %509  ;;  %v243_v44 = vadd.f32 %v749_v18, %v242_v42  ;;  %v277_v45 = vpop.f32.mrf.mxu3 }
  0xde   :  { %v512_v46 = vpop.eup %511  ;;  %369 = vst.msk [vmem:[%s999_s3 + $0xf0] sm:$0xff] %vm338_vm0, %v510_v43  ;;  %v185_v47 = vpop.f32.mrf.mxu0  ;;  %v278_v48 = vadd.f32 %v749_v18, %v277_v45 }
  0xdf   :  { %v514_v49 = vpop.eup %513  ;;  %517 = vtanh.f32 %v243_v44  ;;  %383 = vst.msk [vmem:[%s999_s3 + $0x160] sm:$0xff] %vm338_vm0, %v512_v46  ;;  %v186_v50 = vadd.f32 %v749_v18, %v185_v47  ;;  %v215_v51 = vpop.f32.mrf.mxu1 }
  0xe0   :  { %v516_v52 = vpop.eup %515  ;;  %346 = vst.msk [vmem:[%s999_s3 + $0x38] sm:$0xff] %vm338_vm0, %v514_v49  ;;  %v216_v53 = vadd.f32 %v749_v18, %v215_v51  ;;  %519 = vtanh.f32 %v278_v48 }
  0xe1   :  { %358 = vst.msk [vmem:[%s999_s3 + $0x98] sm:$0xff] %vm338_vm0, %v516_v52  ;;  %521 = vtanh.f32 %v186_v50 }
  0xe2   :  { %523 = vtanh.f32 %v216_v53 }
  0xe4   :  { %v245_v54 = vpop.f32.mrf.mxu2 }
  0xe5   :  { %v518_v55 = vpop.eup %517  ;;  %v246_v56 = vadd.f32 %v749_v18, %v245_v54  ;;  %v280_v57 = vpop.f32.mrf.mxu3 }
  0xe6   :  { %v520_v58 = vpop.eup %519  ;;  %370 = vst.msk [vmem:[%s999_s3 + $0xf8] sm:$0xff] %vm338_vm0, %v518_v55  ;;  %v187_v59 = vpop.f32.mrf.mxu0  ;;  %v281_v60 = vadd.f32 %v749_v18, %v280_v57 }
  0xe7   :  { %v522_v61 = vpop.eup %521  ;;  %525 = vtanh.f32 %v246_v56  ;;  %384 = vst.msk [vmem:[%s999_s3 + $0x168] sm:$0xff] %vm338_vm0, %v520_v58  ;;  %v188_v62 = vadd.f32 %v749_v18, %v187_v59  ;;  %v217_v63 = vpop.f32.mrf.mxu1 }
  0xe8   :  { %v524_v0 = vpop.eup %523  ;;  %347 = vst.msk [vmem:[%s999_s3 + $0x40] sm:$0xff] %vm338_vm0, %v522_v61  ;;  %v218_v1 = vadd.f32 %v749_v18, %v217_v63  ;;  %527 = vtanh.f32 %v281_v60 }
  0xe9   :  { %359 = vst.msk [vmem:[%s999_s3 + $0xa0] sm:$0xff] %vm338_vm0, %v524_v0  ;;  %529 = vtanh.f32 %v188_v62 }
  0xea   :  { %531 = vtanh.f32 %v218_v1 }
  0xec   :  { %v247_v2 = vpop.f32.mrf.mxu2 }
  0xed   :  { %v526_v3 = vpop.eup %525  ;;  %v248_v4 = vadd.f32 %v749_v18, %v247_v2  ;;  %v282_v5 = vpop.f32.mrf.mxu3 }
  0xee   :  { %v528_v6 = vpop.eup %527  ;;  %371 = vst.msk [vmem:[%s999_s3 + $0x100] sm:$0xff] %vm338_vm0, %v526_v3  ;;  %v190_v7 = vpop.f32.mrf.mxu0  ;;  %v283_v8 = vadd.f32 %v749_v18, %v282_v5 }
  0xef   :  { %v530_v9 = vpop.eup %529  ;;  %533 = vtanh.f32 %v248_v4  ;;  %385 = vst.msk [vmem:[%s999_s3 + $0x170] sm:$0xff] %vm338_vm0, %v528_v6  ;;  %v191_v10 = vadd.f32 %v749_v18, %v190_v7  ;;  %v220_v11 = vpop.f32.mrf.mxu1 }
  0xf0   :  { %v532_v12 = vpop.eup %531  ;;  %348 = vst.msk [vmem:[%s999_s3 + $0x48] sm:$0xff] %vm338_vm0, %v530_v9  ;;  %v221_v13 = vadd.f32 %v749_v18, %v220_v11  ;;  %535 = vtanh.f32 %v283_v8 }
  0xf1   :  { %360 = vst.msk [vmem:[%s999_s3 + $0xa8] sm:$0xff] %vm338_vm0, %v532_v12  ;;  %537 = vtanh.f32 %v191_v10 }
  0xf2   :  { %539 = vtanh.f32 %v221_v13 }
  0xf4   :  { %v250_v14 = vpop.f32.mrf.mxu2 }
  0xf5   :  { %v534_v15 = vpop.eup %533  ;;  %v251_v16 = vadd.f32 %v749_v18, %v250_v14  ;;  %v285_v17 = vpop.f32.mrf.mxu3 }
  0xf6   :  { %v536_v19 = vpop.eup %535  ;;  %372 = vst.msk [vmem:[%s999_s3 + $0x108] sm:$0xff] %vm338_vm0, %v534_v15  ;;  %v192_v20 = vpop.f32.mrf.mxu0  ;;  %v286_v21 = vadd.f32 %v749_v18, %v285_v17 }
  0xf7   :  { %v538_v22 = vpop.eup %537  ;;  %541 = vtanh.f32 %v251_v16  ;;  %386 = vst.msk [vmem:[%s999_s3 + $0x178] sm:$0xff] %vm338_vm0, %v536_v19  ;;  %v193_v23 = vadd.f32 %v749_v18, %v192_v20  ;;  %v222_v24 = vpop.f32.mrf.mxu1 }
  0xf8   :  { %v540_v25 = vpop.eup %539  ;;  %349 = vst.msk [vmem:[%s999_s3 + $0x50] sm:$0xff] %vm338_vm0, %v538_v22  ;;  %v223_v26 = vadd.f32 %v749_v18, %v222_v24  ;;  %543 = vtanh.f32 %v286_v21 }
  0xf9   :  { %361 = vst.msk [vmem:[%s999_s3 + $0xb0] sm:$0xff] %vm338_vm0, %v540_v25  ;;  %545 = vtanh.f32 %v193_v23 }
  0xfa   :  { %547 = vtanh.f32 %v223_v26 }
  0xfc   :  { %v252_v27 = vpop.f32.mrf.mxu2 }
  0xfd   :  { %v542_v28 = vpop.eup %541  ;;  %v253_v29 = vadd.f32 %v749_v18, %v252_v27  ;;  %v287_v30 = vpop.f32.mrf.mxu3 }
  0xfe   :  { %v544_v31 = vpop.eup %543  ;;  %373 = vst.msk [vmem:[%s999_s3 + $0x110] sm:$0xff] %vm338_vm0, %v542_v28 }
  0xff   :  { %v546_v32 = vpop.eup %545  ;;  %549 = vtanh.f32 %v253_v29  ;;  %387 = vst.msk [vmem:[%s999_s3 + $0x180] sm:$0xff] %vm338_vm0, %v544_v31 }
 0x100   :  { %v548_v33 = vpop.eup %547  ;;  %350 = vst.msk [vmem:[%s999_s3 + $0x58] sm:$0xff] %vm338_vm0, %v546_v32 }
 0x101   :  { %362 = vst.msk [vmem:[%s999_s3 + $0xb8] sm:$0xff] %vm338_vm0, %v548_v33 }
 0x104   :  { %v255_v34 = vpop.f32.mrf.mxu2 }
 0x105   :  { %v550_v35 = vpop.eup %549  ;;  %v256_v36 = vadd.f32 %v749_v18, %v255_v34 }
 0x106   :  { %374 = vst.msk [vmem:[%s999_s3 + $0x118] sm:$0xff] %vm338_vm0, %v550_v35 }
 0x107   :  { %551 = vtanh.f32 %v256_v36 }
 0x10c   :  { %v257_v37 = vpop.f32.mrf.mxu2 }
 0x10d   :  { %v552_v38 = vpop.eup %551  ;;  %v258_v39 = vadd.f32 %v749_v18, %v257_v37 }
 0x10e   :  { %375 = vst.msk [vmem:[%s999_s3 + $0x120] sm:$0xff] %vm338_vm0, %v552_v38 }
 0x10f   :  { %553 = vtanh.f32 %v258_v39 }
 0x115   :  { %v554_v40 = vpop.eup %553 }
 0x116   :  { %376 = vst.msk [vmem:[%s999_s3 + $0x128] sm:$0xff] %vm338_vm0, %v554_v40 }

// kernel: autoencoder_forward.7
= control target key start
LH: loop header
LB: loop body
LE: loop exit
PB: predicated region body
PF: predicated region fallthrough
CT: control target
= control target key end

     0   :  { %vm2488_vm0 = vcmask 523264   ;;  %vm3254_vm1 = vcmask 1041408   ;;  %vm3250_vm2 = vcmask 556032   ;;  %vm3304_vm3 = vcmask 130048   ;;  %s14474_s1 = inlined_call_operand.vmem [shape: bf16[3136,196], index: 1, kind: input, shape index: {}]   ;;  %s14475_s0 = inlined_call_operand.vmem [shape: f32[2,3136], index: 0, kind: input, shape index: {}]   ;;  %s14476_s2 = inlined_call_operand.vmem [shape: f32[1,196], index: 2, kind: input, shape index: {}]   ;;  %s14477_s3 = inlined_call_operand.vmem [shape: bf16[196,16], index: 3, kind: input, shape index: {}]   ;;  %s14478_s4 = inlined_call_operand.vmem [shape: f32[1,16], index: 4, kind: input, shape index: {}]   ;;  %s14479_s5 = inlined_call_operand.vmem [shape: bf16[16,196], index: 5, kind: input, shape index: {}]   ;;  %s14480_s7 = inlined_call_operand.vmem [shape: bf16[196,3136], index: 7, kind: input, shape index: {}]   ;;  %s14481_s6 = inlined_call_operand.vmem [shape: f32[1,196], index: 6, kind: input, shape index: {}]   ;;  %s14482_s8 = inlined_call_operand.vmem [shape: f32[1,3136], index: 8, kind: input, shape index: {}]   ;;  %s14483_s9 = inlined_call_operand.vmem [shape: f32[2,3136], index: 9, kind: output, shape index: {}]  }
   0x1   :  { %v6187_v0 = vld [vmem:[%s14474_s1 + $0x70] sm:$0xf]  ;;  %v8998_v1 = vld [vmem:[%s14474_s1 + $0x74] sm:$0xf0]  ;;  %v6179_v11 = vld [vmem:[%s14474_s1 + $0x60] sm:$0xf] }
   0x2   :  { %v6251_v2 = vld [vmem:[%s14474_s1 + $0xf0] sm:$0xf]  ;;  %v6188_v3 = vor.u32 %v8998_v1, %v6187_v0  ;;  %v9014_v4 = vld [vmem:[%s14474_s1 + $0xf4] sm:$0xf0]  ;;  %v8996_v13 = vld [vmem:[%s14474_s1 + $0x64] sm:$0xf0] }
   0x3   :  { %v6315_v5 = vld [vmem:[%s14474_s1 + $0x170] sm:$0xf]  ;;  %v9030_v6 = vld [vmem:[%s14474_s1 + $0x174] sm:$0xf0]  ;;  %v6252_v7 = vor.u32 %v9014_v4, %v6251_v2  ;;  %v6243_v14 = vld [vmem:[%s14474_s1 + $0xe0] sm:$0xf]  ;;  %v6180_v16 = vor.u32 %v8996_v13, %v6179_v11 }
   0x4   :  { %v6316_v8 = vor.u32 %v9030_v6, %v6315_v5  ;;  %v6379_v9 = vld [vmem:[%s14474_s1 + $0x1f0] sm:$0xf]  ;;  %v9046_v10 = vld [vmem:[%s14474_s1 + $0x1f4] sm:$0xf0]  ;;  %2492 = vmatpush.bf16.msra.mxu0 %v6188_v3  ;;  %v9012_v15 = vld [vmem:[%s14474_s1 + $0xe4] sm:$0xf0] }
   0x5   :  { %v6380_v12 = vor.u32 %v9046_v10, %v6379_v9  ;;  %2505 = vmatpush.bf16.msra.mxu1 %v6252_v7  ;;  %v6244_v17 = vor.u32 %v9012_v15, %v6243_v14  ;;  %v6307_v18 = vld [vmem:[%s14474_s1 + $0x160] sm:$0xf]  ;;  %v9028_v19 = vld [vmem:[%s14474_s1 + $0x164] sm:$0xf0]  ;;  %v6171_v23 = vld [vmem:[%s14474_s1 + $0x50] sm:$0xf] }
   0x6   :  { %2518 = vmatpush.bf16.msra.mxu2 %v6316_v8  ;;  %v6371_v20 = vld [vmem:[%s14474_s1 + $0x1e0] sm:$0xf]  ;;  %v6308_v21 = vor.u32 %v9028_v19, %v6307_v18  ;;  %v9044_v22 = vld [vmem:[%s14474_s1 + $0x1e4] sm:$0xf0]  ;;  %v8994_v24 = vld [vmem:[%s14474_s1 + $0x54] sm:$0xf0] }
   0x7   :  { %2531 = vmatpush.bf16.msra.mxu3 %v6380_v12  ;;  %v6372_v25 = vor.u32 %v9044_v22, %v6371_v20  ;;  %v6235_v26 = vld [vmem:[%s14474_s1 + $0xd0] sm:$0xf]  ;;  %v9010_v27 = vld [vmem:[%s14474_s1 + $0xd4] sm:$0xf0]  ;;  %v6172_v29 = vor.u32 %v8994_v24, %v6171_v23  ;;  %v6163_v35 = vld [vmem:[%s14474_s1 + $0x40] sm:$0xf] }
   0x8   :  { %v6299_v28 = vld [vmem:[%s14474_s1 + $0x150] sm:$0xf]  ;;  %2493 = vmatpush.bf16.msra.mxu0 %v6180_v16  ;;  %v9026_v30 = vld [vmem:[%s14474_s1 + $0x154] sm:$0xf0]  ;;  %v6236_v33 = vor.u32 %v9010_v27, %v6235_v26  ;;  %v8992_v36 = vld [vmem:[%s14474_s1 + $0x44] sm:$0xf0] }
   0x9   :  { %v6363_v31 = vld [vmem:[%s14474_s1 + $0x1d0] sm:$0xf]  ;;  %v9042_v32 = vld [vmem:[%s14474_s1 + $0x1d4] sm:$0xf0]  ;;  %2506 = vmatpush.bf16.msra.mxu1 %v6244_v17  ;;  %v6300_v34 = vor.u32 %v9026_v30, %v6299_v28  ;;  %v6227_v37 = vld [vmem:[%s14474_s1 + $0xc0] sm:$0xf]  ;;  %v6164_v44 = vor.u32 %v8992_v36, %v6163_v35 }
   0xa   :  { %2519 = vmatpush.bf16.msra.mxu2 %v6308_v21  ;;  %v6364_v38 = vor.u32 %v9042_v32, %v6363_v31  ;;  %v9008_v39 = vld [vmem:[%s14474_s1 + $0xc4] sm:$0xf0]  ;;  %v6291_v40 = vld [vmem:[%s14474_s1 + $0x140] sm:$0xf]  ;;  %v6155_v47 = vld [vmem:[%s14474_s1 + $0x30] sm:$0xf] }
   0xb   :  { %2532 = vmatpush.bf16.msra.mxu3 %v6372_v25  ;;  %v9024_v41 = vld [vmem:[%s14474_s1 + $0x144] sm:$0xf0]  ;;  %v6355_v42 = vld [vmem:[%s14474_s1 + $0x1c0] sm:$0xf]  ;;  %v6228_v45 = vor.u32 %v9008_v39, %v6227_v37  ;;  %v8990_v48 = vld [vmem:[%s14474_s1 + $0x34] sm:$0xf0] }
   0xc   :  { %v9040_v43 = vld [vmem:[%s14474_s1 + $0x1c4] sm:$0xf0]  ;;  %2494 = vmatpush.bf16.msra.mxu0 %v6172_v29  ;;  %v6292_v46 = vor.u32 %v9024_v41, %v6291_v40  ;;  %v6219_v49 = vld [vmem:[%s14474_s1 + $0xb0] sm:$0xf]  ;;  %v9006_v51 = vld [vmem:[%s14474_s1 + $0xb4] sm:$0xf0]  ;;  %v6156_v56 = vor.u32 %v8990_v48, %v6155_v47 }
   0xd   :  { %2507 = vmatpush.bf16.msra.mxu1 %v6236_v33  ;;  %v6356_v50 = vor.u32 %v9040_v43, %v6355_v42  ;;  %v6283_v52 = vld [vmem:[%s14474_s1 + $0x130] sm:$0xf]  ;;  %v9022_v53 = vld [vmem:[%s14474_s1 + $0x134] sm:$0xf0]  ;;  %v6220_v57 = vor.u32 %v9006_v51, %v6219_v49  ;;  %v6147_v59 = vld [vmem:[%s14474_s1 + $0x20] sm:$0xf] }
   0xe   :  { %2520 = vmatpush.bf16.msra.mxu2 %v6300_v34  ;;  %v6347_v54 = vld [vmem:[%s14474_s1 + $0x1b0] sm:$0xf]  ;;  %v9038_v55 = vld [vmem:[%s14474_s1 + $0x1b4] sm:$0xf0]  ;;  %v6284_v58 = vor.u32 %v9022_v53, %v6283_v52  ;;  %v8988_v60 = vld [vmem:[%s14474_s1 + $0x24] sm:$0xf0] }
   0xf   :  { %2533 = vmatpush.bf16.msra.mxu3 %v6364_v38  ;;  %v6211_v61 = vld [vmem:[%s14474_s1 + $0xa0] sm:$0xf]  ;;  %v6348_v62 = vor.u32 %v9038_v55, %v6347_v54  ;;  %v9004_v63 = vld [vmem:[%s14474_s1 + $0xa4] sm:$0xf0]  ;;  %v6148_v4 = vor.u32 %v8988_v60, %v6147_v59  ;;  %v6139_v7 = vld [vmem:[%s14474_s1 + $0x10] sm:$0xf] }
  0x10   :  { %2495 = vmatpush.bf16.msra.mxu0 %v6164_v44  ;;  %v6275_v0 = vld [vmem:[%s14474_s1 + $0x120] sm:$0xf]  ;;  %v9020_v1 = vld [vmem:[%s14474_s1 + $0x124] sm:$0xf0]  ;;  %v6212_v5 = vor.u32 %v9004_v63, %v6211_v61  ;;  %v8986_v8 = vld [vmem:[%s14474_s1 + $0x14] sm:$0xf0] }
  0x11   :  { %2508 = vmatpush.bf16.msra.mxu1 %v6228_v45  ;;  %v6339_v2 = vld [vmem:[%s14474_s1 + $0x1a0] sm:$0xf]  ;;  %v9036_v3 = vld [vmem:[%s14474_s1 + $0x1a4] sm:$0xf0]  ;;  %v6276_v6 = vor.u32 %v9020_v1, %v6275_v0  ;;  %v6203_v9 = vld [vmem:[%s14474_s1 + $0x90] sm:$0xf]  ;;  %v6140_v16 = vor.u32 %v8986_v8, %v6139_v7 }
  0x12   :  { %2521 = vmatpush.bf16.msra.mxu2 %v6292_v46  ;;  %v6340_v10 = vor.u32 %v9036_v3, %v6339_v2  ;;  %v9002_v11 = vld [vmem:[%s14474_s1 + $0x94] sm:$0xf0]  ;;  %v6267_v12 = vld [vmem:[%s14474_s1 + $0x110] sm:$0xf]  ;;  %v6131_v17 = vld [vmem:[%s14474_s1] sm:$0xf] }
  0x13   :  { %2534 = vmatpush.bf16.msra.mxu3 %v6356_v50  ;;  %v9018_v13 = vld [vmem:[%s14474_s1 + $0x114] sm:$0xf0]  ;;  %v6331_v14 = vld [vmem:[%s14474_s1 + $0x190] sm:$0xf]  ;;  %v8984_v18 = vld [vmem:[%s14474_s1 + $0x4] sm:$0xf0]  ;;  %v6204_v19 = vor.u32 %v9002_v11, %v6203_v9 }
  0x14   :  { %2496 = vmatpush.bf16.msra.mxu0 %v6156_v56  ;;  %v9034_v15 = vld [vmem:[%s14474_s1 + $0x194] sm:$0xf0]  ;;  %v6268_v20 = vor.u32 %v9018_v13, %v6267_v12  ;;  %v6195_v21 = vld [vmem:[%s14474_s1 + $0x80] sm:$0xf]  ;;  %v9000_v22 = vld [vmem:[%s14474_s1 + $0x84] sm:$0xf0]  ;;  %v6132_v31 = vor.u32 %v8984_v18, %v6131_v17 }
  0x15   :  { %2509 = vmatpush.bf16.msra.mxu1 %v6220_v57  ;;  %v6259_v23 = vld [vmem:[%s14474_s1 + $0x100] sm:$0xf]  ;;  %v6332_v24 = vor.u32 %v9034_v15, %v6331_v14  ;;  %v9016_v25 = vld [vmem:[%s14474_s1 + $0x104] sm:$0xf0]  ;;  %v6443_v26 = vld [vmem:[%s14474_s1 + $0x270] sm:$0xf]  ;;  %v6196_v35 = vor.u32 %v9000_v22, %v6195_v21 }
  0x16   :  { %2522 = vmatpush.bf16.msra.mxu2 %v6284_v58  ;;  %v9062_v27 = vld [vmem:[%s14474_s1 + $0x274] sm:$0xf0]  ;;  %v6507_v28 = vld [vmem:[%s14474_s1 + $0x2f0] sm:$0xf]  ;;  %v6323_v33 = vld [vmem:[%s14474_s1 + $0x180] sm:$0xf]  ;;  %v6260_v36 = vor.u32 %v9016_v25, %v6259_v23 }
  0x17   :  { %2535 = vmatpush.bf16.msra.mxu3 %v6348_v62  ;;  %v9078_v29 = vld [vmem:[%s14474_s1 + $0x2f4] sm:$0xf0]  ;;  %v6571_v30 = vld [vmem:[%s14474_s1 + $0x370] sm:$0xf]  ;;  %v9032_v34 = vld [vmem:[%s14474_s1 + $0x184] sm:$0xf0]  ;;  %v6444_v39 = vor.u32 %v9062_v27, %v6443_v26 }
  0x18   :  { %2497 = vmatpush.bf16.msra.mxu0 %v6148_v4  ;;  %v9094_v32 = vld [vmem:[%s14474_s1 + $0x374] sm:$0xf0]  ;;  %v6635_v37 = vld [vmem:[%s14474_s1 + $0x3f0] sm:$0xf]  ;;  %v6508_v40 = vor.u32 %v9078_v29, %v6507_v28  ;;  %v6435_v41 = vld [vmem:[%s14474_s1 + $0x260] sm:$0xf]  ;;  %v6324_v43 = vor.u32 %v9032_v34, %v6323_v33 }
  0x19   :  { %2510 = vmatpush.bf16.msra.mxu1 %v6212_v5  ;;  %v9110_v38 = vld [vmem:[%s14474_s1 + $0x3f4] sm:$0xf0]  ;;  %v6572_v42 = vor.u32 %v9094_v32, %v6571_v30  ;;  %v9060_v44 = vld [vmem:[%s14474_s1 + $0x264] sm:$0xf0]  ;;  %v6499_v45 = vld [vmem:[%s14474_s1 + $0x2e0] sm:$0xf] }
  0x1a   :  { %2523 = vmatpush.bf16.msra.mxu2 %v6276_v6  ;;  %v9076_v46 = vld [vmem:[%s14474_s1 + $0x2e4] sm:$0xf0]  ;;  %v6636_v47 = vor.u32 %v9110_v38, %v6635_v37  ;;  %v6563_v48 = vld [vmem:[%s14474_s1 + $0x360] sm:$0xf]  ;;  %v6436_v52 = vor.u32 %v9060_v44, %v6435_v41  ;;  %v6427_v54 = vld [vmem:[%s14474_s1 + $0x250] sm:$0xf] }
  0x1b   :  { %2536 = vmatpush.bf16.msra.mxu3 %v6340_v10  ;;  %v9092_v49 = vld [vmem:[%s14474_s1 + $0x364] sm:$0xf0]  ;;  %v6627_v50 = vld [vmem:[%s14474_s1 + $0x3e0] sm:$0xf]  ;;  %v6500_v53 = vor.u32 %v9076_v46, %v6499_v45  ;;  %v9058_v55 = vld [vmem:[%s14474_s1 + $0x254] sm:$0xf0] }
  0x1c   :  { %2498 = vmatpush.bf16.msra.mxu0 %v6140_v16  ;;  %v9108_v51 = vld [vmem:[%s14474_s1 + $0x3e4] sm:$0xf0]  ;;  %v6564_v56 = vor.u32 %v9092_v49, %v6563_v48  ;;  %v6491_v57 = vld [vmem:[%s14474_s1 + $0x2d0] sm:$0xf]  ;;  %v9074_v58 = vld [vmem:[%s14474_s1 + $0x2d4] sm:$0xf0]  ;;  %v6428_v1 = vor.u32 %v9058_v55, %v6427_v54 }
  0x1d   :  { %2511 = vmatpush.bf16.msra.mxu1 %v6204_v19  ;;  %v33_v59 = vld [vmem:[%s14475_s0] sm:$0xff]  ;;  %v6628_v60 = vor.u32 %v9108_v51, %v6627_v50  ;;  %v6555_v61 = vld [vmem:[%s14474_s1 + $0x350] sm:$0xf]  ;;  %v9090_v62 = vld [vmem:[%s14474_s1 + $0x354] sm:$0xf0]  ;;  %v6492_v2 = vor.u32 %v9074_v58, %v6491_v57  ;;  %vm6092_vm4 = vcmask 1045508  }
  0x1e   :  { %2524 = vmatpush.bf16.msra.mxu2 %v6268_v20  ;;  %47 = vst [vmem:[#allocation1] ss:$4 sm:$0xff] %v33_v59  ;;  %v6619_v63 = vld [vmem:[%s14474_s1 + $0x3d0] sm:$0xf]  ;;  %v9106_v0 = vld [vmem:[%s14474_s1 + $0x3d4] sm:$0xf0]  ;;  %v6556_v5 = vor.u32 %v9090_v62, %v6555_v61 }
  0x1f   :  { %2537 = vmatpush.bf16.msra.mxu3 %v6332_v24  ;;  %v6419_v3 = vld [vmem:[%s14474_s1 + $0x240] sm:$0xf]  ;;  %v9056_v4 = vld [vmem:[%s14474_s1 + $0x244] sm:$0xf0]  ;;  %v6620_v9 = vor.u32 %v9106_v0, %v6619_v63  ;;  %v6411_v13 = vld [vmem:[%s14474_s1 + $0x230] sm:$0xf] }
  0x20   :  { %2499 = vmatpush.bf16.msra.mxu0 %v6132_v31  ;;  %v6483_v6 = vld [vmem:[%s14474_s1 + $0x2c0] sm:$0xf]  ;;  %v9072_v7 = vld [vmem:[%s14474_s1 + $0x2c4] sm:$0xf0]  ;;  %v9054_v14 = vld [vmem:[%s14474_s1 + $0x234] sm:$0xf0]  ;;  %v6420_v17 = vor.u32 %v9056_v4, %v6419_v3 }
  0x21   :  { %2512 = vmatpush.bf16.msra.mxu1 %v6196_v35  ;;  %v6547_v8 = vld [vmem:[%s14474_s1 + $0x340] sm:$0xf]  ;;  %v9088_v10 = vld [vmem:[%s14474_s1 + $0x344] sm:$0xf0]  ;;  %v6475_v15 = vld [vmem:[%s14474_s1 + $0x2b0] sm:$0xf]  ;;  %v6484_v18 = vor.u32 %v9072_v7, %v6483_v6  ;;  %v6412_v34 = vor.u32 %v9054_v14, %v6411_v13 }
  0x22   :  { %2525 = vmatpush.bf16.msra.mxu2 %v6260_v36  ;;  %v6611_v11 = vld [vmem:[%s14474_s1 + $0x3c0] sm:$0xf]  ;;  %v9104_v12 = vld [vmem:[%s14474_s1 + $0x3c4] sm:$0xf0]  ;;  %v9070_v16 = vld [vmem:[%s14474_s1 + $0x2b4] sm:$0xf0]  ;;  %v6548_v22 = vor.u32 %v9088_v10, %v6547_v8 }
  0x23   :  { %2538 = vmatpush.bf16.msra.mxu3 %v6324_v43  ;;  %v6539_v19 = vld [vmem:[%s14474_s1 + $0x330] sm:$0xf]  ;;  %v9086_v20 = vld [vmem:[%s14474_s1 + $0x334] sm:$0xf0]  ;;  %v6612_v25 = vor.u32 %v9104_v12, %v6611_v11  ;;  %v6476_v35 = vor.u32 %v9070_v16, %v6475_v15  ;;  %v6403_v36 = vld [vmem:[%s14474_s1 + $0x220] sm:$0xf] }
  0x24   :  { %2544 = vmatpush.bf16.msrb.mxu0 %v6444_v39  ;;  %v35_v21 = vld [vmem:[%s14475_s0 + $0x10] sm:$0xff]  ;;  %v9102_v31 = vld [vmem:[%s14474_s1 + $0x3b4] sm:$0xf0]  ;;  %v6540_v37 = vor.u32 %v9086_v20, %v6539_v19  ;;  %v9052_v38 = vld [vmem:[%s14474_s1 + $0x224] sm:$0xf0]  ;;  %vm6094_vm5 = vcmask 1043456  }
  0x25   :  { %2557 = vmatpush.bf16.msrb.mxu1 %v6508_v40  ;;  %v52_v23 = vld.sshfl [vmem:[#allocation1 + $0x10] sm:$0xff pattern:$0x73625140]  ;;  %v50_v24 = vld.sshfl [vmem:[#allocation1] sm:$0xff pattern:$0x73625140] }
  0x26   :  { %2570 = vmatpush.bf16.msrb.mxu2 %v6572_v42  ;;  %v10114_v26 = vpack.c.bf16 %v52_v23, %v52_v23  ;;  %v10116_v27 = vpack.c.bf16 %v50_v24, %v50_v24  ;;  %v53_v28 = vld.sshfl [vmem:[#allocation1 + $0x18] sm:$0xff pattern:$0x73625140]  ;;  %v51_v29 = vld.sshfl [vmem:[#allocation1 + $0x8] sm:$0xff pattern:$0x73625140] }
  0x27   :  { %2583 = vmatpush.bf16.msrb.mxu3 %v6636_v47  ;;  %v6603_v30 = vld [vmem:[%s14474_s1 + $0x3b0] sm:$0xf]  ;;  %v10124_v32 = vpack.c.bf16 %v53_v28, %v53_v28  ;;  %58 = vst [vmem:[#allocation1] ss:$4 sm:$0xff] %v35_v21  ;;  %v10126_v33 = vpack.c.bf16 %v51_v29, %v51_v29  ;;  %v6467_v39 = vld [vmem:[%s14474_s1 + $0x2a0] sm:$0xf]  ;;  %v6404_v47 = vor.u32 %v9052_v38, %v6403_v36 }
  0x28   :  { %2545 = vmatpush.bf16.msrb.mxu0 %v6436_v52  ;;  %v9068_v40 = vld [vmem:[%s14474_s1 + $0x2a4] sm:$0xf0]  ;;  %2526 = vmatmul.bf16.vlgmr.msra.gmra.mxu2 %v10114_v26  ;;  %v6604_v41 = vor.u32 %v9102_v31, %v6603_v30  ;;  %v6531_v42 = vld [vmem:[%s14474_s1 + $0x320] sm:$0xf]  ;;  %v6395_v46 = vld [vmem:[%s14474_s1 + $0x210] sm:$0xf] }
  0x29   :  { %2558 = vmatpush.bf16.msrb.mxu1 %v6500_v53  ;;  %2500 = vmatmul.bf16.vlgmr.msra.gmra.mxu0 %v10116_v27  ;;  %v9084_v43 = vld [vmem:[%s14474_s1 + $0x324] sm:$0xf0]  ;;  %v6595_v44 = vld [vmem:[%s14474_s1 + $0x3a0] sm:$0xf]  ;;  %v6468_v48 = vor.u32 %v9068_v40, %v6467_v39  ;;  %v9050_v49 = vld [vmem:[%s14474_s1 + $0x214] sm:$0xf0] }
  0x2a   :  { %2571 = vmatpush.bf16.msrb.mxu2 %v6564_v56  ;;  %2539 = vmatmul.bf16.vlgmr.msra.gmra.mxu3 %v10124_v32  ;;  %v9100_v45 = vld [vmem:[%s14474_s1 + $0x3a4] sm:$0xf0]  ;;  %v6459_v50 = vld [vmem:[%s14474_s1 + $0x290] sm:$0xf]  ;;  %v6532_v52 = vor.u32 %v9084_v43, %v6531_v42  ;;  %v9066_v53 = vld [vmem:[%s14474_s1 + $0x294] sm:$0xf0]  ;;  %v6396_v63 = vor.u32 %v9050_v49, %v6395_v46 }
  0x2b   :  { %2584 = vmatpush.bf16.msrb.mxu3 %v6628_v60  ;;  %2513 = vmatmul.bf16.vlgmr.msra.gmra.mxu1 %v10126_v33  ;;  %v34_v51 = vld [vmem:[%s14475_s0 + $0x8] sm:$0xff]  ;;  %v6523_v54 = vld [vmem:[%s14474_s1 + $0x310] sm:$0xf]  ;;  %v6596_v55 = vor.u32 %v9100_v45, %v6595_v44  ;;  %v9082_v56 = vld [vmem:[%s14474_s1 + $0x314] sm:$0xf0]  ;;  %v6460_v0 = vor.u32 %v9066_v53, %v6459_v50  ;;  %vm6123_vm6 = vcmask 517120  }
  0x2c   :  { %2546 = vmatpush.bf16.msrb.mxu0 %v6428_v1  ;;  %49 = vst [vmem:[#allocation1 + $0x20] ss:$4 sm:$0xff] %v34_v51  ;;  %v6587_v57 = vld [vmem:[%s14474_s1 + $0x390] sm:$0xf]  ;;  %v9098_v58 = vld [vmem:[%s14474_s1 + $0x394] sm:$0xf0] }
  0x2d   :  { %2559 = vmatpush.bf16.msrb.mxu1 %v6492_v2  ;;  %v6387_v59 = vld [vmem:[%s14474_s1 + $0x200] sm:$0xf]  ;;  %v9048_v60 = vld [vmem:[%s14474_s1 + $0x204] sm:$0xf0]  ;;  %v6699_v3 = vld [vmem:[%s14474_s1 + $0x470] sm:$0xf] }
  0x2e   :  { %2572 = vmatpush.bf16.msrb.mxu2 %v6556_v5  ;;  %v6451_v61 = vld [vmem:[%s14474_s1 + $0x280] sm:$0xf]  ;;  %v9064_v62 = vld [vmem:[%s14474_s1 + $0x284] sm:$0xf0]  ;;  %v9126_v4 = vld [vmem:[%s14474_s1 + $0x474] sm:$0xf0]  ;;  %v6524_v5 = vor.u32 %v9082_v56, %v6523_v54  ;;  %v6388_v16 = vor.u32 %v9048_v60, %v6387_v59 }
  0x2f   :  { %2585 = vmatpush.bf16.msrb.mxu3 %v6620_v9  ;;  %v6515_v1 = vld [vmem:[%s14474_s1 + $0x300] sm:$0xf]  ;;  %v9080_v2 = vld [vmem:[%s14474_s1 + $0x304] sm:$0xf0]  ;;  %v6763_v6 = vld [vmem:[%s14474_s1 + $0x4f0] sm:$0xf]  ;;  %v6588_v9 = vor.u32 %v9098_v58, %v6587_v57 }
  0x30   :  { %2547 = vmatpush.bf16.msrb.mxu0 %v6420_v17  ;;  %v9142_v7 = vld [vmem:[%s14474_s1 + $0x4f4] sm:$0xf0]  ;;  %v6827_v8 = vld [vmem:[%s14474_s1 + $0x570] sm:$0xf]  ;;  %v6579_v11 = vld [vmem:[%s14474_s1 + $0x380] sm:$0xf]  ;;  %v6452_v17 = vor.u32 %v9064_v62, %v6451_v61  ;;  %v6516_v21 = vor.u32 %v9080_v2, %v6515_v1 }
  0x31   :  { %2560 = vmatpush.bf16.msrb.mxu1 %v6484_v18  ;;  %v9158_v10 = vld [vmem:[%s14474_s1 + $0x574] sm:$0xf0]  ;;  %v9096_v12 = vld [vmem:[%s14474_s1 + $0x384] sm:$0xf0]  ;;  %v6891_v13 = vld [vmem:[%s14474_s1 + $0x5f0] sm:$0xf] }
  0x32   :  { %2573 = vmatpush.bf16.msrb.mxu2 %v6548_v22  ;;  %v9174_v14 = vld [vmem:[%s14474_s1 + $0x5f4] sm:$0xf0]  ;;  %v6691_v19 = vld [vmem:[%s14474_s1 + $0x460] sm:$0xf]  ;;  %v6700_v22 = vor.u32 %v9126_v4, %v6699_v3  ;;  %v6828_v28 = vor.u32 %v9158_v10, %v6827_v8  ;;  %v9124_v29 = vld [vmem:[%s14474_s1 + $0x464] sm:$0xf0]  ;;  %v6580_v31 = vor.u32 %v9096_v12, %v6579_v11 }
  0x33   :  { %2586 = vmatpush.bf16.msrb.mxu3 %v6612_v25  ;;  %v36_v15 = vld [vmem:[%s14475_s0 + $0x18] sm:$0xff]  ;;  %v56_v18 = vld.sshfl [vmem:[#allocation1 + $0x30] sm:$0xff pattern:$0x73625140]  ;;  %v6764_v25 = vor.u32 %v9142_v7, %v6763_v6  ;;  %v6755_v30 = vld [vmem:[%s14474_s1 + $0x4e0] sm:$0xf]  ;;  %v6892_v38 = vor.u32 %v9174_v14, %v6891_v13  ;;  %v6692_v40 = vor.u32 %v9124_v29, %v6691_v19 }
  0x34   :  { %2548 = vmatpush.bf16.msrb.mxu0 %v6412_v34  ;;  %v54_v20 = vld.sshfl [vmem:[#allocation1 + $0x20] sm:$0xff pattern:$0x73625140]  ;;  %v57_v23 = vld.sshfl [vmem:[#allocation1 + $0x38] sm:$0xff pattern:$0x73625140]  ;;  %v10254_v39 = vpack.c.bf16 %v56_v18, %v56_v18 }
  0x35   :  { %2561 = vmatpush.bf16.msrb.mxu1 %v6476_v35  ;;  %v55_v24 = vld.sshfl [vmem:[#allocation1 + $0x28] sm:$0xff pattern:$0x73625140]  ;;  %v6819_v35 = vld [vmem:[%s14474_s1 + $0x560] sm:$0xf]  ;;  %v10274_v49 = vpack.c.bf16 %v57_v23, %v57_v23 }
  0x36   :  { %2574 = vmatpush.bf16.msrb.mxu2 %v6540_v37  ;;  %59 = vst [vmem:[#allocation1 + $0x20] ss:$4 sm:$0xff] %v36_v15  ;;  %v9140_v34 = vld [vmem:[%s14474_s1 + $0x4e4] sm:$0xf0]  ;;  %v10252_v37 = vpack.c.bf16 %v54_v20, %v54_v20  ;;  %v10262_v43 = vpack.c.bf16 %v55_v24, %v55_v24  ;;  %v6683_v46 = vld [vmem:[%s14474_s1 + $0x450] sm:$0xf] }
  0x37   :  { %2587 = vmatpush.bf16.msrb.mxu3 %v6604_v41  ;;  %v9156_v36 = vld [vmem:[%s14474_s1 + $0x564] sm:$0xf0]  ;;  %v6883_v41 = vld [vmem:[%s14474_s1 + $0x5e0] sm:$0xf]  ;;  %v6756_v44 = vor.u32 %v9140_v34, %v6755_v30  ;;  %v9138_v50 = vld [vmem:[%s14474_s1 + $0x4d4] sm:$0xf0] }
  0x38   :  { %2549 = vmatpush.bf16.msrb.mxu0 %v6404_v47  ;;  %v9172_v42 = vld [vmem:[%s14474_s1 + $0x5e4] sm:$0xf0]  ;;  %v6820_v45 = vor.u32 %v9156_v36, %v6819_v35  ;;  %v9122_v47 = vld [vmem:[%s14474_s1 + $0x454] sm:$0xf0]  ;;  %v6811_v51 = vld [vmem:[%s14474_s1 + $0x550] sm:$0xf] }
  0x39   :  { %2562 = vmatpush.bf16.msrb.mxu1 %v6468_v48  ;;  %v6747_v48 = vld [vmem:[%s14474_s1 + $0x4d0] sm:$0xf]  ;;  %v6884_v53 = vor.u32 %v9172_v42, %v6883_v41  ;;  %v6684_v54 = vor.u32 %v9122_v47, %v6683_v46  ;;  %v9170_v56 = vld [vmem:[%s14474_s1 + $0x5d4] sm:$0xf0]  ;;  %v6675_v59 = vld [vmem:[%s14474_s1 + $0x440] sm:$0xf] }
  0x3a   :  { %2575 = vmatpush.bf16.msrb.mxu2 %v6532_v52  ;;  %v9154_v52 = vld [vmem:[%s14474_s1 + $0x554] sm:$0xf0]  ;;  %v6748_v57 = vor.u32 %v9138_v50, %v6747_v48  ;;  %v9120_v60 = vld [vmem:[%s14474_s1 + $0x444] sm:$0xf0]  ;;  %v6739_v61 = vld [vmem:[%s14474_s1 + $0x4c0] sm:$0xf] }
  0x3b   :  { %2588 = vmatpush.bf16.msrb.mxu3 %v6596_v55  ;;  %v6875_v55 = vld [vmem:[%s14474_s1 + $0x5d0] sm:$0xf]  ;;  %v6812_v58 = vor.u32 %v9154_v52, %v6811_v51  ;;  %v9136_v62 = vld [vmem:[%s14474_s1 + $0x4c4] sm:$0xf0]  ;;  %v6867_v2 = vld [vmem:[%s14474_s1 + $0x5c0] sm:$0xf]  ;;  %v6676_v3 = vor.u32 %v9120_v60, %v6675_v59 }
  0x3c   :  { %2550 = vmatpush.bf16.msrb.mxu0 %v6396_v63  ;;  %v6803_v63 = vld [vmem:[%s14474_s1 + $0x540] sm:$0xf]  ;;  %v6876_v1 = vor.u32 %v9170_v56, %v6875_v55  ;;  %v9168_v4 = vld [vmem:[%s14474_s1 + $0x5c4] sm:$0xf0]  ;;  %v9118_v6 = vld [vmem:[%s14474_s1 + $0x434] sm:$0xf0]  ;;  %v6740_v7 = vor.u32 %v9136_v62, %v6739_v61 }
  0x3d   :  { %2563 = vmatpush.bf16.msrb.mxu1 %v6460_v0  ;;  %v9152_v0 = vld [vmem:[%s14474_s1 + $0x544] sm:$0xf0]  ;;  %v9134_v10 = vld [vmem:[%s14474_s1 + $0x4b4] sm:$0xf0]  ;;  %v6795_v11 = vld [vmem:[%s14474_s1 + $0x530] sm:$0xf]  ;;  %v6868_v15 = vor.u32 %v9168_v4, %v6867_v2 }
  0x3e   :  { %2576 = vmatpush.bf16.msrb.mxu2 %v6524_v5  ;;  %v6667_v5 = vld [vmem:[%s14474_s1 + $0x430] sm:$0xf]  ;;  %v6804_v8 = vor.u32 %v9152_v0, %v6803_v63  ;;  %v9150_v12 = vld [vmem:[%s14474_s1 + $0x534] sm:$0xf0]  ;;  %v6723_v20 = vld [vmem:[%s14474_s1 + $0x4a0] sm:$0xf] }
  0x3f   :  { %2589 = vmatpush.bf16.msrb.mxu3 %v6588_v9  ;;  %v6731_v9 = vld [vmem:[%s14474_s1 + $0x4b0] sm:$0xf]  ;;  %v9166_v14 = vld [vmem:[%s14474_s1 + $0x5b4] sm:$0xf0]  ;;  %v6668_v19 = vor.u32 %v9118_v6, %v6667_v5  ;;  %v37_v23 = vld [vmem:[%s14475_s0 + $0x20] sm:$0xff] }
  0x40   :  { %2551 = vmatpush.bf16.msrb.mxu0 %v6388_v16  ;;  %v6859_v13 = vld [vmem:[%s14474_s1 + $0x5b0] sm:$0xf]  ;;  %v6659_v16 = vld [vmem:[%s14474_s1 + $0x420] sm:$0xf]  ;;  %v6732_v24 = vor.u32 %v9134_v10, %v6731_v9  ;;  %v9130_v46 = vld [vmem:[%s14474_s1 + $0x494] sm:$0xf0] }
  0x41   :  { %2564 = vmatpush.bf16.msrb.mxu1 %v6452_v17  ;;  %v9116_v17 = vld [vmem:[%s14474_s1 + $0x424] sm:$0xf0]  ;;  %v10348_v18 = vld.sshfl [vmem:[#allocation1] sm:$0xff pattern:$0x73625140]  ;;  %v6860_v34 = vor.u32 %v9166_v14, %v6859_v13 }
  0x42   :  { %2577 = vmatpush.bf16.msrb.mxu2 %v6516_v21  ;;  %v9132_v21 = vld [vmem:[%s14474_s1 + $0x4a4] sm:$0xf0]  ;;  %v10363_v29 = vld.sshfl [vmem:[#allocation1 + $0x18] sm:$0xff pattern:$0x73625140]  ;;  %v6660_v35 = vor.u32 %v9116_v17, %v6659_v16 }
  0x43   :  { %2590 = vmatpush.bf16.msrb.mxu3 %v6580_v31  ;;  %2552 = vmatmul.bf16.vlgmr.msrb.gmra.mxu0 %v10252_v37  ;;  %v6787_v30 = vld [vmem:[%s14474_s1 + $0x520] sm:$0xf]  ;;  %v9148_v31 = vld [vmem:[%s14474_s1 + $0x524] sm:$0xf0]  ;;  %v6651_v42 = vld [vmem:[%s14474_s1 + $0x410] sm:$0xf] }
  0x44   :  { %2596 = vmatpush.bf16.msra.mxu0 %v6700_v22  ;;  %2565 = vmatmul.bf16.vlgmr.msrb.gmra.mxu1 %v10262_v43  ;;  %v10356_v22 = vld.sshfl [vmem:[#allocation1 + $0x10] sm:$0xff pattern:$0x73625140]  ;;  %v6851_v36 = vld [vmem:[%s14474_s1 + $0x5a0] sm:$0xf]  ;;  %v6788_v41 = vor.u32 %v9148_v31, %v6787_v30 }
  0x45   :  { %2609 = vmatpush.bf16.msra.mxu1 %v6764_v25  ;;  %2578 = vmatmul.bf16.vlgmr.msrb.gmra.mxu2 %v10254_v39  ;;  %v6796_v25 = vor.u32 %v9150_v12, %v6795_v11  ;;  %v6779_v47 = vld [vmem:[%s14474_s1 + $0x510] sm:$0xf]  ;;  %v9146_v48 = vld [vmem:[%s14474_s1 + $0x514] sm:$0xf0]  ;;  %v9112_v55 = vld [vmem:[%s14474_s1 + $0x404] sm:$0xf0] }
  0x46   :  { %2622 = vmatpush.bf16.msra.mxu2 %v6828_v28  ;;  %2591 = vmatmul.bf16.vlgmr.msrb.gmra.mxu3 %v10274_v49  ;;  %v10361_v28 = vld.sshfl [vmem:[#allocation1 + $0x8] sm:$0xff pattern:$0x73625140]  ;;  %v6843_v51 = vld [vmem:[%s14474_s1 + $0x590] sm:$0xf] }
  0x47   :  { %2635 = vmatpush.bf16.msra.mxu3 %v6892_v38  ;;  %68 = vst [vmem:[#allocation1] ss:$4 sm:$0xff] %v37_v23  ;;  %v9164_v38 = vld [vmem:[%s14474_s1 + $0x5a4] sm:$0xf0]  ;;  %v6771_v60 = vld [vmem:[%s14474_s1 + $0x500] sm:$0xf]  ;;  %v10477_v30 = vpack.c.bf16 %v10361_v28, %v10361_v28 }
  0x48   :  { %2597 = vmatpush.bf16.msra.mxu0 %v6692_v40  ;;  %v6724_v40 = vor.u32 %v9132_v21, %v6723_v20  ;;  %v6852_v50 = vor.u32 %v9164_v38, %v6851_v36  ;;  %v9128_v59 = vld [vmem:[%s14474_s1 + $0x484] sm:$0xf0]  ;;  %v6955_v62 = vld [vmem:[%s14474_s1 + $0x670] sm:$0xf]  ;;  %v9190_v63 = vld [vmem:[%s14474_s1 + $0x674] sm:$0xf0]  ;;  %v10460_v20 = vpack.c.bf16 %v10348_v18, %v10348_v18  ;;  %v10464_v21 = vpack.c.bf16 %v10356_v22, %v10356_v22 }
  0x49   :  { %2610 = vmatpush.bf16.msra.mxu1 %v6756_v44  ;;  %v9114_v44 = vld [vmem:[%s14474_s1 + $0x414] sm:$0xf0]  ;;  %v9144_v61 = vld [vmem:[%s14474_s1 + $0x504] sm:$0xf0]  ;;  %v6835_v6 = vld [vmem:[%s14474_s1 + $0x580] sm:$0xf]  ;;  %v6956_v10 = vor.u32 %v9190_v63, %v6955_v62  ;;  %v10481_v22 = vpack.c.bf16 %v10363_v29, %v10363_v29 }
  0x4a   :  { %2623 = vmatpush.bf16.msra.mxu2 %v6820_v45  ;;  %v6715_v45 = vld [vmem:[%s14474_s1 + $0x490] sm:$0xf]  ;;  %v6652_v52 = vor.u32 %v9114_v44, %v6651_v42  ;;  %v9206_v2 = vld [vmem:[%s14474_s1 + $0x6f4] sm:$0xf0]  ;;  %v6772_v9 = vor.u32 %v9144_v61, %v6771_v60  ;;  %v6947_v16 = vld [vmem:[%s14474_s1 + $0x660] sm:$0xf] }
  0x4b   :  { %2636 = vmatpush.bf16.msra.mxu3 %v6884_v53  ;;  %v9162_v53 = vld [vmem:[%s14474_s1 + $0x594] sm:$0xf0]  ;;  %v6716_v56 = vor.u32 %v9130_v46, %v6715_v45  ;;  %v7147_v12 = vld [vmem:[%s14474_s1 + $0x7f0] sm:$0xf]  ;;  %v9188_v17 = vld [vmem:[%s14474_s1 + $0x664] sm:$0xf0] }
  0x4c   :  { %2598 = vmatpush.bf16.msra.mxu0 %v6684_v54  ;;  %v6643_v54 = vld [vmem:[%s14474_s1 + $0x400] sm:$0xf]  ;;  %v6844_v0 = vor.u32 %v9162_v53, %v6843_v51  ;;  %v9222_v5 = vld [vmem:[%s14474_s1 + $0x774] sm:$0xf0]  ;;  %v9204_v23 = vld [vmem:[%s14474_s1 + $0x6e4] sm:$0xf0]  ;;  %v6948_v31 = vor.u32 %v9188_v17, %v6947_v16 }
  0x4d   :  { %2611 = vmatpush.bf16.msra.mxu1 %v6748_v57  ;;  %v6780_v57 = vor.u32 %v9146_v48, %v6779_v47  ;;  %v6644_v4 = vor.u32 %v9112_v55, %v6643_v54  ;;  %v9238_v13 = vld [vmem:[%s14474_s1 + $0x7f4] sm:$0xf0]  ;;  %v6939_v38 = vld [vmem:[%s14474_s1 + $0x650] sm:$0xf]  ;;  %v6931_v48 = vld [vmem:[%s14474_s1 + $0x640] sm:$0xf] }
  0x4e   :  { %2624 = vmatpush.bf16.msra.mxu2 %v6812_v58  ;;  %v6707_v58 = vld [vmem:[%s14474_s1 + $0x480] sm:$0xf]  ;;  %v7148_v18 = vor.u32 %v9238_v13, %v7147_v12  ;;  %v9186_v29 = vld [vmem:[%s14474_s1 + $0x654] sm:$0xf0]  ;;  %v7067_v42 = vld [vmem:[%s14474_s1 + $0x750] sm:$0xf] }
  0x4f   :  { %2637 = vmatpush.bf16.msra.mxu3 %v6876_v1  ;;  %v7019_v1 = vld [vmem:[%s14474_s1 + $0x6f0] sm:$0xf]  ;;  %v9218_v44 = vld [vmem:[%s14474_s1 + $0x754] sm:$0xf0]  ;;  %v9184_v51 = vld [vmem:[%s14474_s1 + $0x644] sm:$0xf0] }
  0x50   :  { %2599 = vmatpush.bf16.msra.mxu0 %v6676_v3  ;;  %v7083_v3 = vld [vmem:[%s14474_s1 + $0x770] sm:$0xf]  ;;  %v7020_v11 = vor.u32 %v9206_v2, %v7019_v1  ;;  %v9234_v47 = vld [vmem:[%s14474_s1 + $0x7d4] sm:$0xf0]  ;;  %v9200_v53 = vld [vmem:[%s14474_s1 + $0x6c4] sm:$0xf0]  ;;  %v7068_v55 = vor.u32 %v9218_v44, %v7067_v42 }
  0x51   :  { %2612 = vmatpush.bf16.msra.mxu1 %v6740_v7  ;;  %v9160_v7 = vld [vmem:[%s14474_s1 + $0x584] sm:$0xf0]  ;;  %v7084_v14 = vor.u32 %v9222_v5, %v7083_v3  ;;  %v7131_v46 = vld [vmem:[%s14474_s1 + $0x7d0] sm:$0xf]  ;;  %v7123_v1 = vld [vmem:[%s14474_s1 + $0x7c0] sm:$0xf] }
  0x52   :  { %2625 = vmatpush.bf16.msra.mxu2 %v6804_v8  ;;  %v6708_v8 = vor.u32 %v9128_v59, %v6707_v58  ;;  %v9216_v58 = vld [vmem:[%s14474_s1 + $0x744] sm:$0xf0]  ;;  %v10537_v59 = vld.sshfl [vmem:[#allocation1 + $0x30] sm:$0xff pattern:$0x73625140]  ;;  %v7132_v61 = vor.u32 %v9234_v47, %v7131_v46 }
  0x53   :  { %2638 = vmatpush.bf16.msra.mxu3 %v6868_v15  ;;  %v6836_v15 = vor.u32 %v9160_v7, %v6835_v6  ;;  %v38_v60 = vld [vmem:[%s14475_s0 + $0x28] sm:$0xff]  ;;  %v10544_v63 = vld.sshfl [vmem:[#allocation1 + $0x38] sm:$0xff pattern:$0x73625140]  ;;  %v6923_v5 = vld [vmem:[%s14474_s1 + $0x630] sm:$0xf] }
  0x54   :  { %2600 = vmatpush.bf16.msra.mxu0 %v6668_v19  ;;  %v7011_v19 = vld [vmem:[%s14474_s1 + $0x6e0] sm:$0xf]  ;;  %v10542_v62 = vld.sshfl [vmem:[#allocation1 + $0x28] sm:$0xff pattern:$0x73625140] }
  0x55   :  { %2613 = vmatpush.bf16.msra.mxu1 %v6732_v24  ;;  %v7075_v24 = vld [vmem:[%s14474_s1 + $0x760] sm:$0xf]  ;;  %v7012_v36 = vor.u32 %v9204_v23, %v7011_v19  ;;  %v9232_v2 = vld [vmem:[%s14474_s1 + $0x7c4] sm:$0xf0]  ;;  %v9182_v6 = vld [vmem:[%s14474_s1 + $0x634] sm:$0xf0] }
  0x56   :  { %2626 = vmatpush.bf16.msra.mxu2 %v6796_v25  ;;  %v9220_v25 = vld [vmem:[%s14474_s1 + $0x764] sm:$0xf0]  ;;  %v6987_v7 = vld [vmem:[%s14474_s1 + $0x6b0] sm:$0xf]  ;;  %v6924_v12 = vor.u32 %v9182_v6, %v6923_v5  ;;  %v6915_v17 = vld [vmem:[%s14474_s1 + $0x620] sm:$0xf] }
  0x57   :  { %2639 = vmatpush.bf16.msra.mxu3 %v6860_v34  ;;  %v7139_v34 = vld [vmem:[%s14474_s1 + $0x7e0] sm:$0xf]  ;;  %v7076_v28 = vor.u32 %v9220_v25, %v7075_v24  ;;  %v7115_v13 = vld [vmem:[%s14474_s1 + $0x7b0] sm:$0xf]  ;;  %v9180_v19 = vld [vmem:[%s14474_s1 + $0x624] sm:$0xf0] }
  0x58   :  { %2601 = vmatpush.bf16.msra.mxu0 %v6660_v35  ;;  %v9236_v35 = vld [vmem:[%s14474_s1 + $0x7e4] sm:$0xf0]  ;;  %v6979_v23 = vld [vmem:[%s14474_s1 + $0x6a0] sm:$0xf]  ;;  %v9194_v42 = vld [vmem:[%s14474_s1 + $0x694] sm:$0xf0] }
  0x59   :  { %2614 = vmatpush.bf16.msra.mxu1 %v6724_v40  ;;  %v7003_v40 = vld [vmem:[%s14474_s1 + $0x6d0] sm:$0xf]  ;;  %v7140_v45 = vor.u32 %v9236_v35, %v7139_v34  ;;  %v9196_v24 = vld [vmem:[%s14474_s1 + $0x6a4] sm:$0xf0]  ;;  %v7043_v25 = vld [vmem:[%s14474_s1 + $0x720] sm:$0xf]  ;;  %v6916_v34 = vor.u32 %v9180_v19, %v6915_v17 }
  0x5a   :  { %2627 = vmatpush.bf16.msra.mxu2 %v6788_v41  ;;  %v9202_v41 = vld [vmem:[%s14474_s1 + $0x6d4] sm:$0xf0]  ;;  %v7107_v35 = vld [vmem:[%s14474_s1 + $0x7a0] sm:$0xf]  ;;  %v7035_v44 = vld [vmem:[%s14474_s1 + $0x710] sm:$0xf] }
  0x5b   :  { %2640 = vmatpush.bf16.msra.mxu3 %v6852_v50  ;;  %v6940_v50 = vor.u32 %v9186_v29, %v6939_v38  ;;  %v7004_v54 = vor.u32 %v9202_v41, %v7003_v40  ;;  %v6907_v29 = vld [vmem:[%s14474_s1 + $0x610] sm:$0xf]  ;;  %v9178_v40 = vld [vmem:[%s14474_s1 + $0x614] sm:$0xf0] }
  0x5c   :  { %2602 = vmatpush.bf16.msra.mxu0 %v6652_v52  ;;  %v6995_v52 = vld [vmem:[%s14474_s1 + $0x6c0] sm:$0xf]  ;;  %v6971_v41 = vld [vmem:[%s14474_s1 + $0x690] sm:$0xf]  ;;  %v9286_v6 = vld [vmem:[%s14474_s1 + $0x974] sm:$0xf0] }
  0x5d   :  { %2615 = vmatpush.bf16.msra.mxu1 %v6716_v56  ;;  %v7059_v56 = vld [vmem:[%s14474_s1 + $0x740] sm:$0xf]  ;;  %v6996_v3 = vor.u32 %v9200_v53, %v6995_v52  ;;  %v7099_v47 = vld [vmem:[%s14474_s1 + $0x790] sm:$0xf]  ;;  %v9176_v52 = vld [vmem:[%s14474_s1 + $0x604] sm:$0xf0]  ;;  %v6972_v53 = vor.u32 %v9194_v42, %v6971_v41 }
  0x5e   :  { %2628 = vmatpush.bf16.msra.mxu2 %v6780_v57  ;;  %v10532_v57 = vld.sshfl [vmem:[#allocation1 + $0x20] sm:$0xff pattern:$0x73625140]  ;;  %v7259_v41 = vld [vmem:[%s14474_s1 + $0x8d0] sm:$0xf] }
  0x5f   :  { %2641 = vmatpush.bf16.msra.mxu3 %v6844_v0  ;;  %v6932_v0 = vor.u32 %v9184_v51, %v6931_v48  ;;  %69 = vst [vmem:[#allocation1 + $0x20] ss:$4 sm:$0xff] %v38_v60  ;;  %v6908_v48 = vor.u32 %v9178_v40, %v6907_v29  ;;  %v6899_v51 = vld [vmem:[%s14474_s1 + $0x600] sm:$0xf]  ;;  %v9208_v60 = vld [vmem:[%s14474_s1 + $0x704] sm:$0xf0]  ;;  %v10719_v40 = vpack.c.bf16 %v10544_v63, %v10544_v63 }
  0x60   :  { %2603 = vmatpush.bf16.msra.mxu0 %v6644_v4  ;;  %v7060_v4 = vor.u32 %v9216_v58, %v7059_v56  ;;  %v9192_v56 = vld [vmem:[%s14474_s1 + $0x684] sm:$0xf0]  ;;  %v7027_v58 = vld [vmem:[%s14474_s1 + $0x700] sm:$0xf]  ;;  %v6900_v5 = vor.u32 %v9176_v52, %v6899_v51  ;;  %v9250_v29 = vld [vmem:[%s14474_s1 + $0x854] sm:$0xf0] }
  0x61   :  { %2616 = vmatpush.bf16.msra.mxu1 %v6708_v8  ;;  %v9198_v8 = vld [vmem:[%s14474_s1 + $0x6b4] sm:$0xf0] }
  0x62   :  { %2629 = vmatpush.bf16.msra.mxu2 %v6772_v9  ;;  %v7051_v9 = vld [vmem:[%s14474_s1 + $0x730] sm:$0xf]  ;;  %v9266_v42 = vld [vmem:[%s14474_s1 + $0x8d4] sm:$0xf0] }
  0x63   :  { %2642 = vmatpush.bf16.msra.mxu3 %v6836_v15  ;;  %2604 = vmatmul.bf16.vlgmr.msra.gmra.mxu0 %v10460_v20  ;;  %v6988_v15 = vor.u32 %v9198_v8, %v6987_v7  ;;  %v7091_v7 = vld [vmem:[%s14474_s1 + $0x780] sm:$0xf]  ;;  %v9224_v8 = vld [vmem:[%s14474_s1 + $0x784] sm:$0xf0]  ;;  %v9282_v51 = vld [vmem:[%s14474_s1 + $0x954] sm:$0xf0] }
  0x64   :  { %2648 = vmatpush.bf16.msrb.mxu0 %v6956_v10  ;;  %2617 = vmatmul.bf16.vlgmr.msra.gmra.mxu1 %v10477_v30  ;;  %v9214_v10 = vld [vmem:[%s14474_s1 + $0x734] sm:$0xf0]  ;;  %v7092_v19 = vor.u32 %v9224_v8, %v7091_v7  ;;  %v9296_v7 = vld [vmem:[%s14474_s1 + $0x9c4] sm:$0xf0] }
  0x65   :  { %2661 = vmatpush.bf16.msrb.mxu1 %v7020_v11  ;;  %2630 = vmatmul.bf16.vlgmr.msra.gmra.mxu2 %v10464_v21  ;;  %v7124_v11 = vor.u32 %v9232_v2, %v7123_v1  ;;  %v7052_v16 = vor.u32 %v9214_v10, %v7051_v9  ;;  %v7275_v2 = vld [vmem:[%s14474_s1 + $0x8f0] sm:$0xf]  ;;  %v7028_v10 = vor.u32 %v9208_v60, %v7027_v58  ;;  %v10733_v63 = vld.sshfl [vmem:[#allocation1 + $0x18] sm:$0xff pattern:$0x73625140] }
  0x66   :  { %2674 = vmatpush.bf16.msrb.mxu2 %v7084_v14  ;;  %2643 = vmatmul.bf16.vlgmr.msra.gmra.mxu3 %v10481_v22  ;;  %v9230_v14 = vld [vmem:[%s14474_s1 + $0x7b4] sm:$0xf0]  ;;  %v7187_v60 = vld [vmem:[%s14474_s1 + $0x840] sm:$0xf] }
  0x67   :  { %2687 = vmatpush.bf16.msrb.mxu3 %v7148_v18  ;;  %v9212_v18 = vld [vmem:[%s14474_s1 + $0x724] sm:$0xf0] }
  0x68   :  { %2649 = vmatpush.bf16.msrb.mxu0 %v6948_v31  ;;  %v7116_v31 = vor.u32 %v9230_v14, %v7115_v13  ;;  %v7044_v38 = vor.u32 %v9212_v18, %v7043_v25  ;;  %v7403_v13 = vld [vmem:[%s14474_s1 + $0x9f0] sm:$0xf]  ;;  %v9302_v14 = vld [vmem:[%s14474_s1 + $0x9f4] sm:$0xf0]  ;;  %v9268_v25 = vld [vmem:[%s14474_s1 + $0x8e4] sm:$0xf0]  ;;  %v10689_v18 = vpack.c.bf16 %v10532_v57, %v10532_v57 }
  0x69   :  { %2662 = vmatpush.bf16.msrb.mxu1 %v7012_v36  ;;  %v9228_v36 = vld [vmem:[%s14474_s1 + $0x7a4] sm:$0xf0]  ;;  %v7404_v57 = vor.u32 %v9302_v14, %v7403_v13  ;;  %v9262_v13 = vld [vmem:[%s14474_s1 + $0x8b4] sm:$0xf0]  ;;  %v7307_v14 = vld [vmem:[%s14474_s1 + $0x930] sm:$0xf] }
  0x6a   :  { %2675 = vmatpush.bf16.msrb.mxu2 %v7076_v28  ;;  %v6980_v28 = vor.u32 %v9196_v24, %v6979_v23  ;;  %v7108_v46 = vor.u32 %v9228_v36, %v7107_v35  ;;  %v9252_v23 = vld [vmem:[%s14474_s1 + $0x864] sm:$0xf0]  ;;  %v7267_v24 = vld [vmem:[%s14474_s1 + $0x8e0] sm:$0xf] }
  0x6b   :  { %2688 = vmatpush.bf16.msrb.mxu3 %v7140_v45  ;;  %v9210_v45 = vld [vmem:[%s14474_s1 + $0x714] sm:$0xf0]  ;;  %v9284_v35 = vld [vmem:[%s14474_s1 + $0x964] sm:$0xf0]  ;;  %v7395_v36 = vld [vmem:[%s14474_s1 + $0x9e0] sm:$0xf] }
  0x6c   :  { %2650 = vmatpush.bf16.msrb.mxu0 %v6940_v50  ;;  %v9226_v50 = vld [vmem:[%s14474_s1 + $0x794] sm:$0xf0] }
  0x6d   :  { %2663 = vmatpush.bf16.msrb.mxu1 %v7004_v54  ;;  %v7036_v54 = vor.u32 %v9210_v45, %v7035_v44  ;;  %v7100_v1 = vor.u32 %v9226_v50, %v7099_v47  ;;  %v10727_v44 = vld.sshfl [vmem:[#allocation1] sm:$0xff pattern:$0x73625140]  ;;  %v10729_v45 = vld.sshfl [vmem:[#allocation1 + $0x10] sm:$0xff pattern:$0x73625140] }
  0x6e   :  { %2676 = vmatpush.bf16.msrb.mxu2 %v7068_v55  ;;  %v6963_v55 = vld [vmem:[%s14474_s1 + $0x680] sm:$0xf]  ;;  %v7323_v50 = vld [vmem:[%s14474_s1 + $0x950] sm:$0xf] }
  0x6f   :  { %2689 = vmatpush.bf16.msrb.mxu3 %v7132_v61  ;;  %v7211_v61 = vld [vmem:[%s14474_s1 + $0x870] sm:$0xf]  ;;  %v6964_v9 = vor.u32 %v9192_v56, %v6963_v55  ;;  %v9298_v55 = vld [vmem:[%s14474_s1 + $0x9d4] sm:$0xf0]  ;;  %v7260_v56 = vor.u32 %v9266_v42, %v7259_v41  ;;  %v7324_v58 = vor.u32 %v9282_v51, %v7323_v50  ;;  %v7363_v41 = vld [vmem:[%s14474_s1 + $0x9a0] sm:$0xf] }
  0x70   :  { %2651 = vmatpush.bf16.msrb.mxu0 %v6932_v0  ;;  %v9254_v0 = vld [vmem:[%s14474_s1 + $0x874] sm:$0xf0]  ;;  %v9292_v42 = vld [vmem:[%s14474_s1 + $0x9a4] sm:$0xf0]  ;;  %v7163_v50 = vld [vmem:[%s14474_s1 + $0x810] sm:$0xf] }
  0x71   :  { %2664 = vmatpush.bf16.msrb.mxu1 %v6996_v3  ;;  %v9270_v3 = vld [vmem:[%s14474_s1 + $0x8f4] sm:$0xf0] }
  0x72   :  { %2677 = vmatpush.bf16.msrb.mxu2 %v7060_v4  ;;  %v7339_v4 = vld [vmem:[%s14474_s1 + $0x970] sm:$0xf]  ;;  %v9242_v51 = vld [vmem:[%s14474_s1 + $0x814] sm:$0xf0] }
  0x73   :  { %2690 = vmatpush.bf16.msrb.mxu3 %v7124_v11  ;;  %v7212_v11 = vor.u32 %v9254_v0, %v7211_v61  ;;  %v7340_v17 = vor.u32 %v9286_v6, %v7339_v4  ;;  %v9248_v61 = vld [vmem:[%s14474_s1 + $0x844] sm:$0xf0]  ;;  %v7251_v0 = vld [vmem:[%s14474_s1 + $0x8c0] sm:$0xf] }
  0x74   :  { %2652 = vmatpush.bf16.msrb.mxu0 %v6924_v12  ;;  %v7276_v12 = vor.u32 %v9270_v3, %v7275_v2  ;;  %v7315_v2 = vld [vmem:[%s14474_s1 + $0x940] sm:$0xf]  ;;  %v9280_v3 = vld [vmem:[%s14474_s1 + $0x944] sm:$0xf0] }
  0x75   :  { %2665 = vmatpush.bf16.msrb.mxu1 %v6988_v15  ;;  %v7203_v15 = vld [vmem:[%s14474_s1 + $0x860] sm:$0xf] }
  0x76   :  { %2678 = vmatpush.bf16.msrb.mxu2 %v7052_v16  ;;  %v39_v16 = vld [vmem:[%s14475_s0 + $0x30] sm:$0x3]  ;;  %v7379_v6 = vld [vmem:[%s14474_s1 + $0x9c0] sm:$0xf] }
  0x77   :  { %2691 = vmatpush.bf16.msrb.mxu3 %v7116_v31  ;;  %v10693_v31 = vpack.c.bf16 %v10537_v59, %v10537_v59  ;;  %v9300_v59 = vld [vmem:[%s14474_s1 + $0x9e4] sm:$0xf0] }
  0x78   :  { %2653 = vmatpush.bf16.msrb.mxu0 %v6916_v34  ;;  %v7331_v34 = vld [vmem:[%s14474_s1 + $0x960] sm:$0xf]  ;;  %v7396_v52 = vor.u32 %v9300_v59, %v7395_v36 }
  0x79   :  { %2666 = vmatpush.bf16.msrb.mxu1 %v6980_v28  ;;  %v10706_v28 = vpack.c.bf16 %v10542_v62, %v10542_v62  ;;  %v7204_v62 = vor.u32 %v9252_v23, %v7203_v15  ;;  %v7332_v47 = vor.u32 %v9284_v35, %v7331_v34  ;;  %v9278_v15 = vld [vmem:[%s14474_s1 + $0x934] sm:$0xf0]  ;;  %v7171_v34 = vld [vmem:[%s14474_s1 + $0x820] sm:$0xf]  ;;  %v9244_v35 = vld [vmem:[%s14474_s1 + $0x824] sm:$0xf0] }
  0x7a   :  { %2679 = vmatpush.bf16.msrb.mxu2 %v7044_v38  ;;  %v7195_v38 = vld [vmem:[%s14474_s1 + $0x850] sm:$0xf]  ;;  %v9294_v23 = vld [vmem:[%s14474_s1 + $0x9b4] sm:$0xf0]  ;;  %v7235_v36 = vld [vmem:[%s14474_s1 + $0x8a0] sm:$0xf] }
  0x7b   :  { %2692 = vmatpush.bf16.msrb.mxu3 %v7108_v46  ;;  %v7268_v46 = vor.u32 %v9268_v25, %v7267_v24  ;;  %v7308_v25 = vor.u32 %v9278_v15, %v7307_v14  ;;  %v7299_v59 = vld [vmem:[%s14474_s1 + $0x920] sm:$0xf]  ;;  %v9350_v15 = vld [vmem:[%s14474_s1 + $0xb74] sm:$0xf0] }
  0x7c   :  { %2654 = vmatpush.bf16.msrb.mxu0 %v6908_v48  ;;  %v10731_v48 = vld.sshfl [vmem:[#allocation1 + $0x8] sm:$0xff pattern:$0x73625140] }
  0x7d   :  { %2667 = vmatpush.bf16.msrb.mxu1 %v6972_v53  ;;  %78 = vst [vmem:[#allocation1] ss:$4 sm:$0xff] %v39_v16  ;;  %v7196_v53 = vor.u32 %v9250_v29, %v7195_v38  ;;  %v7380_v16 = vor.u32 %v9296_v7, %v7379_v6  ;;  %v9276_v38 = vld [vmem:[%s14474_s1 + $0x924] sm:$0xf0]  ;;  %v7283_v6 = vld [vmem:[%s14474_s1 + $0x900] sm:$0xf] }
  0x7e   :  { %2680 = vmatpush.bf16.msrb.mxu2 %v7036_v54  ;;  %v7387_v54 = vld [vmem:[%s14474_s1 + $0x9d0] sm:$0xf]  ;;  %v9272_v7 = vld [vmem:[%s14474_s1 + $0x904] sm:$0xf0] }
  0x7f   :  { %2693 = vmatpush.bf16.msrb.mxu3 %v7100_v1  ;;  %v9264_v1 = vld [vmem:[%s14474_s1 + $0x8c4] sm:$0xf0]  ;;  %v7388_v4 = vor.u32 %v9298_v55, %v7387_v54  ;;  %v7291_v54 = vld [vmem:[%s14474_s1 + $0x910] sm:$0xf]  ;;  %v9274_v55 = vld [vmem:[%s14474_s1 + $0x914] sm:$0xf0] }
  0x80   :  { %2655 = vmatpush.bf16.msrb.mxu0 %v6900_v5  ;;  %v7188_v5 = vor.u32 %v9248_v61, %v7187_v60  ;;  %v7252_v8 = vor.u32 %v9264_v1, %v7251_v0  ;;  %v7164_v60 = vor.u32 %v9242_v51, %v7163_v50  ;;  %v9290_v61 = vld [vmem:[%s14474_s1 + $0x994] sm:$0xf0]  ;;  %v7155_v0 = vld [vmem:[%s14474_s1 + $0x800] sm:$0xf]  ;;  %v9240_v1 = vld [vmem:[%s14474_s1 + $0x804] sm:$0xf0]  ;;  %v10923_v50 = vpack.c.bf16 %v10731_v48, %v10731_v48 }
  0x81   :  { %2668 = vmatpush.bf16.msrb.mxu1 %v6964_v9  ;;  %v7316_v9 = vor.u32 %v9280_v3, %v7315_v2  ;;  %v7292_v3 = vor.u32 %v9274_v55, %v7291_v54  ;;  %v7156_v14 = vor.u32 %v9240_v1, %v7155_v0  ;;  %v7451_v55 = vld [vmem:[%s14474_s1 + $0xa50] sm:$0xf] }
  0x82   :  { %2681 = vmatpush.bf16.msrb.mxu2 %v7028_v10  ;;  %v7179_v10 = vld [vmem:[%s14474_s1 + $0x830] sm:$0xf] }
  0x83   :  { %2694 = vmatpush.bf16.msrb.mxu3 %v7092_v19  ;;  %2656 = vmatmul.bf16.vlgmr.msrb.gmra.mxu0 %v10689_v18  ;;  %v7371_v19 = vld [vmem:[%s14474_s1 + $0x9b0] sm:$0xf] }
  0x84   :  { %2700 = vmatpush.bf16.msra.mxu0 %v7212_v11  ;;  %2669 = vmatmul.bf16.vlgmr.msrb.gmra.mxu1 %v10706_v28  ;;  %v9246_v11 = vld [vmem:[%s14474_s1 + $0x834] sm:$0xf0]  ;;  %v7372_v29 = vor.u32 %v9294_v23, %v7371_v19  ;;  %v7284_v23 = vor.u32 %v9272_v7, %v7283_v6  ;;  %v7443_v6 = vld [vmem:[%s14474_s1 + $0xa40] sm:$0xf]  ;;  %v9312_v7 = vld [vmem:[%s14474_s1 + $0xa44] sm:$0xf0] }
  0x85   :  { %2713 = vmatpush.bf16.msra.mxu1 %v7276_v12  ;;  %2682 = vmatmul.bf16.vlgmr.msrb.gmra.mxu2 %v10693_v31  ;;  %v7243_v12 = vld [vmem:[%s14474_s1 + $0x8b0] sm:$0xf] }
  0x86   :  { %2726 = vmatpush.bf16.msra.mxu2 %v7340_v17  ;;  %2695 = vmatmul.bf16.vlgmr.msrb.gmra.mxu3 %v10719_v40  ;;  %v7180_v17 = vor.u32 %v9246_v11, %v7179_v10  ;;  %v7244_v24 = vor.u32 %v9262_v13, %v7243_v12  ;;  %v7531_v11 = vld [vmem:[%s14474_s1 + $0xaf0] sm:$0xf]  ;;  %v9334_v12 = vld [vmem:[%s14474_s1 + $0xaf4] sm:$0xf0] }
  0x87   :  { %2739 = vmatpush.bf16.msra.mxu3 %v7404_v57  ;;  %v9260_v57 = vld [vmem:[%s14474_s1 + $0x8a4] sm:$0xf0]  ;;  %v7595_v13 = vld [vmem:[%s14474_s1 + $0xb70] sm:$0xf] }
  0x88   :  { %2701 = vmatpush.bf16.msra.mxu0 %v7204_v62  ;;  %v7172_v62 = vor.u32 %v9244_v35, %v7171_v34  ;;  %v7659_v34 = vld [vmem:[%s14474_s1 + $0xbf0] sm:$0xf]  ;;  %v9366_v35 = vld [vmem:[%s14474_s1 + $0xbf4] sm:$0xf0] }
  0x89   :  { %2714 = vmatpush.bf16.msra.mxu1 %v7268_v46  ;;  %v7236_v46 = vor.u32 %v9260_v57, %v7235_v36  ;;  %v7596_v36 = vor.u32 %v9350_v15, %v7595_v13  ;;  %v7444_v13 = vor.u32 %v9312_v7, %v7443_v6  ;;  %v9360_v15 = vld [vmem:[%s14474_s1 + $0xbc4] sm:$0xf0]  ;;  %v7611_v6 = vld [vmem:[%s14474_s1 + $0xb90] sm:$0xf] }
  0x8a   :  { %2727 = vmatpush.bf16.msra.mxu2 %v7332_v47  ;;  %v7300_v47 = vor.u32 %v9276_v38, %v7299_v59  ;;  %v7459_v59 = vld [vmem:[%s14474_s1 + $0xa60] sm:$0xf]  ;;  %v9316_v38 = vld [vmem:[%s14474_s1 + $0xa64] sm:$0xf0] }
  0x8b   :  { %2740 = vmatpush.bf16.msra.mxu3 %v7396_v52  ;;  %v7227_v52 = vld [vmem:[%s14474_s1 + $0x890] sm:$0xf]  ;;  %v7460_v51 = vor.u32 %v9316_v38, %v7459_v59  ;;  %v9358_v38 = vld [vmem:[%s14474_s1 + $0xbb4] sm:$0xf0] }
  0x8c   :  { %2702 = vmatpush.bf16.msra.mxu0 %v7196_v53  ;;  %v9258_v53 = vld [vmem:[%s14474_s1 + $0x894] sm:$0xf0]  ;;  %v7627_v59 = vld [vmem:[%s14474_s1 + $0xbb0] sm:$0xf] }
  0x8d   :  { %2715 = vmatpush.bf16.msra.mxu1 %v7260_v56  ;;  %v7364_v56 = vor.u32 %v9292_v42, %v7363_v41  ;;  %v7228_v2 = vor.u32 %v9258_v53, %v7227_v52  ;;  %v10910_v41 = vpack.c.bf16 %v10729_v45, %v10729_v45  ;;  %v9332_v42 = vld [vmem:[%s14474_s1 + $0xae4] sm:$0xf0]  ;;  %v10927_v45 = vpack.c.bf16 %v10733_v63, %v10733_v63  ;;  %v7651_v52 = vld [vmem:[%s14474_s1 + $0xbe0] sm:$0xf]  ;;  %v9314_v63 = vld [vmem:[%s14474_s1 + $0xa54] sm:$0xf0] }
  0x8e   :  { %2728 = vmatpush.bf16.msra.mxu2 %v7324_v58  ;;  %v7355_v58 = vld [vmem:[%s14474_s1 + $0x990] sm:$0xf]  ;;  %v9364_v53 = vld [vmem:[%s14474_s1 + $0xbe4] sm:$0xf0]  ;;  %v7452_v1 = vor.u32 %v9314_v63, %v7451_v55  ;;  %v7619_v55 = vld [vmem:[%s14474_s1 + $0xba0] sm:$0xf] }
  0x8f   :  { %2741 = vmatpush.bf16.msra.mxu3 %v7388_v4  ;;  %v7219_v4 = vld [vmem:[%s14474_s1 + $0x880] sm:$0xf]  ;;  %v7356_v10 = vor.u32 %v9290_v61, %v7355_v58  ;;  %v9330_v58 = vld [vmem:[%s14474_s1 + $0xad4] sm:$0xf0]  ;;  %v7652_v0 = vor.u32 %v9364_v53, %v7651_v52  ;;  %v9324_v52 = vld [vmem:[%s14474_s1 + $0xaa4] sm:$0xf0] }
  0x90   :  { %2703 = vmatpush.bf16.msra.mxu0 %v7188_v5  ;;  %v9256_v5 = vld [vmem:[%s14474_s1 + $0x884] sm:$0xf0]  ;;  %v9346_v61 = vld [vmem:[%s14474_s1 + $0xb54] sm:$0xf0]  ;;  %v7555_v53 = vld [vmem:[%s14474_s1 + $0xb20] sm:$0xf] }
  0x91   :  { %2716 = vmatpush.bf16.msra.mxu1 %v7252_v8  ;;  %v7467_v8 = vld [vmem:[%s14474_s1 + $0xa70] sm:$0xf]  ;;  %v7220_v19 = vor.u32 %v9256_v5, %v7219_v4 }
  0x92   :  { %2729 = vmatpush.bf16.msra.mxu2 %v7316_v9  ;;  %v9318_v9 = vld [vmem:[%s14474_s1 + $0xa74] sm:$0xf0] }
  0x93   :  { %2742 = vmatpush.bf16.msra.mxu3 %v7380_v16  ;;  %v7347_v16 = vld [vmem:[%s14474_s1 + $0x980] sm:$0xf] }
  0x94   :  { %2704 = vmatpush.bf16.msra.mxu0 %v7180_v17  ;;  %v9288_v17 = vld [vmem:[%s14474_s1 + $0x984] sm:$0xf0] }
  0x95   :  { %2717 = vmatpush.bf16.msra.mxu1 %v7244_v24  ;;  %v7468_v24 = vor.u32 %v9318_v9, %v7467_v8  ;;  %v7348_v57 = vor.u32 %v9288_v17, %v7347_v16  ;;  %v7507_v8 = vld [vmem:[%s14474_s1 + $0xac0] sm:$0xf]  ;;  %v9328_v9 = vld [vmem:[%s14474_s1 + $0xac4] sm:$0xf0] }
  0x96   :  { %2730 = vmatpush.bf16.msra.mxu2 %v7308_v25  ;;  %v7532_v25 = vor.u32 %v9334_v12, %v7531_v11  ;;  %v9344_v11 = vld [vmem:[%s14474_s1 + $0xb44] sm:$0xf0]  ;;  %v7508_v16 = vor.u32 %v9328_v9, %v7507_v8  ;;  %v9354_v8 = vld [vmem:[%s14474_s1 + $0xb94] sm:$0xf0] }
  0x97   :  { %2743 = vmatpush.bf16.msra.mxu3 %v7372_v29  ;;  %v7523_v29 = vld [vmem:[%s14474_s1 + $0xae0] sm:$0xf] }
  0x98   :  { %2705 = vmatpush.bf16.msra.mxu0 %v7172_v62  ;;  %v10906_v62 = vpack.c.bf16 %v10727_v44, %v10727_v44  ;;  %v7660_v44 = vor.u32 %v9366_v35, %v7659_v34  ;;  %v7524_v54 = vor.u32 %v9332_v42, %v7523_v29  ;;  %v7563_v34 = vld [vmem:[%s14474_s1 + $0xb30] sm:$0xf]  ;;  %v9342_v35 = vld [vmem:[%s14474_s1 + $0xb34] sm:$0xf0]  ;;  %v7427_v29 = vld [vmem:[%s14474_s1 + $0xa20] sm:$0xf] }
  0x99   :  { %2718 = vmatpush.bf16.msra.mxu1 %v7236_v46  ;;  %v7587_v46 = vld [vmem:[%s14474_s1 + $0xb60] sm:$0xf] }
  0x9a   :  { %2731 = vmatpush.bf16.msra.mxu2 %v7300_v47  ;;  %v9348_v47 = vld [vmem:[%s14474_s1 + $0xb64] sm:$0xf0] }
  0x9b   :  { %2744 = vmatpush.bf16.msra.mxu3 %v7364_v56  ;;  %v7588_v48 = vor.u32 %v9348_v47, %v7587_v46  ;;  %v7515_v56 = vld [vmem:[%s14474_s1 + $0xad0] sm:$0xf]  ;;  %v7564_v46 = vor.u32 %v9342_v35, %v7563_v34  ;;  %v9308_v47 = vld [vmem:[%s14474_s1 + $0xa24] sm:$0xf0]  ;;  %v9013_v35 = vld [vmem:[%s14474_s1 + $0xf4] sm:$0xf] }
  0x9c   :  { %2706 = vmatpush.bf16.msra.mxu0 %v7164_v60  ;;  %v7579_v60 = vld [vmem:[%s14474_s1 + $0xb50] sm:$0xf]  ;;  %v7516_v4 = vor.u32 %v9330_v58, %v7515_v56  ;;  %v7428_v63 = vor.u32 %v9308_v47, %v7427_v29  ;;  %v9356_v56 = vld [vmem:[%s14474_s1 + $0xba4] sm:$0xf0] }
  0x9d   :  { %2719 = vmatpush.bf16.msra.mxu1 %v7228_v2  ;;  %v7643_v2 = vld [vmem:[%s14474_s1 + $0xbd0] sm:$0xf]  ;;  %v7580_v5 = vor.u32 %v9346_v61, %v7579_v60  ;;  %v7620_v7 = vor.u32 %v9356_v56, %v7619_v55  ;;  %v9352_v29 = vld [vmem:[%s14474_s1 + $0xb84] sm:$0xf0]  ;;  %v6317_v56 = vld [vmem:[%s14474_s1 + $0x178] sm:$0xf0] }
  0x9e   :  { %2732 = vmatpush.bf16.msra.mxu2 %v7292_v3  ;;  %v9362_v3 = vld [vmem:[%s14474_s1 + $0xbd4] sm:$0xf0]  ;;  %v7419_v58 = vld [vmem:[%s14474_s1 + $0xa10] sm:$0xf] }
  0x9f   :  { %2745 = vmatpush.bf16.msra.mxu3 %v7356_v10  ;;  %v7571_v10 = vld [vmem:[%s14474_s1 + $0xb40] sm:$0xf]  ;;  %v7644_v12 = vor.u32 %v9362_v3, %v7643_v2  ;;  %v7483_v2 = vld [vmem:[%s14474_s1 + $0xa90] sm:$0xf]  ;;  %v9322_v3 = vld [vmem:[%s14474_s1 + $0xa94] sm:$0xf0] }
  0xa0   :  { %2707 = vmatpush.bf16.msra.mxu0 %v7156_v14  ;;  %v7635_v14 = vld [vmem:[%s14474_s1 + $0xbc0] sm:$0xf]  ;;  %v7572_v17 = vor.u32 %v9344_v11, %v7571_v10  ;;  %v9304_v11 = vld [vmem:[%s14474_s1 + $0xa04] sm:$0xf0] }
  0xa1   :  { %2720 = vmatpush.bf16.msra.mxu1 %v7220_v19  ;;  %v7435_v19 = vld [vmem:[%s14474_s1 + $0xa30] sm:$0xf]  ;;  %v7411_v10 = vld [vmem:[%s14474_s1 + $0xa00] sm:$0xf] }
  0xa2   :  { %2733 = vmatpush.bf16.msra.mxu2 %v7284_v23  ;;  %v9310_v23 = vld [vmem:[%s14474_s1 + $0xa34] sm:$0xf0]  ;;  %v75_v47 = vld.sshfl [vmem:[#allocation1 + $0x28] sm:$0xff pattern:$0x73625140] }
  0xa3   :  { %2746 = vmatpush.bf16.msra.mxu3 %v7348_v57  ;;  %2708 = vmatmul.bf16.vlgmr.msra.gmra.mxu0 %v10906_v62  ;;  %v7436_v57 = vor.u32 %v9310_v23, %v7435_v19  ;;  %v9336_v23 = vld [vmem:[%s14474_s1 + $0xb04] sm:$0xf0] }
  0xa4   :  { %2752 = vmatpush.bf16.msrb.mxu0 %v7468_v24  ;;  %2721 = vmatmul.bf16.vlgmr.msra.gmra.mxu1 %v10923_v50  ;;  %v7499_v24 = vld [vmem:[%s14474_s1 + $0xab0] sm:$0xf] }
  0xa5   :  { %2765 = vmatpush.bf16.msrb.mxu1 %v7532_v25  ;;  %2734 = vmatmul.bf16.vlgmr.msra.gmra.mxu2 %v10910_v41  ;;  %v9326_v25 = vld [vmem:[%s14474_s1 + $0xab4] sm:$0xf0] }
  0xa6   :  { %2778 = vmatpush.bf16.msrb.mxu2 %v7596_v36  ;;  %2747 = vmatmul.bf16.vlgmr.msra.gmra.mxu3 %v10927_v45  ;;  %v7636_v36 = vor.u32 %v9360_v15, %v7635_v14  ;;  %v7500_v42 = vor.u32 %v9326_v25, %v7499_v24  ;;  %v2501_v9 = vpop.f32.mrf.mxu0  ;;  %v7475_v14 = vld [vmem:[%s14474_s1 + $0xa80] sm:$0xf]  ;;  %v9320_v15 = vld [vmem:[%s14474_s1 + $0xa84] sm:$0xf0]  ;;  %v7691_v24 = vld [vmem:[%s14474_s1 + $0xc30] sm:$0xf] }
  0xa7   :  { %2791 = vmatpush.bf16.msrb.mxu3 %v7660_v44  ;;  %v7491_v44 = vld [vmem:[%s14474_s1 + $0xaa0] sm:$0xf]  ;;  %v9374_v25 = vld [vmem:[%s14474_s1 + $0xc34] sm:$0xf0] }
  0xa8   :  { %2753 = vmatpush.bf16.msrb.mxu0 %v7460_v51  ;;  %v522_v51 = vld [vmem:[%s14476_s2] sm:$0x3]  ;;  %v7492_v61 = vor.u32 %v9324_v52, %v7491_v44  ;;  %v2514_v34 = vpop.f32.mrf.mxu1  ;;  %v76_v44 = vld.sshfl [vmem:[#allocation1 + $0x30] sm:$0xff pattern:$0x73625140] }
  0xa9   :  { %2766 = vmatpush.bf16.msrb.mxu1 %v7524_v54  ;;  %v9340_v54 = vld [vmem:[%s14474_s1 + $0xb24] sm:$0xf0]  ;;  %v524_v60 = vperm.slane %v522_v51, 0  ;;  %v7476_v51 = vor.u32 %v9320_v15, %v7475_v14 }
  0xaa   :  { %2779 = vmatpush.bf16.msrb.mxu2 %v7588_v48  ;;  %v7628_v48 = vor.u32 %v9358_v38, %v7627_v59  ;;  %v7603_v59 = vld [vmem:[%s14474_s1 + $0xb80] sm:$0xf]  ;;  %v7612_v38 = vor.u32 %v9354_v8, %v7611_v6  ;;  %v11118_v6 = vpack.c.bf16 %v75_v47, %v75_v47  ;;  %v9011_v8 = vld [vmem:[%s14474_s1 + $0xe4] sm:$0xf]  ;;  %v9041_v47 = vld [vmem:[%s14474_s1 + $0x1d4] sm:$0xf] }
  0xab   :  { %2792 = vmatpush.bf16.msrb.mxu3 %v7652_v0  ;;  %v7556_v0 = vor.u32 %v9340_v54, %v7555_v53  ;;  %v77_v53 = vld.sshfl [vmem:[#allocation1 + $0x38] sm:$0xff pattern:$0x73625140]  ;;  %v9029_v54 = vld [vmem:[%s14474_s1 + $0x174] sm:$0xf] }
  0xac   :  { %2754 = vmatpush.bf16.msrb.mxu0 %v7452_v1  ;;  %v9306_v1 = vld [vmem:[%s14474_s1 + $0xa14] sm:$0xf0]  ;;  %v11131_v15 = vpack.c.bf16 %v77_v53, %v77_v53  ;;  %v9368_v53 = vld [vmem:[%s14474_s1 + $0xc04] sm:$0xf0] }
  0xad   :  { %2767 = vmatpush.bf16.msrb.mxu1 %v7516_v4  ;;  %v7547_v4 = vld [vmem:[%s14474_s1 + $0xb10] sm:$0xf] }
  0xae   :  { %2780 = vmatpush.bf16.msrb.mxu2 %v7580_v5  ;;  %v9338_v5 = vld [vmem:[%s14474_s1 + $0xb14] sm:$0xf0] }
  0xaf   :  { %2793 = vmatpush.bf16.msrb.mxu3 %v7644_v12  ;;  %v7420_v12 = vor.u32 %v9306_v1, %v7419_v58  ;;  %v7548_v19 = vor.u32 %v9338_v5, %v7547_v4  ;;  %v9045_v58 = vld [vmem:[%s14474_s1 + $0x1f4] sm:$0xf]  ;;  %v2540_v4 = vpop.f32.mrf.mxu3  ;;  %v2503_v5 = vpop.f32.mrf.mxu0 }
  0xb0   :  { %2755 = vmatpush.bf16.msrb.mxu0 %v7444_v13  ;;  %v2502_v13 = vadd.f32 %v2501_v9, %v524_v60  ;;  %v6381_v60 = vld [vmem:[%s14474_s1 + $0x1f8] sm:$0xf0]  ;;  %v6245_v9 = vld [vmem:[%s14474_s1 + $0xe8] sm:$0xf0]  ;;  %v9039_v5 = vld [vmem:[%s14474_s1 + $0x1c4] sm:$0xf] }
  0xb1   :  { %2768 = vmatpush.bf16.msrb.mxu1 %v7508_v16  ;;  %v7539_v16 = vld [vmem:[%s14474_s1 + $0xb00] sm:$0xf]  ;;  %v6384_v14 = vor.u32 %v9045_v58, %v6381_v60 }
  0xb2   :  { %2781 = vmatpush.bf16.msrb.mxu2 %v7572_v17  ;;  %v7484_v17 = vor.u32 %v9322_v3, %v7483_v2  ;;  %v7540_v52 = vor.u32 %v9336_v23, %v7539_v16  ;;  %v7683_v2 = vld [vmem:[%s14474_s1 + $0xc20] sm:$0xf]  ;;  %v9372_v3 = vld [vmem:[%s14474_s1 + $0xc24] sm:$0xf0]  ;;  %v6373_v23 = vld [vmem:[%s14474_s1 + $0x1e8] sm:$0xf0] }
  0xb3   :  { %2794 = vmatpush.bf16.msrb.mxu3 %v7636_v36  ;;  %v6253_v36 = vld [vmem:[%s14474_s1 + $0xf8] sm:$0xf0]  ;;  %v7684_v16 = vor.u32 %v9372_v3, %v7683_v2 }
  0xb4   :  { %2756 = vmatpush.bf16.msrb.mxu0 %v7436_v57  ;;  %v2515_v57 = vadd.f32 %v2514_v34, %v2502_v13  ;;  %v6256_v55 = vor.u32 %v9013_v35, %v6253_v36  ;;  %v9027_v13 = vld [vmem:[%s14474_s1 + $0x164] sm:$0xf]  ;;  %v9370_v34 = vld [vmem:[%s14474_s1 + $0xc14] sm:$0xf0]  ;;  %v9009_v35 = vld [vmem:[%s14474_s1 + $0xd4] sm:$0xf] }
  0xb5   :  { %2769 = vmatpush.bf16.msrb.mxu1 %v7500_v42  ;;  %v74_v42 = vld.sshfl [vmem:[#allocation1 + $0x20] sm:$0xff pattern:$0x73625140]  ;;  %v6237_v36 = vld [vmem:[%s14474_s1 + $0xd8] sm:$0xf0] }
  0xb6   :  { %2782 = vmatpush.bf16.msrb.mxu2 %v7564_v46  ;;  %v7412_v46 = vor.u32 %v9304_v11, %v7411_v10  ;;  %v2516_v11 = vpop.f32.mrf.mxu1 }
  0xb7   :  { %2795 = vmatpush.bf16.msrb.mxu3 %v7628_v48  ;;  %v7692_v48 = vor.u32 %v9374_v25, %v7691_v24  ;;  %v6248_v24 = vor.u32 %v9011_v8, %v6245_v9  ;;  %v7675_v25 = vld [vmem:[%s14474_s1 + $0xc10] sm:$0xf]  ;;  %v6357_v8 = vld [vmem:[%s14474_s1 + $0x1c8] sm:$0xf0] }
  0xb8   :  { %2757 = vmatpush.bf16.msrb.mxu0 %v7428_v63  ;;  %v2527_v63 = vpop.f32.mrf.mxu2 }
  0xb9   :  { %2770 = vmatpush.bf16.msrb.mxu1 %v7492_v61  ;;  %v7604_v61 = vor.u32 %v9352_v29, %v7603_v59  ;;  %v2528_v1 = vadd.f32 %v2527_v63, %v2515_v57  ;;  %v9025_v59 = vld [vmem:[%s14474_s1 + $0x154] sm:$0xf]  ;;  %v7676_v29 = vor.u32 %v9370_v34, %v7675_v25  ;;  %v6360_v25 = vor.u32 %v9039_v5, %v6357_v8  ;;  %v6285_v34 = vld [vmem:[%s14474_s1 + $0x138] sm:$0xf0]  ;;  %v8991_v5 = vld [vmem:[%s14474_s1 + $0x44] sm:$0xf] }
  0xba   :  { %2783 = vmatpush.bf16.msrb.mxu2 %v7556_v0  ;;  %v11110_v0 = vpack.c.bf16 %v74_v42, %v74_v42  ;;  %v8997_v63 = vld [vmem:[%s14474_s1 + $0x74] sm:$0xf]  ;;  %v6165_v8 = vld [vmem:[%s14474_s1 + $0x48] sm:$0xf0] }
  0xbb   :  { %2796 = vmatpush.bf16.msrb.mxu3 %v7620_v7  ;;  %v11120_v7 = vpack.c.bf16 %v76_v44, %v76_v44  ;;  %v2541_v10 = vadd.f32 %v2540_v4, %v2528_v1  ;;  %v6365_v44 = vld [vmem:[%s14474_s1 + $0x1d8] sm:$0xf0]  ;;  %v6293_v4 = vld [vmem:[%s14474_s1 + $0x148] sm:$0xf0] }
  0xbc   :  { %2758 = vmatpush.bf16.msrb.mxu0 %v7420_v12  ;;  %v6320_v12 = vor.u32 %v9029_v54, %v6317_v56  ;;  %v9007_v54 = vld [vmem:[%s14474_s1 + $0xc4] sm:$0xf]  ;;  %v6189_v56 = vld [vmem:[%s14474_s1 + $0x78] sm:$0xf0]  ;;  %v6368_v1 = vor.u32 %v9041_v47, %v6365_v44  ;;  %v8993_v47 = vld [vmem:[%s14474_s1 + $0x54] sm:$0xf] }
  0xbd   :  { %2771 = vmatpush.bf16.msrb.mxu1 %v7484_v17  ;;  %v6309_v17 = vld [vmem:[%s14474_s1 + $0x168] sm:$0xf0]  ;;  %v6192_v11 = vor.u32 %v8997_v63, %v6189_v56  ;;  %v6173_v44 = vld [vmem:[%s14474_s1 + $0x58] sm:$0xf0]  ;;  %v9035_v63 = vld [vmem:[%s14474_s1 + $0x1a4] sm:$0xf] }
  0xbe   :  { %2784 = vmatpush.bf16.msrb.mxu2 %v7548_v19  ;;  %v9043_v19 = vld [vmem:[%s14474_s1 + $0x1e4] sm:$0xf]  ;;  %v6312_v57 = vor.u32 %v9027_v13, %v6309_v17  ;;  %v6221_v13 = vld [vmem:[%s14474_s1 + $0xb8] sm:$0xf0]  ;;  %v6181_v17 = vld [vmem:[%s14474_s1 + $0x68] sm:$0xf0] }
  0xbf   :  { %2797 = vmatpush.bf16.msrb.mxu3 %v7612_v38  ;;  %v6376_v38 = vor.u32 %v9043_v19, %v6373_v23  ;;  %v79_v19 = vld.sshfl [vmem:[#allocation1] sm:$0xff pattern:$0x73625140]  ;;  %v6341_v56 = vld [vmem:[%s14474_s1 + $0x1a8] sm:$0xf0] }
  0xc0   :  { %2759 = vmatpush.bf16.msrb.mxu0 %v7412_v46  ;;  %v2529_v42 = vpop.f32.mrf.mxu2  ;;  %v6301_v46 = vld [vmem:[%s14474_s1 + $0x158] sm:$0xf0]  ;;  %v2553_v58 = vpop.f32.mrf.mxu0 }
  0xc1   :  { %2772 = vmatpush.bf16.msrb.mxu1 %v7476_v51  ;;  %v6240_v51 = vor.u32 %v9009_v35, %v6237_v36  ;;  %v6304_v60 = vor.u32 %v9025_v59, %v6301_v46  ;;  %v2554_v3 = vadd.f32 %v2553_v58, %v2541_v10  ;;  %v2566_v10 = vpop.f32.mrf.mxu1  ;;  %v9037_v35 = vld [vmem:[%s14474_s1 + $0x1b4] sm:$0xf]  ;;  %v6349_v36 = vld [vmem:[%s14474_s1 + $0x1b8] sm:$0xf0]  ;;  %v6213_v46 = vld [vmem:[%s14474_s1 + $0xa8] sm:$0xf0] }
  0xc2   :  { %2785 = vmatpush.bf16.msrb.mxu2 %v7540_v52  ;;  %v7667_v52 = vld [vmem:[%s14474_s1 + $0xc00] sm:$0xf] }
  0xc3   :  { %2798 = vmatpush.bf16.msrb.mxu3 %v7604_v61  ;;  %2760 = vmatmul.bf16.vlgmr.msrb.gmra.mxu0 %v11110_v0  ;;  %v9023_v61 = vld [vmem:[%s14474_s1 + $0x144] sm:$0xf]  ;;  %v7668_v2 = vor.u32 %v9368_v53, %v7667_v52 }
  0xc4   :  { %2773 = vmatmul.bf16.vlgmr.msrb.gmra.mxu1 %v11118_v6  ;;  %2856 = vmatpush.bf16.msra.mxu0 %v6384_v14  ;;  %v2567_v14 = vadd.f32 %v2566_v10, %v2554_v3  ;;  %v6296_v23 = vor.u32 %v9023_v61, %v6293_v4  ;;  %v9019_v53 = vld [vmem:[%s14474_s1 + $0x124] sm:$0xf]  ;;  %v6176_v61 = vor.u32 %v8993_v47, %v6173_v44  ;;  %v6205_v4 = vld [vmem:[%s14474_s1 + $0x98] sm:$0xf0]  ;;  %v6325_v44 = vld [vmem:[%s14474_s1 + $0x188] sm:$0xf0] }
  0xc5   :  { %2808 = vmatpush.bf16.msra.mxu1 %v7692_v48  ;;  %2786 = vmatmul.bf16.vlgmr.msrb.gmra.mxu2 %v11120_v7  ;;  %v2542_v48 = vpop.f32.mrf.mxu3  ;;  %v6269_v10 = vld [vmem:[%s14474_s1 + $0x118] sm:$0xf0]  ;;  %v9031_v47 = vld [vmem:[%s14474_s1 + $0x184] sm:$0xf] }
  0xc6   :  { %2830 = vmatpush.bf16.msra.mxu2 %v6256_v55  ;;  %2799 = vmatmul.bf16.vlgmr.msrb.gmra.mxu3 %v11131_v15  ;;  %v6229_v55 = vld [vmem:[%s14474_s1 + $0xc8] sm:$0xf0]  ;;  %v6352_v48 = vor.u32 %v9037_v35, %v6349_v36  ;;  %v6509_v36 = vld [vmem:[%s14474_s1 + $0x2f8] sm:$0xf0] }
  0xc7   :  { %2843 = vmatpush.bf16.msra.mxu3 %v6320_v12  ;;  %v6232_v9 = vor.u32 %v9007_v54, %v6229_v55  ;;  %v9005_v12 = vld [vmem:[%s14474_s1 + $0xb4] sm:$0xf]  ;;  %v6277_v55 = vld [vmem:[%s14474_s1 + $0x128] sm:$0xf0] }
  0xc8   :  { %2857 = vmatpush.bf16.msra.mxu0 %v6376_v38  ;;  %v9003_v38 = vld [vmem:[%s14474_s1 + $0xa4] sm:$0xf]  ;;  %v2579_v42 = vpop.f32.mrf.mxu2  ;;  %v2555_v54 = vpop.f32.mrf.mxu0 }
  0xc9   :  { %2809 = vmatpush.bf16.msra.mxu1 %v7684_v16  ;;  %v8995_v16 = vld [vmem:[%s14474_s1 + $0x64] sm:$0xf]  ;;  %v6216_v58 = vor.u32 %v9003_v38, %v6213_v46  ;;  %v6261_v38 = vld [vmem:[%s14474_s1 + $0x108] sm:$0xf0]  ;;  %v9093_v46 = vld [vmem:[%s14474_s1 + $0x374] sm:$0xf] }
  0xca   :  { %2831 = vmatpush.bf16.msra.mxu2 %v6248_v24  ;;  %v9021_v24 = vld [vmem:[%s14474_s1 + $0x134] sm:$0xf]  ;;  %v6184_v59 = vor.u32 %v8995_v16, %v6181_v17  ;;  %v6168_v17 = vor.u32 %v8991_v5, %v6165_v8  ;;  %v6573_v54 = vld [vmem:[%s14474_s1 + $0x378] sm:$0xf0]  ;;  %v9091_v5 = vld [vmem:[%s14474_s1 + $0x364] sm:$0xf] }
  0xcb   :  { %2844 = vmatpush.bf16.msra.mxu3 %v6312_v57  ;;  %v6224_v57 = vor.u32 %v9005_v12, %v6221_v13  ;;  %v6288_v52 = vor.u32 %v9021_v24, %v6285_v34  ;;  %v6344_v12 = vor.u32 %v9035_v63, %v6341_v56  ;;  %v9033_v13 = vld [vmem:[%s14474_s1 + $0x194] sm:$0xf]  ;;  %v8987_v56 = vld [vmem:[%s14474_s1 + $0x24] sm:$0xf] }
  0xcc   :  { %2858 = vmatpush.bf16.msra.mxu0 %v6368_v1  ;;  %v9001_v1 = vld [vmem:[%s14474_s1 + $0x94] sm:$0xf] }
  0xcd   :  { %2810 = vmatpush.bf16.msra.mxu1 %v7676_v29  ;;  %v11227_v29 = vpack.c.bf16 %v79_v19, %v79_v19  ;;  %v6208_v16 = vor.u32 %v9001_v1, %v6205_v4  ;;  %v8999_v19 = vld [vmem:[%s14474_s1 + $0x84] sm:$0xf]  ;;  %v8989_v24 = vld [vmem:[%s14474_s1 + $0x34] sm:$0xf]  ;;  %v6576_v4 = vor.u32 %v9093_v46, %v6573_v54 }
  0xce   :  { %2832 = vmatpush.bf16.msra.mxu2 %v6240_v51  ;;  %v2580_v51 = vadd.f32 %v2579_v42, %v2567_v14  ;;  %v6333_v14 = vld [vmem:[%s14474_s1 + $0x198] sm:$0xf0]  ;;  %v9077_v34 = vld [vmem:[%s14474_s1 + $0x2f4] sm:$0xf]  ;;  %v9071_v46 = vld [vmem:[%s14474_s1 + $0x2c4] sm:$0xf] }
  0xcf   :  { %2845 = vmatpush.bf16.msra.mxu3 %v6304_v60  ;;  %v2592_v60 = vpop.f32.mrf.mxu3  ;;  %v6336_v42 = vor.u32 %v9033_v13, %v6333_v14  ;;  %v6512_v63 = vor.u32 %v9077_v34, %v6509_v36  ;;  %v8985_v14 = vld [vmem:[%s14474_s1 + $0x14] sm:$0xf] }
  0xd0   :  { %2859 = vmatpush.bf16.msra.mxu0 %v6360_v25  ;;  %v11255_v3 = vadd.f32 %v2592_v60, %v2580_v51  ;;  %v6157_v25 = vld [vmem:[%s14474_s1 + $0x38] sm:$0xf0]  ;;  %v2581_v35 = vpop.f32.mrf.mxu2  ;;  %v9075_v60 = vld [vmem:[%s14474_s1 + $0x2e4] sm:$0xf]  ;;  %v9105_v36 = vld [vmem:[%s14474_s1 + $0x3d4] sm:$0xf] }
  0xd1   :  { %2811 = vmatpush.bf16.msra.mxu1 %v7668_v2  ;;  %v2568_v2 = vpop.f32.mrf.mxu1  ;;  %v6557_v35 = vld [vmem:[%s14474_s1 + $0x358] sm:$0xf0] }
  0xd2   :  { %2833 = vmatpush.bf16.msra.mxu2 %v6232_v9  ;;  %v6280_v9 = vor.u32 %v9019_v53, %v6277_v55  ;;  %v6637_v55 = vld [vmem:[%s14474_s1 + $0x3f8] sm:$0xf0]  ;;  %v6328_v2 = vor.u32 %v9031_v47, %v6325_v44  ;;  %v9061_v47 = vld [vmem:[%s14474_s1 + $0x274] sm:$0xf] }
  0xd3   :  { %2846 = vmatpush.bf16.msra.mxu3 %v6296_v23  ;;  %v6197_v23 = vld [vmem:[%s14474_s1 + $0x88] sm:$0xf0]  ;;  %v6445_v44 = vld [vmem:[%s14474_s1 + $0x278] sm:$0xf0] }
  0xd4   :  { %7697 = vmatmul.msk.bf16.vlgmr.msra.gmra.mxu1 %vm2488_vm0, %v11227_v29  ;;  %2860 = vmatpush.bf16.msra.mxu0 %v6352_v48  ;;  %v6200_v51 = vor.u32 %v8999_v19, %v6197_v23  ;;  %v9109_v48 = vld [vmem:[%s14474_s1 + $0x3f4] sm:$0xf]  ;;  %v6493_v19 = vld [vmem:[%s14474_s1 + $0x2d8] sm:$0xf0] }
  0xd5   :  { %2817 = vmatpush.bf16.msrb.mxu1 %v6192_v11  ;;  %v9017_v11 = vld [vmem:[%s14474_s1 + $0x114] sm:$0xf]  ;;  %v6640_v8 = vor.u32 %v9109_v48, %v6637_v55  ;;  %v6549_v48 = vld [vmem:[%s14474_s1 + $0x348] sm:$0xf0]  ;;  %v9103_v55 = vld [vmem:[%s14474_s1 + $0x3c4] sm:$0xf] }
  0xd6   :  { %2834 = vmatpush.bf16.msra.mxu2 %v6224_v57  ;;  %v6272_v57 = vor.u32 %v9017_v11, %v6269_v10  ;;  %v6565_v11 = vld [vmem:[%s14474_s1 + $0x368] sm:$0xf0] }
  0xd7   :  { %2847 = vmatpush.bf16.msra.mxu3 %v6288_v52  ;;  %v6160_v52 = vor.u32 %v8989_v24, %v6157_v25  ;;  %v2594_v53 = vpop.f32.mrf.mxu3  ;;  %v6629_v10 = vld [vmem:[%s14474_s1 + $0x3e8] sm:$0xf0]  ;;  %v6568_v23 = vor.u32 %v9091_v5, %v6565_v11  ;;  %v9089_v24 = vld [vmem:[%s14474_s1 + $0x354] sm:$0xf]  ;;  %v6541_v11 = vld [vmem:[%s14474_s1 + $0x338] sm:$0xf0] }
  0xd8   :  { %2861 = vmatpush.bf16.msra.mxu0 %v6344_v12  ;;  %v9107_v12 = vld [vmem:[%s14474_s1 + $0x3e4] sm:$0xf] }
  0xd9   :  { %2818 = vmatpush.bf16.msrb.mxu1 %v6184_v59  ;;  %v9015_v59 = vld [vmem:[%s14474_s1 + $0x104] sm:$0xf]  ;;  %v6632_v25 = vor.u32 %v9107_v12, %v6629_v10  ;;  %v9101_v12 = vld [vmem:[%s14474_s1 + $0x3b4] sm:$0xf]  ;;  %v6605_v10 = vld [vmem:[%s14474_s1 + $0x3b8] sm:$0xf0] }
  0xda   :  { %2835 = vmatpush.bf16.msra.mxu2 %v6216_v58  ;;  %v6149_v58 = vld [vmem:[%s14474_s1 + $0x28] sm:$0xf0]  ;;  %v6264_v1 = vor.u32 %v9015_v59, %v6261_v38  ;;  %v8983_v38 = vld [vmem:[%s14474_s1 + $0x4] sm:$0xf] }
  0xdb   :  { %2848 = vmatpush.bf16.msra.mxu3 %v6280_v9  ;;  %v6152_v9 = vor.u32 %v8987_v56, %v6149_v58 }
  0xdc   :  { %2862 = vmatpush.bf16.msra.mxu0 %v6336_v42  ;;  %v6133_v42 = vld [vmem:[%s14474_s1 + $0x8] sm:$0xf0] }
  0xdd   :  { %2819 = vmatpush.bf16.msrb.mxu1 %v6176_v61  ;;  %v6501_v61 = vld [vmem:[%s14474_s1 + $0x2e8] sm:$0xf0]  ;;  %v6136_v54 = vor.u32 %v8983_v38, %v6133_v42  ;;  %v9099_v42 = vld [vmem:[%s14474_s1 + $0x3a4] sm:$0xf] }
  0xde   :  { %2836 = vmatpush.bf16.msra.mxu2 %v6208_v16  ;;  %v6504_v13 = vor.u32 %v9075_v60, %v6501_v61  ;;  %v6141_v16 = vld [vmem:[%s14474_s1 + $0x18] sm:$0xf0]  ;;  %v6448_v60 = vor.u32 %v9061_v47, %v6445_v44  ;;  %v9069_v61 = vld [vmem:[%s14474_s1 + $0x2b4] sm:$0xf] }
  0xdf   :  { %2849 = vmatpush.bf16.msra.mxu3 %v6272_v57  ;;  %v6144_v34 = vor.u32 %v8985_v14, %v6141_v16  ;;  %v6621_v57 = vld [vmem:[%s14474_s1 + $0x3d8] sm:$0xf0]  ;;  %v9067_v16 = vld [vmem:[%s14474_s1 + $0x2a4] sm:$0xf] }
  0xe0   :  { %2863 = vmatpush.bf16.msra.mxu0 %v6328_v2  ;;  %v2605_v53 = vpop.f32.mrf.mxu0  ;;  %v9059_v2 = vld [vmem:[%s14474_s1 + $0x264] sm:$0xf] }
  0xe1   :  { %2820 = vmatpush.bf16.msrb.mxu1 %v6168_v17  ;;  %v9073_v17 = vld [vmem:[%s14474_s1 + $0x2d4] sm:$0xf]  ;;  %v2618_v58 = vpop.f32.mrf.mxu1 }
  0xe2   :  { %2837 = vmatpush.bf16.msra.mxu2 %v6200_v51  ;;  %v6496_v59 = vor.u32 %v9073_v17, %v6493_v19  ;;  %v6560_v51 = vor.u32 %v9089_v24, %v6557_v35  ;;  %v6469_v19 = vld [vmem:[%s14474_s1 + $0x2a8] sm:$0xf0]  ;;  %v6429_v24 = vld [vmem:[%s14474_s1 + $0x258] sm:$0xf0]  ;;  %v9083_v35 = vld [vmem:[%s14474_s1 + $0x324] sm:$0xf] }
  0xe3   :  { %2850 = vmatpush.bf16.msra.mxu3 %v6264_v1  ;;  %2864 = vmatmul.bf16.vlgmr.msra.gmra.mxu0 %v10124_v32  ;;  %v6613_v32 = vld [vmem:[%s14474_s1 + $0x3c8] sm:$0xf0]  ;;  %v6477_v1 = vld [vmem:[%s14474_s1 + $0x2b8] sm:$0xf0]  ;;  %v6472_v47 = vor.u32 %v9067_v16, %v6469_v19 }
  0xe4   :  { %2908 = vmatpush.bf16.msrb.mxu0 %v6640_v8  ;;  %v9085_v8 = vld [vmem:[%s14474_s1 + $0x334] sm:$0xf]  ;;  %v6581_v16 = vld [vmem:[%s14474_s1 + $0x388] sm:$0xf0] }
  0xe5   :  { %2821 = vmatpush.bf16.msrb.mxu1 %v6160_v52  ;;  %2838 = vmatmul.bf16.vlgmr.msra.gmra.mxu2 %v10126_v33  ;;  %v6485_v33 = vld [vmem:[%s14474_s1 + $0x2c8] sm:$0xf0]  ;;  %v6624_v52 = vor.u32 %v9105_v36, %v6621_v57  ;;  %v6608_v36 = vor.u32 %v9101_v12, %v6605_v10 }
  0xe6   :  { %2882 = vmatpush.bf16.msrb.mxu2 %v6512_v63  ;;  %2851 = vmatmul.bf16.vlgmr.msra.gmra.mxu3 %v10114_v26  ;;  %v9087_v26 = vld [vmem:[%s14474_s1 + $0x344] sm:$0xf]  ;;  %v2606_v63 = vadd.f32 %v2605_v53, %v11255_v3  ;;  %v6488_v56 = vor.u32 %v9071_v46, %v6485_v33  ;;  %v6597_v46 = vld [vmem:[%s14474_s1 + $0x3a8] sm:$0xf0] }
  0xe7   :  { %2895 = vmatpush.bf16.msrb.mxu3 %v6576_v4  ;;  %v6437_v4 = vld [vmem:[%s14474_s1 + $0x268] sm:$0xf0]  ;;  %v6552_v5 = vor.u32 %v9087_v26, %v6549_v48  ;;  %v9081_v48 = vld [vmem:[%s14474_s1 + $0x314] sm:$0xf] }
  0xe8   :  { %2909 = vmatpush.bf16.msrb.mxu0 %v6632_v25  ;;  %v2619_v3 = vadd.f32 %v2618_v58, %v2606_v63  ;;  %v6440_v14 = vor.u32 %v9059_v2, %v6437_v4  ;;  %v2631_v17 = vpop.f32.mrf.mxu2  ;;  %v2607_v38 = vpop.f32.mrf.mxu0  ;;  %v6421_v53 = vld [vmem:[%s14474_s1 + $0x248] sm:$0xf0]  ;;  %v9097_v63 = vld [vmem:[%s14474_s1 + $0x394] sm:$0xf]  ;;  %v6413_v4 = vld [vmem:[%s14474_s1 + $0x238] sm:$0xf0] }
  0xe9   :  { %2822 = vmatpush.bf16.msrb.mxu1 %v6152_v9  ;;  %v6616_v9 = vor.u32 %v9103_v55, %v6613_v32  ;;  %v2644_v57 = vpop.f32.mrf.mxu3  ;;  %v2620_v26 = vpop.f32.mrf.mxu1  ;;  %v6600_v55 = vor.u32 %v9099_v42, %v6597_v46  ;;  %v6525_v32 = vld [vmem:[%s14474_s1 + $0x318] sm:$0xf0]  ;;  %v9053_v2 = vld [vmem:[%s14474_s1 + $0x234] sm:$0xf]  ;;  %v6517_v10 = vld [vmem:[%s14474_s1 + $0x308] sm:$0xf0] }
  0xea   :  { %2883 = vmatpush.bf16.msrb.mxu2 %v6504_v13  ;;  %v6480_v13 = vor.u32 %v9069_v61, %v6477_v1  ;;  %v2632_v25 = vadd.f32 %v2631_v17, %v2619_v3  ;;  %v9063_v61 = vld [vmem:[%s14474_s1 + $0x284] sm:$0xf]  ;;  %v6453_v1 = vld [vmem:[%s14474_s1 + $0x288] sm:$0xf0]  ;;  %v6416_v19 = vor.u32 %v9053_v2, %v6413_v4  ;;  %v6813_v2 = vld [vmem:[%s14474_s1 + $0x558] sm:$0xf0] }
  0xeb   :  { %2896 = vmatpush.bf16.msrb.mxu3 %v6568_v23  ;;  %v9057_v23 = vld [vmem:[%s14474_s1 + $0x254] sm:$0xf]  ;;  %v6456_v17 = vor.u32 %v9063_v61, %v6453_v1  ;;  %v6757_v38 = vld [vmem:[%s14474_s1 + $0x4e8] sm:$0xf0]  ;;  %v9155_v26 = vld [vmem:[%s14474_s1 + $0x564] sm:$0xf] }
  0xec   :  { %2910 = vmatpush.bf16.msrb.mxu0 %v6624_v52  ;;  %v11451_v33 = vadd.f32 %v2644_v57, %v2632_v25  ;;  %v6432_v44 = vor.u32 %v9057_v23, %v6429_v24  ;;  %v9055_v52 = vld [vmem:[%s14474_s1 + $0x244] sm:$0xf]  ;;  %v9157_v24 = vld [vmem:[%s14474_s1 + $0x574] sm:$0xf]  ;;  %v6829_v25 = vld [vmem:[%s14474_s1 + $0x578] sm:$0xf0] }
  0xed   :  { %2823 = vmatpush.bf16.msrb.mxu1 %v6144_v34  ;;  %v6544_v34 = vor.u32 %v9085_v8, %v6541_v11  ;;  %v6765_v8 = vld [vmem:[%s14474_s1 + $0x4f8] sm:$0xf0]  ;;  %v9079_v11 = vld [vmem:[%s14474_s1 + $0x304] sm:$0xf]  ;;  %v6389_v61 = vld [vmem:[%s14474_s1 + $0x208] sm:$0xf0] }
  0xee   :  { %2884 = vmatpush.bf16.msrb.mxu2 %v6496_v59  ;;  %v6533_v59 = vld [vmem:[%s14474_s1 + $0x328] sm:$0xf0]  ;;  %v9051_v23 = vld [vmem:[%s14474_s1 + $0x224] sm:$0xf]  ;;  %v6893_v57 = vld [vmem:[%s14474_s1 + $0x5f8] sm:$0xf0]  ;;  %v6520_v42 = vor.u32 %v9079_v11, %v6517_v10 }
  0xef   :  { %2897 = vmatpush.bf16.msrb.mxu3 %v6560_v51  ;;  %v9065_v51 = vld [vmem:[%s14474_s1 + $0x294] sm:$0xf] }
  0xf0   :  { %2911 = vmatpush.bf16.msrb.mxu0 %v6616_v9  ;;  %v2633_v3 = vpop.f32.mrf.mxu2  ;;  %v6528_v9 = vor.u32 %v9081_v48, %v6525_v32  ;;  %v9171_v48 = vld [vmem:[%s14474_s1 + $0x5e4] sm:$0xf]  ;;  %v9137_v32 = vld [vmem:[%s14474_s1 + $0x4d4] sm:$0xf] }
  0xf1   :  { %2824 = vmatpush.bf16.msrb.mxu1 %v6136_v54  ;;  %v6536_v54 = vor.u32 %v9083_v35, %v6533_v59  ;;  %v6405_v35 = vld [vmem:[%s14474_s1 + $0x228] sm:$0xf0]  ;;  %v9139_v59 = vld [vmem:[%s14474_s1 + $0x4e4] sm:$0xf]  ;;  %v9153_v1 = vld [vmem:[%s14474_s1 + $0x554] sm:$0xf] }
  0xf2   :  { %2885 = vmatpush.bf16.msrb.mxu2 %v6488_v56  ;;  %v6589_v56 = vld [vmem:[%s14474_s1 + $0x398] sm:$0xf0]  ;;  %v9125_v11 = vld [vmem:[%s14474_s1 + $0x474] sm:$0xf] }
  0xf3   :  { %2898 = vmatpush.bf16.msrb.mxu3 %v6552_v5  ;;  %v9141_v5 = vld [vmem:[%s14474_s1 + $0x4f4] sm:$0xf]  ;;  %v6592_v12 = vor.u32 %v9097_v63, %v6589_v56  ;;  %v6749_v63 = vld [vmem:[%s14474_s1 + $0x4d8] sm:$0xf0]  ;;  %v9047_v56 = vld [vmem:[%s14474_s1 + $0x204] sm:$0xf] }
  0xf4   :  { %2825 = vmatmul.bf16.vlgmr.msrb.gmra.mxu1 %v10116_v27  ;;  %v6461_v27 = vld [vmem:[%s14474_s1 + $0x298] sm:$0xf0]  ;;  %2912 = vmatpush.bf16.msrb.mxu0 %v6608_v36  ;;  %v9173_v36 = vld [vmem:[%s14474_s1 + $0x5f4] sm:$0xf]  ;;  %v6752_v3 = vor.u32 %v9137_v32, %v6749_v63  ;;  %v6392_v10 = vor.u32 %v9047_v56, %v6389_v61  ;;  %v9147_v56 = vld [vmem:[%s14474_s1 + $0x524] sm:$0xf] }
  0xf5   :  { %2869 = vmatpush.bf16.msra.mxu1 %v6448_v60  ;;  %v6464_v58 = vor.u32 %v9065_v51, %v6461_v27  ;;  %v6424_v60 = vor.u32 %v9055_v52, %v6421_v53  ;;  %v9049_v51 = vld [vmem:[%s14474_s1 + $0x214] sm:$0xf]  ;;  %v6821_v27 = vld [vmem:[%s14474_s1 + $0x568] sm:$0xf0]  ;;  %v6896_v52 = vor.u32 %v9173_v36, %v6893_v57  ;;  %v6760_v53 = vor.u32 %v9139_v59, %v6757_v38  ;;  %v6733_v36 = vld [vmem:[%s14474_s1 + $0x4b8] sm:$0xf0] }
  0xf6   :  { %2886 = vmatpush.bf16.msrb.mxu2 %v6480_v13  ;;  %v2646_v13 = vpop.f32.mrf.mxu3  ;;  %v9123_v57 = vld [vmem:[%s14474_s1 + $0x464] sm:$0xf]  ;;  %v6693_v59 = vld [vmem:[%s14474_s1 + $0x468] sm:$0xf0] }
  0xf7   :  { %2899 = vmatpush.bf16.msrb.mxu3 %v6544_v34  ;;  %v6768_v34 = vor.u32 %v9141_v5, %v6765_v8  ;;  %v9169_v5 = vld [vmem:[%s14474_s1 + $0x5d4] sm:$0xf]  ;;  %v6877_v8 = vld [vmem:[%s14474_s1 + $0x5d8] sm:$0xf0]  ;;  %v9151_v13 = vld [vmem:[%s14474_s1 + $0x544] sm:$0xf] }
  0xf8   :  { %2913 = vmatpush.bf16.msrb.mxu0 %v6600_v55  ;;  %v6885_v55 = vld [vmem:[%s14474_s1 + $0x5e8] sm:$0xf0] }
  0xf9   :  { %2870 = vmatpush.bf16.msra.mxu1 %v6440_v14  ;;  %v9095_v14 = vld [vmem:[%s14474_s1 + $0x384] sm:$0xf]  ;;  %v6888_v4 = vor.u32 %v9171_v48, %v6885_v55  ;;  %v6685_v48 = vld [vmem:[%s14474_s1 + $0x458] sm:$0xf0] }
  0xfa   :  { %2887 = vmatpush.bf16.msrb.mxu2 %v6472_v47  ;;  %v6584_v46 = vor.u32 %v9095_v14, %v6581_v16  ;;  %v6832_v47 = vor.u32 %v9157_v24, %v6829_v25  ;;  %v6805_v14 = vld [vmem:[%s14474_s1 + $0x548] sm:$0xf0]  ;;  %v6880_v16 = vor.u32 %v9169_v5, %v6877_v8  ;;  %v9167_v24 = vld [vmem:[%s14474_s1 + $0x5c4] sm:$0xf]  ;;  %v6717_v8 = vld [vmem:[%s14474_s1 + $0x498] sm:$0xf0] }
  0xfb   :  { %2900 = vmatpush.bf16.msrb.mxu3 %v6536_v54  ;;  %v6397_v54 = vld [vmem:[%s14474_s1 + $0x218] sm:$0xf0]  ;;  %v6869_v25 = vld [vmem:[%s14474_s1 + $0x5c8] sm:$0xf0]  ;;  %v6808_v38 = vor.u32 %v9151_v13, %v6805_v14 }
  0xfc   :  { %2914 = vmatpush.bf16.msrb.mxu0 %v6592_v12  ;;  %v6816_v12 = vor.u32 %v9153_v1, %v6813_v2  ;;  %v6781_v13 = vld [vmem:[%s14474_s1 + $0x518] sm:$0xf0] }
  0xfd   :  { %2871 = vmatpush.bf16.msra.mxu1 %v6432_v44  ;;  %v6408_v44 = vor.u32 %v9051_v23, %v6405_v35 }
  0xfe   :  { %2888 = vmatpush.bf16.msrb.mxu2 %v6464_v58  ;;  %v6824_v58 = vor.u32 %v9155_v26, %v6821_v27  ;;  %v9131_v26 = vld [vmem:[%s14474_s1 + $0x4a4] sm:$0xf]  ;;  %v9165_v27 = vld [vmem:[%s14474_s1 + $0x5b4] sm:$0xf] }
  0xff   :  { %2901 = vmatpush.bf16.msrb.mxu3 %v6528_v9  ;;  %v6741_v9 = vld [vmem:[%s14474_s1 + $0x4c8] sm:$0xf0] }
 0x100   :  { %2915 = vmatpush.bf16.msrb.mxu0 %v6584_v46  ;;  %v6797_v46 = vld [vmem:[%s14474_s1 + $0x538] sm:$0xf0] }
 0x101   :  { %2872 = vmatpush.bf16.msra.mxu1 %v6424_v60  ;;  %v6400_v60 = vor.u32 %v9049_v51, %v6397_v54  ;;  %v2670_v35 = vpop.f32.mrf.mxu1  ;;  %v6696_v51 = vor.u32 %v9123_v57, %v6693_v59  ;;  %v9121_v54 = vld [vmem:[%s14474_s1 + $0x454] sm:$0xf] }
 0x102   :  { %2889 = vmatpush.bf16.msrb.mxu2 %v6456_v17  ;;  %v2657_v17 = vpop.f32.mrf.mxu0  ;;  %v6688_v2 = vor.u32 %v9121_v54, %v6685_v48  ;;  %v9159_v54 = vld [vmem:[%s14474_s1 + $0x584] sm:$0xf]  ;;  %v6837_v48 = vld [vmem:[%s14474_s1 + $0x588] sm:$0xf0] }
 0x103   :  { %2902 = vmatpush.bf16.msrb.mxu3 %v6520_v42  ;;  %2916 = vmatmul.bf16.vlgmr.msrb.gmra.mxu0 %v10274_v49  ;;  %v9133_v49 = vld [vmem:[%s14474_s1 + $0x4b4] sm:$0xf] }
 0x104   :  { %2960 = vmatpush.bf16.msra.mxu0 %v6896_v52  ;;  %v6861_v52 = vld [vmem:[%s14474_s1 + $0x5b8] sm:$0xf0] }
 0x105   :  { %2873 = vmatpush.bf16.msra.mxu1 %v6416_v19  ;;  %2890 = vmatmul.bf16.vlgmr.msrb.gmra.mxu2 %v10262_v43  ;;  %v9135_v43 = vld [vmem:[%s14474_s1 + $0x4c4] sm:$0xf] }
 0x106   :  { %2934 = vmatpush.bf16.msra.mxu2 %v6768_v34  ;;  %2903 = vmatmul.bf16.vlgmr.msrb.gmra.mxu3 %v10254_v39  ;;  %v6701_v39 = vld [vmem:[%s14474_s1 + $0x478] sm:$0xf0]  ;;  %v6744_v19 = vor.u32 %v9135_v43, %v6741_v9  ;;  %v2658_v34 = vadd.f32 %v2657_v17, %v11451_v33  ;;  %v9149_v33 = vld [vmem:[%s14474_s1 + $0x534] sm:$0xf]  ;;  %v6853_v43 = vld [vmem:[%s14474_s1 + $0x5a8] sm:$0xf0] }
 0x107   :  { %2947 = vmatpush.bf16.msra.mxu3 %v6832_v47  ;;  %v6704_v23 = vor.u32 %v9125_v11, %v6701_v39  ;;  %v6872_v47 = vor.u32 %v9167_v24, %v6869_v25  ;;  %v6800_v32 = vor.u32 %v9149_v33, %v6797_v46  ;;  %v9119_v9 = vld [vmem:[%s14474_s1 + $0x444] sm:$0xf]  ;;  %v6677_v11 = vld [vmem:[%s14474_s1 + $0x448] sm:$0xf0]  ;;  %v9117_v25 = vld [vmem:[%s14474_s1 + $0x434] sm:$0xf] }
 0x108   :  { %2961 = vmatpush.bf16.msra.mxu0 %v6888_v4  ;;  %v2671_v42 = vadd.f32 %v2670_v35, %v2658_v34  ;;  %v2683_v55 = vpop.f32.mrf.mxu2  ;;  %v6680_v17 = vor.u32 %v9119_v9, %v6677_v11  ;;  %v6709_v24 = vld [vmem:[%s14474_s1 + $0x488] sm:$0xf0]  ;;  %v6669_v34 = vld [vmem:[%s14474_s1 + $0x438] sm:$0xf0]  ;;  %v9205_v35 = vld [vmem:[%s14474_s1 + $0x6f4] sm:$0xf] }
 0x109   :  { %2874 = vmatpush.bf16.msra.mxu1 %v6408_v44  ;;  %v6736_v44 = vor.u32 %v9133_v49, %v6733_v36  ;;  %v2696_v61 = vpop.f32.mrf.mxu3  ;;  %v2672_v39 = vpop.f32.mrf.mxu1  ;;  %v6845_v49 = vld [vmem:[%s14474_s1 + $0x598] sm:$0xf0] }
 0x10a   :  { %2935 = vmatpush.bf16.msra.mxu2 %v6760_v53  ;;  %v6725_v53 = vld [vmem:[%s14474_s1 + $0x4a8] sm:$0xf0]  ;;  %v2684_v63 = vadd.f32 %v2683_v55, %v2671_v42  ;;  %v2659_v4 = vpop.f32.mrf.mxu0  ;;  %v7021_v36 = vld [vmem:[%s14474_s1 + $0x6f8] sm:$0xf0]  ;;  %v9203_v55 = vld [vmem:[%s14474_s1 + $0x6e4] sm:$0xf] }
 0x10b   :  { %2948 = vmatpush.bf16.msra.mxu3 %v6824_v58  ;;  %v6789_v58 = vld [vmem:[%s14474_s1 + $0x528] sm:$0xf0]  ;;  %v6728_v1 = vor.u32 %v9131_v26, %v6725_v53  ;;  %v9221_v26 = vld [vmem:[%s14474_s1 + $0x774] sm:$0xf]  ;;  %v7005_v9 = vld [vmem:[%s14474_s1 + $0x6d8] sm:$0xf0] }
 0x10c   :  { %2962 = vmatpush.bf16.msra.mxu0 %v6880_v16  ;;  %v11653_v5 = vadd.f32 %v2696_v61, %v2684_v63  ;;  %v6773_v42 = vld [vmem:[%s14474_s1 + $0x508] sm:$0xf0] }
 0x10d   :  { %2875 = vmatpush.bf16.msra.mxu1 %v6400_v60  ;;  %v6864_v60 = vor.u32 %v9165_v27, %v6861_v52  ;;  %v7085_v27 = vld [vmem:[%s14474_s1 + $0x778] sm:$0xf0]  ;;  %v7024_v52 = vor.u32 %v9205_v35, %v7021_v36  ;;  %v6661_v53 = vld [vmem:[%s14474_s1 + $0x428] sm:$0xf0] }
 0x10e   :  { %2936 = vmatpush.bf16.msra.mxu2 %v6752_v3  ;;  %v9163_v3 = vld [vmem:[%s14474_s1 + $0x5a4] sm:$0xf]  ;;  %v7133_v36 = vld [vmem:[%s14474_s1 + $0x7d8] sm:$0xf0] }
 0x10f   :  { %2949 = vmatpush.bf16.msra.mxu3 %v6816_v12  ;;  %v6792_v12 = vor.u32 %v9147_v56, %v6789_v58  ;;  %v6856_v14 = vor.u32 %v9163_v3, %v6853_v43  ;;  %v7088_v56 = vor.u32 %v9221_v26, %v7085_v27  ;;  %v9237_v58 = vld [vmem:[%s14474_s1 + $0x7f4] sm:$0xf]  ;;  %v6653_v43 = vld [vmem:[%s14474_s1 + $0x418] sm:$0xf0] }
 0x110   :  { %2963 = vmatpush.bf16.msra.mxu0 %v6872_v47  ;;  %v2685_v59 = vpop.f32.mrf.mxu2  ;;  %v6672_v47 = vor.u32 %v9117_v25, %v6669_v34  ;;  %v9113_v3 = vld [vmem:[%s14474_s1 + $0x414] sm:$0xf]  ;;  %v6957_v25 = vld [vmem:[%s14474_s1 + $0x678] sm:$0xf0] }
 0x111   :  { %2876 = vmatpush.bf16.msra.mxu1 %v6392_v10  ;;  %v9145_v10 = vld [vmem:[%s14474_s1 + $0x514] sm:$0xf]  ;;  %v9215_v59 = vld [vmem:[%s14474_s1 + $0x744] sm:$0xf] }
 0x112   :  { %2937 = vmatpush.bf16.msra.mxu2 %v6744_v19  ;;  %v9127_v19 = vld [vmem:[%s14474_s1 + $0x484] sm:$0xf]  ;;  %v6784_v57 = vor.u32 %v9145_v10, %v6781_v13  ;;  %v7141_v10 = vld [vmem:[%s14474_s1 + $0x7e8] sm:$0xf0]  ;;  %v6656_v13 = vor.u32 %v9113_v3, %v6653_v43  ;;  %v7117_v3 = vld [vmem:[%s14474_s1 + $0x7b8] sm:$0xf0] }
 0x113   :  { %2950 = vmatpush.bf16.msra.mxu3 %v6808_v38  ;;  %v9143_v38 = vld [vmem:[%s14474_s1 + $0x504] sm:$0xf]  ;;  %v6712_v46 = vor.u32 %v9127_v19, %v6709_v24  ;;  %v6645_v19 = vld [vmem:[%s14474_s1 + $0x408] sm:$0xf0]  ;;  %v9189_v24 = vld [vmem:[%s14474_s1 + $0x674] sm:$0xf] }
 0x114   :  { %2877 = vmatmul.bf16.vlgmr.msra.gmra.mxu1 %v10252_v37  ;;  %v9129_v37 = vld [vmem:[%s14474_s1 + $0x494] sm:$0xf]  ;;  %2964 = vmatpush.bf16.msra.mxu0 %v6864_v60  ;;  %v6776_v63 = vor.u32 %v9143_v38, %v6773_v42  ;;  %v7149_v60 = vld [vmem:[%s14474_s1 + $0x7f8] sm:$0xf0]  ;;  %v7061_v38 = vld [vmem:[%s14474_s1 + $0x748] sm:$0xf0]  ;;  %v6960_v42 = vor.u32 %v9189_v24, %v6957_v25 }
 0x115   :  { %2921 = vmatpush.bf16.msrb.mxu1 %v6704_v23  ;;  %v6720_v16 = vor.u32 %v9129_v37, %v6717_v8  ;;  %v9161_v23 = vld [vmem:[%s14474_s1 + $0x594] sm:$0xf]  ;;  %v6840_v37 = vor.u32 %v9159_v54, %v6837_v48  ;;  %v7152_v11 = vor.u32 %v9237_v58, %v7149_v60  ;;  %v9231_v54 = vld [vmem:[%s14474_s1 + $0x7c4] sm:$0xf]  ;;  %v7125_v48 = vld [vmem:[%s14474_s1 + $0x7c8] sm:$0xf0] }
 0x116   :  { %2938 = vmatpush.bf16.msra.mxu2 %v6736_v44  ;;  %v6848_v33 = vor.u32 %v9161_v23, %v6845_v49  ;;  %v9115_v44 = vld [vmem:[%s14474_s1 + $0x424] sm:$0xf]  ;;  %v9201_v8 = vld [vmem:[%s14474_s1 + $0x6d4] sm:$0xf]  ;;  %v6997_v49 = vld [vmem:[%s14474_s1 + $0x6c8] sm:$0xf0] }
 0x117   :  { %2951 = vmatpush.bf16.msra.mxu3 %v6800_v32  ;;  %v7013_v32 = vld [vmem:[%s14474_s1 + $0x6e8] sm:$0xf0]  ;;  %v6664_v61 = vor.u32 %v9115_v44, %v6661_v53  ;;  %v9199_v23 = vld [vmem:[%s14474_s1 + $0x6c4] sm:$0xf]  ;;  %v7064_v53 = vor.u32 %v9215_v59, %v7061_v38  ;;  %v9181_v38 = vld [vmem:[%s14474_s1 + $0x634] sm:$0xf] }
 0x118   :  { %2965 = vmatpush.bf16.msra.mxu0 %v6856_v14  ;;  %v7016_v4 = vor.u32 %v9203_v55, %v7013_v32  ;;  %v9217_v14 = vld [vmem:[%s14474_s1 + $0x754] sm:$0xf]  ;;  %v9187_v44 = vld [vmem:[%s14474_s1 + $0x664] sm:$0xf]  ;;  %v6981_v60 = vld [vmem:[%s14474_s1 + $0x6a8] sm:$0xf0] }
 0x119   :  { %2922 = vmatpush.bf16.msrb.mxu1 %v6696_v51  ;;  %v2698_v51 = vpop.f32.mrf.mxu3  ;;  %v9213_v55 = vld [vmem:[%s14474_s1 + $0x734] sm:$0xf]  ;;  %v9195_v58 = vld [vmem:[%s14474_s1 + $0x6a4] sm:$0xf]  ;;  %v7109_v25 = vld [vmem:[%s14474_s1 + $0x7a8] sm:$0xf0] }
 0x11a   :  { %2939 = vmatpush.bf16.msra.mxu2 %v6728_v1  ;;  %v9219_v1 = vld [vmem:[%s14474_s1 + $0x764] sm:$0xf]  ;;  %v6949_v51 = vld [vmem:[%s14474_s1 + $0x668] sm:$0xf0] }
 0x11b   :  { %2952 = vmatpush.bf16.msra.mxu3 %v6792_v12  ;;  %v9235_v12 = vld [vmem:[%s14474_s1 + $0x7e4] sm:$0xf]  ;;  %v6965_v59 = vld [vmem:[%s14474_s1 + $0x688] sm:$0xf0] }
 0x11c   :  { %2966 = vmatpush.bf16.msra.mxu0 %v6848_v33  ;;  %v7144_v34 = vor.u32 %v9235_v12, %v7141_v10  ;;  %v9197_v33 = vld [vmem:[%s14474_s1 + $0x6b4] sm:$0xf]  ;;  %v9227_v24 = vld [vmem:[%s14474_s1 + $0x7a4] sm:$0xf] }
 0x11d   :  { %2923 = vmatpush.bf16.msrb.mxu1 %v6688_v2  ;;  %v7077_v2 = vld [vmem:[%s14474_s1 + $0x768] sm:$0xf0]  ;;  %v9193_v12 = vld [vmem:[%s14474_s1 + $0x694] sm:$0xf] }
 0x11e   :  { %2940 = vmatpush.bf16.msra.mxu2 %v6720_v16  ;;  %v7080_v39 = vor.u32 %v9219_v1, %v7077_v2  ;;  %v7008_v16 = vor.u32 %v9201_v8, %v7005_v9  ;;  %v6941_v1 = vld [vmem:[%s14474_s1 + $0x658] sm:$0xf0]  ;;  %v7128_v2 = vor.u32 %v9231_v54, %v7125_v48  ;;  %v9211_v8 = vld [vmem:[%s14474_s1 + $0x724] sm:$0xf]  ;;  %v7045_v9 = vld [vmem:[%s14474_s1 + $0x728] sm:$0xf0] }
 0x11f   :  { %2953 = vmatpush.bf16.msra.mxu3 %v6784_v57  ;;  %v9285_v48 = vld [vmem:[%s14474_s1 + $0x974] sm:$0xf] }
 0x120   :  { %2967 = vmatpush.bf16.msra.mxu0 %v6840_v37 }
 0x121   :  { %2924 = vmatpush.bf16.msrb.mxu1 %v6680_v17  ;;  %v9111_v17 = vld [vmem:[%s14474_s1 + $0x404] sm:$0xf] }
 0x122   :  { %2941 = vmatpush.bf16.msra.mxu2 %v6712_v46  ;;  %v6648_v57 = vor.u32 %v9111_v17, %v6645_v19  ;;  %v2709_v46 = vpop.f32.mrf.mxu0 }
 0x123   :  { %2954 = vmatpush.bf16.msra.mxu3 %v6776_v63  ;;  %2968 = vmatmul.bf16.vlgmr.msra.gmra.mxu0 %v10481_v22  ;;  %v7000_v22 = vor.u32 %v9199_v23, %v6997_v49  ;;  %v2710_v27 = vadd.f32 %v2709_v46, %v11653_v5  ;;  %v7053_v5 = vld [vmem:[%s14474_s1 + $0x738] sm:$0xf0]  ;;  %v7048_v23 = vor.u32 %v9211_v8, %v7045_v9  ;;  %v7333_v8 = vld [vmem:[%s14474_s1 + $0x968] sm:$0xf0]  ;;  %v9301_v9 = vld [vmem:[%s14474_s1 + $0x9f4] sm:$0xf] }
 0x124   :  { %3012 = vmatpush.bf16.msrb.mxu0 %v7152_v11  ;;  %v7056_v37 = vor.u32 %v9213_v55, %v7053_v5  ;;  %v6984_v11 = vor.u32 %v9195_v58, %v6981_v60  ;;  %v7277_v46 = vld [vmem:[%s14474_s1 + $0x8f8] sm:$0xf0]  ;;  %v9267_v60 = vld [vmem:[%s14474_s1 + $0x8e4] sm:$0xf] }
 0x125   :  { %2925 = vmatpush.bf16.msrb.mxu1 %v6672_v47  ;;  %2942 = vmatmul.bf16.vlgmr.msra.gmra.mxu2 %v10477_v30  ;;  %v7069_v30 = vld [vmem:[%s14474_s1 + $0x758] sm:$0xf0] }
 0x126   :  { %2986 = vmatpush.bf16.msrb.mxu2 %v7024_v52  ;;  %2955 = vmatmul.bf16.vlgmr.msra.gmra.mxu3 %v10464_v21  ;;  %v7072_v35 = vor.u32 %v9217_v14, %v7069_v30  ;;  %v9233_v21 = vld [vmem:[%s14474_s1 + $0x7d4] sm:$0xf]  ;;  %v6989_v47 = vld [vmem:[%s14474_s1 + $0x6b8] sm:$0xf0]  ;;  %v2722_v52 = vpop.f32.mrf.mxu1  ;;  %v9183_v14 = vld [vmem:[%s14474_s1 + $0x644] sm:$0xf] }
 0x127   :  { %2999 = vmatpush.bf16.msrb.mxu3 %v7088_v56  ;;  %v7136_v26 = vor.u32 %v9233_v21, %v7133_v36  ;;  %v2723_v32 = vadd.f32 %v2722_v52, %v2710_v27  ;;  %v6992_v63 = vor.u32 %v9197_v33, %v6989_v47  ;;  %v6952_v56 = vor.u32 %v9187_v44, %v6949_v51  ;;  %v6933_v30 = vld [vmem:[%s14474_s1 + $0x648] sm:$0xf0]  ;;  %v9225_v44 = vld [vmem:[%s14474_s1 + $0x794] sm:$0xf]  ;;  %v7101_v51 = vld [vmem:[%s14474_s1 + $0x798] sm:$0xf0] }
 0x128   :  { %3013 = vmatpush.bf16.msrb.mxu0 %v7144_v34  ;;  %v2735_v43 = vpop.f32.mrf.mxu2  ;;  %v9209_v34 = vld [vmem:[%s14474_s1 + $0x714] sm:$0xf]  ;;  %v6936_v36 = vor.u32 %v9183_v14, %v6933_v30  ;;  %v7112_v33 = vor.u32 %v9227_v24, %v7109_v25  ;;  %v9207_v27 = vld [vmem:[%s14474_s1 + $0x704] sm:$0xf]  ;;  %v7029_v52 = vld [vmem:[%s14474_s1 + $0x708] sm:$0xf0]  ;;  %v7104_v58 = vor.u32 %v9225_v44, %v7101_v51 }
 0x129   :  { %2926 = vmatpush.bf16.msrb.mxu1 %v6664_v61  ;;  %v9185_v61 = vld [vmem:[%s14474_s1 + $0x654] sm:$0xf]  ;;  %v2748_v10 = vpop.f32.mrf.mxu3  ;;  %v7341_v55 = vld [vmem:[%s14474_s1 + $0x978] sm:$0xf0]  ;;  %v9299_v24 = vld [vmem:[%s14474_s1 + $0x9e4] sm:$0xf] }
 0x12a   :  { %2987 = vmatpush.bf16.msrb.mxu2 %v7016_v4  ;;  %v9229_v4 = vld [vmem:[%s14474_s1 + $0x7b4] sm:$0xf] }
 0x12b   :  { %3000 = vmatpush.bf16.msrb.mxu3 %v7080_v39  ;;  %v6944_v39 = vor.u32 %v9185_v61, %v6941_v1  ;;  %v7120_v17 = vor.u32 %v9229_v4, %v7117_v3  ;;  %v7269_v61 = vld [vmem:[%s14474_s1 + $0x8e8] sm:$0xf0]  ;;  %v7032_v1 = vor.u32 %v9207_v27, %v7029_v52  ;;  %v9223_v4 = vld [vmem:[%s14474_s1 + $0x784] sm:$0xf]  ;;  %v9261_v44 = vld [vmem:[%s14474_s1 + $0x8b4] sm:$0xf] }
 0x12c   :  { %3014 = vmatpush.bf16.msrb.mxu0 %v7136_v26  ;;  %v7093_v3 = vld [vmem:[%s14474_s1 + $0x788] sm:$0xf0]  ;;  %v9297_v51 = vld [vmem:[%s14474_s1 + $0x9d4] sm:$0xf]  ;;  %v7245_v52 = vld [vmem:[%s14474_s1 + $0x8b8] sm:$0xf0] }
 0x12d   :  { %2927 = vmatpush.bf16.msrb.mxu1 %v6656_v13  ;;  %v6973_v13 = vld [vmem:[%s14474_s1 + $0x698] sm:$0xf0]  ;;  %v7096_v14 = vor.u32 %v9223_v4, %v7093_v3  ;;  %v9275_v3 = vld [vmem:[%s14474_s1 + $0x924] sm:$0xf] }
 0x12e   :  { %2988 = vmatpush.bf16.msrb.mxu2 %v7008_v16  ;;  %v2711_v16 = vpop.f32.mrf.mxu0  ;;  %v2724_v49 = vpop.f32.mrf.mxu1  ;;  %v6976_v21 = vor.u32 %v9193_v12, %v6973_v13  ;;  %v6909_v12 = vld [vmem:[%s14474_s1 + $0x618] sm:$0xf0] }
 0x12f   :  { %3001 = vmatpush.bf16.msrb.mxu3 %v7072_v35  ;;  %v7037_v35 = vld [vmem:[%s14474_s1 + $0x718] sm:$0xf0]  ;;  %v9281_v16 = vld [vmem:[%s14474_s1 + $0x954] sm:$0xf] }
 0x130   :  { %3015 = vmatpush.bf16.msrb.mxu0 %v7128_v2  ;;  %v7040_v47 = vor.u32 %v9209_v34, %v7037_v35  ;;  %v2737_v26 = vpop.f32.mrf.mxu2  ;;  %v7344_v2 = vor.u32 %v9285_v48, %v7341_v55  ;;  %v7261_v13 = vld [vmem:[%s14474_s1 + $0x8d8] sm:$0xf0]  ;;  %v9175_v34 = vld [vmem:[%s14474_s1 + $0x604] sm:$0xf]  ;;  %v6901_v35 = vld [vmem:[%s14474_s1 + $0x608] sm:$0xf0] }
 0x131   :  { %2928 = vmatpush.bf16.msrb.mxu1 %v6648_v57  ;;  %v9191_v57 = vld [vmem:[%s14474_s1 + $0x684] sm:$0xf]  ;;  %v7325_v49 = vld [vmem:[%s14474_s1 + $0x958] sm:$0xf0]  ;;  %v9277_v55 = vld [vmem:[%s14474_s1 + $0x934] sm:$0xf] }
 0x132   :  { %2989 = vmatpush.bf16.msrb.mxu2 %v7000_v22  ;;  %v6925_v22 = vld [vmem:[%s14474_s1 + $0x638] sm:$0xf0] }
 0x133   :  { %3002 = vmatpush.bf16.msrb.mxu3 %v7064_v53  ;;  %v6968_v53 = vor.u32 %v9191_v57, %v6965_v59  ;;  %v6928_v54 = vor.u32 %v9181_v38, %v6925_v22  ;;  %v9253_v57 = vld [vmem:[%s14474_s1 + $0x874] sm:$0xf]  ;;  %v7213_v59 = vld [vmem:[%s14474_s1 + $0x878] sm:$0xf0]  ;;  %v7328_v38 = vor.u32 %v9281_v16, %v7325_v49 }
 0x134   :  { %2929 = vmatmul.bf16.vlgmr.msrb.gmra.mxu1 %v10460_v20  ;;  %v2736_v20 = vadd.f32 %v2735_v43, %v2723_v32  ;;  %3016 = vmatpush.bf16.msrb.mxu0 %v7120_v17  ;;  %v9179_v32 = vld [vmem:[%s14474_s1 + $0x624] sm:$0xf]  ;;  %v7389_v26 = vld [vmem:[%s14474_s1 + $0x9d8] sm:$0xf0]  ;;  %v9273_v49 = vld [vmem:[%s14474_s1 + $0x914] sm:$0xf] }
 0x135   :  { %2973 = vmatpush.bf16.msra.mxu1 %v6960_v42  ;;  %v9269_v42 = vld [vmem:[%s14474_s1 + $0x8f4] sm:$0xf] }
 0x136   :  { %2990 = vmatpush.bf16.msrb.mxu2 %v6992_v63  ;;  %v11855_v19 = vadd.f32 %v2748_v10, %v2736_v20  ;;  %v7280_v5 = vor.u32 %v9269_v42, %v7277_v46  ;;  %v6917_v63 = vld [vmem:[%s14474_s1 + $0x628] sm:$0xf0]  ;;  %v7405_v20 = vld [vmem:[%s14474_s1 + $0x9f8] sm:$0xf0]  ;;  %v9265_v10 = vld [vmem:[%s14474_s1 + $0x8d4] sm:$0xf]  ;;  %v6904_v42 = vor.u32 %v9175_v34, %v6901_v35 }
 0x137   :  { %3003 = vmatpush.bf16.msrb.mxu3 %v7056_v37  ;;  %v9283_v37 = vld [vmem:[%s14474_s1 + $0x964] sm:$0xf]  ;;  %v6920_v43 = vor.u32 %v9179_v32, %v6917_v63  ;;  %v7408_v17 = vor.u32 %v9301_v9, %v7405_v20  ;;  %v7264_v25 = vor.u32 %v9265_v10, %v7261_v13  ;;  %v7392_v32 = vor.u32 %v9297_v51, %v7389_v26  ;;  %v7229_v10 = vld [vmem:[%s14474_s1 + $0x898] sm:$0xf0] }
 0x138   :  { %3017 = vmatpush.bf16.msrb.mxu0 %v7112_v33  ;;  %v7336_v30 = vor.u32 %v9283_v37, %v7333_v8  ;;  %v7317_v33 = vld [vmem:[%s14474_s1 + $0x948] sm:$0xf0]  ;;  %v7248_v63 = vor.u32 %v9261_v44, %v7245_v52  ;;  %v7197_v37 = vld [vmem:[%s14474_s1 + $0x858] sm:$0xf0]  ;;  %v9247_v13 = vld [vmem:[%s14474_s1 + $0x844] sm:$0xf] }
 0x139   :  { %2974 = vmatpush.bf16.msra.mxu1 %v6952_v56  ;;  %v2750_v56 = vpop.f32.mrf.mxu3  ;;  %v9255_v35 = vld [vmem:[%s14474_s1 + $0x884] sm:$0xf]  ;;  %v9349_v52 = vld [vmem:[%s14474_s1 + $0xb74] sm:$0xf] }
 0x13a   :  { %2991 = vmatpush.bf16.msrb.mxu2 %v6984_v11  ;;  %v7272_v11 = vor.u32 %v9267_v60, %v7269_v61  ;;  %v9295_v60 = vld [vmem:[%s14474_s1 + $0x9c4] sm:$0xf]  ;;  %v7381_v61 = vld [vmem:[%s14474_s1 + $0x9c8] sm:$0xf0] }
 0x13b   :  { %3004 = vmatpush.bf16.msrb.mxu3 %v7048_v23  ;;  %v7384_v8 = vor.u32 %v9295_v60, %v7381_v61  ;;  %v9243_v26 = vld [vmem:[%s14474_s1 + $0x824] sm:$0xf] }
 0x13c   :  { %3018 = vmatpush.bf16.msrb.mxu0 %v7104_v58  ;;  %v9259_v58 = vld [vmem:[%s14474_s1 + $0x8a4] sm:$0xf] }
 0x13d   :  { %2975 = vmatpush.bf16.msra.mxu1 %v6944_v39  ;;  %v9177_v39 = vld [vmem:[%s14474_s1 + $0x614] sm:$0xf] }
 0x13e   :  { %2992 = vmatpush.bf16.msrb.mxu2 %v6976_v21  ;;  %v6912_v23 = vor.u32 %v9177_v39, %v6909_v12  ;;  %v9263_v21 = vld [vmem:[%s14474_s1 + $0x8c4] sm:$0xf]  ;;  %v9293_v39 = vld [vmem:[%s14474_s1 + $0x9b4] sm:$0xf]  ;;  %v7373_v12 = vld [vmem:[%s14474_s1 + $0x9b8] sm:$0xf0] }
 0x13f   :  { %3005 = vmatpush.bf16.msrb.mxu3 %v7040_v47  ;;  %v7216_v47 = vor.u32 %v9253_v57, %v7213_v59  ;;  %v7221_v57 = vld [vmem:[%s14474_s1 + $0x888] sm:$0xf0]  ;;  %v9245_v59 = vld [vmem:[%s14474_s1 + $0x834] sm:$0xf] }
 0x140   :  { %3019 = vmatpush.bf16.msrb.mxu0 %v7096_v14  ;;  %v11995_v27 = vpop.f32.mrf.mxu0  ;;  %v7189_v14 = vld [vmem:[%s14474_s1 + $0x848] sm:$0xf0]  ;;  %v7224_v44 = vor.u32 %v9255_v35, %v7221_v57 }
 0x141   :  { %2976 = vmatpush.bf16.msra.mxu1 %v6936_v36  ;;  %v7253_v36 = vld [vmem:[%s14474_s1 + $0x8c8] sm:$0xf0]  ;;  %v7192_v34 = vor.u32 %v9247_v13, %v7189_v14  ;;  %v7661_v13 = vld [vmem:[%s14474_s1 + $0xbf8] sm:$0xf0] }
 0x142   :  { %2993 = vmatpush.bf16.msrb.mxu2 %v6968_v53  ;;  %v7256_v46 = vor.u32 %v9263_v21, %v7253_v36  ;;  %v9251_v53 = vld [vmem:[%s14474_s1 + $0x864] sm:$0xf]  ;;  %v7365_v36 = vld [vmem:[%s14474_s1 + $0x9a8] sm:$0xf0] }
 0x143   :  { %3006 = vmatpush.bf16.msrb.mxu3 %v7032_v1  ;;  %3020 = vmatmul.bf16.vlgmr.msrb.gmra.mxu0 %v10719_v40  ;;  %v7205_v40 = vld [vmem:[%s14474_s1 + $0x868] sm:$0xf0]  ;;  %v9291_v21 = vld [vmem:[%s14474_s1 + $0x9a4] sm:$0xf] }
 0x144   :  { %3064 = vmatpush.bf16.msra.mxu0 %v7408_v17  ;;  %v7208_v56 = vor.u32 %v9251_v53, %v7205_v40  ;;  %v7237_v1 = vld [vmem:[%s14474_s1 + $0x8a8] sm:$0xf0]  ;;  %v7597_v53 = vld [vmem:[%s14474_s1 + $0xb78] sm:$0xf0] }
 0x145   :  { %2977 = vmatpush.bf16.msra.mxu1 %v6928_v54  ;;  %2994 = vmatmul.bf16.vlgmr.msrb.gmra.mxu2 %v10706_v28  ;;  %v7397_v28 = vld [vmem:[%s14474_s1 + $0x9e8] sm:$0xf0]  ;;  %v12006_v54 = vpop.f32.mrf.mxu1  ;;  %v7240_v20 = vor.u32 %v9259_v58, %v7237_v1  ;;  %v9241_v1 = vld [vmem:[%s14474_s1 + $0x814] sm:$0xf] }
 0x146   :  { %3038 = vmatpush.bf16.msra.mxu2 %v7280_v5  ;;  %3007 = vmatmul.bf16.vlgmr.msrb.gmra.mxu3 %v10693_v31  ;;  %v7400_v22 = vor.u32 %v9299_v24, %v7397_v28  ;;  %v9279_v31 = vld [vmem:[%s14474_s1 + $0x944] sm:$0xf]  ;;  %v7309_v5 = vld [vmem:[%s14474_s1 + $0x938] sm:$0xf0]  ;;  %v7376_v28 = vor.u32 %v9293_v39, %v7373_v12  ;;  %v7525_v58 = vld [vmem:[%s14474_s1 + $0xae8] sm:$0xf0] }
 0x147   :  { %3051 = vmatpush.bf16.msra.mxu3 %v7344_v2  ;;  %v7320_v48 = vor.u32 %v9279_v31, %v7317_v33  ;;  %v9249_v2 = vld [vmem:[%s14474_s1 + $0x854] sm:$0xf]  ;;  %v7312_v4 = vor.u32 %v9277_v55, %v7309_v5  ;;  %v7293_v24 = vld [vmem:[%s14474_s1 + $0x918] sm:$0xf0]  ;;  %v9271_v33 = vld [vmem:[%s14474_s1 + $0x904] sm:$0xf] }
 0x148   :  { %3065 = vmatpush.bf16.msra.mxu0 %v7400_v22  ;;  %v12039_v9 = vpop.f32.mrf.mxu2  ;;  %v9333_v22 = vld [vmem:[%s14474_s1 + $0xaf4] sm:$0xf]  ;;  %v7296_v31 = vor.u32 %v9273_v49, %v7293_v24  ;;  %v7173_v55 = vld [vmem:[%s14474_s1 + $0x828] sm:$0xf0]  ;;  %v7517_v12 = vld [vmem:[%s14474_s1 + $0xad8] sm:$0xf0] }
 0x149   :  { %2978 = vmatpush.bf16.msra.mxu1 %v6920_v43  ;;  %v7301_v43 = vld [vmem:[%s14474_s1 + $0x928] sm:$0xf0]  ;;  %v12059_v17 = vpop.f32.mrf.mxu3  ;;  %v9289_v5 = vld [vmem:[%s14474_s1 + $0x994] sm:$0xf]  ;;  %v7581_v49 = vld [vmem:[%s14474_s1 + $0xb58] sm:$0xf0] }
 0x14a   :  { %3039 = vmatpush.bf16.msra.mxu2 %v7272_v11  ;;  %v7200_v11 = vor.u32 %v9249_v2, %v7197_v37  ;;  %v7600_v2 = vor.u32 %v9349_v52, %v7597_v53  ;;  %v7176_v37 = vor.u32 %v9243_v26, %v7173_v55  ;;  %v7349_v39 = vld [vmem:[%s14474_s1 + $0x988] sm:$0xf0]  ;;  %v9341_v55 = vld [vmem:[%s14474_s1 + $0xb34] sm:$0xf] }
 0x14b   :  { %3052 = vmatpush.bf16.msra.mxu3 %v7336_v30  ;;  %v2763_v30 = vpop.f32.mrf.mxu0  ;;  %v7509_v35 = vld [vmem:[%s14474_s1 + $0xac8] sm:$0xf0] }
 0x14c   :  { %3066 = vmatpush.bf16.msra.mxu0 %v7392_v32  ;;  %v7357_v32 = vld [vmem:[%s14474_s1 + $0x998] sm:$0xf0]  ;;  %v7461_v26 = vld [vmem:[%s14474_s1 + $0xa68] sm:$0xf0] }
 0x14d   :  { %2979 = vmatpush.bf16.msra.mxu1 %v6912_v23  ;;  %v2776_v16 = vpop.f32.mrf.mxu1  ;;  %v7304_v23 = vor.u32 %v9275_v3, %v7301_v43  ;;  %v7360_v3 = vor.u32 %v9289_v5, %v7357_v32  ;;  %v9347_v43 = vld [vmem:[%s14474_s1 + $0xb64] sm:$0xf]  ;;  %v7565_v5 = vld [vmem:[%s14474_s1 + $0xb38] sm:$0xf0] }
 0x14e   :  { %3040 = vmatpush.bf16.msra.mxu2 %v7264_v25 }
 0x14f   :  { %3053 = vmatpush.bf16.msra.mxu3 %v7328_v38  ;;  %v7181_v38 = vld [vmem:[%s14474_s1 + $0x838] sm:$0xf0] }
 0x150   :  { %3067 = vmatpush.bf16.msra.mxu0 %v7384_v8  ;;  %v7184_v51 = vor.u32 %v9245_v59, %v7181_v38  ;;  %v2789_v40 = vpop.f32.mrf.mxu2  ;;  %v7589_v8 = vld [vmem:[%s14474_s1 + $0xb68] sm:$0xf0] }
 0x151   :  { %2980 = vmatpush.bf16.msra.mxu1 %v6904_v42  ;;  %v7533_v42 = vld [vmem:[%s14474_s1 + $0xaf8] sm:$0xf0]  ;;  %v2802_v61 = vpop.f32.mrf.mxu3  ;;  %v7592_v14 = vor.u32 %v9347_v43, %v7589_v8  ;;  %v7653_v38 = vld [vmem:[%s14474_s1 + $0xbe8] sm:$0xf0]  ;;  %v9361_v40 = vld [vmem:[%s14474_s1 + $0xbd4] sm:$0xf] }
 0x152   :  { %3041 = vmatpush.bf16.msra.mxu2 %v7256_v46  ;;  %v7285_v46 = vld [vmem:[%s14474_s1 + $0x908] sm:$0xf0]  ;;  %v7453_v61 = vld [vmem:[%s14474_s1 + $0xa58] sm:$0xf0]  ;;  %v9339_v43 = vld [vmem:[%s14474_s1 + $0xb24] sm:$0xf] }
 0x153   :  { %3054 = vmatpush.bf16.msra.mxu3 %v7320_v48  ;;  %v7536_v48 = vor.u32 %v9333_v22, %v7533_v42  ;;  %v7288_v60 = vor.u32 %v9271_v33, %v7285_v46  ;;  %v9343_v42 = vld [vmem:[%s14474_s1 + $0xb44] sm:$0xf] }
 0x154   :  { %2981 = vmatmul.bf16.vlgmr.msra.gmra.mxu1 %v10689_v18  ;;  %v9257_v18 = vld [vmem:[%s14474_s1 + $0x894] sm:$0xf]  ;;  %3068 = vmatpush.bf16.msra.mxu0 %v7376_v28  ;;  %v7157_v28 = vld [vmem:[%s14474_s1 + $0x808] sm:$0xf0] }
 0x155   :  { %3025 = vmatpush.bf16.msrb.mxu1 %v7216_v47  ;;  %v7232_v25 = vor.u32 %v9257_v18, %v7229_v10  ;;  %v7368_v47 = vor.u32 %v9291_v21, %v7365_v36  ;;  %v9287_v18 = vld [vmem:[%s14474_s1 + $0x984] sm:$0xf]  ;;  %v9365_v10 = vld [vmem:[%s14474_s1 + $0xbf4] sm:$0xf]  ;;  %v7469_v36 = vld [vmem:[%s14474_s1 + $0xa78] sm:$0xf0] }
 0x156   :  { %3042 = vmatpush.bf16.msra.mxu2 %v7248_v63  ;;  %v12115_v63 = vpop.f32.mrf.mxu1  ;;  %v7352_v16 = vor.u32 %v9287_v18, %v7349_v39  ;;  %v9317_v21 = vld [vmem:[%s14474_s1 + $0xa74] sm:$0xf]  ;;  %v7485_v18 = vld [vmem:[%s14474_s1 + $0xa98] sm:$0xf0]  ;;  %v9311_v39 = vld [vmem:[%s14474_s1 + $0xa44] sm:$0xf] }
 0x157   :  { %3055 = vmatpush.bf16.msra.mxu3 %v7312_v4  ;;  %v7165_v4 = vld [vmem:[%s14474_s1 + $0x818] sm:$0xf0]  ;;  %v7472_v46 = vor.u32 %v9317_v21, %v7469_v36 }
 0x158   :  { %3069 = vmatpush.bf16.msra.mxu0 %v7368_v47  ;;  %v7168_v30 = vor.u32 %v9241_v1, %v7165_v4  ;;  %v9325_v47 = vld [vmem:[%s14474_s1 + $0xab4] sm:$0xf]  ;;  %v7637_v4 = vld [vmem:[%s14474_s1 + $0xbc8] sm:$0xf0]  ;;  %v7437_v21 = vld [vmem:[%s14474_s1 + $0xa38] sm:$0xf0] }
 0x159   :  { %3026 = vmatpush.bf16.msrb.mxu1 %v7208_v56  ;;  %v9331_v56 = vld [vmem:[%s14474_s1 + $0xae4] sm:$0xf] }
 0x15a   :  { %3043 = vmatpush.bf16.msra.mxu2 %v7240_v20  ;;  %v7528_v20 = vor.u32 %v9331_v56, %v7525_v58  ;;  %v9323_v56 = vld [vmem:[%s14474_s1 + $0xaa4] sm:$0xf]  ;;  %v7493_v58 = vld [vmem:[%s14474_s1 + $0xaa8] sm:$0xf0] }
 0x15b   :  { %3056 = vmatpush.bf16.msra.mxu3 %v7304_v23  ;;  %v9345_v23 = vld [vmem:[%s14474_s1 + $0xb54] sm:$0xf]  ;;  %v7496_v8 = vor.u32 %v9323_v56, %v7493_v58 }
 0x15c   :  { %3070 = vmatpush.bf16.msra.mxu0 %v7360_v3  ;;  %v7584_v59 = vor.u32 %v9345_v23, %v7581_v49  ;;  %v9337_v23 = vld [vmem:[%s14474_s1 + $0xb14] sm:$0xf]  ;;  %v7549_v49 = vld [vmem:[%s14474_s1 + $0xb18] sm:$0xf0] }
 0x15d   :  { %3027 = vmatpush.bf16.msrb.mxu1 %v7200_v11  ;;  %v9329_v11 = vld [vmem:[%s14474_s1 + $0xad4] sm:$0xf] }
 0x15e   :  { %3044 = vmatpush.bf16.msra.mxu2 %v7232_v25  ;;  %v7520_v24 = vor.u32 %v9329_v11, %v7517_v12  ;;  %v9327_v25 = vld [vmem:[%s14474_s1 + $0xac4] sm:$0xf]  ;;  %v2815_v57 = vpop.f32.mrf.mxu1  ;;  %v9321_v11 = vld [vmem:[%s14474_s1 + $0xa94] sm:$0xf]  ;;  %v7445_v12 = vld [vmem:[%s14474_s1 + $0xa48] sm:$0xf0] }
 0x15f   :  { %3057 = vmatpush.bf16.msra.mxu3 %v7296_v31  ;;  %v7573_v31 = vld [vmem:[%s14474_s1 + $0xb48] sm:$0xf0]  ;;  %v7512_v33 = vor.u32 %v9327_v25, %v7509_v35  ;;  %v9319_v25 = vld [vmem:[%s14474_s1 + $0xa84] sm:$0xf]  ;;  %v9309_v35 = vld [vmem:[%s14474_s1 + $0xa34] sm:$0xf] }
 0x160   :  { %3071 = vmatpush.bf16.msra.mxu0 %v7352_v16  ;;  %v7576_v53 = vor.u32 %v9343_v42, %v7573_v31  ;;  %v12235_v3 = vpop.f32.mrf.mxu0  ;;  %v9751_v57 = vld [vmem:[%s14476_s2] sm:$0x3]  ;;  %v9335_v31 = vld [vmem:[%s14474_s1 + $0xb04] sm:$0xf] }
 0x161   :  { %3028 = vmatpush.bf16.msrb.mxu1 %v7192_v34  ;;  %v7664_v34 = vor.u32 %v9365_v10, %v7661_v13 }
 0x162   :  { %3045 = vmatpush.bf16.msra.mxu2 %v7224_v44  ;;  %v7501_v44 = vld [vmem:[%s14474_s1 + $0xab8] sm:$0xf0] }
 0x163   :  { %3058 = vmatpush.bf16.msra.mxu3 %v7288_v60  ;;  %3072 = vmatmul.bf16.vlgmr.msra.gmra.mxu0 %v10927_v45  ;;  %v7504_v45 = vor.u32 %v9325_v47, %v7501_v44  ;;  %v9313_v60 = vld [vmem:[%s14474_s1 + $0xa54] sm:$0xf]  ;;  %v7440_v47 = vor.u32 %v9309_v35, %v7437_v21 }
 0x164   :  { %3116 = vmatpush.bf16.msrb.mxu0 %v7664_v34  ;;  %v7477_v34 = vld [vmem:[%s14474_s1 + $0xa88] sm:$0xf0] }
 0x165   :  { %3029 = vmatpush.bf16.msrb.mxu1 %v7184_v51  ;;  %3046 = vmatmul.bf16.vlgmr.msra.gmra.mxu2 %v10923_v50  ;;  %v9239_v50 = vld [vmem:[%s14474_s1 + $0x804] sm:$0xf] }
 0x166   :  { %3090 = vmatpush.bf16.msrb.mxu2 %v7536_v48  ;;  %3059 = vmatmul.bf16.vlgmr.msra.gmra.mxu3 %v10910_v41  ;;  %v9363_v41 = vld [vmem:[%s14474_s1 + $0xbe4] sm:$0xf]  ;;  %v7160_v22 = vor.u32 %v9239_v50, %v7157_v28  ;;  %v7645_v48 = vld [vmem:[%s14474_s1 + $0xbd8] sm:$0xf0]  ;;  %v7488_v50 = vor.u32 %v9321_v11, %v7485_v18  ;;  %v7448_v28 = vor.u32 %v9311_v39, %v7445_v12  ;;  %v7413_v39 = vld [vmem:[%s14474_s1 + $0xa08] sm:$0xf0] }
 0x167   :  { %3103 = vmatpush.bf16.msrb.mxu3 %v7600_v2  ;;  %v9315_v51 = vld [vmem:[%s14474_s1 + $0xa64] sm:$0xf]  ;;  %v7656_v52 = vor.u32 %v9363_v41, %v7653_v38  ;;  %v7648_v1 = vor.u32 %v9361_v40, %v7645_v48  ;;  %v7568_v2 = vor.u32 %v9341_v55, %v7565_v5  ;;  %v7552_v41 = vor.u32 %v9337_v23, %v7549_v49  ;;  %v9353_v5 = vld [vmem:[%s14474_s1 + $0xb94] sm:$0xf] }
 0x168   :  { %v7464_v32 = vor.u32 %v9315_v51, %v7461_v26  ;;  %v2839_v16 = vpop.f32.mrf.mxu2  ;;  %v9355_v38 = vld [vmem:[%s14474_s1 + $0xba4] sm:$0xf]  ;;  %v2867_v42 = vpop.f32.mrf.mxu0  ;;  %v9382_v51 = vld [vmem:[%s14477_s3 + $0x38] sm:$0xff]  ;;  %v2762_v11 = vadd.f32 %v11995_v27, %v11855_v19  ;;  %v9373_v19 = vld [vmem:[%s14474_s1 + $0xc34] sm:$0xf] }
 0x169   :  { %3030 = vmatpush.bf16.msrb.mxu1 %v7176_v37  ;;  %3117 = vmatpush.bf16.msrb.mxu0 %v7656_v52  ;;  %v9359_v37 = vld [vmem:[%s14474_s1 + $0xbc4] sm:$0xf]  ;;  %v7429_v52 = vld [vmem:[%s14474_s1 + $0xa28] sm:$0xf0]  ;;  %v7693_v27 = vld [vmem:[%s14474_s1 + $0xc38] sm:$0xf0] }
 0x16a   :  { %3091 = vmatpush.bf16.msrb.mxu2 %v7528_v20  ;;  %v7456_v20 = vor.u32 %v9313_v60, %v7453_v61  ;;  %v7640_v10 = vor.u32 %v9359_v37, %v7637_v4  ;;  %v9307_v26 = vld [vmem:[%s14474_s1 + $0xa24] sm:$0xf]  ;;  %v9381_v60 = vld [vmem:[%s14477_s3 + $0x30] sm:$0xff] }
 0x16b   :  { %3104 = vmatpush.bf16.msrb.mxu3 %v7592_v14  ;;  %v9357_v14 = vld [vmem:[%s14474_s1 + $0xbb4] sm:$0xf]  ;;  %v7432_v58 = vor.u32 %v9307_v26, %v7429_v52  ;;  %v9351_v4 = vld [vmem:[%s14474_s1 + $0xb84] sm:$0xf] }
 0x16c   :  { %v9305_v61 = vld [vmem:[%s14474_s1 + $0xa14] sm:$0xf]  ;;  %v9303_v18 = vld [vmem:[%s14474_s1 + $0xa04] sm:$0xf] }
 0x16d   :  { %3031 = vmatpush.bf16.msrb.mxu1 %v7168_v30  ;;  %3118 = vmatpush.bf16.msrb.mxu0 %v7648_v1  ;;  %v7629_v30 = vld [vmem:[%s14474_s1 + $0xbb8] sm:$0xf0]  ;;  %v7416_v12 = vor.u32 %v9303_v18, %v7413_v39  ;;  %v9369_v49 = vld [vmem:[%s14474_s1 + $0xc14] sm:$0xf] }
 0x16e   :  { %3092 = vmatpush.bf16.msrb.mxu2 %v7520_v24  ;;  %v2852_v24 = vpop.f32.mrf.mxu3  ;;  %v7632_v36 = vor.u32 %v9357_v14, %v7629_v30  ;;  %v7421_v1 = vld [vmem:[%s14474_s1 + $0xa18] sm:$0xf0]  ;;  %v9371_v14 = vld [vmem:[%s14474_s1 + $0xc24] sm:$0xf]  ;;  %v7685_v30 = vld [vmem:[%s14474_s1 + $0xc28] sm:$0xf0] }
 0x16f   :  { %3105 = vmatpush.bf16.msrb.mxu3 %v7584_v59  ;;  %v525_v59 = vperm.slane %v9751_v57, 1  ;;  %v7688_v23 = vor.u32 %v9371_v14, %v7685_v30 }
 0x170   :  { %v2841_v55 = vpop.f32.mrf.mxu2 }
 0x171   :  { %3032 = vmatpush.bf16.msrb.mxu1 %v7160_v22  ;;  %3119 = vmatpush.bf16.msrb.mxu0 %v7640_v10  ;;  %v7621_v22 = vld [vmem:[%s14474_s1 + $0xba8] sm:$0xf0]  ;;  %v2826_v44 = vpop.f32.mrf.mxu1  ;;  %v2775_v10 = vadd.f32 %v12006_v54, %v2762_v11  ;;  %v9378_v54 = vld [vmem:[%s14477_s3 + $0x18] sm:$0xff] }
 0x172   :  { %3093 = vmatpush.bf16.msrb.mxu2 %v7512_v33  ;;  %v7541_v33 = vld [vmem:[%s14474_s1 + $0xb08] sm:$0xf0]  ;;  %v2827_v40 = vadd.f32 %v2826_v44, %v525_v59  ;;  %v9375_v59 = vld [vmem:[%s14477_s3] sm:$0xff] }
 0x173   :  { %3106 = vmatpush.bf16.msrb.mxu3 %v7576_v53  ;;  %v7624_v53 = vor.u32 %v9355_v38, %v7621_v22  ;;  %v7544_v48 = vor.u32 %v9335_v31, %v7541_v33 }
 0x174   :  { %3033 = vmatmul.bf16.vlgmr.msrb.gmra.mxu1 %v10906_v62  ;;  %v7557_v62 = vld [vmem:[%s14474_s1 + $0xb28] sm:$0xf0] }
 0x175   :  { %3077 = vmatpush.bf16.msra.mxu1 %v7472_v46  ;;  %v7560_v13 = vor.u32 %v9339_v43, %v7557_v62  ;;  %v7480_v46 = vor.u32 %v9319_v25, %v7477_v34  ;;  %3120 = vmatpush.bf16.msrb.mxu0 %v7632_v36  ;;  %v7605_v43 = vld [vmem:[%s14474_s1 + $0xb88] sm:$0xf0]  ;;  %v9367_v34 = vld [vmem:[%s14474_s1 + $0xc04] sm:$0xf] }
 0x176   :  { %3094 = vmatpush.bf16.msrb.mxu2 %v7504_v45  ;;  %v7613_v45 = vld [vmem:[%s14474_s1 + $0xb98] sm:$0xf0]  ;;  %v2854_v56 = vpop.f32.mrf.mxu3 }
 0x177   :  { %3107 = vmatpush.bf16.msrb.mxu3 %v7568_v2  ;;  %v7616_v37 = vor.u32 %v9353_v5, %v7613_v45 }
 0x179   :  { %3078 = vmatpush.bf16.msra.mxu1 %v7464_v32  ;;  %v2840_v32 = vadd.f32 %v2839_v16, %v2827_v40  ;;  %3121 = vmatpush.bf16.msrb.mxu0 %v7624_v53  ;;  %v2788_v16 = vadd.f32 %v12039_v9, %v2775_v10 }
 0x17a   :  { %3095 = vmatpush.bf16.msrb.mxu2 %v7496_v8  ;;  %v7424_v8 = vor.u32 %v9305_v61, %v7421_v1 }
 0x17b   :  { %3108 = vmatpush.bf16.msrb.mxu3 %v7560_v13  ;;  %v2853_v2 = vadd.f32 %v2852_v24, %v2840_v32  ;;  %v9379_v13 = vld [vmem:[%s14477_s3 + $0x20] sm:$0xff]  ;;  %v7677_v24 = vld [vmem:[%s14474_s1 + $0xc18] sm:$0xf0]  ;;  %v2801_v9 = vadd.f32 %v12059_v17, %v2788_v16  ;;  %v7669_v17 = vld [vmem:[%s14474_s1 + $0xc08] sm:$0xf0] }
 0x17c   :  { %v7680_v25 = vor.u32 %v9369_v49, %v7677_v24  ;;  %v7672_v21 = vor.u32 %v9367_v34, %v7669_v17  ;;  %v9385_v16 = vld [vmem:[%s14477_s3 + $0x50] sm:$0xff]  ;;  %v9383_v24 = vld [vmem:[%s14477_s3 + $0x40] sm:$0xff] }
 0x17d   :  { %3079 = vmatpush.bf16.msra.mxu1 %v7456_v20  ;;  %v2866_v62 = vadd.f32 %v12235_v3, %v2853_v2  ;;  %v2828_v20 = vpop.f32.mrf.mxu1  ;;  %3122 = vmatpush.bf16.msrb.mxu0 %v7616_v37  ;;  %v7608_v3 = vor.u32 %v9351_v4, %v7605_v43 }
 0x17e   :  { %3096 = vmatpush.bf16.msrb.mxu2 %v7488_v50 }
 0x17f   :  { %3109 = vmatpush.bf16.msrb.mxu3 %v7552_v41 }
 0x180   :  { %v2917_v50 = vpop.f32.mrf.mxu0 }
 0x181   :  { %3080 = vmatpush.bf16.msra.mxu1 %v7448_v28  ;;  %3123 = vmatpush.bf16.msrb.mxu0 %v7608_v3  ;;  %v2814_v28 = vadd.f32 %v12115_v63, %v2801_v9  ;;  %v9376_v63 = vld [vmem:[%s14477_s3 + $0x8] sm:$0xff] }
 0x182   :  { %3097 = vmatpush.bf16.msrb.mxu2 %v7480_v46 }
 0x183   :  { %3110 = vmatpush.bf16.msrb.mxu3 %v7544_v48  ;;  %9691 = vtanh.f32 %v2814_v28 }
 0x184   :  { %3124 = vmatmul.bf16.vlgmr.msrb.gmra.mxu0 %v11131_v15  ;;  %v9377_v15 = vld [vmem:[%s14477_s3 + $0x10] sm:$0xff] }
 0x185   :  { %3081 = vmatpush.bf16.msra.mxu1 %v7440_v47  ;;  %3098 = vmatmul.bf16.vlgmr.msrb.gmra.mxu2 %v11118_v6  ;;  %v9380_v6 = vld [vmem:[%s14477_s3 + $0x28] sm:$0xff] }
 0x186   :  { %3258 = vmatpush.bf16.msra.mxu2 %v9382_v51  ;;  %3111 = vmatmul.bf16.vlgmr.msrb.gmra.mxu3 %v11120_v7  ;;  %v7696_v7 = vor.u32 %v9373_v19, %v7693_v27 }
 0x188   :  { %v2891_v35 = vpop.f32.mrf.mxu2  ;;  %v2919_v36 = vpop.f32.mrf.mxu0 }
 0x189   :  { %3082 = vmatpush.bf16.msra.mxu1 %v7432_v58  ;;  %v9692_v22 = vpop.eup %9691 }
 0x18a   :  { %3259 = vmatpush.bf16.msra.mxu2 %v9381_v60  ;;  %v3144_v46 = vpack.c.bf16 %v9692_v22, %v9692_v22 }
 0x18d   :  { %3083 = vmatpush.bf16.msra.mxu1 %v7424_v8 }
 0x18e   :  { %3260 = vmatpush.bf16.msra.mxu2 %v9380_v6  ;;  %v3170_v6 = vld [vmem:[%s14477_s3 + $0x60] sm:$0x3] }
 0x18f   :  { %v3224_v39 = vunpack.c.l.b16 %v3170_v6 }
 0x190   :  { %v2893_v38 = vpop.f32.mrf.mxu2 }
 0x191   :  { %3084 = vmatpush.bf16.msra.mxu1 %v7416_v12  ;;  %v2878_v57 = vpop.f32.mrf.mxu1  ;;  %v3237_v12 = vpack.c.b16 %v3224_v39, %v3224_v39 }
 0x192   :  { %3261 = vmatpush.bf16.msra.mxu2 %v9379_v13  ;;  %v2879_v41 = vadd.f32 %v2878_v57, %v2866_v62  ;;  %v9386_v13 = vld [vmem:[%s14477_s3 + $0x58] sm:$0xff] }
 0x193   :  { %v3256_v10 = vsel %vm3254_vm1, %v3237_v12, 0 }
 0x194   :  { %3085 = vmatmul.bf16.vlgmr.msra.gmra.mxu1 %v11110_v0  ;;  %v2904_v0 = vpop.f32.mrf.mxu3  ;;  %v2892_v42 = vadd.f32 %v2891_v35, %v2879_v41  ;;  %3274 = vmatpush.bf16.msra.mxu3 %v3256_v10  ;;  %v8160_v10 = vld [vmem:[%s14480_s7 + $0x320] sm:$0xf] }
 0x195   :  { %3133 = vmatpush.bf16.msrb.mxu1 %v7696_v7 }
 0x196   :  { %3262 = vmatpush.bf16.msra.mxu2 %v9378_v54  ;;  %v2905_v33 = vadd.f32 %v2904_v0, %v2892_v42 }
 0x198   :  { %v2918_v47 = vadd.f32 %v2917_v50, %v2905_v33  ;;  %3275 = vmatpush.bf16.msra.mxu3 %v9386_v13  ;;  %v9501_v13 = vld [vmem:[%s14480_s7 + $0x380] sm:$0xf0] }
 0x199   :  { %3134 = vmatpush.bf16.msrb.mxu1 %v7688_v23  ;;  %v2880_v44 = vpop.f32.mrf.mxu1  ;;  %v9384_v23 = vld [vmem:[%s14477_s3 + $0x48] sm:$0xff] }
 0x19a   :  { %3263 = vmatpush.bf16.msra.mxu2 %v9377_v15  ;;  %v7750_v44 = vld [vmem:[%s14479_s5] sm:$0xf] }
 0x19c   :  { %v2906_v31 = vpop.f32.mrf.mxu3  ;;  %3276 = vmatpush.bf16.msra.mxu3 %v9385_v16 }
 0x19d   :  { %3135 = vmatpush.bf16.msrb.mxu1 %v7680_v25 }
 0x19e   :  { %3264 = vmatpush.bf16.msra.mxu2 %v9376_v63 }
 0x1a0   :  { %v2969_v51 = vpop.f32.mrf.mxu0  ;;  %3277 = vmatpush.bf16.msra.mxu3 %v9384_v23  ;;  %v8060_v23 = vld [vmem:[%s14480_s7 + $0x258] sm:$0xf] }
 0x1a1   :  { %3136 = vmatpush.bf16.msrb.mxu1 %v7672_v21 }
 0x1a2   :  { %3265 = vmatpush.bf16.msra.mxu2 %v9375_v59 }
 0x1a4   :  { %7698 = vmatmul.msk.bf16.vlgmr.msrb.gmra.mxu1 %vm2488_vm0, %v11227_v29  ;;  %3278 = vmatpush.bf16.msra.mxu3 %v9383_v24  ;;  %v8162_v24 = vld [vmem:[%s14480_s7 + $0x384] sm:$0xf0] }
 0x1a5   :  { %3266 = vmatmul.bf16.vlgmr.msra.gmra.mxu2 %v3144_v46 }
 0x1a8   :  { %v2943_v26 = vpop.f32.mrf.mxu2  ;;  %v2971_v40 = vpop.f32.mrf.mxu0 }
 0x1a9   :  { %v2956_v52 = vpop.f32.mrf.mxu3 }
 0x1b0   :  { %v2945_v55 = vpop.f32.mrf.mxu2 }
 0x1b1   :  { %v2930_v53 = vpop.f32.mrf.mxu1  ;;  %v2958_v45 = vpop.f32.mrf.mxu3  ;;  %v9576_v55 = vld [vmem:[%s14480_s7 + $0x5d8] sm:$0xf0] }
 0x1b2   :  { %v2931_v48 = vadd.f32 %v2930_v53, %v2918_v47  ;;  %v7752_v53 = vld [vmem:[%s14479_s5 + $0x8] sm:$0xf0] }
 0x1b4   :  { %v2944_v5 = vadd.f32 %v2943_v26, %v2931_v48  ;;  %v9387_v26 = vld [vmem:[%s14479_s5 + $0x4] sm:$0xf]  ;;  %v8460_v48 = vld [vmem:[%s14480_s7 + $0x578] sm:$0xf] }
 0x1b5   :  { %v7755_v40 = vor.u32 %v9387_v26, %v7752_v53  ;;  %v8461_v45 = vor.u32 %v9576_v55, %v8460_v48  ;;  %v7860_v53 = vld [vmem:[%s14480_s7 + $0xc8] sm:$0xf]  ;;  %v7962_v48 = vld [vmem:[%s14480_s7 + $0x1f4] sm:$0xf0] }
 0x1b6   :  { %v2957_v32 = vadd.f32 %v2956_v52, %v2944_v5  ;;  %v8360_v5 = vld [vmem:[%s14480_s7 + $0x4b0] sm:$0xf] }
 0x1b7   :  { %3328 = vmatpush.bf16.msra.mxu1 %v7755_v40  ;;  %5374 = vmatpush.bf16.msrb.mxu3 %v8461_v45  ;;  %v9439_v40 = vld [vmem:[%s14480_s7 + $0x194] sm:$0xf] }
 0x1b8   :  { %v2970_v56 = vadd.f32 %v2969_v51, %v2957_v32  ;;  %v9388_v51 = vld [vmem:[%s14479_s5 + $0x4] sm:$0xf0]  ;;  %v9551_v32 = vld [vmem:[%s14480_s7 + $0x510] sm:$0xf0] }
 0x1b9   :  { %v2932_v58 = vpop.f32.mrf.mxu1  ;;  %v7751_v52 = vor.u32 %v9388_v51, %v7750_v44  ;;  %v8662_v44 = vld [vmem:[%s14480_s7 + $0x76c] sm:$0xf0] }
 0x1ba   :  { %v8361_v58 = vor.u32 %v9551_v32, %v8360_v5  ;;  %v9589_v32 = vld [vmem:[%s14480_s7 + $0x644] sm:$0xf] }
 0x1bb   :  { %3315 = vmatpush.bf16.msra.mxu0 %v7751_v52 }
 0x1bc   :  { %5375 = vmatpush.bf16.msrb.mxu3 %v8361_v58 }
 0x1c0   :  { %v3021_v61 = vpop.f32.mrf.mxu0 }
 0x1c8   :  { %v2995_v60 = vpop.f32.mrf.mxu2  ;;  %v3023_v37 = vpop.f32.mrf.mxu0 }
 0x1c9   :  { %v3008_v1 = vpop.f32.mrf.mxu3  ;;  %v9526_v37 = vld [vmem:[%s14480_s7 + $0x448] sm:$0xf0] }
 0x1d0   :  { %v2997_v29 = vpop.f32.mrf.mxu2 }
 0x1d1   :  { %v2982_v2 = vpop.f32.mrf.mxu1  ;;  %v3010_v4 = vpop.f32.mrf.mxu3  ;;  %v8260_v29 = vld [vmem:[%s14480_s7 + $0x3e8] sm:$0xf] }
 0x1d2   :  { %v2983_v19 = vadd.f32 %v2982_v2, %v2970_v56  ;;  %v3650_v56 = vld [vmem:[%s14480_s7 + $0x960] sm:$0x33]  ;;  %v8261_v39 = vor.u32 %v9526_v37, %v8260_v29  ;;  %v9414_v29 = vld [vmem:[%s14480_s7 + $0xcc] sm:$0xf]  ;;  %v7862_v37 = vld [vmem:[%s14480_s7 + $0x12c] sm:$0xf0] }
 0x1d3   :  { %v4647_v2 = vunpack.c.h.b16 %v3650_v56 }
 0x1d4   :  { %v2996_v7 = vadd.f32 %v2995_v60, %v2983_v19  ;;  %v4646_v60 = vunpack.c.l.b16 %v3650_v56  ;;  %5376 = vmatpush.bf16.msrb.mxu3 %v8261_v39  ;;  %v8562_v56 = vld [vmem:[%s14480_s7 + $0x6a4] sm:$0xf0] }
 0x1d5   :  { %v4972_v6 = vpack.c.b16 %v4647_v2, %v4647_v2  ;;  %v8470_v39 = vld [vmem:[%s14480_s7 + $0x5e4] sm:$0xf0] }
 0x1d6   :  { %v3009_v30 = vadd.f32 %v3008_v1, %v2996_v7  ;;  %v8462_v1 = vld [vmem:[%s14480_s7 + $0x5dc] sm:$0xf0] }
 0x1d7   :  { %v5303_v12 = vsel %vm3254_vm1, %v4972_v6, 0  ;;  %v9577_v6 = vld [vmem:[%s14480_s7 + $0x5e0] sm:$0xf0] }
 0x1d8   :  { %v3022_v54 = vadd.f32 %v3021_v61, %v3009_v30  ;;  %v9564_v61 = vld [vmem:[%s14480_s7 + $0x57c] sm:$0xf]  ;;  %5416 = vmatpush.bf16.msrb.mxu2 %v5303_v12  ;;  %v9651_v30 = vld [vmem:[%s14480_s7 + $0x830] sm:$0xf0] }
 0x1d9   :  { %v2984_v43 = vpop.f32.mrf.mxu1  ;;  %v8465_v4 = vor.u32 %v9564_v61, %v8462_v1  ;;  %v7965_v61 = vor.u32 %v9439_v40, %v7962_v48  ;;  %v8070_v40 = vld [vmem:[%s14480_s7 + $0x2c4] sm:$0xf0] }
 0x1da   :  { %v8860_v43 = vld [vmem:[%s14480_s7 + $0x898] sm:$0xf] }
 0x1db   :  { %5400 = vmatpush.bf16.msrb.mxu1 %v8465_v4  ;;  %v8565_v4 = vor.u32 %v9589_v32, %v8562_v56  ;;  %v9652_v56 = vld [vmem:[%s14480_s7 + $0x838] sm:$0xf0] }
 0x1e0   :  { %v3073_v20 = vpop.f32.mrf.mxu0 }
 0x1e8   :  { %v3047_v62 = vpop.f32.mrf.mxu2  ;;  %v3075_v3 = vpop.f32.mrf.mxu0 }
 0x1e9   :  { %v3060_v8 = vpop.f32.mrf.mxu3  ;;  %v8262_v3 = vld [vmem:[%s14480_s7 + $0x44c] sm:$0xf0] }
 0x1f0   :  { %v3049_v18 = vpop.f32.mrf.mxu2 }
 0x1f1   :  { %v3034_v11 = vpop.f32.mrf.mxu1  ;;  %v3062_v27 = vpop.f32.mrf.mxu3 }
 0x1f2   :  { %v3035_v49 = vadd.f32 %v3034_v11, %v3022_v54  ;;  %v8362_v11 = vld [vmem:[%s14480_s7 + $0x514] sm:$0xf0]  ;;  %v9514_v27 = vld [vmem:[%s14480_s7 + $0x3ec] sm:$0xf]  ;;  %v8161_v54 = vor.u32 %v9501_v13, %v8160_v10  ;;  %v7762_v10 = vld [vmem:[%s14480_s7 + $0x64] sm:$0xf0] }
 0x1f3   :  { %v8265_v16 = vor.u32 %v9514_v27, %v8262_v3  ;;  %v9389_v27 = vld [vmem:[%s14480_s7 + $0x4] sm:$0xf]  ;;  %v8868_v13 = vld [vmem:[%s14480_s7 + $0x8a0] sm:$0xf] }
 0x1f4   :  { %v3048_v9 = vadd.f32 %v3047_v62, %v3035_v49  ;;  %v4971_v62 = vpack.c.b16 %v4646_v60, %v4646_v60  ;;  %v9489_v49 = vld [vmem:[%s14480_s7 + $0x324] sm:$0xf]  ;;  %5377 = vmatpush.bf16.msrb.mxu3 %v8161_v54  ;;  %v3651_v60 = vld [vmem:[%s14480_s7 + $0x968] sm:$0x33] }
 0x1f5   :  { %v4648_v1 = vunpack.c.l.b16 %v3651_v60 }
 0x1f6   :  { %v3061_v15 = vadd.f32 %v3060_v8, %v3048_v9  ;;  %v9676_v8 = vld [vmem:[%s14480_s7 + $0x8f8] sm:$0xf0]  ;;  %v5300_v19 = vsel %vm3254_vm1, %v4971_v62, 0  ;;  %v9401_v62 = vld [vmem:[%s14480_s7 + $0x60] sm:$0xf0] }
 0x1f7   :  { %5390 = vmatpush.bf16.msrb.mxu0 %v5300_v19  ;;  %v8861_v7 = vor.u32 %v9676_v8, %v8860_v43  ;;  %v9476_v9 = vld [vmem:[%s14480_s7 + $0x2b8] sm:$0xf0]  ;;  %v7760_v43 = vld [vmem:[%s14480_s7] sm:$0xf]  ;;  %v4973_v8 = vpack.c.b16 %v4648_v1, %v4648_v1  ;;  %v7865_v19 = vor.u32 %v9414_v29, %v7862_v37 }
 0x1f8   :  { %v3074_v17 = vadd.f32 %v3073_v20, %v3061_v15  ;;  %v9539_v20 = vld [vmem:[%s14480_s7 + $0x4b4] sm:$0xf]  ;;  %v8862_v15 = vld [vmem:[%s14480_s7 + $0x8fc] sm:$0xf0]  ;;  %v7761_v12 = vor.u32 %v9401_v62, %v7760_v43  ;;  %v8668_v62 = vld [vmem:[%s14480_s7 + $0x710] sm:$0xf] }
 0x1f9   :  { %v3036_v14 = vpop.f32.mrf.mxu1  ;;  %v8365_v18 = vor.u32 %v9539_v20, %v8362_v11  ;;  %v4649_v20 = vunpack.c.h.b16 %v3651_v60  ;;  %v8468_v11 = vld [vmem:[%s14480_s7 + $0x580] sm:$0xf]  ;;  %v5306_v3 = vsel %vm3254_vm1, %v4973_v8, 0  ;;  %v9427_v43 = vld [vmem:[%s14480_s7 + $0x130] sm:$0xf0] }
 0x1fa   :  { %v8760_v14 = vld [vmem:[%s14480_s7 + $0x7d0] sm:$0xf]  ;;  %v8469_v54 = vor.u32 %v9577_v6, %v8468_v11  ;;  %v7970_v60 = vld [vmem:[%s14480_s7 + $0x1fc] sm:$0xf0]  ;;  %v9415_v11 = vld [vmem:[%s14480_s7 + $0xd4] sm:$0xf] }
 0x1fb   :  { %5401 = vmatpush.bf16.msrb.mxu1 %v8365_v18  ;;  %5391 = vmatpush.bf16.msrb.mxu0 %v8861_v7  ;;  %v9565_v18 = vld [vmem:[%s14480_s7 + $0x584] sm:$0xf]  ;;  %v8770_v29 = vld [vmem:[%s14480_s7 + $0x83c] sm:$0xf0]  ;;  %v7870_v6 = vld [vmem:[%s14480_s7 + $0x134] sm:$0xf0] }
 0x1fc   :  { %v9677_v7 = vld [vmem:[%s14480_s7 + $0x900] sm:$0xf0] }
 0x1ff   :  { %5402 = vmatpush.bf16.msrb.mxu1 %v8265_v16 }
 0x201   :  { %v3125_v25 = vpop.f32.mrf.mxu0 }
 0x208   :  { %v3099_v50 = vpop.f32.mrf.mxu2 }
 0x209   :  { %v3112_v28 = vpop.f32.mrf.mxu3  ;;  %v3127_v36 = vpop.f32.mrf.mxu0 }
 0x20a   :  { %v9464_v36 = vld [vmem:[%s14480_s7 + $0x25c] sm:$0xf] }
 0x210   :  { %v3101_v35 = vpop.f32.mrf.mxu2 }
 0x211   :  { %v3086_v34 = vpop.f32.mrf.mxu1  ;;  %v3114_v63 = vpop.f32.mrf.mxu3  ;;  %v9689_v35 = vld [vmem:[%s14478_s4] ss:$0 sm:$0xff] }
 0x212   :  { %v3087_v0 = vadd.f32 %v3086_v34, %v3074_v17  ;;  %v9626_v34 = vld [vmem:[%s14480_s7 + $0x768] sm:$0xf0]  ;;  %v9639_v63 = vld [vmem:[%s14480_s7 + $0x7d4] sm:$0xf] }
 0x214   :  { %v3100_v21 = vadd.f32 %v3099_v50, %v3087_v0  ;;  %v8761_v50 = vor.u32 %v9651_v30, %v8760_v14  ;;  %v8165_v0 = vor.u32 %v9489_v49, %v8162_v24  ;;  %v4974_v30 = vpack.c.b16 %v4649_v20, %v4649_v20  ;;  %v8368_v49 = vld [vmem:[%s14480_s7 + $0x4b8] sm:$0xf]  ;;  %v9627_v20 = vld [vmem:[%s14480_s7 + $0x770] sm:$0xf0] }
 0x216   :  { %v3113_v59 = vadd.f32 %v3112_v28, %v3100_v21  ;;  %v9664_v28 = vld [vmem:[%s14480_s7 + $0x89c] sm:$0xf]  ;;  %v8061_v21 = vor.u32 %v9476_v9, %v8060_v23  ;;  %5392 = vmatpush.bf16.msrb.mxu0 %v8761_v50  ;;  %5403 = vmatpush.bf16.msrb.mxu1 %v8165_v0  ;;  %v8473_v23 = vor.u32 %v9565_v18, %v8470_v39 }
 0x217   :  { %v8865_v17 = vor.u32 %v9664_v28, %v8862_v15  ;;  %v9552_v9 = vld [vmem:[%s14480_s7 + $0x518] sm:$0xf0]  ;;  %v8370_v28 = vld [vmem:[%s14480_s7 + $0x51c] sm:$0xf0]  ;;  %v7765_v15 = vor.u32 %v9389_v27, %v7762_v10  ;;  %v8669_v18 = vor.u32 %v9627_v20, %v8668_v62  ;;  %v7873_v39 = vor.u32 %v9415_v11, %v7870_v6  ;;  %v8670_v27 = vld [vmem:[%s14480_s7 + $0x774] sm:$0xf0] }
 0x218   :  { %v3126_v41 = vadd.f32 %v3125_v25, %v3113_v59  ;;  %v8660_v25 = vld [vmem:[%s14480_s7 + $0x708] sm:$0xf]  ;;  %v8762_v59 = vld [vmem:[%s14480_s7 + $0x834] sm:$0xf0]  ;;  %5378 = vmatpush.bf16.msrb.mxu3 %v8061_v21  ;;  %v9540_v50 = vld [vmem:[%s14480_s7 + $0x4bc] sm:$0xf]  ;;  %v8369_v0 = vor.u32 %v9552_v9, %v8368_v49 }
 0x219   :  { %v3088_v57 = vpop.f32.mrf.mxu1  ;;  %5417 = vmatpush.bf16.msrb.mxu2 %v8865_v17  ;;  %v9665_v17 = vld [vmem:[%s14480_s7 + $0x8a4] sm:$0xf]  ;;  %v8268_v21 = vld [vmem:[%s14480_s7 + $0x3f0] sm:$0xf]  ;;  %v9402_v10 = vld [vmem:[%s14480_s7 + $0x68] sm:$0xf0] }
 0x21a   :  { %v8062_v57 = vld [vmem:[%s14480_s7 + $0x2bc] sm:$0xf0]  ;;  %v9590_v49 = vld [vmem:[%s14480_s7 + $0x64c] sm:$0xf]  ;;  %v9516_v62 = vld [vmem:[%s14480_s7 + $0x3fc] sm:$0xf] }
 0x21b   :  { %v8065_v51 = vor.u32 %v9464_v36, %v8062_v57  ;;  %v9527_v36 = vld [vmem:[%s14480_s7 + $0x450] sm:$0xf0]  ;;  %v9641_v20 = vld [vmem:[%s14480_s7 + $0x7e4] sm:$0xf]  ;;  %v8778_v11 = vld [vmem:[%s14480_s7 + $0x844] sm:$0xf0] }
 0x21c   :  { %v9515_v57 = vld [vmem:[%s14480_s7 + $0x3f4] sm:$0xf] }
 0x21d   :  { %5404 = vmatpush.bf16.msrb.mxu1 %v8065_v51 }
 0x221   :  { %v3138_v38 = vpop.f32.mrf.mxu1  ;;  %5405 = vmatpush.bf16.msrb.mxu1 %v7965_v61 }
 0x222   :  { %v3139_v22 = vadd.f32 %v3138_v38, %v3126_v41  ;;  %v7960_v41 = vld [vmem:[%s14480_s7 + $0x190] sm:$0xf]  ;;  %v9451_v38 = vld [vmem:[%s14480_s7 + $0x1f0] sm:$0xf0] }
 0x223   :  { %v7961_v52 = vor.u32 %v9451_v38, %v7960_v41  ;;  %v8269_v38 = vor.u32 %v9527_v36, %v8268_v21 }
 0x224   :  { %9693 = vtanh.f32 %v3139_v22  ;;  %v8661_v22 = vor.u32 %v9626_v34, %v8660_v25  ;;  %v8869_v25 = vor.u32 %v9677_v7, %v8868_v13  ;;  %v5309_v34 = vsel %vm3254_vm1, %v4974_v30, 0  ;;  %v8568_v13 = vld [vmem:[%s14480_s7 + $0x648] sm:$0xf]  ;;  %v9390_v30 = vld [vmem:[%s14480_s7 + $0xc] sm:$0xf] }
 0x225   :  { %5379 = vmatpush.bf16.msrb.mxu3 %v7961_v52  ;;  %5406 = vmatpush.bf16.msrb.mxu1 %v7865_v19  ;;  %v9477_v52 = vld [vmem:[%s14480_s7 + $0x2c0] sm:$0xf0]  ;;  %v9615_v19 = vld [vmem:[%s14480_s7 + $0x714] sm:$0xf] }
 0x226   :  { %5393 = vmatpush.bf16.msrb.mxu0 %v8661_v22 }
 0x228   :  { %v12401_v42 = vpop.f32.mrf.mxu2 }
 0x229   :  { %v3140_v31 = vpop.f32.mrf.mxu1  ;;  %v3268_v26 = vadd.f32 %v9689_v35, %v12401_v42  ;;  %v9426_v42 = vld [vmem:[%s14480_s7 + $0x128] sm:$0xf0]  ;;  %v8870_v35 = vld [vmem:[%s14480_s7 + $0x904] sm:$0xf0]  ;;  %5407 = vmatpush.bf16.msrb.mxu1 %v7765_v15 }
 0x22a   :  { %v9694_v33 = vpop.eup %9693  ;;  %v8560_v31 = vld [vmem:[%s14480_s7 + $0x640] sm:$0xf]  ;;  %v7861_v2 = vor.u32 %v9426_v42, %v7860_v53  ;;  %v8873_v41 = vor.u32 %v9665_v17, %v8870_v35  ;;  %v9465_v53 = vld [vmem:[%s14480_s7 + $0x264] sm:$0xf]  ;;  %v9452_v42 = vld [vmem:[%s14480_s7 + $0x1f8] sm:$0xf0] }
 0x22b   :  { %v3145_v46 = vpack.c.bf16 %v9694_v33, %v9694_v33  ;;  %v8765_v33 = vor.u32 %v9639_v63, %v8762_v59  ;;  %v8373_v63 = vor.u32 %v9540_v50, %v8370_v28  ;;  %v8270_v59 = vld [vmem:[%s14480_s7 + $0x454] sm:$0xf0]  ;;  %v3288_v50 = vld [vmem:[%s14481_s6] sm:$0x3] }
 0x22c   :  { %5380 = vmatpush.bf16.msrb.mxu3 %v7861_v2  ;;  %v8273_v22 = vor.u32 %v9515_v57, %v8270_v59  ;;  %v9640_v2 = vld [vmem:[%s14480_s7 + $0x7dc] sm:$0xf]  ;;  %v3290_v28 = vperm.slane %v3288_v50, 0  ;;  %v3291_v15 = vperm.slane %v3288_v50, 1  ;;  %v8476_v59 = vld [vmem:[%s14480_s7 + $0x588] sm:$0xf] }
 0x22d   :  { %7747 = vmatmul.msk.bf16.vlgmr.msra.gmra.mxu3 %vm3250_vm2, %v3145_v46  ;;  %v9601_v46 = vld [vmem:[%s14480_s7 + $0x6a0] sm:$0xf0]  ;;  %5418 = vmatpush.bf16.msrb.mxu2 %v8765_v33  ;;  %v9502_v33 = vld [vmem:[%s14480_s7 + $0x388] sm:$0xf0]  ;;  %v8773_v37 = vor.u32 %v9640_v2, %v8770_v29  ;;  %v9528_v2 = vld [vmem:[%s14480_s7 + $0x458] sm:$0xf0] }
 0x22e   :  { %v8561_v45 = vor.u32 %v9601_v46, %v8560_v31  ;;  %v8168_v31 = vld [vmem:[%s14480_s7 + $0x328] sm:$0xf]  ;;  %v9490_v46 = vld [vmem:[%s14480_s7 + $0x32c] sm:$0xf] }
 0x230   :  { %v3269_v47 = vpop.f32.mrf.mxu2  ;;  %5394 = vmatpush.bf16.msrb.mxu0 %v8561_v45  ;;  %5381 = vmatpush.bf16.msrb.mxu3 %v7761_v12  ;;  %v8768_v45 = vld [vmem:[%s14480_s7 + $0x7d8] sm:$0xf]  ;;  %v7768_v12 = vld [vmem:[%s14480_s7 + $0x8] sm:$0xf] }
 0x231   :  { %v9614_v47 = vld [vmem:[%s14480_s7 + $0x70c] sm:$0xf]  ;;  %v8769_v61 = vor.u32 %v9652_v56, %v8768_v45  ;;  %v7769_v7 = vor.u32 %v9402_v10, %v7768_v12  ;;  %v9541_v45 = vld [vmem:[%s14480_s7 + $0x4c4] sm:$0xf]  ;;  %v8676_v12 = vld [vmem:[%s14480_s7 + $0x718] sm:$0xf] }
 0x232   :  { %v8665_v55 = vor.u32 %v9614_v47, %v8662_v44  ;;  %v8170_v47 = vld [vmem:[%s14480_s7 + $0x38c] sm:$0xf0]  ;;  %v8169_v44 = vor.u32 %v9502_v33, %v8168_v31  ;;  %v9566_v31 = vld [vmem:[%s14480_s7 + $0x58c] sm:$0xf]  ;;  %v9628_v10 = vld [vmem:[%s14480_s7 + $0x778] sm:$0xf0] }
 0x233   :  { %v8173_v51 = vor.u32 %v9490_v46, %v8170_v47  ;;  %v8478_v33 = vld [vmem:[%s14480_s7 + $0x5ec] sm:$0xf0]  ;;  %v9666_v56 = vld [vmem:[%s14480_s7 + $0x8ac] sm:$0xf] }
 0x234   :  { %5419 = vmatpush.bf16.msrb.mxu2 %v8665_v55  ;;  %5452 = vmatpush.bf16.msra.mxu3 %v8473_v23  ;;  %v8073_v55 = vor.u32 %v9465_v53, %v8070_v40  ;;  %v8376_v53 = vld [vmem:[%s14480_s7 + $0x4c0] sm:$0xf]  ;;  %v9553_v40 = vld [vmem:[%s14480_s7 + $0x520] sm:$0xf0] }
 0x238   :  { %5420 = vmatpush.bf16.msrb.mxu2 %v8565_v4  ;;  %5453 = vmatpush.bf16.msra.mxu3 %v8373_v63  ;;  %v7868_v4 = vld [vmem:[%s14480_s7 + $0xd0] sm:$0xf] }
 0x239   :  { %v7869_v8 = vor.u32 %v9427_v43, %v7868_v4  ;;  %v8776_v4 = vld [vmem:[%s14480_s7 + $0x7e0] sm:$0xf]  ;;  %v9653_v43 = vld [vmem:[%s14480_s7 + $0x840] sm:$0xf0] }
 0x23c   :  { %5442 = vmatpush.bf16.msra.mxu2 %v5306_v3  ;;  %5454 = vmatpush.bf16.msra.mxu3 %v8273_v22  ;;  %v8673_v3 = vor.u32 %v9615_v19, %v8670_v27  ;;  %v9503_v19 = vld [vmem:[%s14480_s7 + $0x390] sm:$0xf0] }
 0x240   :  { %5443 = vmatpush.bf16.msra.mxu2 %v8869_v25  ;;  %5455 = vmatpush.bf16.msra.mxu3 %v8173_v51  ;;  %v3652_v25 = vld [vmem:[%s14480_s7 + $0x970] sm:$0x33] }
 0x241   :  { %v4650_v63 = vunpack.c.l.b16 %v3652_v25  ;;  %v4651_v21 = vunpack.c.h.b16 %v3652_v25  ;;  %v8078_v25 = vld [vmem:[%s14480_s7 + $0x2cc] sm:$0xf0] }
 0x243   :  { %v4975_v36 = vpack.c.b16 %v4650_v63, %v4650_v63  ;;  %v4976_v57 = vpack.c.b16 %v4651_v21, %v4651_v21  ;;  %v9567_v63 = vld [vmem:[%s14480_s7 + $0x594] sm:$0xf]  ;;  %v8486_v21 = vld [vmem:[%s14480_s7 + $0x5f4] sm:$0xf0] }
 0x244   :  { %5456 = vmatpush.bf16.msra.mxu3 %v8073_v55  ;;  %5444 = vmatpush.bf16.msra.mxu2 %v8769_v61  ;;  %v8481_v55 = vor.u32 %v9566_v31, %v8478_v33  ;;  %v9441_v31 = vld [vmem:[%s14480_s7 + $0x1a4] sm:$0xf] }
 0x248   :  { %5445 = vmatpush.bf16.msra.mxu2 %v8669_v18  ;;  %v8777_v18 = vor.u32 %v9653_v43, %v8776_v4 }
 0x2b0   :  { %v3280_v5 = vpop.f32.mrf.mxu3 }
 0x2b1   :  { %v3281_v58 = vadd.f32 %v3280_v5, %v3268_v26  ;;  %v8068_v26 = vld [vmem:[%s14480_s7 + $0x260] sm:$0xf]  ;;  %v7968_v5 = vld [vmem:[%s14480_s7 + $0x198] sm:$0xf] }
 0x2b2   :  { %v8069_v48 = vor.u32 %v9477_v52, %v8068_v26  ;;  %v7969_v32 = vor.u32 %v9452_v42, %v7968_v5  ;;  %v5312_v26 = vsel %vm3254_vm1, %v4975_v36, 0  ;;  %v5315_v52 = vsel %vm3254_vm1, %v4976_v57, 0  ;;  %v8876_v5 = vld [vmem:[%s14480_s7 + $0x8a8] sm:$0xf]  ;;  %v9678_v42 = vld [vmem:[%s14480_s7 + $0x908] sm:$0xf0] }
 0x2b3   :  { %9695 = vtanh.f32 %v3281_v58  ;;  %v9440_v58 = vld [vmem:[%s14480_s7 + $0x19c] sm:$0xf]  ;;  %v8877_v61 = vor.u32 %v9678_v42, %v8876_v5  ;;  %v7876_v42 = vld [vmem:[%s14480_s7 + $0xd8] sm:$0xf] }
 0x2b4   :  { %v7973_v1 = vor.u32 %v9440_v58, %v7970_v60  ;;  %v8878_v58 = vld [vmem:[%s14480_s7 + $0x90c] sm:$0xf0]  ;;  %v8377_v60 = vor.u32 %v9553_v40, %v8376_v53  ;;  %v9542_v53 = vld [vmem:[%s14480_s7 + $0x4cc] sm:$0xf] }
 0x2b5   :  { %v8386_v40 = vld [vmem:[%s14480_s7 + $0x52c] sm:$0xf0] }
 0x2b6   :  { %5457 = vmatpush.bf16.msra.mxu3 %v7973_v1  ;;  %v8276_v1 = vld [vmem:[%s14480_s7 + $0x3f8] sm:$0xf] }
 0x2b7   :  { %v8277_v6 = vor.u32 %v9528_v2, %v8276_v1  ;;  %v8284_v1 = vld [vmem:[%s14480_s7 + $0x400] sm:$0xf]  ;;  %v9529_v2 = vld [vmem:[%s14480_s7 + $0x460] sm:$0xf0] }
 0x2b8   :  { %v3282_v14 = vpop.f32.mrf.mxu3 }
 0x2b9   :  { %v9696_v16 = vpop.eup %9695  ;;  %v9602_v14 = vld [vmem:[%s14480_s7 + $0x6a8] sm:$0xf0] }
 0x2ba   :  { %v3285_v24 = vpack.c.bf16 %v9696_v16, %v9696_v16  ;;  %5458 = vmatpush.bf16.msra.mxu3 %v7873_v39  ;;  %v7770_v16 = vld [vmem:[%s14480_s7 + $0x6c] sm:$0xf0] }
 0x2bb   :  { %v7773_v23 = vor.u32 %v9390_v30, %v7770_v16  ;;  %v8176_v39 = vld [vmem:[%s14480_s7 + $0x330] sm:$0xf]  ;;  %v8678_v30 = vld [vmem:[%s14480_s7 + $0x77c] sm:$0xf0] }
 0x2bc   :  { %7756 = vmatmul.msk.bf16.vlgmr.msra.gmra.mxu0 %vm3304_vm3, %v3285_v24  ;;  %7757 = vmatmul.msk.bf16.vlgmr.msra.gmra.mxu1 %vm3304_vm3, %v3285_v24  ;;  %v8570_v24 = vld [vmem:[%s14480_s7 + $0x6ac] sm:$0xf0]  ;;  %v8177_v16 = vor.u32 %v9503_v19, %v8176_v39  ;;  %v9391_v39 = vld [vmem:[%s14480_s7 + $0x14] sm:$0xf]  ;;  %v7778_v19 = vld [vmem:[%s14480_s7 + $0x74] sm:$0xf0] }
 0x2bd   :  { %5426 = vmatpush.bf16.msra.mxu0 %v8469_v54  ;;  %5468 = vmatpush.bf16.msra.mxu1 %v5309_v34  ;;  %v8569_v54 = vor.u32 %v9602_v14, %v8568_v13  ;;  %v8573_v9 = vor.u32 %v9590_v49, %v8570_v24  ;;  %v9491_v13 = vld [vmem:[%s14480_s7 + $0x334] sm:$0xf]  ;;  %v9616_v14 = vld [vmem:[%s14480_s7 + $0x71c] sm:$0xf]  ;;  %v9478_v49 = vld [vmem:[%s14480_s7 + $0x2c8] sm:$0xf0] }
 0x2be   :  { %5459 = vmatpush.bf16.msra.mxu3 %v7773_v23  ;;  %v8076_v23 = vld [vmem:[%s14480_s7 + $0x268] sm:$0xf]  ;;  %v8576_v24 = vld [vmem:[%s14480_s7 + $0x650] sm:$0xf]  ;;  %v8681_v50 = vor.u32 %v9616_v14, %v8678_v30  ;;  %v7781_v14 = vor.u32 %v9391_v39, %v7778_v19  ;;  %v9580_v39 = vld [vmem:[%s14480_s7 + $0x5f8] sm:$0xf0] }
 0x2bf   :  { %5446 = vmatpush.bf16.msra.mxu2 %v8569_v54  ;;  %v8677_v54 = vor.u32 %v9628_v10, %v8676_v12  ;;  %v8077_v36 = vor.u32 %v9478_v49, %v8076_v23  ;;  %v9492_v12 = vld [vmem:[%s14480_s7 + $0x33c] sm:$0xf]  ;;  %v8186_v10 = vld [vmem:[%s14480_s7 + $0x39c] sm:$0xf0]  ;;  %v8084_v23 = vld [vmem:[%s14480_s7 + $0x270] sm:$0xf] }
 0x2c0   :  { %v8884_v49 = vld [vmem:[%s14480_s7 + $0x8b0] sm:$0xf] }
 0x2c1   :  { %5427 = vmatpush.bf16.msra.mxu0 %v8369_v0  ;;  %5469 = vmatpush.bf16.msra.mxu1 %v8873_v41  ;;  %v9578_v41 = vld [vmem:[%s14480_s7 + $0x5e8] sm:$0xf0] }
 0x2c2   :  { %v8477_v51 = vor.u32 %v9578_v41, %v8476_v59 }
 0x2c5   :  { %5428 = vmatpush.bf16.msra.mxu0 %v8269_v38  ;;  %5470 = vmatpush.bf16.msra.mxu1 %v8773_v37  ;;  %v8881_v37 = vor.u32 %v9666_v56, %v8878_v58  ;;  %v8389_v58 = vor.u32 %v9542_v53, %v8386_v40  ;;  %v9629_v53 = vld [vmem:[%s14480_s7 + $0x780] sm:$0xf0] }
 0x2c9   :  { %5429 = vmatpush.bf16.msra.mxu0 %v8169_v44  ;;  %5471 = vmatpush.bf16.msra.mxu1 %v8673_v3  ;;  %v8781_v3 = vor.u32 %v9641_v20, %v8778_v11  ;;  %v9403_v20 = vld [vmem:[%s14480_s7 + $0x70] sm:$0xf0] }
 0x2cd   :  { %5430 = vmatpush.bf16.msra.mxu0 %v8069_v48  ;;  %5472 = vmatpush.bf16.msra.mxu1 %v8573_v9 }
 0x2d1   :  { %5431 = vmatpush.bf16.msra.mxu0 %v7969_v32  ;;  %v8378_v32 = vld [vmem:[%s14480_s7 + $0x524] sm:$0xf0] }
 0x2d2   :  { %v8381_v29 = vor.u32 %v9541_v45, %v8378_v32  ;;  %v9428_v45 = vld [vmem:[%s14480_s7 + $0x138] sm:$0xf0] }
 0x2d3   :  { %v7877_v4 = vor.u32 %v9428_v45, %v7876_v42  ;;  %v7886_v42 = vld [vmem:[%s14480_s7 + $0x144] sm:$0xf0] }
 0x2d5   :  { %5432 = vmatpush.bf16.msra.mxu0 %v7869_v8  ;;  %v8278_v8 = vld [vmem:[%s14480_s7 + $0x45c] sm:$0xf0] }
 0x2d6   :  { %v8281_v27 = vor.u32 %v9516_v62, %v8278_v8  ;;  %v7776_v8 = vld [vmem:[%s14480_s7 + $0x10] sm:$0xf] }
 0x2d9   :  { %5433 = vmatpush.bf16.msra.mxu0 %v7769_v7  ;;  %v8178_v7 = vld [vmem:[%s14480_s7 + $0x394] sm:$0xf0] }
 0x2da   :  { %v8181_v9 = vor.u32 %v9491_v13, %v8178_v7  ;;  %v7777_v13 = vor.u32 %v9403_v20, %v7776_v8  ;;  %v7786_v8 = vld [vmem:[%s14480_s7 + $0x7c] sm:$0xf0]  ;;  %v9592_v20 = vld [vmem:[%s14480_s7 + $0x65c] sm:$0xf] }
 0x339   :  { %v3317_v34 = vpop.f32.mrf.mxu0  ;;  %v3330_v17 = vpop.f32.mrf.mxu1 }
 0x33a   :  { %v3318_v35 = vadd.f32 %v3317_v34, %v3290_v28  ;;  %v3331_v0 = vadd.f32 %v3330_v17, %v3291_v15  ;;  %v9603_v28 = vld [vmem:[%s14480_s7 + $0x6b0] sm:$0xf0]  ;;  %v9466_v15 = vld [vmem:[%s14480_s7 + $0x26c] sm:$0xf]  ;;  %v8578_v17 = vld [vmem:[%s14480_s7 + $0x6b4] sm:$0xf0] }
 0x33b   :  { %v9591_v34 = vld [vmem:[%s14480_s7 + $0x654] sm:$0xf]  ;;  %v8577_v57 = vor.u32 %v9603_v28, %v8576_v24  ;;  %v8081_v59 = vor.u32 %v9466_v15, %v8078_v25  ;;  %v8086_v28 = vld [vmem:[%s14480_s7 + $0x2d4] sm:$0xf0] }
 0x33c   :  { %9697 = vtanh.f32 %v3318_v35  ;;  %v8484_v35 = vld [vmem:[%s14480_s7 + $0x590] sm:$0xf]  ;;  %v8581_v41 = vor.u32 %v9591_v34, %v8578_v17  ;;  %v9679_v24 = vld [vmem:[%s14480_s7 + $0x910] sm:$0xf0]  ;;  %v8886_v34 = vld [vmem:[%s14480_s7 + $0x914] sm:$0xf0] }
 0x33d   :  { %9699 = vtanh.f32 %v3331_v0  ;;  %v9579_v0 = vld [vmem:[%s14480_s7 + $0x5f0] sm:$0xf0]  ;;  %v8885_v17 = vor.u32 %v9679_v24, %v8884_v49  ;;  %v8892_v49 = vld [vmem:[%s14480_s7 + $0x8b8] sm:$0xf]  ;;  %v9680_v24 = vld [vmem:[%s14480_s7 + $0x918] sm:$0xf0] }
 0x33e   :  { %v8485_v33 = vor.u32 %v9579_v0, %v8484_v35  ;;  %v9667_v25 = vld [vmem:[%s14480_s7 + $0x8b4] sm:$0xf] }
 0x341   :  { %v3319_v38 = vpop.f32.mrf.mxu0  ;;  %v3332_v22 = vpop.f32.mrf.mxu1 }
 0x342   :  { %v9698_v46 = vpop.eup %9697  ;;  %v7976_v38 = vld [vmem:[%s14480_s7 + $0x1a0] sm:$0xf]  ;;  %v9453_v22 = vld [vmem:[%s14480_s7 + $0x200] sm:$0xf0] }
 0x343   :  { %v9700_v47 = vpop.eup %9699  ;;  %v12736_v44 = vpack.c.bf16 %v9698_v46, %v9698_v46  ;;  %v8489_v46 = vor.u32 %v9567_v63, %v8486_v21  ;;  %v7984_v63 = vld [vmem:[%s14480_s7 + $0x1a8] sm:$0xf] }
 0x344   :  { %v12746_v48 = vpack.c.bf16 %v9700_v47, %v9700_v47  ;;  %v7978_v47 = vld [vmem:[%s14480_s7 + $0x204] sm:$0xf0] }
 0x345   :  { %5382 = vmatmul.bf16.vlgmr.msrb.gmra.mxu3 %v12736_v44  ;;  %5408 = vmatmul.bf16.vlgmr.msrb.gmra.mxu1 %v12736_v44  ;;  %v7981_v5 = vor.u32 %v9441_v31, %v7978_v47  ;;  %v8784_v21 = vld [vmem:[%s14480_s7 + $0x7e8] sm:$0xf]  ;;  %v8786_v31 = vld [vmem:[%s14480_s7 + $0x84c] sm:$0xf0] }
 0x346   :  { %8958 = vmatmul.msk.bf16.vlgmr.msrb.gmra.mxu0 %vm3250_vm2, %v12746_v48  ;;  %8959 = vmatmul.msk.bf16.vlgmr.msrb.gmra.mxu2 %vm3250_vm2, %v12746_v48 }
 0x347   :  { %5478 = vmatpush.bf16.msrb.mxu2 %v8477_v51  ;;  %5494 = vmatpush.bf16.msrb.mxu0 %v5312_v26  ;;  %v8384_v51 = vld [vmem:[%s14480_s7 + $0x4c8] sm:$0xf]  ;;  %v3653_v26 = vld [vmem:[%s14480_s7 + $0x978] sm:$0x33] }
 0x348   :  { %5504 = vmatpush.bf16.msrb.mxu1 %v8481_v55  ;;  %5520 = vmatpush.bf16.msrb.mxu3 %v5315_v52  ;;  %v9554_v52 = vld [vmem:[%s14480_s7 + $0x528] sm:$0xf0]  ;;  %v7977_v55 = vor.u32 %v9453_v22, %v7976_v38  ;;  %v4652_v32 = vunpack.c.l.b16 %v3653_v26  ;;  %v4653_v43 = vunpack.c.h.b16 %v3653_v26  ;;  %v7986_v38 = vld [vmem:[%s14480_s7 + $0x20c] sm:$0xf0]  ;;  %v7884_v26 = vld [vmem:[%s14480_s7 + $0xe0] sm:$0xf] }
 0x349   :  { %v8385_v56 = vor.u32 %v9554_v52, %v8384_v51  ;;  %v9642_v22 = vld [vmem:[%s14480_s7 + $0x7ec] sm:$0xf]  ;;  %v8684_v52 = vld [vmem:[%s14480_s7 + $0x720] sm:$0xf] }
 0x34a   :  { %v4977_v11 = vpack.c.b16 %v4652_v32, %v4652_v32  ;;  %v4978_v7 = vpack.c.b16 %v4653_v43, %v4653_v43  ;;  %v8789_v40 = vor.u32 %v9642_v22, %v8786_v31  ;;  %v9617_v32 = vld [vmem:[%s14480_s7 + $0x724] sm:$0xf]  ;;  %v8794_v22 = vld [vmem:[%s14480_s7 + $0x854] sm:$0xf0] }
 0x34b   :  { %5479 = vmatpush.bf16.msrb.mxu2 %v8377_v60  ;;  %5495 = vmatpush.bf16.msrb.mxu0 %v8877_v61  ;;  %v9416_v60 = vld [vmem:[%s14480_s7 + $0xdc] sm:$0xf]  ;;  %v7878_v61 = vld [vmem:[%s14480_s7 + $0x13c] sm:$0xf0] }
 0x34c   :  { %5505 = vmatpush.bf16.msrb.mxu1 %v8381_v29  ;;  %5521 = vmatpush.bf16.msrb.mxu3 %v8881_v37  ;;  %v9517_v29 = vld [vmem:[%s14480_s7 + $0x404] sm:$0xf]  ;;  %v8286_v37 = vld [vmem:[%s14480_s7 + $0x464] sm:$0xf0]  ;;  %v7881_v62 = vor.u32 %v9416_v60, %v7878_v61  ;;  %v5318_v30 = vsel %vm3254_vm1, %v4977_v11, 0  ;;  %v5321_v15 = vsel %vm3254_vm1, %v4978_v7, 0 }
 0x34d   :  { %v7784_v60 = vld [vmem:[%s14480_s7 + $0x18] sm:$0xf] }
 0x34f   :  { %5480 = vmatpush.bf16.msrb.mxu2 %v8277_v6  ;;  %5496 = vmatpush.bf16.msrb.mxu0 %v8777_v18  ;;  %v8285_v6 = vor.u32 %v9529_v2, %v8284_v1  ;;  %v8289_v18 = vor.u32 %v9517_v29, %v8286_v37  ;;  %v9404_v2 = vld [vmem:[%s14480_s7 + $0x78] sm:$0xf0]  ;;  %v8584_v29 = vld [vmem:[%s14480_s7 + $0x658] sm:$0xf] }
 0x350   :  { %5506 = vmatpush.bf16.msrb.mxu1 %v8281_v27  ;;  %5522 = vmatpush.bf16.msrb.mxu3 %v8781_v3  ;;  %v8184_v27 = vld [vmem:[%s14480_s7 + $0x338] sm:$0xf]  ;;  %v9504_v3 = vld [vmem:[%s14480_s7 + $0x398] sm:$0xf0] }
 0x351   :  { %v9604_v37 = vld [vmem:[%s14480_s7 + $0x6b8] sm:$0xf0] }
 0x352   :  { %v8585_v19 = vor.u32 %v9604_v37, %v8584_v29  ;;  %v9468_v29 = vld [vmem:[%s14480_s7 + $0x27c] sm:$0xf]  ;;  %v8094_v37 = vld [vmem:[%s14480_s7 + $0x2dc] sm:$0xf0] }
 0x353   :  { %5481 = vmatpush.bf16.msrb.mxu2 %v8177_v16  ;;  %5497 = vmatpush.bf16.msrb.mxu0 %v8677_v54  ;;  %v8185_v16 = vor.u32 %v9504_v3, %v8184_v27  ;;  %v8189_v54 = vor.u32 %v9492_v12, %v8186_v10  ;;  %v9568_v27 = vld [vmem:[%s14480_s7 + $0x59c] sm:$0xf]  ;;  %v8494_v3 = vld [vmem:[%s14480_s7 + $0x5fc] sm:$0xf0]  ;;  %v7785_v12 = vor.u32 %v9404_v2, %v7784_v60 }
 0x354   :  { %5507 = vmatpush.bf16.msrb.mxu1 %v8181_v9  ;;  %5523 = vmatpush.bf16.msrb.mxu3 %v8681_v50  ;;  %v9479_v9 = vld [vmem:[%s14480_s7 + $0x2d0] sm:$0xf0]  ;;  %v9480_v60 = vld [vmem:[%s14480_s7 + $0x2d8] sm:$0xf0] }
 0x355   :  { %5460 = vmatmul.bf16.vlgmr.msra.gmra.mxu3 %v12736_v44  ;;  %8961 = vmatmul.msk.bf16.vlgmr.msra.gmra.mxu1 %vm3250_vm2, %v12746_v48  ;;  %v9467_v50 = vld [vmem:[%s14480_s7 + $0x274] sm:$0xf]  ;;  %v8085_v35 = vor.u32 %v9479_v9, %v8084_v23 }
 0x356   :  { %5434 = vmatmul.bf16.vlgmr.msra.gmra.mxu0 %v12736_v44  ;;  %8960 = vmatmul.msk.bf16.vlgmr.msra.gmra.mxu2 %vm3250_vm2, %v12746_v48  ;;  %v8089_v0 = vor.u32 %v9467_v50, %v8086_v28  ;;  %v9555_v23 = vld [vmem:[%s14480_s7 + $0x530] sm:$0xf0]  ;;  %v8394_v50 = vld [vmem:[%s14480_s7 + $0x534] sm:$0xf0] }
 0x357   :  { %5482 = vmatpush.bf16.msrb.mxu2 %v8077_v36  ;;  %5498 = vmatpush.bf16.msrb.mxu0 %v8577_v57  ;;  %v9654_v36 = vld [vmem:[%s14480_s7 + $0x848] sm:$0xf0]  ;;  %v8889_v57 = vor.u32 %v9667_v25, %v8886_v34  ;;  %v9543_v9 = vld [vmem:[%s14480_s7 + $0x4d4] sm:$0xf]  ;;  %v8894_v25 = vld [vmem:[%s14480_s7 + $0x91c] sm:$0xf0] }
 0x358   :  { %5508 = vmatpush.bf16.msrb.mxu1 %v8081_v59  ;;  %5524 = vmatpush.bf16.msrb.mxu3 %v8581_v41  ;;  %v9454_v59 = vld [vmem:[%s14480_s7 + $0x208] sm:$0xf0] }
 0x359   :  { %v9442_v41 = vld [vmem:[%s14480_s7 + $0x1ac] sm:$0xf]  ;;  %v7985_v47 = vor.u32 %v9454_v59, %v7984_v63 }
 0x35a   :  { %v7989_v51 = vor.u32 %v9442_v41, %v7986_v38  ;;  %v9530_v63 = vld [vmem:[%s14480_s7 + $0x468] sm:$0xf0]  ;;  %v8294_v41 = vld [vmem:[%s14480_s7 + $0x46c] sm:$0xf0]  ;;  %v9643_v38 = vld [vmem:[%s14480_s7 + $0x7f4] sm:$0xf] }
 0x35b   :  { %5530 = vmatpush.bf16.msra.mxu0 %v8485_v33  ;;  %5483 = vmatpush.bf16.msrb.mxu2 %v7977_v55  ;;  %v3654_v33 = vld [vmem:[%s14480_s7 + $0x980] sm:$0x33]  ;;  %v9518_v59 = vld [vmem:[%s14480_s7 + $0x40c] sm:$0xf] }
 0x35c   :  { %5556 = vmatpush.bf16.msra.mxu3 %v8489_v46  ;;  %5509 = vmatpush.bf16.msrb.mxu1 %v7981_v5  ;;  %v8785_v46 = vor.u32 %v9654_v36, %v8784_v21  ;;  %v9429_v55 = vld [vmem:[%s14480_s7 + $0x140] sm:$0xf0]  ;;  %v4654_v45 = vunpack.c.l.b16 %v3654_v33  ;;  %v8792_v21 = vld [vmem:[%s14480_s7 + $0x7f0] sm:$0xf] }
 0x35d   :  { %v9417_v5 = vld [vmem:[%s14480_s7 + $0xe4] sm:$0xf]  ;;  %v7885_v61 = vor.u32 %v9429_v55, %v7884_v26  ;;  %v8692_v26 = vld [vmem:[%s14480_s7 + $0x728] sm:$0xf] }
 0x35e   :  { %v7889_v1 = vor.u32 %v9417_v5, %v7886_v42  ;;  %v4979_v11 = vpack.c.b16 %v4654_v45, %v4654_v45  ;;  %v8194_v55 = vld [vmem:[%s14480_s7 + $0x3a4] sm:$0xf0]  ;;  %v9618_v5 = vld [vmem:[%s14480_s7 + $0x72c] sm:$0xf]  ;;  %v8694_v42 = vld [vmem:[%s14480_s7 + $0x78c] sm:$0xf0] }
 0x35f   :  { %5531 = vmatpush.bf16.msra.mxu0 %v8385_v56  ;;  %5484 = vmatpush.bf16.msrb.mxu2 %v7877_v4  ;;  %v8686_v56 = vld [vmem:[%s14480_s7 + $0x784] sm:$0xf0]  ;;  %v4655_v4 = vunpack.c.h.b16 %v3654_v33  ;;  %v8697_v2 = vor.u32 %v9618_v5, %v8694_v42 }
 0x360   :  { %5557 = vmatpush.bf16.msra.mxu3 %v8389_v58  ;;  %5510 = vmatpush.bf16.msrb.mxu1 %v7881_v62  ;;  %v8685_v58 = vor.u32 %v9629_v53, %v8684_v52  ;;  %v8689_v43 = vor.u32 %v9617_v32, %v8686_v56  ;;  %v9392_v62 = vld [vmem:[%s14480_s7 + $0x1c] sm:$0xf]  ;;  %v8797_v52 = vor.u32 %v9643_v38, %v8794_v22  ;;  %v9630_v53 = vld [vmem:[%s14480_s7 + $0x788] sm:$0xf0]  ;;  %v8092_v32 = vld [vmem:[%s14480_s7 + $0x278] sm:$0xf] }
 0x361   :  { %v7789_v10 = vor.u32 %v9392_v62, %v7786_v8  ;;  %v8693_v56 = vor.u32 %v9630_v53, %v8692_v26  ;;  %v8500_v62 = vld [vmem:[%s14480_s7 + $0x5a0] sm:$0xf]  ;;  %v9581_v8 = vld [vmem:[%s14480_s7 + $0x600] sm:$0xf0]  ;;  %v8200_v26 = vld [vmem:[%s14480_s7 + $0x348] sm:$0xf] }
 0x362   :  { %v9405_v38 = vld [vmem:[%s14480_s7 + $0x80] sm:$0xf0] }
 0x363   :  { %5532 = vmatpush.bf16.msra.mxu0 %v8285_v6  ;;  %5485 = vmatpush.bf16.msrb.mxu2 %v7777_v13  ;;  %v8586_v6 = vld [vmem:[%s14480_s7 + $0x6bc] sm:$0xf0]  ;;  %v4980_v13 = vpack.c.b16 %v4655_v4, %v4655_v4  ;;  %v9593_v4 = vld [vmem:[%s14480_s7 + $0x664] sm:$0xf] }
 0x364   :  { %5558 = vmatpush.bf16.msra.mxu3 %v8289_v18  ;;  %5511 = vmatpush.bf16.msrb.mxu1 %v7781_v14  ;;  %v8492_v18 = vld [vmem:[%s14480_s7 + $0x598] sm:$0xf]  ;;  %v8589_v7 = vor.u32 %v9592_v20, %v8586_v6  ;;  %v8093_v20 = vor.u32 %v9480_v60, %v8092_v32  ;;  %v8502_v6 = vld [vmem:[%s14480_s7 + $0x604] sm:$0xf0]  ;;  %v9681_v60 = vld [vmem:[%s14480_s7 + $0x920] sm:$0xf0] }
 0x365   :  { %8963 = vmatmul.msk.bf16.vlgmr.msrb.gmra.mxu3 %vm3250_vm2, %v12746_v48  ;;  %v8493_v14 = vor.u32 %v9580_v39, %v8492_v18  ;;  %v5327_v28 = vsel %vm3254_vm1, %v4980_v13, 0  ;;  %v8097_v39 = vor.u32 %v9468_v29, %v8094_v37  ;;  %v7994_v13 = vld [vmem:[%s14480_s7 + $0x214] sm:$0xf0]  ;;  %v8902_v29 = vld [vmem:[%s14480_s7 + $0x924] sm:$0xf0] }
 0x366   :  { %5486 = vmatmul.bf16.vlgmr.msrb.gmra.mxu2 %v12736_v44  ;;  %8962 = vmatmul.msk.bf16.vlgmr.msrb.gmra.mxu0 %vm3250_vm2, %v12746_v48  ;;  %v9469_v37 = vld [vmem:[%s14480_s7 + $0x284] sm:$0xf] }
 0x367   :  { %5546 = vmatpush.bf16.msra.mxu2 %v5318_v30  ;;  %5533 = vmatpush.bf16.msra.mxu0 %v8185_v16  ;;  %v5324_v30 = vsel %vm3254_vm1, %v4979_v11, 0  ;;  %v8497_v16 = vor.u32 %v9568_v27, %v8494_v3  ;;  %v9569_v11 = vld [vmem:[%s14480_s7 + $0x5a4] sm:$0xf]  ;;  %v9455_v27 = vld [vmem:[%s14480_s7 + $0x210] sm:$0xf0] }
 0x368   :  { %5559 = vmatpush.bf16.msra.mxu3 %v8189_v54  ;;  %5572 = vmatpush.bf16.msra.mxu1 %v5321_v15  ;;  %v8392_v54 = vld [vmem:[%s14480_s7 + $0x4d0] sm:$0xf]  ;;  %v9668_v15 = vld [vmem:[%s14480_s7 + $0x8bc] sm:$0xf] }
 0x369   :  { %5512 = vmatmul.bf16.vlgmr.msrb.gmra.mxu1 %v12736_v44  ;;  %v8393_v34 = vor.u32 %v9555_v23, %v8392_v54  ;;  %v8897_v36 = vor.u32 %v9668_v15, %v8894_v25  ;;  %v9544_v23 = vld [vmem:[%s14480_s7 + $0x4dc] sm:$0xf] }
 0x36b   :  { %5547 = vmatpush.bf16.msra.mxu2 %v8885_v17  ;;  %5534 = vmatpush.bf16.msra.mxu0 %v8085_v35  ;;  %v8893_v17 = vor.u32 %v9680_v24, %v8892_v49  ;;  %v8397_v35 = vor.u32 %v9543_v9, %v8394_v50  ;;  %v8402_v49 = vld [vmem:[%s14480_s7 + $0x53c] sm:$0xf0]  ;;  %v7892_v9 = vld [vmem:[%s14480_s7 + $0xe8] sm:$0xf]  ;;  %v9430_v50 = vld [vmem:[%s14480_s7 + $0x148] sm:$0xf0] }
 0x36c   :  { %5560 = vmatpush.bf16.msra.mxu3 %v8089_v0  ;;  %5573 = vmatpush.bf16.msra.mxu1 %v8889_v57  ;;  %v8292_v0 = vld [vmem:[%s14480_s7 + $0x408] sm:$0xf]  ;;  %v9655_v57 = vld [vmem:[%s14480_s7 + $0x850] sm:$0xf0] }
 0x36d   :  { %v8293_v31 = vor.u32 %v9530_v63, %v8292_v0  ;;  %v8793_v33 = vor.u32 %v9655_v57, %v8792_v21  ;;  %v8300_v0 = vld [vmem:[%s14480_s7 + $0x410] sm:$0xf]  ;;  %v9531_v63 = vld [vmem:[%s14480_s7 + $0x470] sm:$0xf0]  ;;  %v7893_v21 = vor.u32 %v9430_v50, %v7892_v9  ;;  %v8302_v57 = vld [vmem:[%s14480_s7 + $0x474] sm:$0xf0] }
 0x36e   :  { %v8702_v9 = vld [vmem:[%s14480_s7 + $0x794] sm:$0xf0] }
 0x36f   :  { %5548 = vmatpush.bf16.msra.mxu2 %v8785_v46  ;;  %5535 = vmatpush.bf16.msra.mxu0 %v7985_v47  ;;  %v8297_v46 = vor.u32 %v9518_v59, %v8294_v41  ;;  %v8192_v47 = vld [vmem:[%s14480_s7 + $0x340] sm:$0xf] }
 0x370   :  { %5561 = vmatpush.bf16.msra.mxu3 %v7989_v51  ;;  %5574 = vmatpush.bf16.msra.mxu1 %v8789_v40  ;;  %v9505_v51 = vld [vmem:[%s14480_s7 + $0x3a0] sm:$0xf0]  ;;  %v7792_v41 = vld [vmem:[%s14480_s7 + $0x20] sm:$0xf] }
 0x371   :  { %v9493_v40 = vld [vmem:[%s14480_s7 + $0x344] sm:$0xf]  ;;  %v8193_v45 = vor.u32 %v9505_v51, %v8192_v47  ;;  %v7794_v47 = vld [vmem:[%s14480_s7 + $0x84] sm:$0xf0]  ;;  %v7793_v53 = vor.u32 %v9405_v38, %v7792_v41  ;;  %v9594_v41 = vld [vmem:[%s14480_s7 + $0x66c] sm:$0xf] }
 0x372   :  { %v8602_v38 = vld [vmem:[%s14480_s7 + $0x6cc] sm:$0xf0] }
 0x373   :  { %5549 = vmatpush.bf16.msra.mxu2 %v8685_v58  ;;  %5536 = vmatpush.bf16.msra.mxu0 %v7885_v61  ;;  %v8197_v58 = vor.u32 %v9493_v40, %v8194_v55  ;;  %v8592_v61 = vld [vmem:[%s14480_s7 + $0x660] sm:$0xf]  ;;  %v9494_v40 = vld [vmem:[%s14480_s7 + $0x34c] sm:$0xf]  ;;  %v8202_v55 = vld [vmem:[%s14480_s7 + $0x3ac] sm:$0xf0] }
 0x374   :  { %5562 = vmatpush.bf16.msra.mxu3 %v7889_v1  ;;  %5575 = vmatpush.bf16.msra.mxu1 %v8689_v43  ;;  %v9605_v1 = vld [vmem:[%s14480_s7 + $0x6c0] sm:$0xf0]  ;;  %v8594_v43 = vld [vmem:[%s14480_s7 + $0x6c4] sm:$0xf0] }
 0x375   :  { %v8593_v18 = vor.u32 %v9605_v1, %v8592_v61  ;;  %v8597_v3 = vor.u32 %v9593_v4, %v8594_v43  ;;  %v8205_v61 = vor.u32 %v9494_v40, %v8202_v55  ;;  %v9481_v1 = vld [vmem:[%s14480_s7 + $0x2e0] sm:$0xf0]  ;;  %v8102_v4 = vld [vmem:[%s14480_s7 + $0x2e4] sm:$0xf0] }
 0x377   :  { %5550 = vmatpush.bf16.msra.mxu2 %v8585_v19  ;;  %5537 = vmatpush.bf16.msra.mxu0 %v7785_v12  ;;  %v7992_v19 = vld [vmem:[%s14480_s7 + $0x1b0] sm:$0xf]  ;;  %v8501_v12 = vor.u32 %v9581_v8, %v8500_v62 }
 0x378   :  { %5563 = vmatpush.bf16.msra.mxu3 %v7789_v10  ;;  %5576 = vmatpush.bf16.msra.mxu1 %v8589_v7  ;;  %v9443_v10 = vld [vmem:[%s14480_s7 + $0x1b4] sm:$0xf]  ;;  %v3655_v7 = vld [vmem:[%s14480_s7 + $0x988] sm:$0x33]  ;;  %v7993_v54 = vor.u32 %v9455_v27, %v7992_v19  ;;  %v9644_v19 = vld [vmem:[%s14480_s7 + $0x7fc] sm:$0xf] }
 0x379   :  { %v7997_v24 = vor.u32 %v9443_v10, %v7994_v13  ;;  %v4657_v15 = vunpack.c.h.b16 %v3655_v7  ;;  %v8802_v27 = vld [vmem:[%s14480_s7 + $0x85c] sm:$0xf0]  ;;  %v3656_v10 = vld [vmem:[%s14480_s7 + $0x990] sm:$0x33] }
 0x37a   :  { %5538 = vmatmul.bf16.vlgmr.msra.gmra.mxu0 %v12736_v44  ;;  %8964 = vmatmul.msk.bf16.vlgmr.msra.gmra.mxu2 %vm3250_vm2, %v12746_v48  ;;  %v4658_v50 = vunpack.c.l.b16 %v3656_v10 }
 0x37b   :  { %5582 = vmatpush.bf16.msrb.mxu2 %v8493_v14  ;;  %5598 = vmatpush.bf16.msrb.mxu0 %v5324_v30  ;;  %v8505_v14 = vor.u32 %v9569_v11, %v8502_v6  ;;  %v8400_v30 = vld [vmem:[%s14480_s7 + $0x4d8] sm:$0xf]  ;;  %v9656_v6 = vld [vmem:[%s14480_s7 + $0x858] sm:$0xf0] }
 0x37c   :  { %5608 = vmatpush.bf16.msrb.mxu1 %v8497_v16  ;;  %5624 = vmatpush.bf16.msrb.mxu3 %v5327_v28  ;;  %v9556_v16 = vld [vmem:[%s14480_s7 + $0x538] sm:$0xf0]  ;;  %v4656_v28 = vunpack.c.l.b16 %v3655_v7  ;;  %v8800_v11 = vld [vmem:[%s14480_s7 + $0x7f8] sm:$0xf] }
 0x37d   :  { %5564 = vmatmul.bf16.vlgmr.msra.gmra.mxu3 %v12736_v44  ;;  %8965 = vmatmul.msk.bf16.vlgmr.msra.gmra.mxu1 %vm3250_vm2, %v12746_v48  ;;  %v8401_v25 = vor.u32 %v9556_v16, %v8400_v30  ;;  %v8801_v13 = vor.u32 %v9656_v6, %v8800_v11  ;;  %v7900_v30 = vld [vmem:[%s14480_s7 + $0xf0] sm:$0xf]  ;;  %v8808_v11 = vld [vmem:[%s14480_s7 + $0x800] sm:$0xf] }
 0x37e   :  { %v4981_v22 = vpack.c.b16 %v4656_v28, %v4656_v28  ;;  %v8700_v16 = vld [vmem:[%s14480_s7 + $0x730] sm:$0xf]  ;;  %v9419_v28 = vld [vmem:[%s14480_s7 + $0xf4] sm:$0xf] }
 0x37f   :  { %5583 = vmatpush.bf16.msrb.mxu2 %v8393_v34  ;;  %5599 = vmatpush.bf16.msrb.mxu0 %v8893_v17  ;;  %v9418_v34 = vld [vmem:[%s14480_s7 + $0xec] sm:$0xf]  ;;  %v7894_v17 = vld [vmem:[%s14480_s7 + $0x14c] sm:$0xf0] }
 0x380   :  { %5609 = vmatpush.bf16.msrb.mxu1 %v8397_v35  ;;  %5625 = vmatpush.bf16.msrb.mxu3 %v8897_v36  ;;  %v8405_v35 = vor.u32 %v9544_v23, %v8402_v49  ;;  %v9519_v36 = vld [vmem:[%s14480_s7 + $0x414] sm:$0xf]  ;;  %v7897_v59 = vor.u32 %v9418_v34, %v7894_v17  ;;  %v5330_v42 = vsel %vm3254_vm1, %v4981_v22, 0  ;;  %v7800_v34 = vld [vmem:[%s14480_s7 + $0x28] sm:$0xf]  ;;  %v4983_v22 = vpack.c.b16 %v4658_v50, %v4658_v50 }
 0x381   :  { %v8305_v51 = vor.u32 %v9519_v36, %v8302_v57  ;;  %v9431_v49 = vld [vmem:[%s14480_s7 + $0x150] sm:$0xf0]  ;;  %v4659_v36 = vunpack.c.h.b16 %v3656_v10 }
 0x382   :  { %v7901_v17 = vor.u32 %v9431_v49, %v7900_v30  ;;  %v8708_v30 = vld [vmem:[%s14480_s7 + $0x738] sm:$0xf] }
 0x383   :  { %5584 = vmatpush.bf16.msrb.mxu2 %v8293_v31  ;;  %5600 = vmatpush.bf16.msrb.mxu0 %v8793_v33  ;;  %v4982_v31 = vpack.c.b16 %v4657_v15, %v4657_v15  ;;  %v8301_v33 = vor.u32 %v9531_v63, %v8300_v0  ;;  %v7902_v15 = vld [vmem:[%s14480_s7 + $0x154] sm:$0xf0]  ;;  %v9406_v0 = vld [vmem:[%s14480_s7 + $0x88] sm:$0xf0]  ;;  %v8600_v63 = vld [vmem:[%s14480_s7 + $0x668] sm:$0xf]  ;;  %v4984_v40 = vpack.c.b16 %v4659_v36, %v4659_v36 }
 0x384   :  { %5610 = vmatpush.bf16.msrb.mxu1 %v8297_v46  ;;  %5626 = vmatpush.bf16.msrb.mxu3 %v8797_v52  ;;  %v9393_v46 = vld [vmem:[%s14480_s7 + $0x24] sm:$0xf]  ;;  %v9506_v52 = vld [vmem:[%s14480_s7 + $0x3a8] sm:$0xf0]  ;;  %v7905_v57 = vor.u32 %v9419_v28, %v7902_v15  ;;  %v8210_v49 = vld [vmem:[%s14480_s7 + $0x3b4] sm:$0xf0] }
 0x385   :  { %v7797_v5 = vor.u32 %v9393_v46, %v7794_v47  ;;  %v8201_v32 = vor.u32 %v9506_v52, %v8200_v26  ;;  %v9582_v46 = vld [vmem:[%s14480_s7 + $0x608] sm:$0xf0]  ;;  %v8510_v26 = vld [vmem:[%s14480_s7 + $0x60c] sm:$0xf0]  ;;  %v7801_v52 = vor.u32 %v9406_v0, %v7800_v34  ;;  %v8108_v28 = vld [vmem:[%s14480_s7 + $0x288] sm:$0xf] }
 0x386   :  { %v9482_v34 = vld [vmem:[%s14480_s7 + $0x2e8] sm:$0xf0]  ;;  %v9595_v36 = vld [vmem:[%s14480_s7 + $0x674] sm:$0xf] }
 0x387   :  { %5585 = vmatpush.bf16.msrb.mxu2 %v8193_v45  ;;  %5601 = vmatpush.bf16.msrb.mxu0 %v8693_v56  ;;  %v5333_v45 = vsel %vm3254_vm1, %v4982_v31, 0  ;;  %v8100_v56 = vld [vmem:[%s14480_s7 + $0x280] sm:$0xf]  ;;  %v7802_v31 = vld [vmem:[%s14480_s7 + $0x8c] sm:$0xf0] }
 0x388   :  { %5611 = vmatpush.bf16.msrb.mxu1 %v8197_v58  ;;  %5627 = vmatpush.bf16.msrb.mxu3 %v8697_v2  ;;  %v8900_v58 = vld [vmem:[%s14480_s7 + $0x8c0] sm:$0xf]  ;;  %v9669_v2 = vld [vmem:[%s14480_s7 + $0x8c4] sm:$0xf]  ;;  %v8101_v62 = vor.u32 %v9481_v1, %v8100_v56  ;;  %v8410_v1 = vld [vmem:[%s14480_s7 + $0x544] sm:$0xf0] }
 0x389   :  { %v8901_v43 = vor.u32 %v9681_v60, %v8900_v58  ;;  %v8905_v8 = vor.u32 %v9669_v2, %v8902_v29  ;;  %v9557_v56 = vld [vmem:[%s14480_s7 + $0x540] sm:$0xf0]  ;;  %v8908_v58 = vld [vmem:[%s14480_s7 + $0x8c8] sm:$0xf]  ;;  %v9682_v60 = vld [vmem:[%s14480_s7 + $0x928] sm:$0xf0] }
 0x38a   :  { %v5339_v2 = vsel %vm3254_vm1, %v4984_v40, 0  ;;  %v9670_v29 = vld [vmem:[%s14480_s7 + $0x8cc] sm:$0xf]  ;;  %v8010_v40 = vld [vmem:[%s14480_s7 + $0x224] sm:$0xf0] }
 0x38b   :  { %5586 = vmatpush.bf16.msrb.mxu2 %v8093_v20  ;;  %5602 = vmatpush.bf16.msrb.mxu0 %v8593_v18  ;;  %v8000_v20 = vld [vmem:[%s14480_s7 + $0x1b8] sm:$0xf]  ;;  %v8105_v18 = vor.u32 %v9469_v37, %v8102_v4  ;;  %v8910_v37 = vld [vmem:[%s14480_s7 + $0x92c] sm:$0xf0] }
 0x38c   :  { %5612 = vmatpush.bf16.msrb.mxu1 %v8097_v39  ;;  %5628 = vmatpush.bf16.msrb.mxu3 %v8597_v3  ;;  %v9456_v39 = vld [vmem:[%s14480_s7 + $0x218] sm:$0xf0]  ;;  %v8913_v6 = vor.u32 %v9670_v29, %v8910_v37 }
 0x38d   :  { %v9444_v3 = vld [vmem:[%s14480_s7 + $0x1bc] sm:$0xf]  ;;  %v8001_v7 = vor.u32 %v9456_v39, %v8000_v20 }
 0x38e   :  { %8966 = vmatmul.msk.bf16.vlgmr.msrb.gmra.mxu0 %vm3250_vm2, %v12746_v48  ;;  %v9532_v20 = vld [vmem:[%s14480_s7 + $0x478] sm:$0xf0] }
 0x38f   :  { %5634 = vmatpush.bf16.msra.mxu0 %v8501_v12  ;;  %5587 = vmatpush.bf16.msrb.mxu2 %v7993_v54  ;;  %v8002_v12 = vld [vmem:[%s14480_s7 + $0x21c] sm:$0xf0]  ;;  %v9631_v54 = vld [vmem:[%s14480_s7 + $0x790] sm:$0xf0]  ;;  %v9520_v39 = vld [vmem:[%s14480_s7 + $0x41c] sm:$0xf] }
 0x390   :  { %5660 = vmatpush.bf16.msra.mxu3 %v8505_v14  ;;  %5613 = vmatpush.bf16.msrb.mxu1 %v7997_v24  ;;  %v8805_v14 = vor.u32 %v9644_v19, %v8802_v27  ;;  %v8005_v23 = vor.u32 %v9444_v3, %v8002_v12  ;;  %v9619_v24 = vld [vmem:[%s14480_s7 + $0x734] sm:$0xf]  ;;  %v8310_v19 = vld [vmem:[%s14480_s7 + $0x47c] sm:$0xf0]  ;;  %v9645_v27 = vld [vmem:[%s14480_s7 + $0x804] sm:$0xf] }
 0x391   :  { %8967 = vmatmul.msk.bf16.vlgmr.msrb.gmra.mxu3 %vm3250_vm2, %v12746_v48  ;;  %v8810_v3 = vld [vmem:[%s14480_s7 + $0x864] sm:$0xf0] }
 0x393   :  { %5635 = vmatpush.bf16.msra.mxu0 %v8401_v25  ;;  %5588 = vmatpush.bf16.msrb.mxu2 %v7893_v21  ;;  %v8701_v25 = vor.u32 %v9631_v54, %v8700_v16  ;;  %v9606_v21 = vld [vmem:[%s14480_s7 + $0x6c8] sm:$0xf0]  ;;  %v8813_v16 = vor.u32 %v9645_v27, %v8810_v3  ;;  %v9632_v54 = vld [vmem:[%s14480_s7 + $0x798] sm:$0xf0]  ;;  %v9407_v27 = vld [vmem:[%s14480_s7 + $0x90] sm:$0xf0] }
 0x394   :  { %5661 = vmatpush.bf16.msra.mxu3 %v8405_v35  ;;  %5614 = vmatpush.bf16.msrb.mxu1 %v7897_v59  ;;  %v8705_v35 = vor.u32 %v9619_v24, %v8702_v9  ;;  %v9394_v59 = vld [vmem:[%s14480_s7 + $0x2c] sm:$0xf]  ;;  %v8601_v47 = vor.u32 %v9606_v21, %v8600_v63  ;;  %v9620_v24 = vld [vmem:[%s14480_s7 + $0x73c] sm:$0xf]  ;;  %v8710_v9 = vld [vmem:[%s14480_s7 + $0x79c] sm:$0xf0]  ;;  %v8709_v15 = vor.u32 %v9632_v54, %v8708_v30 }
 0x395   :  { %v7805_v55 = vor.u32 %v9394_v59, %v7802_v31  ;;  %v8713_v0 = vor.u32 %v9620_v24, %v8710_v9  ;;  %v9470_v63 = vld [vmem:[%s14480_s7 + $0x28c] sm:$0xf]  ;;  %v8110_v21 = vld [vmem:[%s14480_s7 + $0x2ec] sm:$0xf0]  ;;  %v8518_v31 = vld [vmem:[%s14480_s7 + $0x614] sm:$0xf0] }
 0x396   :  { %v8516_v59 = vld [vmem:[%s14480_s7 + $0x5b0] sm:$0xf]  ;;  %v8216_v30 = vld [vmem:[%s14480_s7 + $0x358] sm:$0xf] }
 0x397   :  { %5636 = vmatpush.bf16.msra.mxu0 %v8301_v33  ;;  %5589 = vmatpush.bf16.msrb.mxu2 %v7793_v53  ;;  %v8508_v33 = vld [vmem:[%s14480_s7 + $0x5a8] sm:$0xf]  ;;  %v8605_v53 = vor.u32 %v9594_v41, %v8602_v38  ;;  %v9583_v41 = vld [vmem:[%s14480_s7 + $0x610] sm:$0xf0]  ;;  %v8109_v38 = vor.u32 %v9482_v34, %v8108_v28 }
 0x398   :  { %5662 = vmatpush.bf16.msra.mxu3 %v8305_v51  ;;  %5615 = vmatpush.bf16.msrb.mxu1 %v7797_v5  ;;  %v9570_v51 = vld [vmem:[%s14480_s7 + $0x5ac] sm:$0xf]  ;;  %v8509_v5 = vor.u32 %v9582_v46, %v8508_v33  ;;  %v8113_v46 = vor.u32 %v9470_v63, %v8110_v21  ;;  %v9683_v34 = vld [vmem:[%s14480_s7 + $0x930] sm:$0xf0]  ;;  %v8918_v63 = vld [vmem:[%s14480_s7 + $0x934] sm:$0xf0] }
 0x399   :  { %v9471_v21 = vld [vmem:[%s14480_s7 + $0x294] sm:$0xf] }
 0x39a   :  { %5590 = vmatmul.bf16.vlgmr.msrb.gmra.mxu2 %v12736_v44 }
 0x39b   :  { %5650 = vmatpush.bf16.msra.mxu2 %v5330_v42  ;;  %5637 = vmatpush.bf16.msra.mxu0 %v8201_v32  ;;  %v5336_v42 = vsel %vm3254_vm1, %v4983_v22, 0  ;;  %v8408_v32 = vld [vmem:[%s14480_s7 + $0x4e0] sm:$0xf]  ;;  %v9571_v22 = vld [vmem:[%s14480_s7 + $0x5b4] sm:$0xf] }
 0x39c   :  { %5676 = vmatpush.bf16.msra.mxu1 %v5333_v45  ;;  %5663 = vmatpush.bf16.msra.mxu3 %v8205_v61  ;;  %v8513_v45 = vor.u32 %v9570_v51, %v8510_v26  ;;  %v9545_v61 = vld [vmem:[%s14480_s7 + $0x4e4] sm:$0xf]  ;;  %v8409_v4 = vor.u32 %v9557_v56, %v8408_v32  ;;  %v9546_v56 = vld [vmem:[%s14480_s7 + $0x4ec] sm:$0xf] }
 0x39d   :  { %5616 = vmatmul.bf16.vlgmr.msrb.gmra.mxu1 %v12736_v44  ;;  %v9457_v51 = vld [vmem:[%s14480_s7 + $0x220] sm:$0xf0] }
 0x39f   :  { %5651 = vmatpush.bf16.msra.mxu2 %v8901_v43  ;;  %5638 = vmatpush.bf16.msra.mxu0 %v8101_v62  ;;  %v8909_v43 = vor.u32 %v9682_v60, %v8908_v58  ;;  %v8413_v62 = vor.u32 %v9545_v61, %v8410_v1  ;;  %v8418_v58 = vld [vmem:[%s14480_s7 + $0x54c] sm:$0xf0]  ;;  %v7908_v61 = vld [vmem:[%s14480_s7 + $0xf8] sm:$0xf]  ;;  %v9432_v1 = vld [vmem:[%s14480_s7 + $0x158] sm:$0xf0] }
 0x3a0   :  { %5677 = vmatpush.bf16.msra.mxu1 %v8905_v8  ;;  %5664 = vmatpush.bf16.msra.mxu3 %v8105_v18  ;;  %v8308_v8 = vld [vmem:[%s14480_s7 + $0x418] sm:$0xf]  ;;  %v9657_v18 = vld [vmem:[%s14480_s7 + $0x860] sm:$0xf0] }
 0x3a1   :  { %v8309_v12 = vor.u32 %v9532_v20, %v8308_v8  ;;  %v8809_v10 = vor.u32 %v9657_v18, %v8808_v11  ;;  %v8316_v8 = vld [vmem:[%s14480_s7 + $0x420] sm:$0xf]  ;;  %v9533_v20 = vld [vmem:[%s14480_s7 + $0x480] sm:$0xf0]  ;;  %v7909_v11 = vor.u32 %v9432_v1, %v7908_v61  ;;  %v8318_v18 = vld [vmem:[%s14480_s7 + $0x484] sm:$0xf0] }
 0x3a2   :  { %v9433_v1 = vld [vmem:[%s14480_s7 + $0x160] sm:$0xf0] }
 0x3a3   :  { %5652 = vmatpush.bf16.msra.mxu2 %v8801_v13  ;;  %5639 = vmatpush.bf16.msra.mxu0 %v8001_v7  ;;  %v8313_v13 = vor.u32 %v9520_v39, %v8310_v19  ;;  %v8208_v7 = vld [vmem:[%s14480_s7 + $0x350] sm:$0xf] }
 0x3a4   :  { %5678 = vmatpush.bf16.msra.mxu1 %v8805_v14  ;;  %5665 = vmatpush.bf16.msra.mxu3 %v8005_v23  ;;  %v9507_v14 = vld [vmem:[%s14480_s7 + $0x3b0] sm:$0xf0]  ;;  %v7808_v19 = vld [vmem:[%s14480_s7 + $0x30] sm:$0xf] }
 0x3a5   :  { %v9495_v23 = vld [vmem:[%s14480_s7 + $0x354] sm:$0xf]  ;;  %v8209_v50 = vor.u32 %v9507_v14, %v8208_v7  ;;  %v7810_v7 = vld [vmem:[%s14480_s7 + $0x94] sm:$0xf0]  ;;  %v7809_v54 = vor.u32 %v9407_v27, %v7808_v19  ;;  %v9408_v27 = vld [vmem:[%s14480_s7 + $0x98] sm:$0xf0] }
 0x3a7   :  { %5653 = vmatpush.bf16.msra.mxu2 %v8701_v25  ;;  %5640 = vmatpush.bf16.msra.mxu0 %v7901_v17  ;;  %v8213_v25 = vor.u32 %v9495_v23, %v8210_v49  ;;  %v8608_v17 = vld [vmem:[%s14480_s7 + $0x670] sm:$0xf]  ;;  %v9496_v23 = vld [vmem:[%s14480_s7 + $0x35c] sm:$0xf]  ;;  %v8218_v49 = vld [vmem:[%s14480_s7 + $0x3bc] sm:$0xf0] }
 0x3a8   :  { %5679 = vmatpush.bf16.msra.mxu1 %v8705_v35  ;;  %5666 = vmatpush.bf16.msra.mxu3 %v7905_v57  ;;  %v9607_v35 = vld [vmem:[%s14480_s7 + $0x6d0] sm:$0xf0]  ;;  %v8610_v57 = vld [vmem:[%s14480_s7 + $0x6d4] sm:$0xf0] }
 0x3a9   :  { %v8609_v33 = vor.u32 %v9607_v35, %v8608_v17  ;;  %v8613_v26 = vor.u32 %v9595_v36, %v8610_v57  ;;  %v8221_v17 = vor.u32 %v9496_v23, %v8218_v49  ;;  %v9483_v35 = vld [vmem:[%s14480_s7 + $0x2f0] sm:$0xf0]  ;;  %v8118_v36 = vld [vmem:[%s14480_s7 + $0x2f4] sm:$0xf0]  ;;  %v9584_v49 = vld [vmem:[%s14480_s7 + $0x618] sm:$0xf0] }
 0x3aa   :  { %v8524_v23 = vld [vmem:[%s14480_s7 + $0x5b8] sm:$0xf] }
 0x3ab   :  { %5654 = vmatpush.bf16.msra.mxu2 %v8601_v47  ;;  %5641 = vmatpush.bf16.msra.mxu0 %v7801_v52  ;;  %v8008_v47 = vld [vmem:[%s14480_s7 + $0x1c0] sm:$0xf]  ;;  %v8517_v52 = vor.u32 %v9583_v41, %v8516_v59 }
 0x3ac   :  { %5680 = vmatpush.bf16.msra.mxu1 %v8605_v53  ;;  %5667 = vmatpush.bf16.msra.mxu3 %v7805_v55  ;;  %v9445_v53 = vld [vmem:[%s14480_s7 + $0x1c4] sm:$0xf]  ;;  %v3657_v55 = vld [vmem:[%s14480_s7 + $0x998] sm:$0x33]  ;;  %v8009_v32 = vor.u32 %v9457_v51, %v8008_v47  ;;  %v8121_v47 = vor.u32 %v9471_v21, %v8118_v36  ;;  %v9458_v51 = vld [vmem:[%s14480_s7 + $0x228] sm:$0xf0] }
 0x3ad   :  { %v8013_v60 = vor.u32 %v9445_v53, %v8010_v40  ;;  %v4661_v29 = vunpack.c.h.b16 %v3657_v55  ;;  %v9446_v53 = vld [vmem:[%s14480_s7 + $0x1cc] sm:$0xf]  ;;  %v8018_v40 = vld [vmem:[%s14480_s7 + $0x22c] sm:$0xf0] }
 0x3ae   :  { %5642 = vmatmul.bf16.vlgmr.msra.gmra.mxu0 %v12736_v44  ;;  %8968 = vmatmul.msk.bf16.vlgmr.msra.gmra.mxu2 %vm3250_vm2, %v12746_v48 }
 0x3af   :  { %5686 = vmatpush.bf16.msrb.mxu2 %v8509_v5  ;;  %5702 = vmatpush.bf16.msrb.mxu0 %v5336_v42  ;;  %v8521_v5 = vor.u32 %v9571_v22, %v8518_v31  ;;  %v8416_v42 = vld [vmem:[%s14480_s7 + $0x4e8] sm:$0xf] }
 0x3b0   :  { %5712 = vmatpush.bf16.msrb.mxu1 %v8513_v45  ;;  %5728 = vmatpush.bf16.msrb.mxu3 %v5339_v2  ;;  %v9558_v45 = vld [vmem:[%s14480_s7 + $0x548] sm:$0xf0]  ;;  %v4660_v2 = vunpack.c.l.b16 %v3657_v55  ;;  %v8016_v31 = vld [vmem:[%s14480_s7 + $0x1c8] sm:$0xf]  ;;  %v3658_v55 = vld [vmem:[%s14480_s7 + $0x9a0] sm:$0x33] }
 0x3b1   :  { %5668 = vmatmul.bf16.vlgmr.msra.gmra.mxu3 %v12736_v44  ;;  %8969 = vmatmul.msk.bf16.vlgmr.msra.gmra.mxu1 %vm3250_vm2, %v12746_v48  ;;  %v8417_v37 = vor.u32 %v9558_v45, %v8416_v42  ;;  %v8017_v42 = vor.u32 %v9458_v51, %v8016_v31  ;;  %v8924_v31 = vld [vmem:[%s14480_s7 + $0x8d8] sm:$0xf] }
 0x3b2   :  { %v4985_v3 = vpack.c.b16 %v4660_v2, %v4660_v2  ;;  %v9621_v2 = vld [vmem:[%s14480_s7 + $0x744] sm:$0xf]  ;;  %v8426_v51 = vld [vmem:[%s14480_s7 + $0x554] sm:$0xf0] }
 0x3b3   :  { %5687 = vmatpush.bf16.msrb.mxu2 %v8409_v4  ;;  %5703 = vmatpush.bf16.msrb.mxu0 %v8909_v43  ;;  %v9420_v4 = vld [vmem:[%s14480_s7 + $0xfc] sm:$0xf]  ;;  %v7910_v43 = vld [vmem:[%s14480_s7 + $0x15c] sm:$0xf0] }
 0x3b4   :  { %5713 = vmatpush.bf16.msrb.mxu1 %v8413_v62  ;;  %5729 = vmatpush.bf16.msrb.mxu3 %v8913_v6  ;;  %v8421_v62 = vor.u32 %v9546_v56, %v8418_v58  ;;  %v9521_v6 = vld [vmem:[%s14480_s7 + $0x424] sm:$0xf]  ;;  %v7913_v39 = vor.u32 %v9420_v4, %v7910_v43  ;;  %v5342_v9 = vsel %vm3254_vm1, %v4985_v3, 0  ;;  %v8716_v56 = vld [vmem:[%s14480_s7 + $0x740] sm:$0xf] }
 0x3b5   :  { %v8321_v14 = vor.u32 %v9521_v6, %v8318_v18  ;;  %v9633_v58 = vld [vmem:[%s14480_s7 + $0x7a0] sm:$0xf0]  ;;  %v7816_v6 = vld [vmem:[%s14480_s7 + $0x38] sm:$0xf] }
 0x3b6   :  { %v9421_v43 = vld [vmem:[%s14480_s7 + $0x104] sm:$0xf]  ;;  %v8616_v3 = vld [vmem:[%s14480_s7 + $0x678] sm:$0xf] }
 0x3b7   :  { %5688 = vmatpush.bf16.msrb.mxu2 %v8309_v12  ;;  %5704 = vmatpush.bf16.msrb.mxu0 %v8809_v10  ;;  %v4986_v12 = vpack.c.b16 %v4661_v29, %v4661_v29  ;;  %v8317_v10 = vor.u32 %v9533_v20, %v8316_v8  ;;  %v8718_v29 = vld [vmem:[%s14480_s7 + $0x7a4] sm:$0xf0]  ;;  %v13649_v8 = vld [vmem:[%s14482_s8] sm:$0xff] }
 0x3b8   :  { %5714 = vmatpush.bf16.msrb.mxu1 %v8313_v13  ;;  %5730 = vmatpush.bf16.msrb.mxu3 %v8813_v16  ;;  %v9395_v13 = vld [vmem:[%s14480_s7 + $0x34] sm:$0xf]  ;;  %v9508_v16 = vld [vmem:[%s14480_s7 + $0x3b8] sm:$0xf0]  ;;  %v8721_v19 = vor.u32 %v9621_v2, %v8718_v29 }
 0x3b9   :  { %v7813_v24 = vor.u32 %v9395_v13, %v7810_v7  ;;  %v8217_v28 = vor.u32 %v9508_v16, %v8216_v30  ;;  %v9396_v7 = vld [vmem:[%s14480_s7 + $0x3c] sm:$0xf]  ;;  %v8618_v30 = vld [vmem:[%s14480_s7 + $0x6dc] sm:$0xf0]  ;;  %v9659_v29 = vld [vmem:[%s14480_s7 + $0x870] sm:$0xf0] }
 0x3bb   :  { %5689 = vmatpush.bf16.msrb.mxu2 %v8209_v50  ;;  %5705 = vmatpush.bf16.msrb.mxu0 %v8709_v15  ;;  %v5345_v50 = vsel %vm3254_vm1, %v4986_v12, 0  ;;  %v8116_v15 = vld [vmem:[%s14480_s7 + $0x290] sm:$0xf]  ;;  %v9608_v12 = vld [vmem:[%s14480_s7 + $0x6d8] sm:$0xf0] }
 0x3bc   :  { %5715 = vmatpush.bf16.msrb.mxu1 %v8213_v25  ;;  %5731 = vmatpush.bf16.msrb.mxu3 %v8713_v0  ;;  %v8916_v25 = vld [vmem:[%s14480_s7 + $0x8d0] sm:$0xf]  ;;  %v9671_v0 = vld [vmem:[%s14480_s7 + $0x8d4] sm:$0xf] }
 0x3bd   :  { %v8917_v59 = vor.u32 %v9683_v34, %v8916_v25  ;;  %v8921_v22 = vor.u32 %v9671_v0, %v8918_v63  ;;  %v7817_v25 = vor.u32 %v9408_v27, %v7816_v6  ;;  %v8525_v0 = vor.u32 %v9584_v49, %v8524_v23 }
 0x3bf   :  { %5690 = vmatpush.bf16.msrb.mxu2 %v8109_v38  ;;  %5706 = vmatpush.bf16.msrb.mxu0 %v8609_v33  ;;  %v8117_v38 = vor.u32 %v9483_v35, %v8116_v15  ;;  %v8816_v33 = vld [vmem:[%s14480_s7 + $0x808] sm:$0xf]  ;;  %v3671_v15 = vperm.slane %v13649_v8, 0 }
 0x3c0   :  { %5716 = vmatpush.bf16.msrb.mxu1 %v8113_v46  ;;  %5732 = vmatpush.bf16.msrb.mxu3 %v8613_v26  ;;  %v9658_v46 = vld [vmem:[%s14480_s7 + $0x868] sm:$0xf0] }
 0x3c1   :  { %v9646_v26 = vld [vmem:[%s14480_s7 + $0x80c] sm:$0xf] }
 0x3c2   :  { %8970 = vmatmul.msk.bf16.vlgmr.msrb.gmra.mxu0 %vm3250_vm2, %v12746_v48  ;;  %v13587_v57 = vpop.f32.mrf.mxu1 }
 0x3c3   :  { %5738 = vmatpush.bf16.msra.mxu0 %v8517_v52  ;;  %5691 = vmatpush.bf16.msrb.mxu2 %v8009_v32  ;;  %v13589_v41 = vpop.f32.mrf.mxu0  ;;  %v8818_v52 = vld [vmem:[%s14480_s7 + $0x86c] sm:$0xf0]  ;;  %v7916_v32 = vld [vmem:[%s14480_s7 + $0x100] sm:$0xf] }
 0x3c4   :  { %5764 = vmatpush.bf16.msra.mxu3 %v8521_v5  ;;  %5717 = vmatpush.bf16.msrb.mxu1 %v8013_v60  ;;  %v8817_v5 = vor.u32 %v9658_v46, %v8816_v33  ;;  %v8821_v45 = vor.u32 %v9646_v26, %v8818_v52  ;;  %v8021_v60 = vor.u32 %v9446_v53, %v8018_v40  ;;  %v9684_v46 = vld [vmem:[%s14480_s7 + $0x938] sm:$0xf0] }
 0x3c5   :  { %8971 = vmatmul.msk.bf16.vlgmr.msrb.gmra.mxu3 %vm3250_vm2, %v12746_v48 }
 0x3c7   :  { %5739 = vmatpush.bf16.msra.mxu0 %v8417_v37  ;;  %5692 = vmatpush.bf16.msrb.mxu2 %v7909_v11  ;;  %v4662_v37 = vunpack.c.l.b16 %v3658_v55  ;;  %v8717_v11 = vor.u32 %v9633_v58, %v8716_v56  ;;  %v8925_v56 = vor.u32 %v9684_v46, %v8924_v31  ;;  %v9585_v31 = vld [vmem:[%s14480_s7 + $0x620] sm:$0xf0] }
 0x3c8   :  { %5765 = vmatpush.bf16.msra.mxu3 %v8421_v62  ;;  %5718 = vmatpush.bf16.msrb.mxu1 %v7913_v39  ;;  %v5383_v61 = vpop.f32.mrf.mxu3  ;;  %v7918_v62 = vld [vmem:[%s14480_s7 + $0x164] sm:$0xf0]  ;;  %v7917_v39 = vor.u32 %v9433_v1, %v7916_v32  ;;  %v3674_v1 = vperm.slane %v13649_v8, 3 }
 0x3c9   :  { %v13638_v4 = vpop.f32.mrf.mxu2  ;;  %v7921_v13 = vor.u32 %v9421_v43, %v7918_v62  ;;  %v4987_v16 = vpack.c.b16 %v4662_v37, %v4662_v37  ;;  %v5384_v52 = vadd.f32 %v5383_v61, %v3671_v15  ;;  %v8824_v61 = vld [vmem:[%s14480_s7 + $0x810] sm:$0xf]  ;;  %v9522_v37 = vld [vmem:[%s14480_s7 + $0x42c] sm:$0xf]  ;;  %v9647_v62 = vld [vmem:[%s14480_s7 + $0x814] sm:$0xf] }
 0x3ca   :  { %v5411_v20 = vpop.f32.mrf.mxu1 }
 0x3cb   :  { %5740 = vmatpush.bf16.msra.mxu0 %v8317_v10  ;;  %5693 = vmatpush.bf16.msrb.mxu2 %v7809_v54  ;;  %v5398_v18 = vpop.f32.mrf.mxu0  ;;  %v4663_v10 = vunpack.c.h.b16 %v3658_v55  ;;  %v7818_v54 = vld [vmem:[%s14480_s7 + $0x9c] sm:$0xf0]  ;;  %v5348_v63 = vsel %vm3254_vm1, %v4987_v16, 0  ;;  %v9672_v55 = vld [vmem:[%s14480_s7 + $0x8dc] sm:$0xf]  ;;  %v5397_v43 = vadd.f32 %v13589_v41, %v5384_v52 }
 0x3cc   :  { %5766 = vmatpush.bf16.msra.mxu3 %v8321_v14  ;;  %5719 = vmatpush.bf16.msrb.mxu1 %v7813_v24  ;;  %v9596_v14 = vld [vmem:[%s14480_s7 + $0x67c] sm:$0xf]  ;;  %v3672_v24 = vperm.slane %v13649_v8, 1  ;;  %v7821_v35 = vor.u32 %v9396_v7, %v7818_v54  ;;  %v8826_v20 = vld [vmem:[%s14480_s7 + $0x874] sm:$0xf0]  ;;  %v8825_v18 = vor.u32 %v9659_v29, %v8824_v61 }
 0x3cd   :  { %v8621_v34 = vor.u32 %v9596_v14, %v8618_v30  ;;  %v9634_v30 = vld [vmem:[%s14480_s7 + $0x7a8] sm:$0xf0]  ;;  %v9497_v16 = vld [vmem:[%s14480_s7 + $0x364] sm:$0xf]  ;;  %v8226_v54 = vld [vmem:[%s14480_s7 + $0x3c4] sm:$0xf0] }
 0x3ce   :  { %5694 = vmatmul.bf16.vlgmr.msrb.gmra.mxu2 %v12736_v44  ;;  %v5410_v26 = vadd.f32 %v13587_v57, %v3672_v24  ;;  %v8324_v57 = vld [vmem:[%s14480_s7 + $0x428] sm:$0xf]  ;;  %v9622_v24 = vld [vmem:[%s14480_s7 + $0x74c] sm:$0xf]  ;;  %v9560_v29 = vld [vmem:[%s14480_s7 + $0x558] sm:$0xf0] }
 0x3cf   :  { %5754 = vmatpush.bf16.msra.mxu2 %v5342_v9  ;;  %5741 = vmatpush.bf16.msra.mxu0 %v8217_v28  ;;  %v8617_v9 = vor.u32 %v9608_v12, %v8616_v3  ;;  %v8526_v28 = vld [vmem:[%s14480_s7 + $0x61c] sm:$0xf0]  ;;  %v9509_v12 = vld [vmem:[%s14480_s7 + $0x3c0] sm:$0xf0] }
 0x3d0   :  { %5780 = vmatpush.bf16.msra.mxu1 %v5345_v50  ;;  %5767 = vmatpush.bf16.msra.mxu3 %v8221_v17  ;;  %v9572_v50 = vld [vmem:[%s14480_s7 + $0x5bc] sm:$0xf]  ;;  %v4988_v17 = vpack.c.b16 %v4663_v10, %v4663_v10  ;;  %v5385_v21 = vpop.f32.mrf.mxu3  ;;  %v5423_v32 = vadd.f32 %v13638_v4, %v5410_v26  ;;  %v8326_v4 = vld [vmem:[%s14480_s7 + $0x48c] sm:$0xf0]  ;;  %v8224_v3 = vld [vmem:[%s14480_s7 + $0x360] sm:$0xf] }
 0x3d1   :  { %5720 = vmatmul.bf16.vlgmr.msrb.gmra.mxu1 %v12736_v44  ;;  %v8529_v36 = vor.u32 %v9572_v50, %v8526_v28  ;;  %v8724_v10 = vld [vmem:[%s14480_s7 + $0x748] sm:$0xf]  ;;  %v8225_v50 = vor.u32 %v9509_v12, %v8224_v3  ;;  %v8124_v28 = vld [vmem:[%s14480_s7 + $0x298] sm:$0xf]  ;;  %v8126_v21 = vld [vmem:[%s14480_s7 + $0x2fc] sm:$0xf0] }
 0x3d2   :  { %v5474_v33 = vpop.f32.mrf.mxu1  ;;  %v5351_v53 = vsel %vm3254_vm1, %v4988_v17, 0  ;;  %9701 = vtanh.f32 %v5423_v32  ;;  %v8725_v15 = vor.u32 %v9634_v30, %v8724_v10  ;;  %v8624_v17 = vld [vmem:[%s14480_s7 + $0x680] sm:$0xf] }
 0x3d3   :  { %5755 = vmatpush.bf16.msra.mxu2 %v8917_v59  ;;  %5742 = vmatpush.bf16.msra.mxu0 %v8117_v38  ;;  %v5424_v59 = vpop.f32.mrf.mxu2  ;;  %v8424_v38 = vld [vmem:[%s14480_s7 + $0x4f0] sm:$0xf]  ;;  %v5435_v40 = vpop.f32.mrf.mxu0  ;;  %9703 = vtanh.f32 %v5397_v43 }
 0x3d4   :  { %5781 = vmatpush.bf16.msra.mxu1 %v8921_v22  ;;  %5768 = vmatpush.bf16.msra.mxu3 %v8121_v47  ;;  %v9559_v22 = vld [vmem:[%s14480_s7 + $0x550] sm:$0xf0] }
 0x3d5   :  { %v9547_v47 = vld [vmem:[%s14480_s7 + $0x4f4] sm:$0xf] }
 0x3d6   :  { %v8429_v58 = vor.u32 %v9547_v47, %v8426_v51  ;;  %v9573_v47 = vld [vmem:[%s14480_s7 + $0x5c4] sm:$0xf]  ;;  %v8534_v51 = vld [vmem:[%s14480_s7 + $0x624] sm:$0xf0] }
 0x3d7   :  { %5756 = vmatpush.bf16.msra.mxu2 %v8817_v5  ;;  %5743 = vmatpush.bf16.msra.mxu0 %v8017_v42  ;;  %v8926_v5 = vld [vmem:[%s14480_s7 + $0x93c] sm:$0xf0]  ;;  %v3673_v42 = vperm.slane %v13649_v8, 2 }
 0x3d8   :  { %5782 = vmatpush.bf16.msra.mxu1 %v8821_v45  ;;  %5769 = vmatpush.bf16.msra.mxu3 %v8021_v60  ;;  %v8425_v45 = vor.u32 %v9559_v22, %v8424_v38  ;;  %v9534_v60 = vld [vmem:[%s14480_s7 + $0x488] sm:$0xf0]  ;;  %v8929_v2 = vor.u32 %v9672_v55, %v8926_v5  ;;  %v5461_v41 = vpop.f32.mrf.mxu3  ;;  %v9702_v59 = vpop.eup %9701  ;;  %v8626_v38 = vld [vmem:[%s14480_s7 + $0x6e4] sm:$0xf0]  ;;  %v8532_v22 = vld [vmem:[%s14480_s7 + $0x5c0] sm:$0xf] }
 0x3d9   :  { %v8325_v6 = vor.u32 %v9534_v60, %v8324_v57  ;;  %v5462_v27 = vadd.f32 %v5461_v41, %v3674_v1  ;;  %v9704_v26 = vpop.eup %9703  ;;  %v8024_v55 = vld [vmem:[%s14480_s7 + $0x1d0] sm:$0xf]  ;;  %v9459_v5 = vld [vmem:[%s14480_s7 + $0x230] sm:$0xf0]  ;;  %v6073_v57 = vrot.slane %v9702_v59, 6  ;;  %v8537_v1 = vor.u32 %v9573_v47, %v8534_v51 }
 0x3da   :  { %v5476_v14 = vpop.f32.mrf.mxu1  ;;  %v3659_v60 = vld [vmem:[%s14480_s7 + $0x9a8] sm:$0x33] }
 0x3db   :  { %5757 = vmatpush.bf16.msra.mxu2 %v8717_v11  ;;  %5744 = vmatpush.bf16.msra.mxu0 %v7917_v39  ;;  %v5436_v11 = vadd.f32 %v5435_v40, %v3673_v42  ;;  %v8329_v39 = vor.u32 %v9522_v37, %v8326_v4  ;;  %v5475_v23 = vadd.f32 %v5474_v33, %v5462_v27  ;;  %v5437_v49 = vpop.f32.mrf.mxu0  ;;  %v9447_v42 = vld [vmem:[%s14480_s7 + $0x1d4] sm:$0xf]  ;;  %v4665_v27 = vunpack.c.h.b16 %v3659_v60  ;;  %v9510_v59 = vld [vmem:[%s14480_s7 + $0x3c8] sm:$0xf0] }
 0x3dc   :  { %5783 = vmatpush.bf16.msra.mxu1 %v8721_v19  ;;  %5770 = vmatpush.bf16.msra.mxu3 %v7921_v13  ;;  %v5448_v19 = vpop.f32.mrf.mxu2  ;;  %v8829_v13 = vor.u32 %v9647_v62, %v8826_v20  ;;  %v8025_v20 = vor.u32 %v9459_v5, %v8024_v55  ;;  %v6091_v3 = vsel %vm3254_vm1, %v9704_v26, %v6073_v57  ;;  %v9523_v49 = vld [vmem:[%s14480_s7 + $0x434] sm:$0xf]  ;;  %v9685_v55 = vld [vmem:[%s14480_s7 + $0x940] sm:$0xf0]  ;;  %v8934_v57 = vld [vmem:[%s14480_s7 + $0x944] sm:$0xf0] }
 0x3dd   :  { %v5449_v7 = vadd.f32 %v5448_v19, %v5436_v11  ;;  %v9548_v11 = vld [vmem:[%s14480_s7 + $0x4fc] sm:$0xf]  ;;  %v4664_v19 = vunpack.c.l.b16 %v3659_v60  ;;  %v3675_v60 = vperm.slane %v13649_v8, 4 }
 0x3df   :  { %5758 = vmatpush.bf16.msra.mxu2 %v8617_v9  ;;  %5745 = vmatpush.bf16.msra.mxu0 %v7817_v25  ;;  %v8726_v9 = vld [vmem:[%s14480_s7 + $0x7ac] sm:$0xf0]  ;;  %9705 = vtanh.f32 %v5449_v7  ;;  %v8229_v25 = vor.u32 %v9497_v16, %v8226_v54  ;;  %v9535_v54 = vld [vmem:[%s14480_s7 + $0x490] sm:$0xf0] }
 0x3e0   :  { %5784 = vmatpush.bf16.msra.mxu1 %v8621_v34  ;;  %5771 = vmatpush.bf16.msra.mxu3 %v7821_v35  ;;  %9707 = vtanh.f32 %v5475_v23  ;;  %v9484_v34 = vld [vmem:[%s14480_s7 + $0x2f8] sm:$0xf0]  ;;  %v9609_v35 = vld [vmem:[%s14480_s7 + $0x6e0] sm:$0xf0]  ;;  %v5463_v46 = vpop.f32.mrf.mxu3  ;;  %v7926_v7 = vld [vmem:[%s14480_s7 + $0x16c] sm:$0xf0] }
 0x3e1   :  { %v8125_v33 = vor.u32 %v9484_v34, %v8124_v28  ;;  %v8625_v52 = vor.u32 %v9609_v35, %v8624_v17  ;;  %v8332_v16 = vld [vmem:[%s14480_s7 + $0x430] sm:$0xf]  ;;  %v7824_v28 = vld [vmem:[%s14480_s7 + $0x40] sm:$0xf]  ;;  %v4990_v34 = vpack.c.b16 %v4665_v27, %v4665_v27  ;;  %v9397_v35 = vld [vmem:[%s14480_s7 + $0x44] sm:$0xf] }
 0x3e2   :  { %5746 = vmatmul.bf16.vlgmr.msra.gmra.mxu0 %v12736_v44  ;;  %8972 = vmatmul.msk.bf16.vlgmr.msra.gmra.mxu2 %vm3250_vm2, %v12746_v48  ;;  %v8333_v17 = vor.u32 %v9535_v54, %v8332_v16  ;;  %v8234_v46 = vld [vmem:[%s14480_s7 + $0x3cc] sm:$0xf0]  ;;  %v8034_v27 = vld [vmem:[%s14480_s7 + $0x23c] sm:$0xf0]  ;;  %v9635_v54 = vld [vmem:[%s14480_s7 + $0x7b0] sm:$0xf0] }
 0x3e3   :  { %5790 = vmatpush.bf16.msrb.mxu2 %v8525_v0  ;;  %5806 = vmatpush.bf16.msrb.mxu0 %v5348_v63  ;;  %v8729_v0 = vor.u32 %v9622_v24, %v8726_v9  ;;  %v9472_v63 = vld [vmem:[%s14480_s7 + $0x29c] sm:$0xf]  ;;  %v13831_v43 = vpop.f32.mrf.mxu0  ;;  %v8334_v24 = vld [vmem:[%s14480_s7 + $0x494] sm:$0xf0]  ;;  %v5357_v26 = vsel %vm3254_vm1, %v4990_v34, 0 }
 0x3e4   :  { %5816 = vmatpush.bf16.msrb.mxu1 %v8529_v36  ;;  %5832 = vmatpush.bf16.msrb.mxu3 %v5351_v53  ;;  %v9597_v36 = vld [vmem:[%s14480_s7 + $0x684] sm:$0xf]  ;;  %v8129_v53 = vor.u32 %v9472_v63, %v8126_v21  ;;  %v5450_v40 = vpop.f32.mrf.mxu2  ;;  %v8337_v21 = vor.u32 %v9523_v49, %v8334_v24  ;;  %v8732_v16 = vld [vmem:[%s14480_s7 + $0x750] sm:$0xf] }
 0x3e5   :  { %5772 = vmatmul.bf16.vlgmr.msra.gmra.mxu3 %v12736_v44  ;;  %8973 = vmatmul.msk.bf16.vlgmr.msra.gmra.mxu1 %vm3250_vm2, %v12746_v48  ;;  %v8629_v32 = vor.u32 %v9597_v36, %v8626_v38  ;;  %v8232_v36 = vld [vmem:[%s14480_s7 + $0x368] sm:$0xf]  ;;  %v8932_v40 = vld [vmem:[%s14480_s7 + $0x8e0] sm:$0xf] }
 0x3e6   :  { %v13833_v62 = vpop.f32.mrf.mxu1 }
 0x3e7   :  { %5791 = vmatpush.bf16.msrb.mxu2 %v8425_v45  ;;  %5807 = vmatpush.bf16.msrb.mxu0 %v8925_v56  ;;  %v9706_v45 = vpop.eup %9705  ;;  %v8533_v56 = vor.u32 %v9585_v31, %v8532_v22 }
 0x3e8   :  { %5817 = vmatpush.bf16.msrb.mxu1 %v8429_v58  ;;  %5833 = vmatpush.bf16.msrb.mxu3 %v8929_v2  ;;  %v8026_v58 = vld [vmem:[%s14480_s7 + $0x234] sm:$0xf0]  ;;  %v9708_v61 = vpop.eup %9707  ;;  %v6074_v37 = vrot.slane %v9706_v45, 4  ;;  %v13889_v63 = vpop.f32.mrf.mxu3  ;;  %v9673_v45 = vld [vmem:[%s14480_s7 + $0x8e4] sm:$0xf] }
 0x3e9   :  { %v8432_v2 = vld [vmem:[%s14480_s7 + $0x4f8] sm:$0xf]  ;;  %v6075_v4 = vrot.slane %v9708_v61, 2  ;;  %v8029_v41 = vor.u32 %v9447_v42, %v8026_v58  ;;  %v9485_v42 = vld [vmem:[%s14480_s7 + $0x300] sm:$0xf0]  ;;  %v3676_v58 = vperm.slane %v13649_v8, 5 }
 0x3ea   :  { %v8433_v10 = vor.u32 %v9560_v29, %v8432_v2  ;;  %v8937_v29 = vor.u32 %v9673_v45, %v8934_v57  ;;  %v9586_v45 = vld [vmem:[%s14480_s7 + $0x628] sm:$0xf0] }
 0x3eb   :  { %5792 = vmatpush.bf16.msrb.mxu2 %v8325_v6  ;;  %5808 = vmatpush.bf16.msrb.mxu0 %v8825_v18  ;;  %v8434_v6 = vld [vmem:[%s14480_s7 + $0x55c] sm:$0xf0]  ;;  %v7924_v18 = vld [vmem:[%s14480_s7 + $0x108] sm:$0xf]  ;;  %v6093_v12 = vsel %vm6092_vm4, %v6074_v37, %v6075_v4  ;;  %v5502_v38 = vpop.f32.mrf.mxu0  ;;  %v8032_v37 = vld [vmem:[%s14480_s7 + $0x1d8] sm:$0xf] }
 0x3ec   :  { %5818 = vmatpush.bf16.msrb.mxu1 %v8329_v39  ;;  %5834 = vmatpush.bf16.msrb.mxu3 %v8829_v13  ;;  %v9434_v39 = vld [vmem:[%s14480_s7 + $0x168] sm:$0xf0]  ;;  %v6095_v14 = vsel %vm6094_vm5, %v6091_v3, %v6093_v12  ;;  %v8437_v30 = vor.u32 %v9548_v11, %v8434_v6  ;;  %v8832_v4 = vld [vmem:[%s14480_s7 + $0x818] sm:$0xf]  ;;  %v13960_v3 = vld [vmem:[%s14480_s7 + $0x9b0] sm:$0x33] }
 0x3ed   :  { %v9422_v13 = vld [vmem:[%s14480_s7 + $0x10c] sm:$0xf]  ;;  %6117 = vst [vmem:[%s14483_s9] sm:$0xff] %v6095_v14  ;;  %v7925_v23 = vor.u32 %v9434_v39, %v7924_v18  ;;  %v9648_v18 = vld [vmem:[%s14480_s7 + $0x81c] sm:$0xf]  ;;  %v8834_v39 = vld [vmem:[%s14480_s7 + $0x87c] sm:$0xf0] }
 0x3ee   :  { %v7929_v9 = vor.u32 %v9422_v13, %v7926_v7  ;;  %v5515_v22 = vpop.f32.mrf.mxu1  ;;  %v3677_v12 = vperm.slane %v13649_v8, 6  ;;  %v8837_v14 = vor.u32 %v9648_v18, %v8834_v39  ;;  %v8940_v18 = vld [vmem:[%s14480_s7 + $0x8e8] sm:$0xf]  ;;  %v9686_v39 = vld [vmem:[%s14480_s7 + $0x948] sm:$0xf0] }
 0x3ef   :  { %5793 = vmatpush.bf16.msrb.mxu2 %v8225_v50  ;;  %5809 = vmatpush.bf16.msrb.mxu0 %v8725_v15  ;;  %v13875_v50 = vpop.f32.mrf.mxu2  ;;  %v9409_v15 = vld [vmem:[%s14480_s7 + $0xa0] sm:$0xf0]  ;;  %v9398_v22 = vld [vmem:[%s14480_s7 + $0x4c] sm:$0xf] }
 0x3f0   :  { %5819 = vmatpush.bf16.msrb.mxu1 %v8229_v25  ;;  %5835 = vmatpush.bf16.msrb.mxu3 %v8729_v0  ;;  %v4989_v25 = vpack.c.b16 %v4664_v19, %v4664_v19  ;;  %v7826_v0 = vld [vmem:[%s14480_s7 + $0xa4] sm:$0xf0]  ;;  %v7825_v31 = vor.u32 %v9409_v15, %v7824_v28  ;;  %v5528_v11 = vpop.f32.mrf.mxu3  ;;  %v9448_v19 = vld [vmem:[%s14480_s7 + $0x1dc] sm:$0xf]  ;;  %v9623_v28 = vld [vmem:[%s14480_s7 + $0x754] sm:$0xf]  ;;  %v5488_v34 = vadd.f32 %v13875_v50, %v3675_v60 }
 0x3f1   :  { %v7829_v47 = vor.u32 %v9397_v35, %v7826_v0  ;;  %v8037_v24 = vor.u32 %v9448_v19, %v8034_v27  ;;  %v8734_v15 = vld [vmem:[%s14480_s7 + $0x7b4] sm:$0xf0]  ;;  %v3678_v0 = vperm.slane %v13649_v8, 7  ;;  %v9410_v50 = vld [vmem:[%s14480_s7 + $0xa8] sm:$0xf0] }
 0x3f2   :  { %v5354_v51 = vsel %vm3254_vm1, %v4989_v25, 0  ;;  %v4666_v25 = vunpack.c.l.b16 %v13960_v3  ;;  %v8737_v38 = vor.u32 %v9623_v28, %v8734_v15  ;;  %v9610_v8 = vld [vmem:[%s14480_s7 + $0x6e8] sm:$0xf0]  ;;  %v8542_v60 = vld [vmem:[%s14480_s7 + $0x62c] sm:$0xf0] }
 0x3f3   :  { %5794 = vmatpush.bf16.msrb.mxu2 %v8125_v33  ;;  %5810 = vmatpush.bf16.msrb.mxu0 %v8625_v52  ;;  %v9498_v33 = vld [vmem:[%s14480_s7 + $0x36c] sm:$0xf]  ;;  %v8233_v52 = vor.u32 %v9510_v59, %v8232_v36  ;;  %v7832_v36 = vld [vmem:[%s14480_s7 + $0x48] sm:$0xf]  ;;  %v9549_v19 = vld [vmem:[%s14480_s7 + $0x504] sm:$0xf] }
 0x3f4   :  { %5820 = vmatpush.bf16.msrb.mxu1 %v8129_v53  ;;  %5836 = vmatpush.bf16.msrb.mxu3 %v8629_v32  ;;  %v8132_v53 = vld [vmem:[%s14480_s7 + $0x2a0] sm:$0xf]  ;;  %v8237_v5 = vor.u32 %v9498_v33, %v8234_v46  ;;  %v9473_v32 = vld [vmem:[%s14480_s7 + $0x2a4] sm:$0xf]  ;;  %v8442_v27 = vld [vmem:[%s14480_s7 + $0x564] sm:$0xf0] }
 0x3f5   :  { %v8133_v2 = vor.u32 %v9485_v42, %v8132_v53  ;;  %v5501_v53 = vadd.f32 %v13831_v43, %v5488_v34  ;;  %v8540_v42 = vld [vmem:[%s14480_s7 + $0x5c8] sm:$0xf]  ;;  %v9574_v43 = vld [vmem:[%s14480_s7 + $0x5cc] sm:$0xf]  ;;  %v9661_v15 = vld [vmem:[%s14480_s7 + $0x880] sm:$0xf0] }
 0x3f6   :  { %8974 = vmatmul.msk.bf16.vlgmr.msrb.gmra.mxu0 %vm3250_vm2, %v12746_v48  ;;  %v8545_v11 = vor.u32 %v9574_v43, %v8542_v60  ;;  %v8342_v34 = vld [vmem:[%s14480_s7 + $0x49c] sm:$0xf0]  ;;  %v9611_v43 = vld [vmem:[%s14480_s7 + $0x6f0] sm:$0xf0] }
 0x3f7   :  { %5842 = vmatpush.bf16.msra.mxu0 %v8533_v56  ;;  %5795 = vmatpush.bf16.msrb.mxu2 %v8025_v20  ;;  %v8134_v56 = vld [vmem:[%s14480_s7 + $0x304] sm:$0xf0]  ;;  %v5489_v61 = vpop.f32.mrf.mxu2  ;;  %v9660_v20 = vld [vmem:[%s14480_s7 + $0x878] sm:$0xf0] }
 0x3f8   :  { %5868 = vmatpush.bf16.msra.mxu3 %v8537_v1  ;;  %5821 = vmatpush.bf16.msrb.mxu1 %v8029_v41  ;;  %v8933_v1 = vor.u32 %v9685_v55, %v8932_v40  ;;  %v8137_v6 = vor.u32 %v9473_v32, %v8134_v56  ;;  %v9460_v41 = vld [vmem:[%s14480_s7 + $0x238] sm:$0xf0]  ;;  %v8833_v13 = vor.u32 %v9660_v20, %v8832_v4 }
 0x3f9   :  { %8975 = vmatmul.msk.bf16.vlgmr.msrb.gmra.mxu3 %vm3250_vm2, %v12746_v48  ;;  %v8033_v7 = vor.u32 %v9460_v41, %v8032_v37  ;;  %v8541_v4 = vor.u32 %v9586_v45, %v8540_v42  ;;  %v9561_v41 = vld [vmem:[%s14480_s7 + $0x560] sm:$0xf0]  ;;  %v8140_v45 = vld [vmem:[%s14480_s7 + $0x2a8] sm:$0xf] }
 0x3fa   :  { %v5578_v49 = vpop.f32.mrf.mxu1 }
 0x3fb   :  { %5843 = vmatpush.bf16.msra.mxu0 %v8433_v10  ;;  %5796 = vmatpush.bf16.msrb.mxu2 %v7925_v23  ;;  %v5539_v10 = vpop.f32.mrf.mxu0  ;;  %v5514_v23 = vadd.f32 %v13833_v62, %v3676_v58  ;;  %v9423_v62 = vld [vmem:[%s14480_s7 + $0x114] sm:$0xf] }
 0x3fc   :  { %5869 = vmatpush.bf16.msra.mxu3 %v8437_v30  ;;  %5822 = vmatpush.bf16.msrb.mxu1 %v7929_v9  ;;  %v7932_v30 = vld [vmem:[%s14480_s7 + $0x110] sm:$0xf]  ;;  %v9435_v9 = vld [vmem:[%s14480_s7 + $0x170] sm:$0xf0]  ;;  %v5540_v33 = vadd.f32 %v5539_v10, %v3677_v12  ;;  %v9674_v12 = vld [vmem:[%s14480_s7 + $0x8ec] sm:$0xf] }
 0x3fd   :  { %v5527_v35 = vadd.f32 %v13889_v63, %v5514_v23  ;;  %v7933_v59 = vor.u32 %v9435_v9, %v7932_v30  ;;  %v8632_v63 = vld [vmem:[%s14480_s7 + $0x688] sm:$0xf]  ;;  %v8942_v10 = vld [vmem:[%s14480_s7 + $0x94c] sm:$0xf0]  ;;  %v8340_v23 = vld [vmem:[%s14480_s7 + $0x438] sm:$0xf] }
 0x3fe   :  { %v8633_v58 = vor.u32 %v9610_v8, %v8632_v63  ;;  %v8945_v28 = vor.u32 %v9674_v12, %v8942_v10 }
 0x3ff   :  { %5844 = vmatpush.bf16.msra.mxu0 %v8333_v17  ;;  %5797 = vmatpush.bf16.msrb.mxu2 %v7825_v31  ;;  %v7934_v17 = vld [vmem:[%s14480_s7 + $0x174] sm:$0xf0]  ;;  %v4667_v31 = vunpack.c.h.b16 %v13960_v3  ;;  %v5552_v40 = vpop.f32.mrf.mxu2  ;;  %9709 = vtanh.f32 %v5527_v35  ;;  %v9649_v35 = vld [vmem:[%s14480_s7 + $0x824] sm:$0xf] }
 0x400   :  { %5870 = vmatpush.bf16.msra.mxu3 %v8337_v21  ;;  %5823 = vmatpush.bf16.msrb.mxu1 %v7829_v47  ;;  %v8733_v21 = vor.u32 %v9635_v54, %v8732_v16  ;;  %v7937_v46 = vor.u32 %v9423_v62, %v7934_v17  ;;  %v7834_v47 = vld [vmem:[%s14480_s7 + $0xac] sm:$0xf0]  ;;  %v5565_v55 = vpop.f32.mrf.mxu3  ;;  %v5553_v57 = vadd.f32 %v5552_v40, %v5540_v33  ;;  %v8740_v33 = vld [vmem:[%s14480_s7 + $0x758] sm:$0xf]  ;;  %v9624_v40 = vld [vmem:[%s14480_s7 + $0x75c] sm:$0xf] }
 0x401   :  { %v5566_v32 = vadd.f32 %v5565_v55, %v3678_v0  ;;  %v7837_v61 = vor.u32 %v9398_v22, %v7834_v47  ;;  %v8941_v16 = vor.u32 %v9686_v39, %v8940_v18  ;;  %v8445_v54 = vor.u32 %v9549_v19, %v8442_v27  ;;  %v8842_v0 = vld [vmem:[%s14480_s7 + $0x884] sm:$0xf0]  ;;  %v9636_v47 = vld [vmem:[%s14480_s7 + $0x7b8] sm:$0xf0]  ;;  %v8742_v55 = vld [vmem:[%s14480_s7 + $0x7bc] sm:$0xf0] }
 0x402   :  { %5798 = vmatmul.bf16.vlgmr.msrb.gmra.mxu2 %v12736_v44  ;;  %9711 = vtanh.f32 %v5553_v57  ;;  %v5580_v37 = vpop.f32.mrf.mxu1  ;;  %v9486_v57 = vld [vmem:[%s14480_s7 + $0x308] sm:$0xf0]  ;;  %v8745_v60 = vor.u32 %v9624_v40, %v8742_v55  ;;  %v8550_v18 = vld [vmem:[%s14480_s7 + $0x634] sm:$0xf0]  ;;  %v8040_v27 = vld [vmem:[%s14480_s7 + $0x1e0] sm:$0xf] }
 0x403   :  { %5858 = vmatpush.bf16.msra.mxu2 %v5354_v51  ;;  %5845 = vmatpush.bf16.msra.mxu0 %v8233_v52  ;;  %v9598_v51 = vld [vmem:[%s14480_s7 + $0x68c] sm:$0xf]  ;;  %v4991_v52 = vpack.c.b16 %v4666_v25, %v4666_v25  ;;  %v5541_v56 = vpop.f32.mrf.mxu0  ;;  %9713 = vtanh.f32 %v5501_v53  ;;  %v9524_v25 = vld [vmem:[%s14480_s7 + $0x43c] sm:$0xf]  ;;  %v8642_v37 = vld [vmem:[%s14480_s7 + $0x6f4] sm:$0xf0] }
 0x404   :  { %5884 = vmatpush.bf16.msra.mxu1 %v5357_v26  ;;  %5871 = vmatpush.bf16.msra.mxu3 %v8237_v5  ;;  %v8634_v26 = vld [vmem:[%s14480_s7 + $0x6ec] sm:$0xf0]  ;;  %v7833_v5 = vor.u32 %v9410_v50, %v7832_v36  ;;  %v8345_v22 = vor.u32 %v9524_v25, %v8342_v34  ;;  %v9436_v25 = vld [vmem:[%s14480_s7 + $0x178] sm:$0xf0]  ;;  %v7842_v40 = vld [vmem:[%s14480_s7 + $0xb4] sm:$0xf0] }
 0x405   :  { %5824 = vmatmul.bf16.vlgmr.msrb.gmra.mxu1 %v12736_v44  ;;  %v5360_v20 = vsel %vm3254_vm1, %v4991_v52, 0 }
 0x407   :  { %5859 = vmatpush.bf16.msra.mxu2 %v8933_v1  ;;  %5846 = vmatpush.bf16.msra.mxu0 %v8133_v2  ;;  %v8637_v1 = vor.u32 %v9598_v51, %v8634_v26  ;;  %v4992_v2 = vpack.c.b16 %v4667_v31, %v4667_v31  ;;  %v9511_v31 = vld [vmem:[%s14480_s7 + $0x3d0] sm:$0xf0]  ;;  %v8242_v26 = vld [vmem:[%s14480_s7 + $0x3d4] sm:$0xf0] }
 0x408   :  { %5885 = vmatpush.bf16.msra.mxu1 %v8937_v29  ;;  %5872 = vmatpush.bf16.msra.mxu3 %v8137_v6  ;;  %v5579_v29 = vadd.f32 %v5578_v49, %v5566_v32  ;;  %v8440_v6 = vld [vmem:[%s14480_s7 + $0x500] sm:$0xf]  ;;  %v5567_v30 = vpop.f32.mrf.mxu3  ;;  %v9536_v49 = vld [vmem:[%s14480_s7 + $0x498] sm:$0xf0]  ;;  %v9499_v51 = vld [vmem:[%s14480_s7 + $0x374] sm:$0xf]  ;;  %v8741_v32 = vor.u32 %v9636_v47, %v8740_v33 }
 0x409   :  { %v5363_v3 = vsel %vm3254_vm1, %v4992_v2, 0  ;;  %v8341_v50 = vor.u32 %v9536_v49, %v8340_v23  ;;  %v8245_v56 = vor.u32 %v9499_v51, %v8242_v26  ;;  %v9599_v2 = vld [vmem:[%s14480_s7 + $0x694] sm:$0xf] }
 0x40a   :  { %9715 = vtanh.f32 %v5579_v29  ;;  %v8645_v12 = vor.u32 %v9599_v2, %v8642_v37  ;;  %v9411_v47 = vld [vmem:[%s14480_s7 + $0xb0] sm:$0xf0]  ;;  %v8148_v2 = vld [vmem:[%s14480_s7 + $0x2b0] sm:$0xf] }
 0x40b   :  { %5860 = vmatpush.bf16.msra.mxu2 %v8833_v13  ;;  %5847 = vmatpush.bf16.msra.mxu0 %v8033_v7  ;;  %v9710_v13 = vpop.eup %9709  ;;  %v8441_v7 = vor.u32 %v9561_v41, %v8440_v6  ;;  %v14086_v36 = vpop.f32.mrf.mxu0  ;;  %v8141_v6 = vor.u32 %v9486_v57, %v8140_v45  ;;  %v9575_v41 = vld [vmem:[%s14480_s7 + $0x5d4] sm:$0xf]  ;;  %v8948_v37 = vld [vmem:[%s14480_s7 + $0x8f0] sm:$0xf] }
 0x40c   :  { %5886 = vmatpush.bf16.msra.mxu1 %v8837_v14  ;;  %5873 = vmatpush.bf16.msra.mxu3 %v8037_v24  ;;  %v5554_v14 = vpop.f32.mrf.mxu2  ;;  %v8840_v24 = vld [vmem:[%s14480_s7 + $0x820] sm:$0xf]  ;;  %v9712_v9 = vpop.eup %9711  ;;  %v6076_v17 = vrot.slane %v9710_v13, 6  ;;  %v9449_v13 = vld [vmem:[%s14480_s7 + $0x1e4] sm:$0xf]  ;;  %v8553_v30 = vor.u32 %v9575_v41, %v8550_v18 }
 0x40d   :  { %v9714_v62 = vpop.eup %9713  ;;  %v8841_v8 = vor.u32 %v9661_v15, %v8840_v24  ;;  %v3661_v14 = vld [vmem:[%s14480_s7 + $0x9b8] sm:$0x33]  ;;  %v9550_v24 = vld [vmem:[%s14480_s7 + $0x50c] sm:$0xf]  ;;  %v9475_v18 = vld [vmem:[%s14480_s7 + $0x2b4] sm:$0xf] }
 0x40e   :  { %v6096_v52 = vsel %vm3254_vm1, %v9714_v62, %v6076_v17  ;;  %v7940_v15 = vld [vmem:[%s14480_s7 + $0x118] sm:$0xf]  ;;  %v4668_v34 = vunpack.c.l.b16 %v3661_v14  ;;  %v4669_v62 = vunpack.c.h.b16 %v3661_v14  ;;  %v9662_v14 = vld [vmem:[%s14480_s7 + $0x888] sm:$0xf0] }
 0x40f   :  { %5861 = vmatpush.bf16.msra.mxu2 %v8733_v21  ;;  %5848 = vmatpush.bf16.msra.mxu0 %v7933_v59  ;;  %v8240_v59 = vld [vmem:[%s14480_s7 + $0x370] sm:$0xf]  ;;  %v8950_v41 = vld [vmem:[%s14480_s7 + $0x954] sm:$0xf0] }
 0x410   :  { %5887 = vmatpush.bf16.msra.mxu1 %v8737_v38  ;;  %5874 = vmatpush.bf16.msra.mxu3 %v7937_v46  ;;  %v9716_v21 = vpop.eup %9715  ;;  %v6077_v38 = vrot.slane %v9712_v9, 4  ;;  %v8845_v46 = vor.u32 %v9649_v35, %v8842_v0  ;;  %v8241_v42 = vor.u32 %v9511_v31, %v8240_v59  ;;  %v8450_v9 = vld [vmem:[%s14480_s7 + $0x56c] sm:$0xf0]  ;;  %v9424_v35 = vld [vmem:[%s14480_s7 + $0x11c] sm:$0xf]  ;;  %v4993_v51 = vpack.c.b16 %v4668_v34, %v4668_v34 }
 0x411   :  { %v6078_v63 = vrot.slane %v9716_v21, 2  ;;  %v7942_v0 = vld [vmem:[%s14480_s7 + $0x17c] sm:$0xf0]  ;;  %v4994_v26 = vpack.c.b16 %v4669_v62, %v4669_v62 }
 0x412   :  { %v8348_v59 = vld [vmem:[%s14480_s7 + $0x440] sm:$0xf]  ;;  %v7945_v33 = vor.u32 %v9424_v35, %v7942_v0 }
 0x413   :  { %5862 = vmatpush.bf16.msra.mxu2 %v8633_v58  ;;  %5849 = vmatpush.bf16.msra.mxu0 %v7833_v5  ;;  %v6097_v53 = vsel %vm6092_vm4, %v6077_v38, %v6078_v63  ;;  %v8640_v58 = vld [vmem:[%s14480_s7 + $0x690] sm:$0xf]  ;;  %v9537_v38 = vld [vmem:[%s14480_s7 + $0x4a0] sm:$0xf0]  ;;  %v7941_v63 = vor.u32 %v9436_v25, %v7940_v15  ;;  %v7948_v62 = vld [vmem:[%s14480_s7 + $0x120] sm:$0xf] }
 0x414   :  { %5888 = vmatpush.bf16.msra.mxu1 %v8637_v1  ;;  %5875 = vmatpush.bf16.msra.mxu3 %v7837_v61  ;;  %v6098_v5 = vsel %vm6094_vm5, %v6096_v52, %v6097_v53  ;;  %v9474_v61 = vld [vmem:[%s14480_s7 + $0x2ac] sm:$0xf]  ;;  %v8142_v1 = vld [vmem:[%s14480_s7 + $0x30c] sm:$0xf0]  ;;  %v14139_v29 = vpop.f32.mrf.mxu3  ;;  %v8641_v39 = vor.u32 %v9611_v43, %v8640_v58  ;;  %v8349_v52 = vor.u32 %v9537_v38, %v8348_v59  ;;  %v9399_v53 = vld [vmem:[%s14480_s7 + $0x54] sm:$0xf] }
 0x415   :  { %6118 = vst [vmem:[%s14483_s9 + $0x8] sm:$0xff] %v6098_v5  ;;  %v8145_v19 = vor.u32 %v9474_v61, %v8142_v1  ;;  %v8248_v5 = vld [vmem:[%s14480_s7 + $0x378] sm:$0xf]  ;;  %v14242_v58 = vld [vmem:[%s14482_s8 + $0x8] sm:$0xff]  ;;  %v7845_v43 = vor.u32 %v9399_v53, %v7842_v40  ;;  %v5369_v61 = vsel %vm3254_vm1, %v4994_v26, 0 }
 0x416   :  { %5850 = vmatmul.bf16.vlgmr.msra.gmra.mxu0 %v12736_v44  ;;  %8976 = vmatmul.msk.bf16.vlgmr.msra.gmra.mxu2 %vm3250_vm2, %v12746_v48  ;;  %v3681_v15 = vperm.slane %v14242_v58, 2  ;;  %v3662_v59 = vld [vmem:[%s14480_s7 + $0x9c0] sm:$0x3] }
 0x417   :  { %5894 = vmatpush.bf16.msrb.mxu2 %v8541_v4  ;;  %5910 = vmatpush.bf16.msrb.mxu0 %v5360_v20  ;;  %v8548_v4 = vld [vmem:[%s14480_s7 + $0x5d0] sm:$0xf]  ;;  %v9587_v20 = vld [vmem:[%s14480_s7 + $0x630] sm:$0xf0]  ;;  %v4670_v53 = vunpack.c.l.b16 %v3662_v59 }
 0x418   :  { %5920 = vmatpush.bf16.msrb.mxu1 %v8545_v11  ;;  %5936 = vmatpush.bf16.msrb.mxu3 %v5363_v3  ;;  %v5606_v11 = vpop.f32.mrf.mxu0  ;;  %v9461_v3 = vld [vmem:[%s14480_s7 + $0x240] sm:$0xf0]  ;;  %v8549_v10 = vor.u32 %v9587_v20, %v8548_v4  ;;  %v9687_v4 = vld [vmem:[%s14480_s7 + $0x950] sm:$0xf0] }
 0x419   :  { %5876 = vmatmul.bf16.vlgmr.msra.gmra.mxu3 %v12736_v44  ;;  %8977 = vmatmul.msk.bf16.vlgmr.msra.gmra.mxu1 %vm3250_vm2, %v12746_v48  ;;  %v8041_v49 = vor.u32 %v9461_v3, %v8040_v27  ;;  %v9487_v11 = vld [vmem:[%s14480_s7 + $0x310] sm:$0xf0]  ;;  %v8949_v3 = vor.u32 %v9687_v4, %v8948_v37  ;;  %v8556_v37 = vld [vmem:[%s14480_s7 + $0x5d8] sm:$0xf]  ;;  %v9588_v4 = vld [vmem:[%s14480_s7 + $0x638] sm:$0xf0] }
 0x41a   :  { %v14177_v23 = vpop.f32.mrf.mxu1 }
 0x41b   :  { %5895 = vmatpush.bf16.msrb.mxu2 %v8441_v7  ;;  %5911 = vmatpush.bf16.msrb.mxu0 %v8941_v16  ;;  %v8042_v7 = vld [vmem:[%s14480_s7 + $0x244] sm:$0xf0] }
 0x41c   :  { %5921 = vmatpush.bf16.msrb.mxu1 %v8445_v54  ;;  %5937 = vmatpush.bf16.msrb.mxu3 %v8945_v28  ;;  %v8448_v16 = vld [vmem:[%s14480_s7 + $0x508] sm:$0xf]  ;;  %v9562_v54 = vld [vmem:[%s14480_s7 + $0x568] sm:$0xf0]  ;;  %v8045_v28 = vor.u32 %v9449_v13, %v8042_v7  ;;  %v5632_v21 = vpop.f32.mrf.mxu3 }
 0x41d   :  { %v8449_v17 = vor.u32 %v9562_v54, %v8448_v16  ;;  %v14213_v31 = vpop.f32.mrf.mxu2  ;;  %v8048_v13 = vld [vmem:[%s14480_s7 + $0x1e8] sm:$0xf]  ;;  %v9462_v16 = vld [vmem:[%s14480_s7 + $0x248] sm:$0xf0]  ;;  %v8748_v21 = vld [vmem:[%s14480_s7 + $0x760] sm:$0xf] }
 0x41e   :  { %v8848_v7 = vld [vmem:[%s14480_s7 + $0x828] sm:$0xf]  ;;  %v9650_v54 = vld [vmem:[%s14480_s7 + $0x82c] sm:$0xf]  ;;  %v8049_v35 = vor.u32 %v9462_v16, %v8048_v13  ;;  %v9563_v13 = vld [vmem:[%s14480_s7 + $0x570] sm:$0xf0] }
 0x41f   :  { %5896 = vmatpush.bf16.msrb.mxu2 %v8341_v50  ;;  %5912 = vmatpush.bf16.msrb.mxu0 %v8841_v8  ;;  %v8453_v50 = vor.u32 %v9550_v24, %v8450_v9  ;;  %v9525_v8 = vld [vmem:[%s14480_s7 + $0x444] sm:$0xf]  ;;  %v3679_v24 = vperm.slane %v14242_v58, 0  ;;  %v9450_v9 = vld [vmem:[%s14480_s7 + $0x1ec] sm:$0xf]  ;;  %v8849_v34 = vor.u32 %v9662_v14, %v8848_v7 }
 0x420   :  { %5922 = vmatpush.bf16.msrb.mxu1 %v8345_v22  ;;  %5938 = vmatpush.bf16.msrb.mxu3 %v8845_v46  ;;  %v8350_v22 = vld [vmem:[%s14480_s7 + $0x4a4] sm:$0xf0]  ;;  %v7840_v46 = vld [vmem:[%s14480_s7 + $0x50] sm:$0xf]  ;;  %v8956_v14 = vld [vmem:[%s14480_s7 + $0x8f8] sm:$0xf] }
 0x421   :  { %v8353_v55 = vor.u32 %v9525_v8, %v8350_v22  ;;  %v7841_v57 = vor.u32 %v9411_v47, %v7840_v46  ;;  %v9625_v8 = vld [vmem:[%s14480_s7 + $0x764] sm:$0xf]  ;;  %v8750_v22 = vld [vmem:[%s14480_s7 + $0x7c4] sm:$0xf0] }
 0x422   :  { %v5619_v45 = vpop.f32.mrf.mxu1  ;;  %v9425_v46 = vld [vmem:[%s14480_s7 + $0x124] sm:$0xf]  ;;  %v7950_v47 = vld [vmem:[%s14480_s7 + $0x184] sm:$0xf0] }
 0x423   :  { %5897 = vmatpush.bf16.msrb.mxu2 %v8241_v42  ;;  %5913 = vmatpush.bf16.msrb.mxu0 %v8741_v32  ;;  %v9512_v42 = vld [vmem:[%s14480_s7 + $0x3d8] sm:$0xf0] }
 0x424   :  { %5923 = vmatpush.bf16.msrb.mxu1 %v8245_v56  ;;  %5939 = vmatpush.bf16.msrb.mxu3 %v8745_v60  ;;  %v9500_v32 = vld [vmem:[%s14480_s7 + $0x37c] sm:$0xf]  ;;  %v8250_v56 = vld [vmem:[%s14480_s7 + $0x3dc] sm:$0xf0]  ;;  %v5366_v60 = vsel %vm3254_vm1, %v4993_v51, 0  ;;  %v8249_v1 = vor.u32 %v9512_v42, %v8248_v5  ;;  %v3682_v51 = vperm.slane %v14242_v58, 3 }
 0x425   :  { %v8253_v20 = vor.u32 %v9500_v32, %v8250_v56  ;;  %v5593_v27 = vpop.f32.mrf.mxu2  ;;  %v9412_v5 = vld [vmem:[%s14480_s7 + $0xb8] sm:$0xf0]  ;;  %v8648_v42 = vld [vmem:[%s14480_s7 + $0x698] sm:$0xf]  ;;  %v7953_v32 = vor.u32 %v9425_v46, %v7950_v47 }
 0x426   :  { %v9612_v45 = vld [vmem:[%s14480_s7 + $0x6f8] sm:$0xf0] }
 0x427   :  { %5898 = vmatpush.bf16.msrb.mxu2 %v8141_v6  ;;  %5914 = vmatpush.bf16.msrb.mxu0 %v8641_v39  ;;  %v9675_v6 = vld [vmem:[%s14480_s7 + $0x8f4] sm:$0xf]  ;;  %v8150_v39 = vld [vmem:[%s14480_s7 + $0x314] sm:$0xf0]  ;;  %v9600_v56 = vld [vmem:[%s14480_s7 + $0x69c] sm:$0xf] }
 0x428   :  { %5924 = vmatpush.bf16.msrb.mxu1 %v8145_v19  ;;  %5940 = vmatpush.bf16.msrb.mxu3 %v8645_v12  ;;  %v3680_v19 = vperm.slane %v14242_v58, 1  ;;  %v8149_v12 = vor.u32 %v9487_v11, %v8148_v2  ;;  %v7850_v2 = vld [vmem:[%s14480_s7 + $0xbc] sm:$0xf0] }
 0x42a   :  { %8978 = vmatmul.msk.bf16.vlgmr.msrb.gmra.mxu0 %vm3250_vm2, %v12746_v48 }
 0x42b   :  { %5946 = vmatpush.bf16.msra.mxu0 %v8549_v10  ;;  %5899 = vmatpush.bf16.msrb.mxu2 %v8041_v49  ;;  %v8953_v10 = vor.u32 %v9675_v6, %v8950_v41  ;;  %v8850_v49 = vld [vmem:[%s14480_s7 + $0x88c] sm:$0xf0]  ;;  %v5643_v25 = vpop.f32.mrf.mxu0  ;;  %v8649_v41 = vor.u32 %v9612_v45, %v8648_v42 }
 0x42c   :  { %5972 = vmatpush.bf16.msra.mxu3 %v8553_v30  ;;  %5925 = vmatpush.bf16.msrb.mxu1 %v8045_v28  ;;  %v8153_v30 = vor.u32 %v9475_v18, %v8150_v39  ;;  %v8050_v28 = vld [vmem:[%s14480_s7 + $0x24c] sm:$0xf0]  ;;  %v8853_v0 = vor.u32 %v9650_v54, %v8850_v49 }
 0x42d   :  { %8979 = vmatmul.msk.bf16.vlgmr.msrb.gmra.mxu3 %vm3250_vm2, %v12746_v48 }
 0x42e   :  { %v5682_v38 = vpop.f32.mrf.mxu1 }
 0x42f   :  { %5947 = vmatpush.bf16.msra.mxu0 %v8449_v17  ;;  %5900 = vmatpush.bf16.msrb.mxu2 %v7941_v63  ;;  %v5618_v17 = vadd.f32 %v14177_v23, %v3680_v19  ;;  %v8053_v63 = vor.u32 %v9450_v9, %v8050_v28  ;;  %v9437_v23 = vld [vmem:[%s14480_s7 + $0x180] sm:$0xf0]  ;;  %v8356_v28 = vld [vmem:[%s14480_s7 + $0x448] sm:$0xf] }
 0x430   :  { %5973 = vmatpush.bf16.msra.mxu3 %v8453_v50  ;;  %5926 = vmatpush.bf16.msrb.mxu1 %v7945_v33  ;;  %v9637_v50 = vld [vmem:[%s14480_s7 + $0x7c0] sm:$0xf0]  ;;  %v5592_v33 = vadd.f32 %v14213_v31, %v3679_v24  ;;  %v7949_v31 = vor.u32 %v9437_v23, %v7948_v62  ;;  %v9663_v62 = vld [vmem:[%s14480_s7 + $0x890] sm:$0xf0] }
 0x431   :  { %v8749_v26 = vor.u32 %v9637_v50, %v8748_v21  ;;  %v5631_v40 = vadd.f32 %v14139_v29, %v5618_v17  ;;  %v9400_v29 = vld [vmem:[%s14480_s7 + $0x5c] sm:$0xf]  ;;  %v8256_v50 = vld [vmem:[%s14480_s7 + $0x380] sm:$0xf] }
 0x433   :  { %5948 = vmatpush.bf16.msra.mxu0 %v8349_v52  ;;  %5901 = vmatpush.bf16.msrb.mxu2 %v7841_v57  ;;  %v7848_v52 = vld [vmem:[%s14480_s7 + $0x58] sm:$0xf]  ;;  %v5644_v57 = vadd.f32 %v5643_v25, %v3681_v15  ;;  %v5645_v6 = vpop.f32.mrf.mxu0  ;;  %9717 = vtanh.f32 %v5631_v40  ;;  %v9538_v15 = vld [vmem:[%s14480_s7 + $0x4a8] sm:$0xf0]  ;;  %v9488_v40 = vld [vmem:[%s14480_s7 + $0x318] sm:$0xf0] }
 0x434   :  { %5974 = vmatpush.bf16.msra.mxu3 %v8353_v55  ;;  %5927 = vmatpush.bf16.msrb.mxu1 %v7845_v43  ;;  %v8753_v55 = vor.u32 %v9625_v8, %v8750_v22  ;;  %v8650_v43 = vld [vmem:[%s14480_s7 + $0x6fc] sm:$0xf0]  ;;  %v7849_v18 = vor.u32 %v9412_v5, %v7848_v52  ;;  %v8357_v21 = vor.u32 %v9538_v15, %v8356_v28  ;;  %v9513_v8 = vld [vmem:[%s14480_s7 + $0x3e0] sm:$0xf0]  ;;  %v8756_v22 = vld [vmem:[%s14480_s7 + $0x768] sm:$0xf] }
 0x435   :  { %v8653_v39 = vor.u32 %v9600_v56, %v8650_v43 }
 0x436   :  { %5902 = vmatmul.bf16.vlgmr.msrb.gmra.mxu2 %v12736_v44  ;;  %v5684_v27 = vpop.f32.mrf.mxu1 }
 0x437   :  { %5962 = vmatpush.bf16.msra.mxu2 %v5366_v60  ;;  %5949 = vmatpush.bf16.msra.mxu0 %v8249_v1  ;;  %v5605_v60 = vadd.f32 %v14086_v36, %v5592_v33  ;;  %v5669_v1 = vpop.f32.mrf.mxu3  ;;  %v4995_v36 = vpack.c.b16 %v4670_v53, %v4670_v53  ;;  %v9638_v33 = vld [vmem:[%s14480_s7 + $0x7c8] sm:$0xf0]  ;;  %v8156_v53 = vld [vmem:[%s14480_s7 + $0x2b8] sm:$0xf] }
 0x438   :  { %5988 = vmatpush.bf16.msra.mxu1 %v5369_v61  ;;  %5975 = vmatpush.bf16.msra.mxu3 %v8253_v20  ;;  %v5656_v61 = vpop.f32.mrf.mxu2  ;;  %v5670_v11 = vadd.f32 %v5669_v1, %v3682_v51  ;;  %v8757_v52 = vor.u32 %v9638_v33, %v8756_v22  ;;  %v8157_v45 = vor.u32 %v9488_v40, %v8156_v53 }
 0x439   :  { %5928 = vmatmul.bf16.vlgmr.msrb.gmra.mxu1 %v12736_v44  ;;  %v5657_v20 = vadd.f32 %v5656_v61, %v5644_v57  ;;  %v5372_v7 = vsel %vm3254_vm1, %v4995_v36, 0  ;;  %v9718_v54 = vpop.eup %9717  ;;  %v9438_v61 = vld [vmem:[%s14480_s7 + $0x188] sm:$0xf0]  ;;  %v3684_v36 = vperm.slane %v14242_v58, 5 }
 0x43a   :  { %v5683_v19 = vadd.f32 %v5682_v38, %v5670_v11  ;;  %v6079_v59 = vrot.slane %v9718_v54, 6 }
 0x43b   :  { %5963 = vmatpush.bf16.msra.mxu2 %v8949_v3  ;;  %5950 = vmatpush.bf16.msra.mxu0 %v8149_v12  ;;  %9719 = vtanh.f32 %v5657_v20  ;;  %v7853_v3 = vor.u32 %v9400_v29, %v7850_v2  ;;  %v8557_v12 = vor.u32 %v9588_v4, %v8556_v37  ;;  %v9463_v29 = vld [vmem:[%s14480_s7 + $0x250] sm:$0xf0]  ;;  %v7856_v4 = vld [vmem:[%s14480_s7 + $0x60] sm:$0xf]  ;;  %v9413_v20 = vld [vmem:[%s14480_s7 + $0xc0] sm:$0xf0] }
 0x43c   :  { %5989 = vmatpush.bf16.msra.mxu1 %v8953_v10  ;;  %5976 = vmatpush.bf16.msra.mxu3 %v8153_v30  ;;  %9721 = vtanh.f32 %v5605_v60  ;;  %v8456_v10 = vld [vmem:[%s14480_s7 + $0x510] sm:$0xf]  ;;  %v9688_v30 = vld [vmem:[%s14480_s7 + $0x958] sm:$0xf0]  ;;  %v7956_v60 = vld [vmem:[%s14480_s7 + $0x128] sm:$0xf]  ;;  %v7857_v6 = vor.u32 %v9413_v20, %v7856_v4 }
 0x43d   :  { %9723 = vtanh.f32 %v5683_v19  ;;  %v8457_v16 = vor.u32 %v9563_v13, %v8456_v10  ;;  %v8957_v9 = vor.u32 %v9688_v30, %v8956_v14  ;;  %v7957_v2 = vor.u32 %v9438_v61, %v7956_v60 }
 0x43e   :  { %v3685_v19 = vperm.slane %v14242_v58, 6 }
 0x43f   :  { %5964 = vmatpush.bf16.msra.mxu2 %v8849_v34  ;;  %5951 = vmatpush.bf16.msra.mxu0 %v8049_v35  ;;  %v5671_v24 = vpop.f32.mrf.mxu3  ;;  %v8856_v34 = vld [vmem:[%s14480_s7 + $0x830] sm:$0xf] }
 0x440   :  { %5990 = vmatpush.bf16.msra.mxu1 %v8853_v0  ;;  %5977 = vmatpush.bf16.msra.mxu3 %v8053_v63  ;;  %v5658_v49 = vpop.f32.mrf.mxu2  ;;  %v5708_v0 = vpop.f32.mrf.mxu0  ;;  %v8857_v23 = vor.u32 %v9663_v62, %v8856_v34 }
 0x441   :  { %v9720_v25 = vpop.eup %9719 }
 0x442   :  { %v9722_v17 = vpop.eup %9721  ;;  %v6080_v38 = vrot.slane %v9720_v25, 4 }
 0x443   :  { %5965 = vmatpush.bf16.msra.mxu2 %v8749_v26  ;;  %5952 = vmatpush.bf16.msra.mxu0 %v7949_v31  ;;  %v9724_v35 = vpop.eup %9723  ;;  %v6099_v46 = vsel %vm3254_vm1, %v9722_v17, %v6079_v59  ;;  %v8257_v26 = vor.u32 %v9513_v8, %v8256_v50  ;;  %v8656_v31 = vld [vmem:[%s14480_s7 + $0x6a0] sm:$0xf] }
 0x444   :  { %5991 = vmatpush.bf16.msra.mxu1 %v8753_v55  ;;  %5978 = vmatpush.bf16.msra.mxu3 %v7953_v32  ;;  %v6081_v63 = vrot.slane %v9724_v35, 2  ;;  %v9613_v55 = vld [vmem:[%s14480_s7 + $0x700] sm:$0xf0]  ;;  %v8056_v32 = vld [vmem:[%s14480_s7 + $0x1f0] sm:$0xf] }
 0x445   :  { %v8657_v57 = vor.u32 %v9613_v55, %v8656_v31  ;;  %v8057_v43 = vor.u32 %v9463_v29, %v8056_v32 }
 0x446   :  { %v6100_v47 = vsel %vm6092_vm4, %v6080_v38, %v6081_v63 }
 0x447   :  { %5966 = vmatpush.bf16.msra.mxu2 %v8649_v41  ;;  %5953 = vmatpush.bf16.msra.mxu0 %v7849_v18  ;;  %v6101_v51 = vsel %vm6094_vm5, %v6099_v46, %v6100_v47  ;;  %v3665_v46 = vld [vmem:[%s14482_s8 + $0x10] sm:$0xff] }
 0x448   :  { %5992 = vmatpush.bf16.msra.mxu1 %v8653_v39  ;;  %5979 = vmatpush.bf16.msra.mxu3 %v7853_v3  ;;  %6119 = vst [vmem:[%s14483_s9 + $0x10] sm:$0xff] %v6101_v51  ;;  %v5734_v5 = vpop.f32.mrf.mxu3  ;;  %v5710_v42 = vpop.f32.mrf.mxu0  ;;  %v3688_v51 = vperm.slane %v3665_v46, 1  ;;  %v3689_v40 = vperm.slane %v3665_v46, 2 }
 0x44a   :  { %8980 = vmatmul.msk.bf16.vlgmr.msra.gmra.mxu2 %vm3250_vm2, %v12746_v48  ;;  %5954 = vmatmul.bf16.vlgmr.msra.gmra.mxu0 %v12736_v44 }
 0x44b   :  { %5998 = vmatpush.bf16.msrb.mxu2 %v8557_v12  ;;  %6014 = vmatpush.bf16.msrb.mxu0 %v5372_v7  ;;  %v3686_v12 = vperm.slane %v14242_v58, 7 }
 0x44c   :  { %8981 = vmatmul.msk.bf16.vlgmr.msra.gmra.mxu1 %vm3250_vm2, %v12746_v48  ;;  %5980 = vmatmul.bf16.vlgmr.msra.gmra.mxu3 %v12736_v44 }
 0x44e   :  { %v5721_v56 = vpop.f32.mrf.mxu1 }
 0x44f   :  { %5999 = vmatpush.bf16.msrb.mxu2 %v8457_v16  ;;  %6015 = vmatpush.bf16.msrb.mxu0 %v8957_v9  ;;  %v5722_v39 = vadd.f32 %v5721_v56, %v3684_v36 }
 0x450   :  { %v5736_v1 = vpop.f32.mrf.mxu3 }
 0x451   :  { %v5695_v37 = vpop.f32.mrf.mxu2  ;;  %v5735_v10 = vadd.f32 %v5734_v5, %v5722_v39  ;;  %v3690_v5 = vperm.slane %v3665_v46, 3 }
 0x453   :  { %6000 = vmatpush.bf16.msrb.mxu2 %v8357_v21  ;;  %6016 = vmatpush.bf16.msrb.mxu0 %v8857_v23  ;;  %9725 = vtanh.f32 %v5735_v10 }
 0x456   :  { %v5723_v11 = vpop.f32.mrf.mxu1 }
 0x457   :  { %6001 = vmatpush.bf16.msrb.mxu2 %v8257_v26  ;;  %6017 = vmatpush.bf16.msrb.mxu0 %v8757_v52  ;;  %v3687_v26 = vperm.slane %v3665_v46, 0 }
 0x459   :  { %v5697_v41 = vpop.f32.mrf.mxu2  ;;  %v9726_v9 = vpop.eup %9725 }
 0x45a   :  { %v6082_v17 = vrot.slane %v9726_v9, 6 }
 0x45b   :  { %6002 = vmatpush.bf16.msrb.mxu2 %v8157_v45  ;;  %6018 = vmatpush.bf16.msrb.mxu0 %v8657_v57 }
 0x45e   :  { %8982 = vmatmul.msk.bf16.vlgmr.msrb.gmra.mxu0 %vm3250_vm2, %v12746_v48  ;;  %v3683_v48 = vperm.slane %v14242_v58, 4 }
 0x45f   :  { %6003 = vmatpush.bf16.msrb.mxu2 %v8057_v43  ;;  %v5747_v18 = vpop.f32.mrf.mxu0 }
 0x460   :  { %v5696_v3 = vadd.f32 %v5695_v37, %v3683_v48  ;;  %v5748_v13 = vadd.f32 %v5747_v18, %v3685_v19 }
 0x462   :  { %v5786_v27 = vpop.f32.mrf.mxu1  ;;  %v5709_v7 = vadd.f32 %v5708_v0, %v5696_v3 }
 0x463   :  { %6004 = vmatpush.bf16.msrb.mxu2 %v7957_v2 }
 0x465   :  { %v5760_v14 = vpop.f32.mrf.mxu2 }
 0x466   :  { %v5761_v16 = vadd.f32 %v5760_v14, %v5748_v13 }
 0x467   :  { %6005 = vmatpush.bf16.msrb.mxu2 %v7857_v6  ;;  %v5749_v49 = vpop.f32.mrf.mxu0 }
 0x468   :  { %v5773_v30 = vpop.f32.mrf.mxu3  ;;  %9727 = vtanh.f32 %v5761_v16  ;;  %v3692_v16 = vperm.slane %v3665_v46, 5  ;;  %v3693_v49 = vperm.slane %v3665_v46, 6 }
 0x469   :  { %v5774_v54 = vadd.f32 %v5773_v30, %v3686_v12  ;;  %9729 = vtanh.f32 %v5709_v7 }
 0x46a   :  { %6006 = vmatmul.bf16.vlgmr.msrb.gmra.mxu2 %v12736_v44  ;;  %v5788_v24 = vpop.f32.mrf.mxu1 }
 0x46b   :  { %v5787_v44 = vadd.f32 %v5786_v27, %v5774_v54  ;;  %v3691_v54 = vperm.slane %v3665_v46, 4 }
 0x46d   :  { %9731 = vtanh.f32 %v5787_v44  ;;  %v5762_v28 = vpop.f32.mrf.mxu2 }
 0x46e   :  { %v9728_v25 = vpop.eup %9727 }
 0x46f   :  { %v9730_v34 = vpop.eup %9729  ;;  %v6083_v35 = vrot.slane %v9728_v25, 4  ;;  %v3694_v25 = vperm.slane %v3665_v46, 7 }
 0x470   :  { %v5775_v15 = vpop.f32.mrf.mxu3  ;;  %v6102_v21 = vsel %vm3254_vm1, %v9730_v34, %v6082_v17 }
 0x473   :  { %v9732_v58 = vpop.eup %9731  ;;  %v5812_v62 = vpop.f32.mrf.mxu0 }
 0x474   :  { %v6084_v0 = vrot.slane %v9732_v58, 2 }
 0x476   :  { %v6103_v50 = vsel %vm6092_vm4, %v6083_v35, %v6084_v0 }
 0x477   :  { %v6104_v59 = vsel %vm6094_vm5, %v6102_v21, %v6103_v50 }
 0x478   :  { %6120 = vst [vmem:[%s14483_s9 + $0x18] sm:$0xff] %v6104_v59 }
 0x47b   :  { %v5814_v63 = vpop.f32.mrf.mxu0 }
 0x47c   :  { %v5838_v38 = vpop.f32.mrf.mxu3 }
 0x482   :  { %v5825_v23 = vpop.f32.mrf.mxu1 }
 0x483   :  { %v5826_v53 = vadd.f32 %v5825_v23, %v3688_v51 }
 0x484   :  { %v5840_v8 = vpop.f32.mrf.mxu3 }
 0x485   :  { %v5799_v22 = vpop.f32.mrf.mxu2  ;;  %v5839_v42 = vadd.f32 %v5838_v38, %v5826_v53 }
 0x486   :  { %v5800_v55 = vadd.f32 %v5799_v22, %v3687_v26 }
 0x487   :  { %9733 = vtanh.f32 %v5839_v42 }
 0x488   :  { %v5813_v57 = vadd.f32 %v5812_v62, %v5800_v55  ;;  %v9690_v55 = vld [vmem:[%s14482_s8 + $0x18] ss:$0 sm:$0xff] }
 0x48a   :  { %v5827_v33 = vpop.f32.mrf.mxu1 }
 0x48d   :  { %v5801_v47 = vpop.f32.mrf.mxu2  ;;  %v9734_v2 = vpop.eup %9733 }
 0x48e   :  { %v6085_v36 = vrot.slane %v9734_v2, 6 }
 0x493   :  { %v5851_v52 = vpop.f32.mrf.mxu0 }
 0x494   :  { %v5852_v45 = vadd.f32 %v5851_v52, %v3689_v40 }
 0x496   :  { %v5890_v31 = vpop.f32.mrf.mxu1 }
 0x499   :  { %v5864_v32 = vpop.f32.mrf.mxu2 }
 0x49a   :  { %v5865_v56 = vadd.f32 %v5864_v32, %v5852_v45 }
 0x49b   :  { %v5853_v60 = vpop.f32.mrf.mxu0 }
 0x49c   :  { %v5877_v29 = vpop.f32.mrf.mxu3  ;;  %9735 = vtanh.f32 %v5865_v56 }
 0x49d   :  { %v5878_v43 = vadd.f32 %v5877_v29, %v3690_v5  ;;  %9737 = vtanh.f32 %v5813_v57 }
 0x49e   :  { %v5892_v1 = vpop.f32.mrf.mxu1 }
 0x49f   :  { %v5891_v61 = vadd.f32 %v5890_v31, %v5878_v43 }
 0x4a1   :  { %9739 = vtanh.f32 %v5891_v61  ;;  %v5866_v37 = vpop.f32.mrf.mxu2 }
 0x4a2   :  { %v9736_v20 = vpop.eup %9735 }
 0x4a3   :  { %v9738_v11 = vpop.eup %9737  ;;  %v6086_v48 = vrot.slane %v9736_v20, 4 }
 0x4a4   :  { %v5879_v4 = vpop.f32.mrf.mxu3  ;;  %v6105_v39 = vsel %vm3254_vm1, %v9738_v11, %v6085_v36 }
 0x4a7   :  { %v9740_v6 = vpop.eup %9739  ;;  %v5916_v41 = vpop.f32.mrf.mxu0 }
 0x4a8   :  { %v6087_v18 = vrot.slane %v9740_v6, 2 }
 0x4aa   :  { %v6106_v19 = vsel %vm6092_vm4, %v6086_v48, %v6087_v18 }
 0x4ab   :  { %v6107_v27 = vsel %vm6094_vm5, %v6105_v39, %v6106_v19 }
 0x4ac   :  { %6121 = vst [vmem:[%s14483_s9 + $0x20] sm:$0xff] %v6107_v27 }
 0x4af   :  { %v5918_v12 = vpop.f32.mrf.mxu0 }
 0x4b0   :  { %v5942_v3 = vpop.f32.mrf.mxu3 }
 0x4b6   :  { %v5929_v10 = vpop.f32.mrf.mxu1 }
 0x4b7   :  { %v5930_v9 = vadd.f32 %v5929_v10, %v3692_v16 }
 0x4b8   :  { %v5944_v13 = vpop.f32.mrf.mxu3 }
 0x4b9   :  { %v5903_v7 = vpop.f32.mrf.mxu2  ;;  %v5943_v34 = vadd.f32 %v5942_v3, %v5930_v9 }
 0x4ba   :  { %v5904_v28 = vadd.f32 %v5903_v7, %v3691_v54 }
 0x4bb   :  { %9741 = vtanh.f32 %v5943_v34 }
 0x4bc   :  { %v5917_v17 = vadd.f32 %v5916_v41, %v5904_v28 }
 0x4be   :  { %v5931_v14 = vpop.f32.mrf.mxu1 }
 0x4c1   :  { %v5905_v30 = vpop.f32.mrf.mxu2  ;;  %v9742_v63 = vpop.eup %9741 }
 0x4c2   :  { %v6088_v47 = vrot.slane %v9742_v63, 6 }
 0x4c7   :  { %v5955_v44 = vpop.f32.mrf.mxu0 }
 0x4c8   :  { %v5956_v15 = vadd.f32 %v5955_v44, %v3693_v49 }
 0x4c9   :  { %v5994_v24 = vpop.f32.mrf.mxu1 }
 0x4cd   :  { %v5968_v58 = vpop.f32.mrf.mxu2 }
 0x4ce   :  { %v5969_v62 = vadd.f32 %v5968_v58, %v5956_v15 }
 0x4cf   :  { %v5981_v35 = vpop.f32.mrf.mxu3  ;;  %v5957_v21 = vpop.f32.mrf.mxu0 }
 0x4d0   :  { %v5982_v0 = vadd.f32 %v5981_v35, %v3694_v25  ;;  %9743 = vtanh.f32 %v5969_v62 }
 0x4d1   :  { %v5996_v50 = vpop.f32.mrf.mxu1  ;;  %9745 = vtanh.f32 %v5917_v17 }
 0x4d2   :  { %v5995_v59 = vadd.f32 %v5994_v24, %v5982_v0 }
 0x4d4   :  { %9747 = vtanh.f32 %v5995_v59 }
 0x4d5   :  { %v5970_v38 = vpop.f32.mrf.mxu2 }
 0x4d6   :  { %v9744_v8 = vpop.eup %9743 }
 0x4d7   :  { %v5983_v23 = vpop.f32.mrf.mxu3  ;;  %v9746_v22 = vpop.eup %9745  ;;  %v6089_v51 = vrot.slane %v9744_v8, 4 }
 0x4d8   :  { %v6108_v52 = vsel %vm3254_vm1, %v9746_v22, %v6088_v47 }
 0x4da   :  { %v9748_v33 = vpop.eup %9747 }
 0x4db   :  { %v6020_v46 = vpop.f32.mrf.mxu0  ;;  %v6090_v26 = vrot.slane %v9748_v33, 2 }
 0x4dd   :  { %v6109_v53 = vsel %vm6092_vm4, %v6089_v51, %v6090_v26 }
 0x4de   :  { %v6110_v40 = vsel %vm6094_vm5, %v6108_v52, %v6109_v53 }
 0x4df   :  { %6122 = vst [vmem:[%s14483_s9 + $0x28] sm:$0xff] %v6110_v40 }
 0x4e3   :  { %v6022_v31 = vpop.f32.mrf.mxu0 }
 0x4ed   :  { %v6007_v5 = vpop.f32.mrf.mxu2 }
 0x4ee   :  { %v6008_v42 = vadd.f32 %v9690_v55, %v6007_v5 }
 0x4f0   :  { %v6021_v45 = vadd.f32 %v6020_v46, %v6008_v42 }
 0x4f2   :  { %9749 = vtanh.f32 %v6021_v45 }
 0x4f5   :  { %v6009_v57 = vpop.f32.mrf.mxu2 }
 0x4f8   :  { %v9750_v32 = vpop.eup %9749 }
 0x4f9   :  { %6124 = vst.msk [vmem:[%s14483_s9 + $0x30] sm:$0x3] %vm6123_vm6, %v9750_v32 }

</bundles_post_ra>
